<compile_context>
chip_gen: v7x
topology: tpu7x:2x2x1
jax: 0.10.0
libtpu: 0.0.40
codegen_flags: <defaults>
</compile_context>

<pallas_src>
import math
from functools import partial

import jax
import jax.numpy as jnp
from jax.experimental import pallas as pl
from jax.experimental.pallas import tpu as pltpu

D_MODEL = 32
FFN_DIM = 512
LN_EPS = 1e-5
OUT_PAD = 128      # lane-dense padded head output (lane 0 = 5min, lane 1 = hourly)
# TODO(synk): dropout (p=0.1) is only active in train mode; this kernel
# reproduces eval-mode semantics (dropout == identity).
# TODO(synk): the reference nn.TransformerDecoder is called without a tgt
# mask, so no causal mask is applied here either.


# ----------------------------- in-kernel helpers ----------------------------

def _mm(a, b):
    return jnp.dot(a, b, preferred_element_type=jnp.float32)


def _layernorm(y, g, b):
    mu = jnp.mean(y, axis=-1, keepdims=True)
    var = jnp.mean(jnp.square(y - mu), axis=-1, keepdims=True)
    return (y - mu) * jax.lax.rsqrt(var + LN_EPS) * g + b


def _mha(xq, xkv, b_tile, sq, skv, n_heads,
         wqkv_ref, bqkv_ref, wo_ref, bo_ref, layer, self_attn):
    """Multi-head attention on batch-flattened activations.

    xq: (b_tile*sq, D), xkv: (b_tile*skv, D).
    wqkv: (L, D, 3D) with [Wq/sqrt(dh) | Wk | Wv]; bqkv: (L, 1, 3D).
    wo: (L, D, D) (original, head-major rows); bo: (L, 1, D).
    """
    wqkv = wqkv_ref[layer]
    bqkv = bqkv_ref[layer]
    wo = wo_ref[layer]
    bo = bo_ref[layer]
    d = wo.shape[0]
    dh = d // n_heads

    if self_attn:
        qkv = _mm(xq, wqkv) + bqkv                       # (b*sq, 3D) one push
        q_all, kv_all = qkv, qkv
        k_off, v_off = d, 2 * d
    else:
        q_all = _mm(xq, wqkv[:, :d]) + bqkv[:, :d]       # (b*sq, D)
        kv_all = _mm(xkv, wqkv[:, d:]) + bqkv[:, d:]     # (b*skv, 2D)
        k_off, v_off = 0, d

    outs = []
    for b in range(b_tile):                              # static -> unrolled
        qb = q_all[b * sq:(b + 1) * sq]
        kvb = kv_all[b * skv:(b + 1) * skv]
        heads = []
        for h in range(n_heads):                         # static -> unrolled
            q = qb[:, h * dh:(h + 1) * dh]               # (sq, dh), scale folded
            k = kvb[:, k_off + h * dh:k_off + (h + 1) * dh]
            v = kvb[:, v_off + h * dh:v_off + (h + 1) * dh]
            # NT matmul: contract on dh of both operands -> no k.T relayout.
            s = jax.lax.dot_general(q, k, (((1,), (1,)), ((), ())),
                                    preferred_element_type=jnp.float32)
            m = jnp.max(s, axis=-1, keepdims=True)
            p = jnp.exp(s - m)                           # un-normalized probs
            o = _mm(p, v)                                # (sq, dh)
            denom = jnp.sum(p, axis=-1, keepdims=True)
            heads.append(o * pl.reciprocal(denom, approx=True))
        outs.append(jnp.concatenate(heads, axis=-1))     # (sq, D) head-major
    o_flat = outs[0] if b_tile == 1 else jnp.concatenate(outs, axis=0)
    return _mm(o_flat, wo) + bo                          # single (·,D)@(D,D)


# ------------------------------ fused model kernel ---------------------------

def _model_kernel(*refs, n_heads_enc, n_heads_dec, b_tile):
    (hx, fx, peh, pef,
     e_in_w, e_in_b,
     e_wqkv, e_bqkv, e_wo, e_bo,
     e_g1, e_be1, e_w1, e_b1, e_w2, e_b2, e_g2, e_be2,
     d_in_w, d_in_b,
     ds_wqkv, ds_bqkv, ds_wo, ds_bo, d_g1, d_be1,
     dc_wqkv, dc_bqkv, dc_wo, dc_bo, d_g2, d_be2,
     d_w1, d_b1, d_w2, d_b2, d_g3, d_be3,
     h_w, h_b,
     out_ref) = refs

    n_layers_enc = e_wqkv.shape[0]
    n_layers_dec = ds_wqkv.shape[0]
    sh, in_h = hx.shape[1], hx.shape[2]
    sf, in_f = fx.shape[1], fx.shape[2]

    # ---------------- HourlyEncoder (post-norm, ReLU FFN) ----------------
    # Fold batch into the matmul M dim: (b_tile*Sh, in_h).
    h = _mm(hx[...].reshape(b_tile * sh, in_h), e_in_w[...]) + e_in_b[...]
    h = h + peh[...]                                      # PE pre-tiled over batch
    for l in range(n_layers_enc):
        sa = _mha(h, h, b_tile, sh, sh, n_heads_enc,
                  e_wqkv, e_bqkv, e_wo, e_bo, l, True)
        h = _layernorm(h + sa, e_g1[l], e_be1[l])
        ff = _mm(jnp.maximum(_mm(h, e_w1[l]) + e_b1[l], 0.0), e_w2[l]) + e_b2[l]
        h = _layernorm(h + ff, e_g2[l], e_be2[l])
    memory = h                                            # (b_tile*Sh, D)

    # ---------------- FiveMinDecoder (self-attn, cross-attn, FFN) --------
    f = _mm(fx[...].reshape(b_tile * sf, in_f), d_in_w[...]) + d_in_b[...]
    f = f + pef[...]
    for l in range(n_layers_dec):
        sa = _mha(f, f, b_tile, sf, sf, n_heads_dec,
                  ds_wqkv, ds_bqkv, ds_wo, ds_bo, l, True)
        f = _layernorm(f + sa, d_g1[l], d_be1[l])
        ca = _mha(f, memory, b_tile, sf, sh, n_heads_dec,
                  dc_wqkv, dc_bqkv, dc_wo, dc_bo, l, False)
        f = _layernorm(f + ca, d_g2[l], d_be2[l])
        ff = _mm(jnp.maximum(_mm(f, d_w1[l]) + d_b1[l], 0.0), d_w2[l]) + d_b2[l]
        f = _layernorm(f + ff, d_g3[l], d_be3[l])

    # -------- MultiTaskHead, fused + lane-padded (single unmasked store) --
    out = _mm(f, h_w[...]) + h_b[...]                     # (b_tile*Sf, OUT_PAD)
    out_ref[...] = out.reshape(b_tile, sf, OUT_PAD)


# ---------------------------- wrapper (JAX glue) -----------------------------

def positional_encoding(seq_len, d_model):
    position = jnp.arange(seq_len, dtype=jnp.float32)[:, None]
    div_term = jnp.exp(jnp.arange(0, d_model, 2, dtype=jnp.float32)
                       * (-math.log(10000.0) / d_model))
    pe = jnp.zeros((seq_len, d_model), jnp.float32)
    pe = pe.at[:, 0::2].set(jnp.sin(position * div_term))
    pe = pe.at[:, 1::2].set(jnp.cos(position * div_term))
    return pe


def multires_traffic_transformer(hourly_seq, fivemin_seq, packed,
                                 n_heads_enc, n_heads_dec):
    """Fused forward pass; `packed` is the flat list from pack_params()."""
    B, Sh, in_h = hourly_seq.shape
    _, Sf, in_f = fivemin_seq.shape
    # One 2-way "parallel" grid axis when possible (feeds both v7x TCs); on
    # single-TC chips the extra step is one ~0.35us pipeline tick, negligible.
    nc = 2 if (B >= 2 and B % 2 == 0) else 1
    b_tile = B // nc

    pe_h = jnp.tile(positional_encoding(Sh, D_MODEL), (b_tile, 1))
    pe_f = jnp.tile(positional_encoding(Sf, D_MODEL), (b_tile, 1))
    args = [hourly_seq, fivemin_seq, pe_h, pe_f] + list(packed)

    def _const_spec(shape):
        nd = len(shape)
        return pl.BlockSpec(shape, lambda i, _nd=nd: (0,) * _nd)

    in_specs = ([pl.BlockSpec((b_tile, Sh, in_h), lambda i: (i, 0, 0)),
                 pl.BlockSpec((b_tile, Sf, in_f), lambda i: (i, 0, 0))]
                + [_const_spec(a.shape) for a in args[2:]])

    kernel = partial(_model_kernel, n_heads_enc=n_heads_enc,
                     n_heads_dec=n_heads_dec, b_tile=b_tile)

    head_out = pl.pallas_call(
        kernel,
        out_shape=jax.ShapeDtypeStruct((B, Sf, OUT_PAD), jnp.float32),
        grid=(nc,),
        in_specs=in_specs,
        out_specs=pl.BlockSpec((b_tile, Sf, OUT_PAD), lambda i: (i, 0, 0)),
        compiler_params=pltpu.CompilerParams(
            dimension_semantics=("parallel",)),
    )(*args)

    out_5min = head_out[:, :, 0:1]      # (B, Sf, 1)
    out_hourly = head_out[:, 0, 1:2]    # (B, 1)
    return out_5min, out_hourly


# -------------------- parameter init (PyTorch-like structure) ----------------

def _dense(key, fan_in, fan_out, scale=0.05):
    kw, kb = jax.random.split(key)
    w = scale * jax.random.normal(kw, (fan_in, fan_out), jnp.float32)
    b = scale * jax.random.normal(kb, (fan_out,), jnp.float32)
    return w, b


def _attn_params(key, d_model):
    ks = jax.random.split(key, 4)
    p = {}
    for name, k in zip(("q", "k", "v", "o"), ks):
        w, b = _dense(k, d_model, d_model)
        p["w" + name] = w
        p["b" + name] = b
    return p


def _enc_layer_params(key, d_model, ffn_dim):
    k1, k2, k3 = jax.random.split(key, 3)
    w1, b1 = _dense(k2, d_model, ffn_dim)
    w2, b2 = _dense(k3, ffn_dim, d_model)
    return {"self_attn": _attn_params(k1, d_model),
            "ln1_g": jnp.ones((d_model,), jnp.float32),
            "ln1_b": jnp.zeros((d_model,), jnp.float32),
            "ff_w1": w1, "ff_b1": b1, "ff_w2": w2, "ff_b2": b2,
            "ln2_g": jnp.ones((d_model,), jnp.float32),
            "ln2_b": jnp.zeros((d_model,), jnp.float32)}


def _dec_layer_params(key, d_model, ffn_dim):
    k1, k2, k3, k4 = jax.random.split(key, 4)
    w1, b1 = _dense(k3, d_model, ffn_dim)
    w2, b2 = _dense(k4, ffn_dim, d_model)
    return {"self_attn": _attn_params(k1, d_model),
            "cross_attn": _attn_params(k2, d_model),
            "ln1_g": jnp.ones((d_model,), jnp.float32),
            "ln1_b": jnp.zeros((d_model,), jnp.float32),
            "ln2_g": jnp.ones((d_model,), jnp.float32),
            "ln2_b": jnp.zeros((d_model,), jnp.float32),
            "ff_w1": w1, "ff_b1": b1, "ff_w2": w2, "ff_b2": b2,
            "ln3_g": jnp.ones((d_model,), jnp.float32),
            "ln3_b": jnp.zeros((d_model,), jnp.float32)}


def init_params(key, in_dim_hourly, in_dim_5min, d_model,
                n_layers_enc, n_layers_dec):
    k_enc_in, k_dec_in, k_h5, k_hh, k_rest = jax.random.split(key, 5)
    enc_in_w, enc_in_b = _dense(k_enc_in, in_dim_hourly, d_model)
    dec_in_w, dec_in_b = _dense(k_dec_in, in_dim_5min, d_model)
    w5, b5 = _dense(k_h5, d_model, 1)
    wh, bh = _dense(k_hh, d_model, 1)
    enc_keys = jax.random.split(jax.random.fold_in(k_rest, 0), n_layers_enc)
    dec_keys = jax.random.split(jax.random.fold_in(k_rest, 1), n_layers_dec)
    return {
        "enc": {"in_w": enc_in_w, "in_b": enc_in_b,
                "layers": [_enc_layer_params(k, d_model, FFN_DIM) for k in enc_keys]},
        "dec": {"in_w": dec_in_w, "in_b": dec_in_b,
                "layers": [_dec_layer_params(k, d_model, FFN_DIM) for k in dec_keys]},
        "head": {"w5": w5, "b5": b5, "wh": wh, "bh": bh},
    }


# ------------------- pack params into the fused-kernel layout ----------------

def pack_params(params, n_heads_enc, n_heads_dec):
    D = D_MODEL

    def v2(x):                       # (N,) -> (1, N)
        return x.reshape(1, -1)

    def attn_pack(layers, key, n_heads):
        dh = D // n_heads
        scale = 1.0 / math.sqrt(dh)   # folded into Wq / bq
        wqkv = jnp.stack([jnp.concatenate(
            [lp[key]["wq"] * scale, lp[key]["wk"], lp[key]["wv"]], axis=1)
            for lp in layers])                                    # (L, D, 3D)
        bqkv = jnp.stack([v2(jnp.concatenate(
            [lp[key]["bq"] * scale, lp[key]["bk"], lp[key]["bv"]]))
            for lp in layers])                                    # (L, 1, 3D)
        wo = jnp.stack([lp[key]["wo"] for lp in layers])          # (L, D, D)
        bo = jnp.stack([v2(lp[key]["bo"]) for lp in layers])      # (L, 1, D)
        return [wqkv, bqkv, wo, bo]

    def stack2(layers, name):
        return jnp.stack([lp[name] for lp in layers])

    def stackv(layers, name):
        return jnp.stack([v2(lp[name]) for lp in layers])

    enc, dec = params["enc"]["layers"], params["dec"]["layers"]

    # Fused, lane-padded head: lane 0 = 5min head, lane 1 = hourly head.
    hw = jnp.concatenate([params["head"]["w5"], params["head"]["wh"]], axis=1)
    hw = jnp.pad(hw, ((0, 0), (0, OUT_PAD - hw.shape[1])))
    hb = jnp.concatenate([params["head"]["b5"], params["head"]["bh"]])
    hb = jnp.pad(hb, (0, OUT_PAD - hb.shape[0])).reshape(1, OUT_PAD)

    packed = [
        params["enc"]["in_w"], v2(params["enc"]["in_b"]),
        *attn_pack(enc, "self_attn", n_heads_enc),
        stackv(enc, "ln1_g"), stackv(enc, "ln1_b"),
        stack2(enc, "ff_w1"), stackv(enc, "ff_b1"),
        stack2(enc, "ff_w2"), stackv(enc, "ff_b2"),
        stackv(enc, "ln2_g"), stackv(enc, "ln2_b"),
        params["dec"]["in_w"], v2(params["dec"]["in_b"]),
        *attn_pack(dec, "self_attn", n_heads_dec),
        stackv(dec, "ln1_g"), stackv(dec, "ln1_b"),
        *attn_pack(dec, "cross_attn", n_heads_dec),
        stackv(dec, "ln2_g"), stackv(dec, "ln2_b"),
        stack2(dec, "ff_w1"), stackv(dec, "ff_b1"),
        stack2(dec, "ff_w2"), stackv(dec, "ff_b2"),
        stackv(dec, "ln3_g"), stackv(dec, "ln3_b"),
        hw, hb,
    ]
    return packed


# --------------------- pure-JAX reference (for validation) -------------------

def _ref_ln(x, g, b):
    mu = x.mean(-1, keepdims=True)
    var = ((x - mu) ** 2).mean(-1, keepdims=True)
    return (x - mu) / jnp.sqrt(var + LN_EPS) * g + b


def _ref_mha(q_in, k_in, v_in, p, n_heads):
    B, S, D = q_in.shape
    T = k_in.shape[1]
    dh = D // n_heads
    q = (q_in @ p["wq"] + p["bq"]).reshape(B, S, n_heads, dh).transpose(0, 2, 1, 3)
    k = (k_in @ p["wk"] + p["bk"]).reshape(B, T, n_heads, dh).transpose(0, 2, 1, 3)
    v = (v_in @ p["wv"] + p["bv"]).reshape(B, T, n_heads, dh).transpose(0, 2, 1, 3)
    s = jnp.einsum("bhqd,bhkd->bhqk", q, k) / math.sqrt(dh)
    a = jax.nn.softmax(s, axis=-1)
    o = jnp.einsum("bhqk,bhkd->bhqd", a, v)
    o = o.transpose(0, 2, 1, 3).reshape(B, S, D)
    return o @ p["wo"] + p["bo"]


def _ref_forward(hourly_seq, fivemin_seq, params, n_heads_enc, n_heads_dec):
    B, Sh, _ = hourly_seq.shape
    _, Sf, _ = fivemin_seq.shape
    h = hourly_seq @ params["enc"]["in_w"] + params["enc"]["in_b"]
    h = h + positional_encoding(Sh, D_MODEL)[None]
    for lp in params["enc"]["layers"]:
        sa = _ref_mha(h, h, h, lp["self_attn"], n_heads_enc)
        h = _ref_ln(h + sa, lp["ln1_g"], lp["ln1_b"])
        ff = jnp.maximum(h @ lp["ff_w1"] + lp["ff_b1"], 0.0) @ lp["ff_w2"] + lp["ff_b2"]
        h = _ref_ln(h + ff, lp["ln2_g"], lp["ln2_b"])
    memory = h
    f = fivemin_seq @ params["dec"]["in_w"] + params["dec"]["in_b"]
    f = f + positional_encoding(Sf, D_MODEL)[None]
    for lp in params["dec"]["layers"]:
        sa = _ref_mha(f, f, f, lp["self_attn"], n_heads_dec)
        f = _ref_ln(f + sa, lp["ln1_g"], lp["ln1_b"])
        ca = _ref_mha(f, memory, memory, lp["cross_attn"], n_heads_dec)
        f = _ref_ln(f + ca, lp["ln2_g"], lp["ln2_b"])
        ff = jnp.maximum(f @ lp["ff_w1"] + lp["ff_b1"], 0.0) @ lp["ff_w2"] + lp["ff_b2"]
        f = _ref_ln(f + ff, lp["ln3_g"], lp["ln3_b"])
    out_5min = f @ params["head"]["w5"] + params["head"]["b5"]
    out_hourly = f[:, 0] @ params["head"]["wh"] + params["head"]["bh"]
    return out_5min, out_hourly


# --------------------------------- driver ------------------------------------

if __name__ == "__main__":
    B = 2
    S_HOURLY, S_5MIN = 8, 12
    IN_DIM_HOURLY, IN_DIM_5MIN = 4, 6
    N_HEADS_ENC = N_HEADS_DEC = 4
    N_LAYERS_ENC = N_LAYERS_DEC = 2

    key = jax.random.PRNGKey(0)
    k_in1, k_in2, k_par = jax.random.split(key, 3)
    hourly_seq = jax.random.normal(k_in1, (B, S_HOURLY, IN_DIM_HOURLY), jnp.float32)
    fivemin_seq = jax.random.normal(k_in2, (B, S_5MIN, IN_DIM_5MIN), jnp.float32)
    params = init_params(k_par, IN_DIM_HOURLY, IN_DIM_5MIN, D_MODEL,
                         N_LAYERS_ENC, N_LAYERS_DEC)
    packed = pack_params(params, N_HEADS_ENC, N_HEADS_DEC)

    fwd = jax.jit(partial(multires_traffic_transformer,
                          n_heads_enc=N_HEADS_ENC, n_heads_dec=N_HEADS_DEC))
    out_5min, out_hourly = fwd(hourly_seq, fivemin_seq, packed)
    jax.block_until_ready((out_5min, out_hourly))

    assert out_5min.shape == (B, S_5MIN, 1)
    assert out_hourly.shape == (B, 1)
    assert jnp.all(jnp.isfinite(out_5min)) and jnp.all(jnp.isfinite(out_hourly))

    # Cross-check the fused kernel against a plain-XLA reference of the same math.
    ref_5min, ref_hourly = _ref_forward(hourly_seq, fivemin_seq, params,
                                        N_HEADS_ENC, N_HEADS_DEC)
    assert jnp.allclose(out_5min, ref_5min, atol=3e-2, rtol=3e-2), \
        float(jnp.max(jnp.abs(out_5min - ref_5min)))
    assert jnp.allclose(out_hourly, ref_hourly, atol=3e-2, rtol=3e-2), \
        float(jnp.max(jnp.abs(out_hourly - ref_hourly)))

    print("KERNEL_OK")
</pallas_src>

<mosaic_0001>
module attributes {stable_mosaic.version = 11 : i64} {
  func.func @_model_kernel(%arg0: i32, %arg1: memref<1x8x4xf32, #tpu.memory_space<vmem>>, %arg2: memref<1x12x6xf32, #tpu.memory_space<vmem>>, %arg3: memref<8x32xf32, #tpu.memory_space<vmem>>, %arg4: memref<12x32xf32, #tpu.memory_space<vmem>>, %arg5: memref<4x32xf32, #tpu.memory_space<vmem>>, %arg6: memref<1x32xf32, #tpu.memory_space<vmem>>, %arg7: memref<2x32x96xf32, #tpu.memory_space<vmem>>, %arg8: memref<2x1x96xf32, #tpu.memory_space<vmem>>, %arg9: memref<2x32x32xf32, #tpu.memory_space<vmem>>, %arg10: memref<2x1x32xf32, #tpu.memory_space<vmem>>, %arg11: memref<2x1x32xf32, #tpu.memory_space<vmem>>, %arg12: memref<2x1x32xf32, #tpu.memory_space<vmem>>, %arg13: memref<2x32x512xf32, #tpu.memory_space<vmem>>, %arg14: memref<2x1x512xf32, #tpu.memory_space<vmem>>, %arg15: memref<2x512x32xf32, #tpu.memory_space<vmem>>, %arg16: memref<2x1x32xf32, #tpu.memory_space<vmem>>, %arg17: memref<2x1x32xf32, #tpu.memory_space<vmem>>, %arg18: memref<2x1x32xf32, #tpu.memory_space<vmem>>, %arg19: memref<6x32xf32, #tpu.memory_space<vmem>>, %arg20: memref<1x32xf32, #tpu.memory_space<vmem>>, %arg21: memref<2x32x96xf32, #tpu.memory_space<vmem>>, %arg22: memref<2x1x96xf32, #tpu.memory_space<vmem>>, %arg23: memref<2x32x32xf32, #tpu.memory_space<vmem>>, %arg24: memref<2x1x32xf32, #tpu.memory_space<vmem>>, %arg25: memref<2x1x32xf32, #tpu.memory_space<vmem>>, %arg26: memref<2x1x32xf32, #tpu.memory_space<vmem>>, %arg27: memref<2x32x96xf32, #tpu.memory_space<vmem>>, %arg28: memref<2x1x96xf32, #tpu.memory_space<vmem>>, %arg29: memref<2x32x32xf32, #tpu.memory_space<vmem>>, %arg30: memref<2x1x32xf32, #tpu.memory_space<vmem>>, %arg31: memref<2x1x32xf32, #tpu.memory_space<vmem>>, %arg32: memref<2x1x32xf32, #tpu.memory_space<vmem>>, %arg33: memref<2x32x512xf32, #tpu.memory_space<vmem>>, %arg34: memref<2x1x512xf32, #tpu.memory_space<vmem>>, %arg35: memref<2x512x32xf32, #tpu.memory_space<vmem>>, %arg36: memref<2x1x32xf32, #tpu.memory_space<vmem>>, %arg37: memref<2x1x32xf32, #tpu.memory_space<vmem>>, %arg38: memref<2x1x32xf32, #tpu.memory_space<vmem>>, %arg39: memref<32x128xf32, #tpu.memory_space<vmem>>, %arg40: memref<1x128xf32, #tpu.memory_space<vmem>>, %arg41: memref<1x12x128xf32, #tpu.memory_space<vmem>>) attributes {dimension_semantics = [#tpu.dimension_semantics<parallel>], iteration_bounds = array<i64: 2>, scalar_prefetch = 0 : i64, scratch_operands = 0 : i64, tpu.core_type = #tpu.core_type<tc>, window_params = [{transform_indices = @transform_0, window_bounds = array<i64: 1, 8, 4>}, {transform_indices = @transform_1, window_bounds = array<i64: 1, 12, 6>}, {pipeline_mode = #tpu.pipeline_mode<synchronous>, transform_indices = @transform_2, window_bounds = array<i64: 8, 32>}, {pipeline_mode = #tpu.pipeline_mode<synchronous>, transform_indices = @transform_3, window_bounds = array<i64: 12, 32>}, {pipeline_mode = #tpu.pipeline_mode<synchronous>, transform_indices = @transform_4, window_bounds = array<i64: 4, 32>}, {pipeline_mode = #tpu.pipeline_mode<synchronous>, transform_indices = @transform_5, window_bounds = array<i64: 1, 32>}, {pipeline_mode = #tpu.pipeline_mode<synchronous>, transform_indices = @transform_6, window_bounds = array<i64: 2, 32, 96>}, {pipeline_mode = #tpu.pipeline_mode<synchronous>, transform_indices = @transform_7, window_bounds = array<i64: 2, 1, 96>}, {pipeline_mode = #tpu.pipeline_mode<synchronous>, transform_indices = @transform_8, window_bounds = array<i64: 2, 32, 32>}, {pipeline_mode = #tpu.pipeline_mode<synchronous>, transform_indices = @transform_9, window_bounds = array<i64: 2, 1, 32>}, {pipeline_mode = #tpu.pipeline_mode<synchronous>, transform_indices = @transform_10, window_bounds = array<i64: 2, 1, 32>}, {pipeline_mode = #tpu.pipeline_mode<synchronous>, transform_indices = @transform_11, window_bounds = array<i64: 2, 1, 32>}, {pipeline_mode = #tpu.pipeline_mode<synchronous>, transform_indices = @transform_12, window_bounds = array<i64: 2, 32, 512>}, {pipeline_mode = #tpu.pipeline_mode<synchronous>, transform_indices = @transform_13, window_bounds = array<i64: 2, 1, 512>}, {pipeline_mode = #tpu.pipeline_mode<synchronous>, transform_indices = @transform_14, window_bounds = array<i64: 2, 512, 32>}, {pipeline_mode = #tpu.pipeline_mode<synchronous>, transform_indices = @transform_15, window_bounds = array<i64: 2, 1, 32>}, {pipeline_mode = #tpu.pipeline_mode<synchronous>, transform_indices = @transform_16, window_bounds = array<i64: 2, 1, 32>}, {pipeline_mode = #tpu.pipeline_mode<synchronous>, transform_indices = @transform_17, window_bounds = array<i64: 2, 1, 32>}, {pipeline_mode = #tpu.pipeline_mode<synchronous>, transform_indices = @transform_18, window_bounds = array<i64: 6, 32>}, {pipeline_mode = #tpu.pipeline_mode<synchronous>, transform_indices = @transform_19, window_bounds = array<i64: 1, 32>}, {pipeline_mode = #tpu.pipeline_mode<synchronous>, transform_indices = @transform_20, window_bounds = array<i64: 2, 32, 96>}, {pipeline_mode = #tpu.pipeline_mode<synchronous>, transform_indices = @transform_21, window_bounds = array<i64: 2, 1, 96>}, {pipeline_mode = #tpu.pipeline_mode<synchronous>, transform_indices = @transform_22, window_bounds = array<i64: 2, 32, 32>}, {pipeline_mode = #tpu.pipeline_mode<synchronous>, transform_indices = @transform_23, window_bounds = array<i64: 2, 1, 32>}, {pipeline_mode = #tpu.pipeline_mode<synchronous>, transform_indices = @transform_24, window_bounds = array<i64: 2, 1, 32>}, {pipeline_mode = #tpu.pipeline_mode<synchronous>, transform_indices = @transform_25, window_bounds = array<i64: 2, 1, 32>}, {pipeline_mode = #tpu.pipeline_mode<synchronous>, transform_indices = @transform_26, window_bounds = array<i64: 2, 32, 96>}, {pipeline_mode = #tpu.pipeline_mode<synchronous>, transform_indices = @transform_27, window_bounds = array<i64: 2, 1, 96>}, {pipeline_mode = #tpu.pipeline_mode<synchronous>, transform_indices = @transform_28, window_bounds = array<i64: 2, 32, 32>}, {pipeline_mode = #tpu.pipeline_mode<synchronous>, transform_indices = @transform_29, window_bounds = array<i64: 2, 1, 32>}, {pipeline_mode = #tpu.pipeline_mode<synchronous>, transform_indices = @transform_30, window_bounds = array<i64: 2, 1, 32>}, {pipeline_mode = #tpu.pipeline_mode<synchronous>, transform_indices = @transform_31, window_bounds = array<i64: 2, 1, 32>}, {pipeline_mode = #tpu.pipeline_mode<synchronous>, transform_indices = @transform_32, window_bounds = array<i64: 2, 32, 512>}, {pipeline_mode = #tpu.pipeline_mode<synchronous>, transform_indices = @transform_33, window_bounds = array<i64: 2, 1, 512>}, {pipeline_mode = #tpu.pipeline_mode<synchronous>, transform_indices = @transform_34, window_bounds = array<i64: 2, 512, 32>}, {pipeline_mode = #tpu.pipeline_mode<synchronous>, transform_indices = @transform_35, window_bounds = array<i64: 2, 1, 32>}, {pipeline_mode = #tpu.pipeline_mode<synchronous>, transform_indices = @transform_36, window_bounds = array<i64: 2, 1, 32>}, {pipeline_mode = #tpu.pipeline_mode<synchronous>, transform_indices = @transform_37, window_bounds = array<i64: 2, 1, 32>}, {pipeline_mode = #tpu.pipeline_mode<synchronous>, transform_indices = @transform_38, window_bounds = array<i64: 32, 128>}, {pipeline_mode = #tpu.pipeline_mode<synchronous>, transform_indices = @transform_39, window_bounds = array<i64: 1, 128>}, {transform_indices = @transform_40, window_bounds = array<i64: 1, 12, 128>}]} {
    %c0 = arith.constant 0 : index
    %c0_0 = arith.constant 0 : index
    %c0_1 = arith.constant 0 : index
    %0 = vector.load %arg1[%c0, %c0_0, %c0_1] : memref<1x8x4xf32, #tpu.memory_space<vmem>>, vector<1x8x4xf32>
    %1 = vector.shape_cast %0 : vector<1x8x4xf32> to vector<8x4xf32>
    %c0_2 = arith.constant 0 : index
    %c0_3 = arith.constant 0 : index
    %2 = vector.load %arg5[%c0_2, %c0_3] : memref<4x32xf32, #tpu.memory_space<vmem>>, vector<4x32xf32>
    %cst = arith.constant dense<0.000000e+00> : vector<8x32xf32>
    %3 = tpu.matmul %1, %2, %cst {dimension_numbers = #tpu.dot_dimension_numbers<[1], [0], [0], [1], [0, 0, 1, 1], [], []>} : vector<8x4xf32>, vector<4x32xf32>, vector<8x32xf32> -> vector<8x32xf32>
    %c0_4 = arith.constant 0 : index
    %c0_5 = arith.constant 0 : index
    %4 = vector.load %arg6[%c0_4, %c0_5] : memref<1x32xf32, #tpu.memory_space<vmem>>, vector<1x32xf32>
    %5 = vector.broadcast %4 : vector<1x32xf32> to vector<8x32xf32>
    %6 = arith.addf %3, %5 : vector<8x32xf32>
    %c0_6 = arith.constant 0 : index
    %c0_7 = arith.constant 0 : index
    %7 = vector.load %arg3[%c0_6, %c0_7] : memref<8x32xf32, #tpu.memory_space<vmem>>, vector<8x32xf32>
    %8 = arith.addf %6, %7 : vector<8x32xf32>
    %c0_8 = arith.constant 0 : index
    %c0_9 = arith.constant 0 : index
    %c0_10 = arith.constant 0 : index
    %9 = vector.load %arg7[%c0_8, %c0_9, %c0_10] : memref<2x32x96xf32, #tpu.memory_space<vmem>>, vector<1x32x96xf32>
    %10 = vector.shape_cast %9 : vector<1x32x96xf32> to vector<32x96xf32>
    %c0_11 = arith.constant 0 : index
    %c0_12 = arith.constant 0 : index
    %c0_13 = arith.constant 0 : index
    %11 = vector.load %arg8[%c0_11, %c0_12, %c0_13] : memref<2x1x96xf32, #tpu.memory_space<vmem>>, vector<1x1x96xf32>
    %12 = vector.shape_cast %11 : vector<1x1x96xf32> to vector<1x96xf32>
    %c0_14 = arith.constant 0 : index
    %c0_15 = arith.constant 0 : index
    %c0_16 = arith.constant 0 : index
    %13 = vector.load %arg9[%c0_14, %c0_15, %c0_16] : memref<2x32x32xf32, #tpu.memory_space<vmem>>, vector<1x32x32xf32>
    %14 = vector.shape_cast %13 : vector<1x32x32xf32> to vector<32x32xf32>
    %c0_17 = arith.constant 0 : index
    %c0_18 = arith.constant 0 : index
    %c0_19 = arith.constant 0 : index
    %15 = vector.load %arg10[%c0_17, %c0_18, %c0_19] : memref<2x1x32xf32, #tpu.memory_space<vmem>>, vector<1x1x32xf32>
    %16 = vector.shape_cast %15 : vector<1x1x32xf32> to vector<1x32xf32>
    %cst_20 = arith.constant dense<0.000000e+00> : vector<8x96xf32>
    %17 = tpu.matmul %8, %10, %cst_20 {dimension_numbers = #tpu.dot_dimension_numbers<[1], [0], [0], [1], [0, 0, 1, 1], [], []>} : vector<8x32xf32>, vector<32x96xf32>, vector<8x96xf32> -> vector<8x96xf32>
    %18 = vector.broadcast %12 : vector<1x96xf32> to vector<8x96xf32>
    %19 = arith.addf %17, %18 : vector<8x96xf32>
    %20 = vector.extract_strided_slice %19 {offsets = [0, 0], sizes = [8, 8], strides = [1, 1]} : vector<8x96xf32> to vector<8x8xf32>
    %21 = vector.extract_strided_slice %19 {offsets = [0, 32], sizes = [8, 8], strides = [1, 1]} : vector<8x96xf32> to vector<8x8xf32>
    %22 = vector.extract_strided_slice %19 {offsets = [0, 64], sizes = [8, 8], strides = [1, 1]} : vector<8x96xf32> to vector<8x8xf32>
    %cst_21 = arith.constant dense<0.000000e+00> : vector<8x8xf32>
    %23 = tpu.matmul %20, %21, %cst_21 {dimension_numbers = #tpu.dot_dimension_numbers<[1], [1], [0], [0], [0, 0, 1, 0], [], []>} : vector<8x8xf32>, vector<8x8xf32>, vector<8x8xf32> -> vector<8x8xf32>
    %cst_22 = arith.constant dense<0xFF800000> : vector<8xf32>
    %24 = vector.multi_reduction <maximumf>, %23, %cst_22 [1] : vector<8x8xf32> to vector<8xf32>
    %25 = vector.shape_cast %24 : vector<8xf32> to vector<8x1xf32>
    %26 = vector.broadcast %25 : vector<8x1xf32> to vector<8x8xf32>
    %27 = arith.subf %23, %26 : vector<8x8xf32>
    %28 = math.exp %27 : vector<8x8xf32>
    %cst_23 = arith.constant dense<0.000000e+00> : vector<8x8xf32>
    %29 = tpu.matmul %28, %22, %cst_23 {dimension_numbers = #tpu.dot_dimension_numbers<[1], [0], [0], [1], [0, 0, 1, 1], [], []>} : vector<8x8xf32>, vector<8x8xf32>, vector<8x8xf32> -> vector<8x8xf32>
    %cst_24 = arith.constant dense<0.000000e+00> : vector<8xf32>
    %30 = vector.multi_reduction <add>, %28, %cst_24 [1] : vector<8x8xf32> to vector<8xf32>
    %31 = vector.shape_cast %30 : vector<8xf32> to vector<8x1xf32>
    %32 = tpu.reciprocal %31 {approx = true} : vector<8x1xf32> -> vector<8x1xf32>
    %33 = vector.broadcast %32 : vector<8x1xf32> to vector<8x8xf32>
    %34 = arith.mulf %29, %33 : vector<8x8xf32>
    %35 = vector.extract_strided_slice %19 {offsets = [0, 8], sizes = [8, 8], strides = [1, 1]} : vector<8x96xf32> to vector<8x8xf32>
    %36 = vector.extract_strided_slice %19 {offsets = [0, 40], sizes = [8, 8], strides = [1, 1]} : vector<8x96xf32> to vector<8x8xf32>
    %37 = vector.extract_strided_slice %19 {offsets = [0, 72], sizes = [8, 8], strides = [1, 1]} : vector<8x96xf32> to vector<8x8xf32>
    %cst_25 = arith.constant dense<0.000000e+00> : vector<8x8xf32>
    %38 = tpu.matmul %35, %36, %cst_25 {dimension_numbers = #tpu.dot_dimension_numbers<[1], [1], [0], [0], [0, 0, 1, 0], [], []>} : vector<8x8xf32>, vector<8x8xf32>, vector<8x8xf32> -> vector<8x8xf32>
    %cst_26 = arith.constant dense<0xFF800000> : vector<8xf32>
    %39 = vector.multi_reduction <maximumf>, %38, %cst_26 [1] : vector<8x8xf32> to vector<8xf32>
    %40 = vector.shape_cast %39 : vector<8xf32> to vector<8x1xf32>
    %41 = vector.broadcast %40 : vector<8x1xf32> to vector<8x8xf32>
    %42 = arith.subf %38, %41 : vector<8x8xf32>
    %43 = math.exp %42 : vector<8x8xf32>
    %cst_27 = arith.constant dense<0.000000e+00> : vector<8x8xf32>
    %44 = tpu.matmul %43, %37, %cst_27 {dimension_numbers = #tpu.dot_dimension_numbers<[1], [0], [0], [1], [0, 0, 1, 1], [], []>} : vector<8x8xf32>, vector<8x8xf32>, vector<8x8xf32> -> vector<8x8xf32>
    %cst_28 = arith.constant dense<0.000000e+00> : vector<8xf32>
    %45 = vector.multi_reduction <add>, %43, %cst_28 [1] : vector<8x8xf32> to vector<8xf32>
    %46 = vector.shape_cast %45 : vector<8xf32> to vector<8x1xf32>
    %47 = tpu.reciprocal %46 {approx = true} : vector<8x1xf32> -> vector<8x1xf32>
    %48 = vector.broadcast %47 : vector<8x1xf32> to vector<8x8xf32>
    %49 = arith.mulf %44, %48 : vector<8x8xf32>
    %50 = vector.extract_strided_slice %19 {offsets = [0, 16], sizes = [8, 8], strides = [1, 1]} : vector<8x96xf32> to vector<8x8xf32>
    %51 = vector.extract_strided_slice %19 {offsets = [0, 48], sizes = [8, 8], strides = [1, 1]} : vector<8x96xf32> to vector<8x8xf32>
    %52 = vector.extract_strided_slice %19 {offsets = [0, 80], sizes = [8, 8], strides = [1, 1]} : vector<8x96xf32> to vector<8x8xf32>
    %cst_29 = arith.constant dense<0.000000e+00> : vector<8x8xf32>
    %53 = tpu.matmul %50, %51, %cst_29 {dimension_numbers = #tpu.dot_dimension_numbers<[1], [1], [0], [0], [0, 0, 1, 0], [], []>} : vector<8x8xf32>, vector<8x8xf32>, vector<8x8xf32> -> vector<8x8xf32>
    %cst_30 = arith.constant dense<0xFF800000> : vector<8xf32>
    %54 = vector.multi_reduction <maximumf>, %53, %cst_30 [1] : vector<8x8xf32> to vector<8xf32>
    %55 = vector.shape_cast %54 : vector<8xf32> to vector<8x1xf32>
    %56 = vector.broadcast %55 : vector<8x1xf32> to vector<8x8xf32>
    %57 = arith.subf %53, %56 : vector<8x8xf32>
    %58 = math.exp %57 : vector<8x8xf32>
    %cst_31 = arith.constant dense<0.000000e+00> : vector<8x8xf32>
    %59 = tpu.matmul %58, %52, %cst_31 {dimension_numbers = #tpu.dot_dimension_numbers<[1], [0], [0], [1], [0, 0, 1, 1], [], []>} : vector<8x8xf32>, vector<8x8xf32>, vector<8x8xf32> -> vector<8x8xf32>
    %cst_32 = arith.constant dense<0.000000e+00> : vector<8xf32>
    %60 = vector.multi_reduction <add>, %58, %cst_32 [1] : vector<8x8xf32> to vector<8xf32>
    %61 = vector.shape_cast %60 : vector<8xf32> to vector<8x1xf32>
    %62 = tpu.reciprocal %61 {approx = true} : vector<8x1xf32> -> vector<8x1xf32>
    %63 = vector.broadcast %62 : vector<8x1xf32> to vector<8x8xf32>
    %64 = arith.mulf %59, %63 : vector<8x8xf32>
    %65 = vector.extract_strided_slice %19 {offsets = [0, 24], sizes = [8, 8], strides = [1, 1]} : vector<8x96xf32> to vector<8x8xf32>
    %66 = vector.extract_strided_slice %19 {offsets = [0, 56], sizes = [8, 8], strides = [1, 1]} : vector<8x96xf32> to vector<8x8xf32>
    %67 = vector.extract_strided_slice %19 {offsets = [0, 88], sizes = [8, 8], strides = [1, 1]} : vector<8x96xf32> to vector<8x8xf32>
    %cst_33 = arith.constant dense<0.000000e+00> : vector<8x8xf32>
    %68 = tpu.matmul %65, %66, %cst_33 {dimension_numbers = #tpu.dot_dimension_numbers<[1], [1], [0], [0], [0, 0, 1, 0], [], []>} : vector<8x8xf32>, vector<8x8xf32>, vector<8x8xf32> -> vector<8x8xf32>
    %cst_34 = arith.constant dense<0xFF800000> : vector<8xf32>
    %69 = vector.multi_reduction <maximumf>, %68, %cst_34 [1] : vector<8x8xf32> to vector<8xf32>
    %70 = vector.shape_cast %69 : vector<8xf32> to vector<8x1xf32>
    %71 = vector.broadcast %70 : vector<8x1xf32> to vector<8x8xf32>
    %72 = arith.subf %68, %71 : vector<8x8xf32>
    %73 = math.exp %72 : vector<8x8xf32>
    %cst_35 = arith.constant dense<0.000000e+00> : vector<8x8xf32>
    %74 = tpu.matmul %73, %67, %cst_35 {dimension_numbers = #tpu.dot_dimension_numbers<[1], [0], [0], [1], [0, 0, 1, 1], [], []>} : vector<8x8xf32>, vector<8x8xf32>, vector<8x8xf32> -> vector<8x8xf32>
    %cst_36 = arith.constant dense<0.000000e+00> : vector<8xf32>
    %75 = vector.multi_reduction <add>, %73, %cst_36 [1] : vector<8x8xf32> to vector<8xf32>
    %76 = vector.shape_cast %75 : vector<8xf32> to vector<8x1xf32>
    %77 = tpu.reciprocal %76 {approx = true} : vector<8x1xf32> -> vector<8x1xf32>
    %78 = vector.broadcast %77 : vector<8x1xf32> to vector<8x8xf32>
    %79 = arith.mulf %74, %78 : vector<8x8xf32>
    %80 = tpu.concatenate %34, %49, %64, %79 in 1 : vector<8x8xf32>, vector<8x8xf32>, vector<8x8xf32>, vector<8x8xf32> -> vector<8x32xf32>
    %cst_37 = arith.constant dense<0.000000e+00> : vector<8x32xf32>
    %81 = tpu.matmul %80, %14, %cst_37 {dimension_numbers = #tpu.dot_dimension_numbers<[1], [0], [0], [1], [0, 0, 1, 1], [], []>} : vector<8x32xf32>, vector<32x32xf32>, vector<8x32xf32> -> vector<8x32xf32>
    %82 = vector.broadcast %16 : vector<1x32xf32> to vector<8x32xf32>
    %83 = arith.addf %81, %82 : vector<8x32xf32>
    %84 = arith.addf %8, %83 : vector<8x32xf32>
    %c0_38 = arith.constant 0 : index
    %c0_39 = arith.constant 0 : index
    %c0_40 = arith.constant 0 : index
    %85 = vector.load %arg11[%c0_38, %c0_39, %c0_40] : memref<2x1x32xf32, #tpu.memory_space<vmem>>, vector<1x1x32xf32>
    %86 = vector.shape_cast %85 : vector<1x1x32xf32> to vector<1x32xf32>
    %c0_41 = arith.constant 0 : index
    %c0_42 = arith.constant 0 : index
    %c0_43 = arith.constant 0 : index
    %87 = vector.load %arg12[%c0_41, %c0_42, %c0_43] : memref<2x1x32xf32, #tpu.memory_space<vmem>>, vector<1x1x32xf32>
    %88 = vector.shape_cast %87 : vector<1x1x32xf32> to vector<1x32xf32>
    %cst_44 = arith.constant dense<0.000000e+00> : vector<8xf32>
    %89 = vector.multi_reduction <add>, %84, %cst_44 [1] : vector<8x32xf32> to vector<8xf32>
    %90 = vector.shape_cast %89 : vector<8xf32> to vector<8x1xf32>
    %cst_45 = arith.constant 3.200000e+01 : f32
    %91 = vector.broadcast %cst_45 : f32 to vector<8x1xf32>
    %92 = arith.divf %90, %91 : vector<8x1xf32>
    %93 = vector.broadcast %92 : vector<8x1xf32> to vector<8x32xf32>
    %94 = arith.subf %84, %93 : vector<8x32xf32>
    %95 = arith.mulf %94, %94 : vector<8x32xf32>
    %cst_46 = arith.constant dense<0.000000e+00> : vector<8xf32>
    %96 = vector.multi_reduction <add>, %95, %cst_46 [1] : vector<8x32xf32> to vector<8xf32>
    %97 = vector.shape_cast %96 : vector<8xf32> to vector<8x1xf32>
    %cst_47 = arith.constant 3.200000e+01 : f32
    %98 = vector.broadcast %cst_47 : f32 to vector<8x1xf32>
    %99 = arith.divf %97, %98 : vector<8x1xf32>
    %100 = vector.broadcast %92 : vector<8x1xf32> to vector<8x32xf32>
    %101 = arith.subf %84, %100 : vector<8x32xf32>
    %cst_48 = arith.constant 9.99999974E-6 : f32
    %102 = vector.broadcast %cst_48 : f32 to vector<8x1xf32>
    %103 = arith.addf %99, %102 : vector<8x1xf32>
    %104 = math.rsqrt %103 : vector<8x1xf32>
    %105 = vector.broadcast %104 : vector<8x1xf32> to vector<8x32xf32>
    %106 = arith.mulf %101, %105 : vector<8x32xf32>
    %107 = vector.broadcast %86 : vector<1x32xf32> to vector<8x32xf32>
    %108 = arith.mulf %106, %107 : vector<8x32xf32>
    %109 = vector.broadcast %88 : vector<1x32xf32> to vector<8x32xf32>
    %110 = arith.addf %108, %109 : vector<8x32xf32>
    %c0_49 = arith.constant 0 : index
    %c0_50 = arith.constant 0 : index
    %c0_51 = arith.constant 0 : index
    %111 = vector.load %arg13[%c0_49, %c0_50, %c0_51] : memref<2x32x512xf32, #tpu.memory_space<vmem>>, vector<1x32x512xf32>
    %112 = vector.shape_cast %111 : vector<1x32x512xf32> to vector<32x512xf32>
    %cst_52 = arith.constant dense<0.000000e+00> : vector<8x512xf32>
    %113 = tpu.matmul %110, %112, %cst_52 {dimension_numbers = #tpu.dot_dimension_numbers<[1], [0], [0], [1], [0, 0, 1, 1], [], []>} : vector<8x32xf32>, vector<32x512xf32>, vector<8x512xf32> -> vector<8x512xf32>
    %c0_53 = arith.constant 0 : index
    %c0_54 = arith.constant 0 : index
    %c0_55 = arith.constant 0 : index
    %114 = vector.load %arg14[%c0_53, %c0_54, %c0_55] : memref<2x1x512xf32, #tpu.memory_space<vmem>>, vector<1x1x512xf32>
    %115 = vector.shape_cast %114 : vector<1x1x512xf32> to vector<1x512xf32>
    %116 = vector.broadcast %115 : vector<1x512xf32> to vector<8x512xf32>
    %117 = arith.addf %113, %116 : vector<8x512xf32>
    %cst_56 = arith.constant 0.000000e+00 : f32
    %118 = vector.broadcast %cst_56 : f32 to vector<8x512xf32>
    %119 = arith.maximumf %117, %118 : vector<8x512xf32>
    %c0_57 = arith.constant 0 : index
    %c0_58 = arith.constant 0 : index
    %c0_59 = arith.constant 0 : index
    %120 = vector.load %arg15[%c0_57, %c0_58, %c0_59] : memref<2x512x32xf32, #tpu.memory_space<vmem>>, vector<1x512x32xf32>
    %121 = vector.shape_cast %120 : vector<1x512x32xf32> to vector<512x32xf32>
    %cst_60 = arith.constant dense<0.000000e+00> : vector<8x32xf32>
    %122 = tpu.matmul %119, %121, %cst_60 {dimension_numbers = #tpu.dot_dimension_numbers<[1], [0], [0], [1], [0, 0, 1, 1], [], []>} : vector<8x512xf32>, vector<512x32xf32>, vector<8x32xf32> -> vector<8x32xf32>
    %c0_61 = arith.constant 0 : index
    %c0_62 = arith.constant 0 : index
    %c0_63 = arith.constant 0 : index
    %123 = vector.load %arg16[%c0_61, %c0_62, %c0_63] : memref<2x1x32xf32, #tpu.memory_space<vmem>>, vector<1x1x32xf32>
    %124 = vector.shape_cast %123 : vector<1x1x32xf32> to vector<1x32xf32>
    %125 = vector.broadcast %124 : vector<1x32xf32> to vector<8x32xf32>
    %126 = arith.addf %122, %125 : vector<8x32xf32>
    %127 = arith.addf %110, %126 : vector<8x32xf32>
    %c0_64 = arith.constant 0 : index
    %c0_65 = arith.constant 0 : index
    %c0_66 = arith.constant 0 : index
    %128 = vector.load %arg17[%c0_64, %c0_65, %c0_66] : memref<2x1x32xf32, #tpu.memory_space<vmem>>, vector<1x1x32xf32>
    %129 = vector.shape_cast %128 : vector<1x1x32xf32> to vector<1x32xf32>
    %c0_67 = arith.constant 0 : index
    %c0_68 = arith.constant 0 : index
    %c0_69 = arith.constant 0 : index
    %130 = vector.load %arg18[%c0_67, %c0_68, %c0_69] : memref<2x1x32xf32, #tpu.memory_space<vmem>>, vector<1x1x32xf32>
    %131 = vector.shape_cast %130 : vector<1x1x32xf32> to vector<1x32xf32>
    %cst_70 = arith.constant dense<0.000000e+00> : vector<8xf32>
    %132 = vector.multi_reduction <add>, %127, %cst_70 [1] : vector<8x32xf32> to vector<8xf32>
    %133 = vector.shape_cast %132 : vector<8xf32> to vector<8x1xf32>
    %cst_71 = arith.constant 3.200000e+01 : f32
    %134 = vector.broadcast %cst_71 : f32 to vector<8x1xf32>
    %135 = arith.divf %133, %134 : vector<8x1xf32>
    %136 = vector.broadcast %135 : vector<8x1xf32> to vector<8x32xf32>
    %137 = arith.subf %127, %136 : vector<8x32xf32>
    %138 = arith.mulf %137, %137 : vector<8x32xf32>
    %cst_72 = arith.constant dense<0.000000e+00> : vector<8xf32>
    %139 = vector.multi_reduction <add>, %138, %cst_72 [1] : vector<8x32xf32> to vector<8xf32>
    %140 = vector.shape_cast %139 : vector<8xf32> to vector<8x1xf32>
    %cst_73 = arith.constant 3.200000e+01 : f32
    %141 = vector.broadcast %cst_73 : f32 to vector<8x1xf32>
    %142 = arith.divf %140, %141 : vector<8x1xf32>
    %143 = vector.broadcast %135 : vector<8x1xf32> to vector<8x32xf32>
    %144 = arith.subf %127, %143 : vector<8x32xf32>
    %cst_74 = arith.constant 9.99999974E-6 : f32
    %145 = vector.broadcast %cst_74 : f32 to vector<8x1xf32>
    %146 = arith.addf %142, %145 : vector<8x1xf32>
    %147 = math.rsqrt %146 : vector<8x1xf32>
    %148 = vector.broadcast %147 : vector<8x1xf32> to vector<8x32xf32>
    %149 = arith.mulf %144, %148 : vector<8x32xf32>
    %150 = vector.broadcast %129 : vector<1x32xf32> to vector<8x32xf32>
    %151 = arith.mulf %149, %150 : vector<8x32xf32>
    %152 = vector.broadcast %131 : vector<1x32xf32> to vector<8x32xf32>
    %153 = arith.addf %151, %152 : vector<8x32xf32>
    %c1 = arith.constant 1 : index
    %c0_75 = arith.constant 0 : index
    %c0_76 = arith.constant 0 : index
    %154 = vector.load %arg7[%c1, %c0_75, %c0_76] : memref<2x32x96xf32, #tpu.memory_space<vmem>>, vector<1x32x96xf32>
    %155 = vector.shape_cast %154 : vector<1x32x96xf32> to vector<32x96xf32>
    %c1_77 = arith.constant 1 : index
    %c0_78 = arith.constant 0 : index
    %c0_79 = arith.constant 0 : index
    %156 = vector.load %arg8[%c1_77, %c0_78, %c0_79] : memref<2x1x96xf32, #tpu.memory_space<vmem>>, vector<1x1x96xf32>
    %157 = vector.shape_cast %156 : vector<1x1x96xf32> to vector<1x96xf32>
    %c1_80 = arith.constant 1 : index
    %c0_81 = arith.constant 0 : index
    %c0_82 = arith.constant 0 : index
    %158 = vector.load %arg9[%c1_80, %c0_81, %c0_82] : memref<2x32x32xf32, #tpu.memory_space<vmem>>, vector<1x32x32xf32>
    %159 = vector.shape_cast %158 : vector<1x32x32xf32> to vector<32x32xf32>
    %c1_83 = arith.constant 1 : index
    %c0_84 = arith.constant 0 : index
    %c0_85 = arith.constant 0 : index
    %160 = vector.load %arg10[%c1_83, %c0_84, %c0_85] : memref<2x1x32xf32, #tpu.memory_space<vmem>>, vector<1x1x32xf32>
    %161 = vector.shape_cast %160 : vector<1x1x32xf32> to vector<1x32xf32>
    %cst_86 = arith.constant dense<0.000000e+00> : vector<8x96xf32>
    %162 = tpu.matmul %153, %155, %cst_86 {dimension_numbers = #tpu.dot_dimension_numbers<[1], [0], [0], [1], [0, 0, 1, 1], [], []>} : vector<8x32xf32>, vector<32x96xf32>, vector<8x96xf32> -> vector<8x96xf32>
    %163 = vector.broadcast %157 : vector<1x96xf32> to vector<8x96xf32>
    %164 = arith.addf %162, %163 : vector<8x96xf32>
    %165 = vector.extract_strided_slice %164 {offsets = [0, 0], sizes = [8, 8], strides = [1, 1]} : vector<8x96xf32> to vector<8x8xf32>
    %166 = vector.extract_strided_slice %164 {offsets = [0, 32], sizes = [8, 8], strides = [1, 1]} : vector<8x96xf32> to vector<8x8xf32>
    %167 = vector.extract_strided_slice %164 {offsets = [0, 64], sizes = [8, 8], strides = [1, 1]} : vector<8x96xf32> to vector<8x8xf32>
    %cst_87 = arith.constant dense<0.000000e+00> : vector<8x8xf32>
    %168 = tpu.matmul %165, %166, %cst_87 {dimension_numbers = #tpu.dot_dimension_numbers<[1], [1], [0], [0], [0, 0, 1, 0], [], []>} : vector<8x8xf32>, vector<8x8xf32>, vector<8x8xf32> -> vector<8x8xf32>
    %cst_88 = arith.constant dense<0xFF800000> : vector<8xf32>
    %169 = vector.multi_reduction <maximumf>, %168, %cst_88 [1] : vector<8x8xf32> to vector<8xf32>
    %170 = vector.shape_cast %169 : vector<8xf32> to vector<8x1xf32>
    %171 = vector.broadcast %170 : vector<8x1xf32> to vector<8x8xf32>
    %172 = arith.subf %168, %171 : vector<8x8xf32>
    %173 = math.exp %172 : vector<8x8xf32>
    %cst_89 = arith.constant dense<0.000000e+00> : vector<8x8xf32>
    %174 = tpu.matmul %173, %167, %cst_89 {dimension_numbers = #tpu.dot_dimension_numbers<[1], [0], [0], [1], [0, 0, 1, 1], [], []>} : vector<8x8xf32>, vector<8x8xf32>, vector<8x8xf32> -> vector<8x8xf32>
    %cst_90 = arith.constant dense<0.000000e+00> : vector<8xf32>
    %175 = vector.multi_reduction <add>, %173, %cst_90 [1] : vector<8x8xf32> to vector<8xf32>
    %176 = vector.shape_cast %175 : vector<8xf32> to vector<8x1xf32>
    %177 = tpu.reciprocal %176 {approx = true} : vector<8x1xf32> -> vector<8x1xf32>
    %178 = vector.broadcast %177 : vector<8x1xf32> to vector<8x8xf32>
    %179 = arith.mulf %174, %178 : vector<8x8xf32>
    %180 = vector.extract_strided_slice %164 {offsets = [0, 8], sizes = [8, 8], strides = [1, 1]} : vector<8x96xf32> to vector<8x8xf32>
    %181 = vector.extract_strided_slice %164 {offsets = [0, 40], sizes = [8, 8], strides = [1, 1]} : vector<8x96xf32> to vector<8x8xf32>
    %182 = vector.extract_strided_slice %164 {offsets = [0, 72], sizes = [8, 8], strides = [1, 1]} : vector<8x96xf32> to vector<8x8xf32>
    %cst_91 = arith.constant dense<0.000000e+00> : vector<8x8xf32>
    %183 = tpu.matmul %180, %181, %cst_91 {dimension_numbers = #tpu.dot_dimension_numbers<[1], [1], [0], [0], [0, 0, 1, 0], [], []>} : vector<8x8xf32>, vector<8x8xf32>, vector<8x8xf32> -> vector<8x8xf32>
    %cst_92 = arith.constant dense<0xFF800000> : vector<8xf32>
    %184 = vector.multi_reduction <maximumf>, %183, %cst_92 [1] : vector<8x8xf32> to vector<8xf32>
    %185 = vector.shape_cast %184 : vector<8xf32> to vector<8x1xf32>
    %186 = vector.broadcast %185 : vector<8x1xf32> to vector<8x8xf32>
    %187 = arith.subf %183, %186 : vector<8x8xf32>
    %188 = math.exp %187 : vector<8x8xf32>
    %cst_93 = arith.constant dense<0.000000e+00> : vector<8x8xf32>
    %189 = tpu.matmul %188, %182, %cst_93 {dimension_numbers = #tpu.dot_dimension_numbers<[1], [0], [0], [1], [0, 0, 1, 1], [], []>} : vector<8x8xf32>, vector<8x8xf32>, vector<8x8xf32> -> vector<8x8xf32>
    %cst_94 = arith.constant dense<0.000000e+00> : vector<8xf32>
    %190 = vector.multi_reduction <add>, %188, %cst_94 [1] : vector<8x8xf32> to vector<8xf32>
    %191 = vector.shape_cast %190 : vector<8xf32> to vector<8x1xf32>
    %192 = tpu.reciprocal %191 {approx = true} : vector<8x1xf32> -> vector<8x1xf32>
    %193 = vector.broadcast %192 : vector<8x1xf32> to vector<8x8xf32>
    %194 = arith.mulf %189, %193 : vector<8x8xf32>
    %195 = vector.extract_strided_slice %164 {offsets = [0, 16], sizes = [8, 8], strides = [1, 1]} : vector<8x96xf32> to vector<8x8xf32>
    %196 = vector.extract_strided_slice %164 {offsets = [0, 48], sizes = [8, 8], strides = [1, 1]} : vector<8x96xf32> to vector<8x8xf32>
    %197 = vector.extract_strided_slice %164 {offsets = [0, 80], sizes = [8, 8], strides = [1, 1]} : vector<8x96xf32> to vector<8x8xf32>
    %cst_95 = arith.constant dense<0.000000e+00> : vector<8x8xf32>
    %198 = tpu.matmul %195, %196, %cst_95 {dimension_numbers = #tpu.dot_dimension_numbers<[1], [1], [0], [0], [0, 0, 1, 0], [], []>} : vector<8x8xf32>, vector<8x8xf32>, vector<8x8xf32> -> vector<8x8xf32>
    %cst_96 = arith.constant dense<0xFF800000> : vector<8xf32>
    %199 = vector.multi_reduction <maximumf>, %198, %cst_96 [1] : vector<8x8xf32> to vector<8xf32>
    %200 = vector.shape_cast %199 : vector<8xf32> to vector<8x1xf32>
    %201 = vector.broadcast %200 : vector<8x1xf32> to vector<8x8xf32>
    %202 = arith.subf %198, %201 : vector<8x8xf32>
    %203 = math.exp %202 : vector<8x8xf32>
    %cst_97 = arith.constant dense<0.000000e+00> : vector<8x8xf32>
    %204 = tpu.matmul %203, %197, %cst_97 {dimension_numbers = #tpu.dot_dimension_numbers<[1], [0], [0], [1], [0, 0, 1, 1], [], []>} : vector<8x8xf32>, vector<8x8xf32>, vector<8x8xf32> -> vector<8x8xf32>
    %cst_98 = arith.constant dense<0.000000e+00> : vector<8xf32>
    %205 = vector.multi_reduction <add>, %203, %cst_98 [1] : vector<8x8xf32> to vector<8xf32>
    %206 = vector.shape_cast %205 : vector<8xf32> to vector<8x1xf32>
    %207 = tpu.reciprocal %206 {approx = true} : vector<8x1xf32> -> vector<8x1xf32>
    %208 = vector.broadcast %207 : vector<8x1xf32> to vector<8x8xf32>
    %209 = arith.mulf %204, %208 : vector<8x8xf32>
    %210 = vector.extract_strided_slice %164 {offsets = [0, 24], sizes = [8, 8], strides = [1, 1]} : vector<8x96xf32> to vector<8x8xf32>
    %211 = vector.extract_strided_slice %164 {offsets = [0, 56], sizes = [8, 8], strides = [1, 1]} : vector<8x96xf32> to vector<8x8xf32>
    %212 = vector.extract_strided_slice %164 {offsets = [0, 88], sizes = [8, 8], strides = [1, 1]} : vector<8x96xf32> to vector<8x8xf32>
    %cst_99 = arith.constant dense<0.000000e+00> : vector<8x8xf32>
    %213 = tpu.matmul %210, %211, %cst_99 {dimension_numbers = #tpu.dot_dimension_numbers<[1], [1], [0], [0], [0, 0, 1, 0], [], []>} : vector<8x8xf32>, vector<8x8xf32>, vector<8x8xf32> -> vector<8x8xf32>
    %cst_100 = arith.constant dense<0xFF800000> : vector<8xf32>
    %214 = vector.multi_reduction <maximumf>, %213, %cst_100 [1] : vector<8x8xf32> to vector<8xf32>
    %215 = vector.shape_cast %214 : vector<8xf32> to vector<8x1xf32>
    %216 = vector.broadcast %215 : vector<8x1xf32> to vector<8x8xf32>
    %217 = arith.subf %213, %216 : vector<8x8xf32>
    %218 = math.exp %217 : vector<8x8xf32>
    %cst_101 = arith.constant dense<0.000000e+00> : vector<8x8xf32>
    %219 = tpu.matmul %218, %212, %cst_101 {dimension_numbers = #tpu.dot_dimension_numbers<[1], [0], [0], [1], [0, 0, 1, 1], [], []>} : vector<8x8xf32>, vector<8x8xf32>, vector<8x8xf32> -> vector<8x8xf32>
    %cst_102 = arith.constant dense<0.000000e+00> : vector<8xf32>
    %220 = vector.multi_reduction <add>, %218, %cst_102 [1] : vector<8x8xf32> to vector<8xf32>
    %221 = vector.shape_cast %220 : vector<8xf32> to vector<8x1xf32>
    %222 = tpu.reciprocal %221 {approx = true} : vector<8x1xf32> -> vector<8x1xf32>
    %223 = vector.broadcast %222 : vector<8x1xf32> to vector<8x8xf32>
    %224 = arith.mulf %219, %223 : vector<8x8xf32>
    %225 = tpu.concatenate %179, %194, %209, %224 in 1 : vector<8x8xf32>, vector<8x8xf32>, vector<8x8xf32>, vector<8x8xf32> -> vector<8x32xf32>
    %cst_103 = arith.constant dense<0.000000e+00> : vector<8x32xf32>
    %226 = tpu.matmul %225, %159, %cst_103 {dimension_numbers = #tpu.dot_dimension_numbers<[1], [0], [0], [1], [0, 0, 1, 1], [], []>} : vector<8x32xf32>, vector<32x32xf32>, vector<8x32xf32> -> vector<8x32xf32>
    %227 = vector.broadcast %161 : vector<1x32xf32> to vector<8x32xf32>
    %228 = arith.addf %226, %227 : vector<8x32xf32>
    %229 = arith.addf %153, %228 : vector<8x32xf32>
    %c1_104 = arith.constant 1 : index
    %c0_105 = arith.constant 0 : index
    %c0_106 = arith.constant 0 : index
    %230 = vector.load %arg11[%c1_104, %c0_105, %c0_106] : memref<2x1x32xf32, #tpu.memory_space<vmem>>, vector<1x1x32xf32>
    %231 = vector.shape_cast %230 : vector<1x1x32xf32> to vector<1x32xf32>
    %c1_107 = arith.constant 1 : index
    %c0_108 = arith.constant 0 : index
    %c0_109 = arith.constant 0 : index
    %232 = vector.load %arg12[%c1_107, %c0_108, %c0_109] : memref<2x1x32xf32, #tpu.memory_space<vmem>>, vector<1x1x32xf32>
    %233 = vector.shape_cast %232 : vector<1x1x32xf32> to vector<1x32xf32>
    %cst_110 = arith.constant dense<0.000000e+00> : vector<8xf32>
    %234 = vector.multi_reduction <add>, %229, %cst_110 [1] : vector<8x32xf32> to vector<8xf32>
    %235 = vector.shape_cast %234 : vector<8xf32> to vector<8x1xf32>
    %cst_111 = arith.constant 3.200000e+01 : f32
    %236 = vector.broadcast %cst_111 : f32 to vector<8x1xf32>
    %237 = arith.divf %235, %236 : vector<8x1xf32>
    %238 = vector.broadcast %237 : vector<8x1xf32> to vector<8x32xf32>
    %239 = arith.subf %229, %238 : vector<8x32xf32>
    %240 = arith.mulf %239, %239 : vector<8x32xf32>
    %cst_112 = arith.constant dense<0.000000e+00> : vector<8xf32>
    %241 = vector.multi_reduction <add>, %240, %cst_112 [1] : vector<8x32xf32> to vector<8xf32>
    %242 = vector.shape_cast %241 : vector<8xf32> to vector<8x1xf32>
    %cst_113 = arith.constant 3.200000e+01 : f32
    %243 = vector.broadcast %cst_113 : f32 to vector<8x1xf32>
    %244 = arith.divf %242, %243 : vector<8x1xf32>
    %245 = vector.broadcast %237 : vector<8x1xf32> to vector<8x32xf32>
    %246 = arith.subf %229, %245 : vector<8x32xf32>
    %cst_114 = arith.constant 9.99999974E-6 : f32
    %247 = vector.broadcast %cst_114 : f32 to vector<8x1xf32>
    %248 = arith.addf %244, %247 : vector<8x1xf32>
    %249 = math.rsqrt %248 : vector<8x1xf32>
    %250 = vector.broadcast %249 : vector<8x1xf32> to vector<8x32xf32>
    %251 = arith.mulf %246, %250 : vector<8x32xf32>
    %252 = vector.broadcast %231 : vector<1x32xf32> to vector<8x32xf32>
    %253 = arith.mulf %251, %252 : vector<8x32xf32>
    %254 = vector.broadcast %233 : vector<1x32xf32> to vector<8x32xf32>
    %255 = arith.addf %253, %254 : vector<8x32xf32>
    %c1_115 = arith.constant 1 : index
    %c0_116 = arith.constant 0 : index
    %c0_117 = arith.constant 0 : index
    %256 = vector.load %arg13[%c1_115, %c0_116, %c0_117] : memref<2x32x512xf32, #tpu.memory_space<vmem>>, vector<1x32x512xf32>
    %257 = vector.shape_cast %256 : vector<1x32x512xf32> to vector<32x512xf32>
    %cst_118 = arith.constant dense<0.000000e+00> : vector<8x512xf32>
    %258 = tpu.matmul %255, %257, %cst_118 {dimension_numbers = #tpu.dot_dimension_numbers<[1], [0], [0], [1], [0, 0, 1, 1], [], []>} : vector<8x32xf32>, vector<32x512xf32>, vector<8x512xf32> -> vector<8x512xf32>
    %c1_119 = arith.constant 1 : index
    %c0_120 = arith.constant 0 : index
    %c0_121 = arith.constant 0 : index
    %259 = vector.load %arg14[%c1_119, %c0_120, %c0_121] : memref<2x1x512xf32, #tpu.memory_space<vmem>>, vector<1x1x512xf32>
    %260 = vector.shape_cast %259 : vector<1x1x512xf32> to vector<1x512xf32>
    %261 = vector.broadcast %260 : vector<1x512xf32> to vector<8x512xf32>
    %262 = arith.addf %258, %261 : vector<8x512xf32>
    %cst_122 = arith.constant 0.000000e+00 : f32
    %263 = vector.broadcast %cst_122 : f32 to vector<8x512xf32>
    %264 = arith.maximumf %262, %263 : vector<8x512xf32>
    %c1_123 = arith.constant 1 : index
    %c0_124 = arith.constant 0 : index
    %c0_125 = arith.constant 0 : index
    %265 = vector.load %arg15[%c1_123, %c0_124, %c0_125] : memref<2x512x32xf32, #tpu.memory_space<vmem>>, vector<1x512x32xf32>
    %266 = vector.shape_cast %265 : vector<1x512x32xf32> to vector<512x32xf32>
    %cst_126 = arith.constant dense<0.000000e+00> : vector<8x32xf32>
    %267 = tpu.matmul %264, %266, %cst_126 {dimension_numbers = #tpu.dot_dimension_numbers<[1], [0], [0], [1], [0, 0, 1, 1], [], []>} : vector<8x512xf32>, vector<512x32xf32>, vector<8x32xf32> -> vector<8x32xf32>
    %c1_127 = arith.constant 1 : index
    %c0_128 = arith.constant 0 : index
    %c0_129 = arith.constant 0 : index
    %268 = vector.load %arg16[%c1_127, %c0_128, %c0_129] : memref<2x1x32xf32, #tpu.memory_space<vmem>>, vector<1x1x32xf32>
    %269 = vector.shape_cast %268 : vector<1x1x32xf32> to vector<1x32xf32>
    %270 = vector.broadcast %269 : vector<1x32xf32> to vector<8x32xf32>
    %271 = arith.addf %267, %270 : vector<8x32xf32>
    %272 = arith.addf %255, %271 : vector<8x32xf32>
    %c1_130 = arith.constant 1 : index
    %c0_131 = arith.constant 0 : index
    %c0_132 = arith.constant 0 : index
    %273 = vector.load %arg17[%c1_130, %c0_131, %c0_132] : memref<2x1x32xf32, #tpu.memory_space<vmem>>, vector<1x1x32xf32>
    %274 = vector.shape_cast %273 : vector<1x1x32xf32> to vector<1x32xf32>
    %c1_133 = arith.constant 1 : index
    %c0_134 = arith.constant 0 : index
    %c0_135 = arith.constant 0 : index
    %275 = vector.load %arg18[%c1_133, %c0_134, %c0_135] : memref<2x1x32xf32, #tpu.memory_space<vmem>>, vector<1x1x32xf32>
    %276 = vector.shape_cast %275 : vector<1x1x32xf32> to vector<1x32xf32>
    %cst_136 = arith.constant dense<0.000000e+00> : vector<8xf32>
    %277 = vector.multi_reduction <add>, %272, %cst_136 [1] : vector<8x32xf32> to vector<8xf32>
    %278 = vector.shape_cast %277 : vector<8xf32> to vector<8x1xf32>
    %cst_137 = arith.constant 3.200000e+01 : f32
    %279 = vector.broadcast %cst_137 : f32 to vector<8x1xf32>
    %280 = arith.divf %278, %279 : vector<8x1xf32>
    %281 = vector.broadcast %280 : vector<8x1xf32> to vector<8x32xf32>
    %282 = arith.subf %272, %281 : vector<8x32xf32>
    %283 = arith.mulf %282, %282 : vector<8x32xf32>
    %cst_138 = arith.constant dense<0.000000e+00> : vector<8xf32>
    %284 = vector.multi_reduction <add>, %283, %cst_138 [1] : vector<8x32xf32> to vector<8xf32>
    %285 = vector.shape_cast %284 : vector<8xf32> to vector<8x1xf32>
    %cst_139 = arith.constant 3.200000e+01 : f32
    %286 = vector.broadcast %cst_139 : f32 to vector<8x1xf32>
    %287 = arith.divf %285, %286 : vector<8x1xf32>
    %288 = vector.broadcast %280 : vector<8x1xf32> to vector<8x32xf32>
    %289 = arith.subf %272, %288 : vector<8x32xf32>
    %cst_140 = arith.constant 9.99999974E-6 : f32
    %290 = vector.broadcast %cst_140 : f32 to vector<8x1xf32>
    %291 = arith.addf %287, %290 : vector<8x1xf32>
    %292 = math.rsqrt %291 : vector<8x1xf32>
    %293 = vector.broadcast %292 : vector<8x1xf32> to vector<8x32xf32>
    %294 = arith.mulf %289, %293 : vector<8x32xf32>
    %295 = vector.broadcast %274 : vector<1x32xf32> to vector<8x32xf32>
    %296 = arith.mulf %294, %295 : vector<8x32xf32>
    %297 = vector.broadcast %276 : vector<1x32xf32> to vector<8x32xf32>
    %298 = arith.addf %296, %297 : vector<8x32xf32>
    %c0_141 = arith.constant 0 : index
    %c0_142 = arith.constant 0 : index
    %c0_143 = arith.constant 0 : index
    %299 = vector.load %arg2[%c0_141, %c0_142, %c0_143] : memref<1x12x6xf32, #tpu.memory_space<vmem>>, vector<1x12x6xf32>
    %300 = vector.shape_cast %299 : vector<1x12x6xf32> to vector<12x6xf32>
    %c0_144 = arith.constant 0 : index
    %c0_145 = arith.constant 0 : index
    %301 = vector.load %arg19[%c0_144, %c0_145] : memref<6x32xf32, #tpu.memory_space<vmem>>, vector<6x32xf32>
    %cst_146 = arith.constant dense<0.000000e+00> : vector<12x32xf32>
    %302 = tpu.matmul %300, %301, %cst_146 {dimension_numbers = #tpu.dot_dimension_numbers<[1], [0], [0], [1], [0, 0, 1, 1], [], []>} : vector<12x6xf32>, vector<6x32xf32>, vector<12x32xf32> -> vector<12x32xf32>
    %c0_147 = arith.constant 0 : index
    %c0_148 = arith.constant 0 : index
    %303 = vector.load %arg20[%c0_147, %c0_148] : memref<1x32xf32, #tpu.memory_space<vmem>>, vector<1x32xf32>
    %304 = vector.broadcast %303 : vector<1x32xf32> to vector<12x32xf32>
    %305 = arith.addf %302, %304 : vector<12x32xf32>
    %c0_149 = arith.constant 0 : index
    %c0_150 = arith.constant 0 : index
    %306 = vector.load %arg4[%c0_149, %c0_150] : memref<12x32xf32, #tpu.memory_space<vmem>>, vector<12x32xf32>
    %307 = arith.addf %305, %306 : vector<12x32xf32>
    %c0_151 = arith.constant 0 : index
    %c0_152 = arith.constant 0 : index
    %c0_153 = arith.constant 0 : index
    %308 = vector.load %arg21[%c0_151, %c0_152, %c0_153] : memref<2x32x96xf32, #tpu.memory_space<vmem>>, vector<1x32x96xf32>
    %309 = vector.shape_cast %308 : vector<1x32x96xf32> to vector<32x96xf32>
    %c0_154 = arith.constant 0 : index
    %c0_155 = arith.constant 0 : index
    %c0_156 = arith.constant 0 : index
    %310 = vector.load %arg22[%c0_154, %c0_155, %c0_156] : memref<2x1x96xf32, #tpu.memory_space<vmem>>, vector<1x1x96xf32>
    %311 = vector.shape_cast %310 : vector<1x1x96xf32> to vector<1x96xf32>
    %c0_157 = arith.constant 0 : index
    %c0_158 = arith.constant 0 : index
    %c0_159 = arith.constant 0 : index
    %312 = vector.load %arg23[%c0_157, %c0_158, %c0_159] : memref<2x32x32xf32, #tpu.memory_space<vmem>>, vector<1x32x32xf32>
    %313 = vector.shape_cast %312 : vector<1x32x32xf32> to vector<32x32xf32>
    %c0_160 = arith.constant 0 : index
    %c0_161 = arith.constant 0 : index
    %c0_162 = arith.constant 0 : index
    %314 = vector.load %arg24[%c0_160, %c0_161, %c0_162] : memref<2x1x32xf32, #tpu.memory_space<vmem>>, vector<1x1x32xf32>
    %315 = vector.shape_cast %314 : vector<1x1x32xf32> to vector<1x32xf32>
    %cst_163 = arith.constant dense<0.000000e+00> : vector<12x96xf32>
    %316 = tpu.matmul %307, %309, %cst_163 {dimension_numbers = #tpu.dot_dimension_numbers<[1], [0], [0], [1], [0, 0, 1, 1], [], []>} : vector<12x32xf32>, vector<32x96xf32>, vector<12x96xf32> -> vector<12x96xf32>
    %317 = vector.broadcast %311 : vector<1x96xf32> to vector<12x96xf32>
    %318 = arith.addf %316, %317 : vector<12x96xf32>
    %319 = vector.extract_strided_slice %318 {offsets = [0, 0], sizes = [12, 8], strides = [1, 1]} : vector<12x96xf32> to vector<12x8xf32>
    %320 = vector.extract_strided_slice %318 {offsets = [0, 32], sizes = [12, 8], strides = [1, 1]} : vector<12x96xf32> to vector<12x8xf32>
    %321 = vector.extract_strided_slice %318 {offsets = [0, 64], sizes = [12, 8], strides = [1, 1]} : vector<12x96xf32> to vector<12x8xf32>
    %cst_164 = arith.constant dense<0.000000e+00> : vector<12x12xf32>
    %322 = tpu.matmul %319, %320, %cst_164 {dimension_numbers = #tpu.dot_dimension_numbers<[1], [1], [0], [0], [0, 0, 1, 0], [], []>} : vector<12x8xf32>, vector<12x8xf32>, vector<12x12xf32> -> vector<12x12xf32>
    %cst_165 = arith.constant dense<0xFF800000> : vector<12xf32>
    %323 = vector.multi_reduction <maximumf>, %322, %cst_165 [1] : vector<12x12xf32> to vector<12xf32>
    %324 = vector.shape_cast %323 : vector<12xf32> to vector<12x1xf32>
    %325 = vector.broadcast %324 : vector<12x1xf32> to vector<12x12xf32>
    %326 = arith.subf %322, %325 : vector<12x12xf32>
    %327 = math.exp %326 : vector<12x12xf32>
    %cst_166 = arith.constant dense<0.000000e+00> : vector<12x8xf32>
    %328 = tpu.matmul %327, %321, %cst_166 {dimension_numbers = #tpu.dot_dimension_numbers<[1], [0], [0], [1], [0, 0, 1, 1], [], []>} : vector<12x12xf32>, vector<12x8xf32>, vector<12x8xf32> -> vector<12x8xf32>
    %cst_167 = arith.constant dense<0.000000e+00> : vector<12xf32>
    %329 = vector.multi_reduction <add>, %327, %cst_167 [1] : vector<12x12xf32> to vector<12xf32>
    %330 = vector.shape_cast %329 : vector<12xf32> to vector<12x1xf32>
    %331 = tpu.reciprocal %330 {approx = true} : vector<12x1xf32> -> vector<12x1xf32>
    %332 = vector.broadcast %331 : vector<12x1xf32> to vector<12x8xf32>
    %333 = arith.mulf %328, %332 : vector<12x8xf32>
    %334 = vector.extract_strided_slice %318 {offsets = [0, 8], sizes = [12, 8], strides = [1, 1]} : vector<12x96xf32> to vector<12x8xf32>
    %335 = vector.extract_strided_slice %318 {offsets = [0, 40], sizes = [12, 8], strides = [1, 1]} : vector<12x96xf32> to vector<12x8xf32>
    %336 = vector.extract_strided_slice %318 {offsets = [0, 72], sizes = [12, 8], strides = [1, 1]} : vector<12x96xf32> to vector<12x8xf32>
    %cst_168 = arith.constant dense<0.000000e+00> : vector<12x12xf32>
    %337 = tpu.matmul %334, %335, %cst_168 {dimension_numbers = #tpu.dot_dimension_numbers<[1], [1], [0], [0], [0, 0, 1, 0], [], []>} : vector<12x8xf32>, vector<12x8xf32>, vector<12x12xf32> -> vector<12x12xf32>
    %cst_169 = arith.constant dense<0xFF800000> : vector<12xf32>
    %338 = vector.multi_reduction <maximumf>, %337, %cst_169 [1] : vector<12x12xf32> to vector<12xf32>
    %339 = vector.shape_cast %338 : vector<12xf32> to vector<12x1xf32>
    %340 = vector.broadcast %339 : vector<12x1xf32> to vector<12x12xf32>
    %341 = arith.subf %337, %340 : vector<12x12xf32>
    %342 = math.exp %341 : vector<12x12xf32>
    %cst_170 = arith.constant dense<0.000000e+00> : vector<12x8xf32>
    %343 = tpu.matmul %342, %336, %cst_170 {dimension_numbers = #tpu.dot_dimension_numbers<[1], [0], [0], [1], [0, 0, 1, 1], [], []>} : vector<12x12xf32>, vector<12x8xf32>, vector<12x8xf32> -> vector<12x8xf32>
    %cst_171 = arith.constant dense<0.000000e+00> : vector<12xf32>
    %344 = vector.multi_reduction <add>, %342, %cst_171 [1] : vector<12x12xf32> to vector<12xf32>
    %345 = vector.shape_cast %344 : vector<12xf32> to vector<12x1xf32>
    %346 = tpu.reciprocal %345 {approx = true} : vector<12x1xf32> -> vector<12x1xf32>
    %347 = vector.broadcast %346 : vector<12x1xf32> to vector<12x8xf32>
    %348 = arith.mulf %343, %347 : vector<12x8xf32>
    %349 = vector.extract_strided_slice %318 {offsets = [0, 16], sizes = [12, 8], strides = [1, 1]} : vector<12x96xf32> to vector<12x8xf32>
    %350 = vector.extract_strided_slice %318 {offsets = [0, 48], sizes = [12, 8], strides = [1, 1]} : vector<12x96xf32> to vector<12x8xf32>
    %351 = vector.extract_strided_slice %318 {offsets = [0, 80], sizes = [12, 8], strides = [1, 1]} : vector<12x96xf32> to vector<12x8xf32>
    %cst_172 = arith.constant dense<0.000000e+00> : vector<12x12xf32>
    %352 = tpu.matmul %349, %350, %cst_172 {dimension_numbers = #tpu.dot_dimension_numbers<[1], [1], [0], [0], [0, 0, 1, 0], [], []>} : vector<12x8xf32>, vector<12x8xf32>, vector<12x12xf32> -> vector<12x12xf32>
    %cst_173 = arith.constant dense<0xFF800000> : vector<12xf32>
    %353 = vector.multi_reduction <maximumf>, %352, %cst_173 [1] : vector<12x12xf32> to vector<12xf32>
    %354 = vector.shape_cast %353 : vector<12xf32> to vector<12x1xf32>
    %355 = vector.broadcast %354 : vector<12x1xf32> to vector<12x12xf32>
    %356 = arith.subf %352, %355 : vector<12x12xf32>
    %357 = math.exp %356 : vector<12x12xf32>
    %cst_174 = arith.constant dense<0.000000e+00> : vector<12x8xf32>
    %358 = tpu.matmul %357, %351, %cst_174 {dimension_numbers = #tpu.dot_dimension_numbers<[1], [0], [0], [1], [0, 0, 1, 1], [], []>} : vector<12x12xf32>, vector<12x8xf32>, vector<12x8xf32> -> vector<12x8xf32>
    %cst_175 = arith.constant dense<0.000000e+00> : vector<12xf32>
    %359 = vector.multi_reduction <add>, %357, %cst_175 [1] : vector<12x12xf32> to vector<12xf32>
    %360 = vector.shape_cast %359 : vector<12xf32> to vector<12x1xf32>
    %361 = tpu.reciprocal %360 {approx = true} : vector<12x1xf32> -> vector<12x1xf32>
    %362 = vector.broadcast %361 : vector<12x1xf32> to vector<12x8xf32>
    %363 = arith.mulf %358, %362 : vector<12x8xf32>
    %364 = vector.extract_strided_slice %318 {offsets = [0, 24], sizes = [12, 8], strides = [1, 1]} : vector<12x96xf32> to vector<12x8xf32>
    %365 = vector.extract_strided_slice %318 {offsets = [0, 56], sizes = [12, 8], strides = [1, 1]} : vector<12x96xf32> to vector<12x8xf32>
    %366 = vector.extract_strided_slice %318 {offsets = [0, 88], sizes = [12, 8], strides = [1, 1]} : vector<12x96xf32> to vector<12x8xf32>
    %cst_176 = arith.constant dense<0.000000e+00> : vector<12x12xf32>
    %367 = tpu.matmul %364, %365, %cst_176 {dimension_numbers = #tpu.dot_dimension_numbers<[1], [1], [0], [0], [0, 0, 1, 0], [], []>} : vector<12x8xf32>, vector<12x8xf32>, vector<12x12xf32> -> vector<12x12xf32>
    %cst_177 = arith.constant dense<0xFF800000> : vector<12xf32>
    %368 = vector.multi_reduction <maximumf>, %367, %cst_177 [1] : vector<12x12xf32> to vector<12xf32>
    %369 = vector.shape_cast %368 : vector<12xf32> to vector<12x1xf32>
    %370 = vector.broadcast %369 : vector<12x1xf32> to vector<12x12xf32>
    %371 = arith.subf %367, %370 : vector<12x12xf32>
    %372 = math.exp %371 : vector<12x12xf32>
    %cst_178 = arith.constant dense<0.000000e+00> : vector<12x8xf32>
    %373 = tpu.matmul %372, %366, %cst_178 {dimension_numbers = #tpu.dot_dimension_numbers<[1], [0], [0], [1], [0, 0, 1, 1], [], []>} : vector<12x12xf32>, vector<12x8xf32>, vector<12x8xf32> -> vector<12x8xf32>
    %cst_179 = arith.constant dense<0.000000e+00> : vector<12xf32>
    %374 = vector.multi_reduction <add>, %372, %cst_179 [1] : vector<12x12xf32> to vector<12xf32>
    %375 = vector.shape_cast %374 : vector<12xf32> to vector<12x1xf32>
    %376 = tpu.reciprocal %375 {approx = true} : vector<12x1xf32> -> vector<12x1xf32>
    %377 = vector.broadcast %376 : vector<12x1xf32> to vector<12x8xf32>
    %378 = arith.mulf %373, %377 : vector<12x8xf32>
    %379 = tpu.concatenate %333, %348, %363, %378 in 1 : vector<12x8xf32>, vector<12x8xf32>, vector<12x8xf32>, vector<12x8xf32> -> vector<12x32xf32>
    %cst_180 = arith.constant dense<0.000000e+00> : vector<12x32xf32>
    %380 = tpu.matmul %379, %313, %cst_180 {dimension_numbers = #tpu.dot_dimension_numbers<[1], [0], [0], [1], [0, 0, 1, 1], [], []>} : vector<12x32xf32>, vector<32x32xf32>, vector<12x32xf32> -> vector<12x32xf32>
    %381 = vector.broadcast %315 : vector<1x32xf32> to vector<12x32xf32>
    %382 = arith.addf %380, %381 : vector<12x32xf32>
    %383 = arith.addf %307, %382 : vector<12x32xf32>
    %c0_181 = arith.constant 0 : index
    %c0_182 = arith.constant 0 : index
    %c0_183 = arith.constant 0 : index
    %384 = vector.load %arg25[%c0_181, %c0_182, %c0_183] : memref<2x1x32xf32, #tpu.memory_space<vmem>>, vector<1x1x32xf32>
    %385 = vector.shape_cast %384 : vector<1x1x32xf32> to vector<1x32xf32>
    %c0_184 = arith.constant 0 : index
    %c0_185 = arith.constant 0 : index
    %c0_186 = arith.constant 0 : index
    %386 = vector.load %arg26[%c0_184, %c0_185, %c0_186] : memref<2x1x32xf32, #tpu.memory_space<vmem>>, vector<1x1x32xf32>
    %387 = vector.shape_cast %386 : vector<1x1x32xf32> to vector<1x32xf32>
    %cst_187 = arith.constant dense<0.000000e+00> : vector<12xf32>
    %388 = vector.multi_reduction <add>, %383, %cst_187 [1] : vector<12x32xf32> to vector<12xf32>
    %389 = vector.shape_cast %388 : vector<12xf32> to vector<12x1xf32>
    %cst_188 = arith.constant 3.200000e+01 : f32
    %390 = vector.broadcast %cst_188 : f32 to vector<12x1xf32>
    %391 = arith.divf %389, %390 : vector<12x1xf32>
    %392 = vector.broadcast %391 : vector<12x1xf32> to vector<12x32xf32>
    %393 = arith.subf %383, %392 : vector<12x32xf32>
    %394 = arith.mulf %393, %393 : vector<12x32xf32>
    %cst_189 = arith.constant dense<0.000000e+00> : vector<12xf32>
    %395 = vector.multi_reduction <add>, %394, %cst_189 [1] : vector<12x32xf32> to vector<12xf32>
    %396 = vector.shape_cast %395 : vector<12xf32> to vector<12x1xf32>
    %cst_190 = arith.constant 3.200000e+01 : f32
    %397 = vector.broadcast %cst_190 : f32 to vector<12x1xf32>
    %398 = arith.divf %396, %397 : vector<12x1xf32>
    %399 = vector.broadcast %391 : vector<12x1xf32> to vector<12x32xf32>
    %400 = arith.subf %383, %399 : vector<12x32xf32>
    %cst_191 = arith.constant 9.99999974E-6 : f32
    %401 = vector.broadcast %cst_191 : f32 to vector<12x1xf32>
    %402 = arith.addf %398, %401 : vector<12x1xf32>
    %403 = math.rsqrt %402 : vector<12x1xf32>
    %404 = vector.broadcast %403 : vector<12x1xf32> to vector<12x32xf32>
    %405 = arith.mulf %400, %404 : vector<12x32xf32>
    %406 = vector.broadcast %385 : vector<1x32xf32> to vector<12x32xf32>
    %407 = arith.mulf %405, %406 : vector<12x32xf32>
    %408 = vector.broadcast %387 : vector<1x32xf32> to vector<12x32xf32>
    %409 = arith.addf %407, %408 : vector<12x32xf32>
    %c0_192 = arith.constant 0 : index
    %c0_193 = arith.constant 0 : index
    %c0_194 = arith.constant 0 : index
    %410 = vector.load %arg27[%c0_192, %c0_193, %c0_194] : memref<2x32x96xf32, #tpu.memory_space<vmem>>, vector<1x32x96xf32>
    %411 = vector.shape_cast %410 : vector<1x32x96xf32> to vector<32x96xf32>
    %c0_195 = arith.constant 0 : index
    %c0_196 = arith.constant 0 : index
    %c0_197 = arith.constant 0 : index
    %412 = vector.load %arg28[%c0_195, %c0_196, %c0_197] : memref<2x1x96xf32, #tpu.memory_space<vmem>>, vector<1x1x96xf32>
    %413 = vector.shape_cast %412 : vector<1x1x96xf32> to vector<1x96xf32>
    %c0_198 = arith.constant 0 : index
    %c0_199 = arith.constant 0 : index
    %c0_200 = arith.constant 0 : index
    %414 = vector.load %arg29[%c0_198, %c0_199, %c0_200] : memref<2x32x32xf32, #tpu.memory_space<vmem>>, vector<1x32x32xf32>
    %415 = vector.shape_cast %414 : vector<1x32x32xf32> to vector<32x32xf32>
    %c0_201 = arith.constant 0 : index
    %c0_202 = arith.constant 0 : index
    %c0_203 = arith.constant 0 : index
    %416 = vector.load %arg30[%c0_201, %c0_202, %c0_203] : memref<2x1x32xf32, #tpu.memory_space<vmem>>, vector<1x1x32xf32>
    %417 = vector.shape_cast %416 : vector<1x1x32xf32> to vector<1x32xf32>
    %418 = vector.extract_strided_slice %411 {offsets = [0, 0], sizes = [32, 32], strides = [1, 1]} : vector<32x96xf32> to vector<32x32xf32>
    %cst_204 = arith.constant dense<0.000000e+00> : vector<12x32xf32>
    %419 = tpu.matmul %409, %418, %cst_204 {dimension_numbers = #tpu.dot_dimension_numbers<[1], [0], [0], [1], [0, 0, 1, 1], [], []>} : vector<12x32xf32>, vector<32x32xf32>, vector<12x32xf32> -> vector<12x32xf32>
    %420 = vector.extract_strided_slice %413 {offsets = [0, 0], sizes = [1, 32], strides = [1, 1]} : vector<1x96xf32> to vector<1x32xf32>
    %421 = vector.broadcast %420 : vector<1x32xf32> to vector<12x32xf32>
    %422 = arith.addf %419, %421 : vector<12x32xf32>
    %423 = vector.extract_strided_slice %411 {offsets = [0, 32], sizes = [32, 64], strides = [1, 1]} : vector<32x96xf32> to vector<32x64xf32>
    %cst_205 = arith.constant dense<0.000000e+00> : vector<8x64xf32>
    %424 = tpu.matmul %298, %423, %cst_205 {dimension_numbers = #tpu.dot_dimension_numbers<[1], [0], [0], [1], [0, 0, 1, 1], [], []>} : vector<8x32xf32>, vector<32x64xf32>, vector<8x64xf32> -> vector<8x64xf32>
    %425 = vector.extract_strided_slice %413 {offsets = [0, 32], sizes = [1, 64], strides = [1, 1]} : vector<1x96xf32> to vector<1x64xf32>
    %426 = vector.broadcast %425 : vector<1x64xf32> to vector<8x64xf32>
    %427 = arith.addf %424, %426 : vector<8x64xf32>
    %428 = vector.extract_strided_slice %422 {offsets = [0, 0], sizes = [12, 8], strides = [1, 1]} : vector<12x32xf32> to vector<12x8xf32>
    %429 = vector.extract_strided_slice %427 {offsets = [0, 0], sizes = [8, 8], strides = [1, 1]} : vector<8x64xf32> to vector<8x8xf32>
    %430 = vector.extract_strided_slice %427 {offsets = [0, 32], sizes = [8, 8], strides = [1, 1]} : vector<8x64xf32> to vector<8x8xf32>
    %cst_206 = arith.constant dense<0.000000e+00> : vector<12x8xf32>
    %431 = tpu.matmul %428, %429, %cst_206 {dimension_numbers = #tpu.dot_dimension_numbers<[1], [1], [0], [0], [0, 0, 1, 0], [], []>} : vector<12x8xf32>, vector<8x8xf32>, vector<12x8xf32> -> vector<12x8xf32>
    %cst_207 = arith.constant dense<0xFF800000> : vector<12xf32>
    %432 = vector.multi_reduction <maximumf>, %431, %cst_207 [1] : vector<12x8xf32> to vector<12xf32>
    %433 = vector.shape_cast %432 : vector<12xf32> to vector<12x1xf32>
    %434 = vector.broadcast %433 : vector<12x1xf32> to vector<12x8xf32>
    %435 = arith.subf %431, %434 : vector<12x8xf32>
    %436 = math.exp %435 : vector<12x8xf32>
    %cst_208 = arith.constant dense<0.000000e+00> : vector<12x8xf32>
    %437 = tpu.matmul %436, %430, %cst_208 {dimension_numbers = #tpu.dot_dimension_numbers<[1], [0], [0], [1], [0, 0, 1, 1], [], []>} : vector<12x8xf32>, vector<8x8xf32>, vector<12x8xf32> -> vector<12x8xf32>
    %cst_209 = arith.constant dense<0.000000e+00> : vector<12xf32>
    %438 = vector.multi_reduction <add>, %436, %cst_209 [1] : vector<12x8xf32> to vector<12xf32>
    %439 = vector.shape_cast %438 : vector<12xf32> to vector<12x1xf32>
    %440 = tpu.reciprocal %439 {approx = true} : vector<12x1xf32> -> vector<12x1xf32>
    %441 = vector.broadcast %440 : vector<12x1xf32> to vector<12x8xf32>
    %442 = arith.mulf %437, %441 : vector<12x8xf32>
    %443 = vector.extract_strided_slice %422 {offsets = [0, 8], sizes = [12, 8], strides = [1, 1]} : vector<12x32xf32> to vector<12x8xf32>
    %444 = vector.extract_strided_slice %427 {offsets = [0, 8], sizes = [8, 8], strides = [1, 1]} : vector<8x64xf32> to vector<8x8xf32>
    %445 = vector.extract_strided_slice %427 {offsets = [0, 40], sizes = [8, 8], strides = [1, 1]} : vector<8x64xf32> to vector<8x8xf32>
    %cst_210 = arith.constant dense<0.000000e+00> : vector<12x8xf32>
    %446 = tpu.matmul %443, %444, %cst_210 {dimension_numbers = #tpu.dot_dimension_numbers<[1], [1], [0], [0], [0, 0, 1, 0], [], []>} : vector<12x8xf32>, vector<8x8xf32>, vector<12x8xf32> -> vector<12x8xf32>
    %cst_211 = arith.constant dense<0xFF800000> : vector<12xf32>
    %447 = vector.multi_reduction <maximumf>, %446, %cst_211 [1] : vector<12x8xf32> to vector<12xf32>
    %448 = vector.shape_cast %447 : vector<12xf32> to vector<12x1xf32>
    %449 = vector.broadcast %448 : vector<12x1xf32> to vector<12x8xf32>
    %450 = arith.subf %446, %449 : vector<12x8xf32>
    %451 = math.exp %450 : vector<12x8xf32>
    %cst_212 = arith.constant dense<0.000000e+00> : vector<12x8xf32>
    %452 = tpu.matmul %451, %445, %cst_212 {dimension_numbers = #tpu.dot_dimension_numbers<[1], [0], [0], [1], [0, 0, 1, 1], [], []>} : vector<12x8xf32>, vector<8x8xf32>, vector<12x8xf32> -> vector<12x8xf32>
    %cst_213 = arith.constant dense<0.000000e+00> : vector<12xf32>
    %453 = vector.multi_reduction <add>, %451, %cst_213 [1] : vector<12x8xf32> to vector<12xf32>
    %454 = vector.shape_cast %453 : vector<12xf32> to vector<12x1xf32>
    %455 = tpu.reciprocal %454 {approx = true} : vector<12x1xf32> -> vector<12x1xf32>
    %456 = vector.broadcast %455 : vector<12x1xf32> to vector<12x8xf32>
    %457 = arith.mulf %452, %456 : vector<12x8xf32>
    %458 = vector.extract_strided_slice %422 {offsets = [0, 16], sizes = [12, 8], strides = [1, 1]} : vector<12x32xf32> to vector<12x8xf32>
    %459 = vector.extract_strided_slice %427 {offsets = [0, 16], sizes = [8, 8], strides = [1, 1]} : vector<8x64xf32> to vector<8x8xf32>
    %460 = vector.extract_strided_slice %427 {offsets = [0, 48], sizes = [8, 8], strides = [1, 1]} : vector<8x64xf32> to vector<8x8xf32>
    %cst_214 = arith.constant dense<0.000000e+00> : vector<12x8xf32>
    %461 = tpu.matmul %458, %459, %cst_214 {dimension_numbers = #tpu.dot_dimension_numbers<[1], [1], [0], [0], [0, 0, 1, 0], [], []>} : vector<12x8xf32>, vector<8x8xf32>, vector<12x8xf32> -> vector<12x8xf32>
    %cst_215 = arith.constant dense<0xFF800000> : vector<12xf32>
    %462 = vector.multi_reduction <maximumf>, %461, %cst_215 [1] : vector<12x8xf32> to vector<12xf32>
    %463 = vector.shape_cast %462 : vector<12xf32> to vector<12x1xf32>
    %464 = vector.broadcast %463 : vector<12x1xf32> to vector<12x8xf32>
    %465 = arith.subf %461, %464 : vector<12x8xf32>
    %466 = math.exp %465 : vector<12x8xf32>
    %cst_216 = arith.constant dense<0.000000e+00> : vector<12x8xf32>
    %467 = tpu.matmul %466, %460, %cst_216 {dimension_numbers = #tpu.dot_dimension_numbers<[1], [0], [0], [1], [0, 0, 1, 1], [], []>} : vector<12x8xf32>, vector<8x8xf32>, vector<12x8xf32> -> vector<12x8xf32>
    %cst_217 = arith.constant dense<0.000000e+00> : vector<12xf32>
    %468 = vector.multi_reduction <add>, %466, %cst_217 [1] : vector<12x8xf32> to vector<12xf32>
    %469 = vector.shape_cast %468 : vector<12xf32> to vector<12x1xf32>
    %470 = tpu.reciprocal %469 {approx = true} : vector<12x1xf32> -> vector<12x1xf32>
    %471 = vector.broadcast %470 : vector<12x1xf32> to vector<12x8xf32>
    %472 = arith.mulf %467, %471 : vector<12x8xf32>
    %473 = vector.extract_strided_slice %422 {offsets = [0, 24], sizes = [12, 8], strides = [1, 1]} : vector<12x32xf32> to vector<12x8xf32>
    %474 = vector.extract_strided_slice %427 {offsets = [0, 24], sizes = [8, 8], strides = [1, 1]} : vector<8x64xf32> to vector<8x8xf32>
    %475 = vector.extract_strided_slice %427 {offsets = [0, 56], sizes = [8, 8], strides = [1, 1]} : vector<8x64xf32> to vector<8x8xf32>
    %cst_218 = arith.constant dense<0.000000e+00> : vector<12x8xf32>
    %476 = tpu.matmul %473, %474, %cst_218 {dimension_numbers = #tpu.dot_dimension_numbers<[1], [1], [0], [0], [0, 0, 1, 0], [], []>} : vector<12x8xf32>, vector<8x8xf32>, vector<12x8xf32> -> vector<12x8xf32>
    %cst_219 = arith.constant dense<0xFF800000> : vector<12xf32>
    %477 = vector.multi_reduction <maximumf>, %476, %cst_219 [1] : vector<12x8xf32> to vector<12xf32>
    %478 = vector.shape_cast %477 : vector<12xf32> to vector<12x1xf32>
    %479 = vector.broadcast %478 : vector<12x1xf32> to vector<12x8xf32>
    %480 = arith.subf %476, %479 : vector<12x8xf32>
    %481 = math.exp %480 : vector<12x8xf32>
    %cst_220 = arith.constant dense<0.000000e+00> : vector<12x8xf32>
    %482 = tpu.matmul %481, %475, %cst_220 {dimension_numbers = #tpu.dot_dimension_numbers<[1], [0], [0], [1], [0, 0, 1, 1], [], []>} : vector<12x8xf32>, vector<8x8xf32>, vector<12x8xf32> -> vector<12x8xf32>
    %cst_221 = arith.constant dense<0.000000e+00> : vector<12xf32>
    %483 = vector.multi_reduction <add>, %481, %cst_221 [1] : vector<12x8xf32> to vector<12xf32>
    %484 = vector.shape_cast %483 : vector<12xf32> to vector<12x1xf32>
    %485 = tpu.reciprocal %484 {approx = true} : vector<12x1xf32> -> vector<12x1xf32>
    %486 = vector.broadcast %485 : vector<12x1xf32> to vector<12x8xf32>
    %487 = arith.mulf %482, %486 : vector<12x8xf32>
    %488 = tpu.concatenate %442, %457, %472, %487 in 1 : vector<12x8xf32>, vector<12x8xf32>, vector<12x8xf32>, vector<12x8xf32> -> vector<12x32xf32>
    %cst_222 = arith.constant dense<0.000000e+00> : vector<12x32xf32>
    %489 = tpu.matmul %488, %415, %cst_222 {dimension_numbers = #tpu.dot_dimension_numbers<[1], [0], [0], [1], [0, 0, 1, 1], [], []>} : vector<12x32xf32>, vector<32x32xf32>, vector<12x32xf32> -> vector<12x32xf32>
    %490 = vector.broadcast %417 : vector<1x32xf32> to vector<12x32xf32>
    %491 = arith.addf %489, %490 : vector<12x32xf32>
    %492 = arith.addf %409, %491 : vector<12x32xf32>
    %c0_223 = arith.constant 0 : index
    %c0_224 = arith.constant 0 : index
    %c0_225 = arith.constant 0 : index
    %493 = vector.load %arg31[%c0_223, %c0_224, %c0_225] : memref<2x1x32xf32, #tpu.memory_space<vmem>>, vector<1x1x32xf32>
    %494 = vector.shape_cast %493 : vector<1x1x32xf32> to vector<1x32xf32>
    %c0_226 = arith.constant 0 : index
    %c0_227 = arith.constant 0 : index
    %c0_228 = arith.constant 0 : index
    %495 = vector.load %arg32[%c0_226, %c0_227, %c0_228] : memref<2x1x32xf32, #tpu.memory_space<vmem>>, vector<1x1x32xf32>
    %496 = vector.shape_cast %495 : vector<1x1x32xf32> to vector<1x32xf32>
    %cst_229 = arith.constant dense<0.000000e+00> : vector<12xf32>
    %497 = vector.multi_reduction <add>, %492, %cst_229 [1] : vector<12x32xf32> to vector<12xf32>
    %498 = vector.shape_cast %497 : vector<12xf32> to vector<12x1xf32>
    %cst_230 = arith.constant 3.200000e+01 : f32
    %499 = vector.broadcast %cst_230 : f32 to vector<12x1xf32>
    %500 = arith.divf %498, %499 : vector<12x1xf32>
    %501 = vector.broadcast %500 : vector<12x1xf32> to vector<12x32xf32>
    %502 = arith.subf %492, %501 : vector<12x32xf32>
    %503 = arith.mulf %502, %502 : vector<12x32xf32>
    %cst_231 = arith.constant dense<0.000000e+00> : vector<12xf32>
    %504 = vector.multi_reduction <add>, %503, %cst_231 [1] : vector<12x32xf32> to vector<12xf32>
    %505 = vector.shape_cast %504 : vector<12xf32> to vector<12x1xf32>
    %cst_232 = arith.constant 3.200000e+01 : f32
    %506 = vector.broadcast %cst_232 : f32 to vector<12x1xf32>
    %507 = arith.divf %505, %506 : vector<12x1xf32>
    %508 = vector.broadcast %500 : vector<12x1xf32> to vector<12x32xf32>
    %509 = arith.subf %492, %508 : vector<12x32xf32>
    %cst_233 = arith.constant 9.99999974E-6 : f32
    %510 = vector.broadcast %cst_233 : f32 to vector<12x1xf32>
    %511 = arith.addf %507, %510 : vector<12x1xf32>
    %512 = math.rsqrt %511 : vector<12x1xf32>
    %513 = vector.broadcast %512 : vector<12x1xf32> to vector<12x32xf32>
    %514 = arith.mulf %509, %513 : vector<12x32xf32>
    %515 = vector.broadcast %494 : vector<1x32xf32> to vector<12x32xf32>
    %516 = arith.mulf %514, %515 : vector<12x32xf32>
    %517 = vector.broadcast %496 : vector<1x32xf32> to vector<12x32xf32>
    %518 = arith.addf %516, %517 : vector<12x32xf32>
    %c0_234 = arith.constant 0 : index
    %c0_235 = arith.constant 0 : index
    %c0_236 = arith.constant 0 : index
    %519 = vector.load %arg33[%c0_234, %c0_235, %c0_236] : memref<2x32x512xf32, #tpu.memory_space<vmem>>, vector<1x32x512xf32>
    %520 = vector.shape_cast %519 : vector<1x32x512xf32> to vector<32x512xf32>
    %cst_237 = arith.constant dense<0.000000e+00> : vector<12x512xf32>
    %521 = tpu.matmul %518, %520, %cst_237 {dimension_numbers = #tpu.dot_dimension_numbers<[1], [0], [0], [1], [0, 0, 1, 1], [], []>} : vector<12x32xf32>, vector<32x512xf32>, vector<12x512xf32> -> vector<12x512xf32>
    %c0_238 = arith.constant 0 : index
    %c0_239 = arith.constant 0 : index
    %c0_240 = arith.constant 0 : index
    %522 = vector.load %arg34[%c0_238, %c0_239, %c0_240] : memref<2x1x512xf32, #tpu.memory_space<vmem>>, vector<1x1x512xf32>
    %523 = vector.shape_cast %522 : vector<1x1x512xf32> to vector<1x512xf32>
    %524 = vector.broadcast %523 : vector<1x512xf32> to vector<12x512xf32>
    %525 = arith.addf %521, %524 : vector<12x512xf32>
    %cst_241 = arith.constant 0.000000e+00 : f32
    %526 = vector.broadcast %cst_241 : f32 to vector<12x512xf32>
    %527 = arith.maximumf %525, %526 : vector<12x512xf32>
    %c0_242 = arith.constant 0 : index
    %c0_243 = arith.constant 0 : index
    %c0_244 = arith.constant 0 : index
    %528 = vector.load %arg35[%c0_242, %c0_243, %c0_244] : memref<2x512x32xf32, #tpu.memory_space<vmem>>, vector<1x512x32xf32>
    %529 = vector.shape_cast %528 : vector<1x512x32xf32> to vector<512x32xf32>
    %cst_245 = arith.constant dense<0.000000e+00> : vector<12x32xf32>
    %530 = tpu.matmul %527, %529, %cst_245 {dimension_numbers = #tpu.dot_dimension_numbers<[1], [0], [0], [1], [0, 0, 1, 1], [], []>} : vector<12x512xf32>, vector<512x32xf32>, vector<12x32xf32> -> vector<12x32xf32>
    %c0_246 = arith.constant 0 : index
    %c0_247 = arith.constant 0 : index
    %c0_248 = arith.constant 0 : index
    %531 = vector.load %arg36[%c0_246, %c0_247, %c0_248] : memref<2x1x32xf32, #tpu.memory_space<vmem>>, vector<1x1x32xf32>
    %532 = vector.shape_cast %531 : vector<1x1x32xf32> to vector<1x32xf32>
    %533 = vector.broadcast %532 : vector<1x32xf32> to vector<12x32xf32>
    %534 = arith.addf %530, %533 : vector<12x32xf32>
    %535 = arith.addf %518, %534 : vector<12x32xf32>
    %c0_249 = arith.constant 0 : index
    %c0_250 = arith.constant 0 : index
    %c0_251 = arith.constant 0 : index
    %536 = vector.load %arg37[%c0_249, %c0_250, %c0_251] : memref<2x1x32xf32, #tpu.memory_space<vmem>>, vector<1x1x32xf32>
    %537 = vector.shape_cast %536 : vector<1x1x32xf32> to vector<1x32xf32>
    %c0_252 = arith.constant 0 : index
    %c0_253 = arith.constant 0 : index
    %c0_254 = arith.constant 0 : index
    %538 = vector.load %arg38[%c0_252, %c0_253, %c0_254] : memref<2x1x32xf32, #tpu.memory_space<vmem>>, vector<1x1x32xf32>
    %539 = vector.shape_cast %538 : vector<1x1x32xf32> to vector<1x32xf32>
    %cst_255 = arith.constant dense<0.000000e+00> : vector<12xf32>
    %540 = vector.multi_reduction <add>, %535, %cst_255 [1] : vector<12x32xf32> to vector<12xf32>
    %541 = vector.shape_cast %540 : vector<12xf32> to vector<12x1xf32>
    %cst_256 = arith.constant 3.200000e+01 : f32
    %542 = vector.broadcast %cst_256 : f32 to vector<12x1xf32>
    %543 = arith.divf %541, %542 : vector<12x1xf32>
    %544 = vector.broadcast %543 : vector<12x1xf32> to vector<12x32xf32>
    %545 = arith.subf %535, %544 : vector<12x32xf32>
    %546 = arith.mulf %545, %545 : vector<12x32xf32>
    %cst_257 = arith.constant dense<0.000000e+00> : vector<12xf32>
    %547 = vector.multi_reduction <add>, %546, %cst_257 [1] : vector<12x32xf32> to vector<12xf32>
    %548 = vector.shape_cast %547 : vector<12xf32> to vector<12x1xf32>
    %cst_258 = arith.constant 3.200000e+01 : f32
    %549 = vector.broadcast %cst_258 : f32 to vector<12x1xf32>
    %550 = arith.divf %548, %549 : vector<12x1xf32>
    %551 = vector.broadcast %543 : vector<12x1xf32> to vector<12x32xf32>
    %552 = arith.subf %535, %551 : vector<12x32xf32>
    %cst_259 = arith.constant 9.99999974E-6 : f32
    %553 = vector.broadcast %cst_259 : f32 to vector<12x1xf32>
    %554 = arith.addf %550, %553 : vector<12x1xf32>
    %555 = math.rsqrt %554 : vector<12x1xf32>
    %556 = vector.broadcast %555 : vector<12x1xf32> to vector<12x32xf32>
    %557 = arith.mulf %552, %556 : vector<12x32xf32>
    %558 = vector.broadcast %537 : vector<1x32xf32> to vector<12x32xf32>
    %559 = arith.mulf %557, %558 : vector<12x32xf32>
    %560 = vector.broadcast %539 : vector<1x32xf32> to vector<12x32xf32>
    %561 = arith.addf %559, %560 : vector<12x32xf32>
    %c1_260 = arith.constant 1 : index
    %c0_261 = arith.constant 0 : index
    %c0_262 = arith.constant 0 : index
    %562 = vector.load %arg21[%c1_260, %c0_261, %c0_262] : memref<2x32x96xf32, #tpu.memory_space<vmem>>, vector<1x32x96xf32>
    %563 = vector.shape_cast %562 : vector<1x32x96xf32> to vector<32x96xf32>
    %c1_263 = arith.constant 1 : index
    %c0_264 = arith.constant 0 : index
    %c0_265 = arith.constant 0 : index
    %564 = vector.load %arg22[%c1_263, %c0_264, %c0_265] : memref<2x1x96xf32, #tpu.memory_space<vmem>>, vector<1x1x96xf32>
    %565 = vector.shape_cast %564 : vector<1x1x96xf32> to vector<1x96xf32>
    %c1_266 = arith.constant 1 : index
    %c0_267 = arith.constant 0 : index
    %c0_268 = arith.constant 0 : index
    %566 = vector.load %arg23[%c1_266, %c0_267, %c0_268] : memref<2x32x32xf32, #tpu.memory_space<vmem>>, vector<1x32x32xf32>
    %567 = vector.shape_cast %566 : vector<1x32x32xf32> to vector<32x32xf32>
    %c1_269 = arith.constant 1 : index
    %c0_270 = arith.constant 0 : index
    %c0_271 = arith.constant 0 : index
    %568 = vector.load %arg24[%c1_269, %c0_270, %c0_271] : memref<2x1x32xf32, #tpu.memory_space<vmem>>, vector<1x1x32xf32>
    %569 = vector.shape_cast %568 : vector<1x1x32xf32> to vector<1x32xf32>
    %cst_272 = arith.constant dense<0.000000e+00> : vector<12x96xf32>
    %570 = tpu.matmul %561, %563, %cst_272 {dimension_numbers = #tpu.dot_dimension_numbers<[1], [0], [0], [1], [0, 0, 1, 1], [], []>} : vector<12x32xf32>, vector<32x96xf32>, vector<12x96xf32> -> vector<12x96xf32>
    %571 = vector.broadcast %565 : vector<1x96xf32> to vector<12x96xf32>
    %572 = arith.addf %570, %571 : vector<12x96xf32>
    %573 = vector.extract_strided_slice %572 {offsets = [0, 0], sizes = [12, 8], strides = [1, 1]} : vector<12x96xf32> to vector<12x8xf32>
    %574 = vector.extract_strided_slice %572 {offsets = [0, 32], sizes = [12, 8], strides = [1, 1]} : vector<12x96xf32> to vector<12x8xf32>
    %575 = vector.extract_strided_slice %572 {offsets = [0, 64], sizes = [12, 8], strides = [1, 1]} : vector<12x96xf32> to vector<12x8xf32>
    %cst_273 = arith.constant dense<0.000000e+00> : vector<12x12xf32>
    %576 = tpu.matmul %573, %574, %cst_273 {dimension_numbers = #tpu.dot_dimension_numbers<[1], [1], [0], [0], [0, 0, 1, 0], [], []>} : vector<12x8xf32>, vector<12x8xf32>, vector<12x12xf32> -> vector<12x12xf32>
    %cst_274 = arith.constant dense<0xFF800000> : vector<12xf32>
    %577 = vector.multi_reduction <maximumf>, %576, %cst_274 [1] : vector<12x12xf32> to vector<12xf32>
    %578 = vector.shape_cast %577 : vector<12xf32> to vector<12x1xf32>
    %579 = vector.broadcast %578 : vector<12x1xf32> to vector<12x12xf32>
    %580 = arith.subf %576, %579 : vector<12x12xf32>
    %581 = math.exp %580 : vector<12x12xf32>
    %cst_275 = arith.constant dense<0.000000e+00> : vector<12x8xf32>
    %582 = tpu.matmul %581, %575, %cst_275 {dimension_numbers = #tpu.dot_dimension_numbers<[1], [0], [0], [1], [0, 0, 1, 1], [], []>} : vector<12x12xf32>, vector<12x8xf32>, vector<12x8xf32> -> vector<12x8xf32>
    %cst_276 = arith.constant dense<0.000000e+00> : vector<12xf32>
    %583 = vector.multi_reduction <add>, %581, %cst_276 [1] : vector<12x12xf32> to vector<12xf32>
    %584 = vector.shape_cast %583 : vector<12xf32> to vector<12x1xf32>
    %585 = tpu.reciprocal %584 {approx = true} : vector<12x1xf32> -> vector<12x1xf32>
    %586 = vector.broadcast %585 : vector<12x1xf32> to vector<12x8xf32>
    %587 = arith.mulf %582, %586 : vector<12x8xf32>
    %588 = vector.extract_strided_slice %572 {offsets = [0, 8], sizes = [12, 8], strides = [1, 1]} : vector<12x96xf32> to vector<12x8xf32>
    %589 = vector.extract_strided_slice %572 {offsets = [0, 40], sizes = [12, 8], strides = [1, 1]} : vector<12x96xf32> to vector<12x8xf32>
    %590 = vector.extract_strided_slice %572 {offsets = [0, 72], sizes = [12, 8], strides = [1, 1]} : vector<12x96xf32> to vector<12x8xf32>
    %cst_277 = arith.constant dense<0.000000e+00> : vector<12x12xf32>
    %591 = tpu.matmul %588, %589, %cst_277 {dimension_numbers = #tpu.dot_dimension_numbers<[1], [1], [0], [0], [0, 0, 1, 0], [], []>} : vector<12x8xf32>, vector<12x8xf32>, vector<12x12xf32> -> vector<12x12xf32>
    %cst_278 = arith.constant dense<0xFF800000> : vector<12xf32>
    %592 = vector.multi_reduction <maximumf>, %591, %cst_278 [1] : vector<12x12xf32> to vector<12xf32>
    %593 = vector.shape_cast %592 : vector<12xf32> to vector<12x1xf32>
    %594 = vector.broadcast %593 : vector<12x1xf32> to vector<12x12xf32>
    %595 = arith.subf %591, %594 : vector<12x12xf32>
    %596 = math.exp %595 : vector<12x12xf32>
    %cst_279 = arith.constant dense<0.000000e+00> : vector<12x8xf32>
    %597 = tpu.matmul %596, %590, %cst_279 {dimension_numbers = #tpu.dot_dimension_numbers<[1], [0], [0], [1], [0, 0, 1, 1], [], []>} : vector<12x12xf32>, vector<12x8xf32>, vector<12x8xf32> -> vector<12x8xf32>
    %cst_280 = arith.constant dense<0.000000e+00> : vector<12xf32>
    %598 = vector.multi_reduction <add>, %596, %cst_280 [1] : vector<12x12xf32> to vector<12xf32>
    %599 = vector.shape_cast %598 : vector<12xf32> to vector<12x1xf32>
    %600 = tpu.reciprocal %599 {approx = true} : vector<12x1xf32> -> vector<12x1xf32>
    %601 = vector.broadcast %600 : vector<12x1xf32> to vector<12x8xf32>
    %602 = arith.mulf %597, %601 : vector<12x8xf32>
    %603 = vector.extract_strided_slice %572 {offsets = [0, 16], sizes = [12, 8], strides = [1, 1]} : vector<12x96xf32> to vector<12x8xf32>
    %604 = vector.extract_strided_slice %572 {offsets = [0, 48], sizes = [12, 8], strides = [1, 1]} : vector<12x96xf32> to vector<12x8xf32>
    %605 = vector.extract_strided_slice %572 {offsets = [0, 80], sizes = [12, 8], strides = [1, 1]} : vector<12x96xf32> to vector<12x8xf32>
    %cst_281 = arith.constant dense<0.000000e+00> : vector<12x12xf32>
    %606 = tpu.matmul %603, %604, %cst_281 {dimension_numbers = #tpu.dot_dimension_numbers<[1], [1], [0], [0], [0, 0, 1, 0], [], []>} : vector<12x8xf32>, vector<12x8xf32>, vector<12x12xf32> -> vector<12x12xf32>
    %cst_282 = arith.constant dense<0xFF800000> : vector<12xf32>
    %607 = vector.multi_reduction <maximumf>, %606, %cst_282 [1] : vector<12x12xf32> to vector<12xf32>
    %608 = vector.shape_cast %607 : vector<12xf32> to vector<12x1xf32>
    %609 = vector.broadcast %608 : vector<12x1xf32> to vector<12x12xf32>
    %610 = arith.subf %606, %609 : vector<12x12xf32>
    %611 = math.exp %610 : vector<12x12xf32>
    %cst_283 = arith.constant dense<0.000000e+00> : vector<12x8xf32>
    %612 = tpu.matmul %611, %605, %cst_283 {dimension_numbers = #tpu.dot_dimension_numbers<[1], [0], [0], [1], [0, 0, 1, 1], [], []>} : vector<12x12xf32>, vector<12x8xf32>, vector<12x8xf32> -> vector<12x8xf32>
    %cst_284 = arith.constant dense<0.000000e+00> : vector<12xf32>
    %613 = vector.multi_reduction <add>, %611, %cst_284 [1] : vector<12x12xf32> to vector<12xf32>
    %614 = vector.shape_cast %613 : vector<12xf32> to vector<12x1xf32>
    %615 = tpu.reciprocal %614 {approx = true} : vector<12x1xf32> -> vector<12x1xf32>
    %616 = vector.broadcast %615 : vector<12x1xf32> to vector<12x8xf32>
    %617 = arith.mulf %612, %616 : vector<12x8xf32>
    %618 = vector.extract_strided_slice %572 {offsets = [0, 24], sizes = [12, 8], strides = [1, 1]} : vector<12x96xf32> to vector<12x8xf32>
    %619 = vector.extract_strided_slice %572 {offsets = [0, 56], sizes = [12, 8], strides = [1, 1]} : vector<12x96xf32> to vector<12x8xf32>
    %620 = vector.extract_strided_slice %572 {offsets = [0, 88], sizes = [12, 8], strides = [1, 1]} : vector<12x96xf32> to vector<12x8xf32>
    %cst_285 = arith.constant dense<0.000000e+00> : vector<12x12xf32>
    %621 = tpu.matmul %618, %619, %cst_285 {dimension_numbers = #tpu.dot_dimension_numbers<[1], [1], [0], [0], [0, 0, 1, 0], [], []>} : vector<12x8xf32>, vector<12x8xf32>, vector<12x12xf32> -> vector<12x12xf32>
    %cst_286 = arith.constant dense<0xFF800000> : vector<12xf32>
    %622 = vector.multi_reduction <maximumf>, %621, %cst_286 [1] : vector<12x12xf32> to vector<12xf32>
    %623 = vector.shape_cast %622 : vector<12xf32> to vector<12x1xf32>
    %624 = vector.broadcast %623 : vector<12x1xf32> to vector<12x12xf32>
    %625 = arith.subf %621, %624 : vector<12x12xf32>
    %626 = math.exp %625 : vector<12x12xf32>
    %cst_287 = arith.constant dense<0.000000e+00> : vector<12x8xf32>
    %627 = tpu.matmul %626, %620, %cst_287 {dimension_numbers = #tpu.dot_dimension_numbers<[1], [0], [0], [1], [0, 0, 1, 1], [], []>} : vector<12x12xf32>, vector<12x8xf32>, vector<12x8xf32> -> vector<12x8xf32>
    %cst_288 = arith.constant dense<0.000000e+00> : vector<12xf32>
    %628 = vector.multi_reduction <add>, %626, %cst_288 [1] : vector<12x12xf32> to vector<12xf32>
    %629 = vector.shape_cast %628 : vector<12xf32> to vector<12x1xf32>
    %630 = tpu.reciprocal %629 {approx = true} : vector<12x1xf32> -> vector<12x1xf32>
    %631 = vector.broadcast %630 : vector<12x1xf32> to vector<12x8xf32>
    %632 = arith.mulf %627, %631 : vector<12x8xf32>
    %633 = tpu.concatenate %587, %602, %617, %632 in 1 : vector<12x8xf32>, vector<12x8xf32>, vector<12x8xf32>, vector<12x8xf32> -> vector<12x32xf32>
    %cst_289 = arith.constant dense<0.000000e+00> : vector<12x32xf32>
    %634 = tpu.matmul %633, %567, %cst_289 {dimension_numbers = #tpu.dot_dimension_numbers<[1], [0], [0], [1], [0, 0, 1, 1], [], []>} : vector<12x32xf32>, vector<32x32xf32>, vector<12x32xf32> -> vector<12x32xf32>
    %635 = vector.broadcast %569 : vector<1x32xf32> to vector<12x32xf32>
    %636 = arith.addf %634, %635 : vector<12x32xf32>
    %637 = arith.addf %561, %636 : vector<12x32xf32>
    %c1_290 = arith.constant 1 : index
    %c0_291 = arith.constant 0 : index
    %c0_292 = arith.constant 0 : index
    %638 = vector.load %arg25[%c1_290, %c0_291, %c0_292] : memref<2x1x32xf32, #tpu.memory_space<vmem>>, vector<1x1x32xf32>
    %639 = vector.shape_cast %638 : vector<1x1x32xf32> to vector<1x32xf32>
    %c1_293 = arith.constant 1 : index
    %c0_294 = arith.constant 0 : index
    %c0_295 = arith.constant 0 : index
    %640 = vector.load %arg26[%c1_293, %c0_294, %c0_295] : memref<2x1x32xf32, #tpu.memory_space<vmem>>, vector<1x1x32xf32>
    %641 = vector.shape_cast %640 : vector<1x1x32xf32> to vector<1x32xf32>
    %cst_296 = arith.constant dense<0.000000e+00> : vector<12xf32>
    %642 = vector.multi_reduction <add>, %637, %cst_296 [1] : vector<12x32xf32> to vector<12xf32>
    %643 = vector.shape_cast %642 : vector<12xf32> to vector<12x1xf32>
    %cst_297 = arith.constant 3.200000e+01 : f32
    %644 = vector.broadcast %cst_297 : f32 to vector<12x1xf32>
    %645 = arith.divf %643, %644 : vector<12x1xf32>
    %646 = vector.broadcast %645 : vector<12x1xf32> to vector<12x32xf32>
    %647 = arith.subf %637, %646 : vector<12x32xf32>
    %648 = arith.mulf %647, %647 : vector<12x32xf32>
    %cst_298 = arith.constant dense<0.000000e+00> : vector<12xf32>
    %649 = vector.multi_reduction <add>, %648, %cst_298 [1] : vector<12x32xf32> to vector<12xf32>
    %650 = vector.shape_cast %649 : vector<12xf32> to vector<12x1xf32>
    %cst_299 = arith.constant 3.200000e+01 : f32
    %651 = vector.broadcast %cst_299 : f32 to vector<12x1xf32>
    %652 = arith.divf %650, %651 : vector<12x1xf32>
    %653 = vector.broadcast %645 : vector<12x1xf32> to vector<12x32xf32>
    %654 = arith.subf %637, %653 : vector<12x32xf32>
    %cst_300 = arith.constant 9.99999974E-6 : f32
    %655 = vector.broadcast %cst_300 : f32 to vector<12x1xf32>
    %656 = arith.addf %652, %655 : vector<12x1xf32>
    %657 = math.rsqrt %656 : vector<12x1xf32>
    %658 = vector.broadcast %657 : vector<12x1xf32> to vector<12x32xf32>
    %659 = arith.mulf %654, %658 : vector<12x32xf32>
    %660 = vector.broadcast %639 : vector<1x32xf32> to vector<12x32xf32>
    %661 = arith.mulf %659, %660 : vector<12x32xf32>
    %662 = vector.broadcast %641 : vector<1x32xf32> to vector<12x32xf32>
    %663 = arith.addf %661, %662 : vector<12x32xf32>
    %c1_301 = arith.constant 1 : index
    %c0_302 = arith.constant 0 : index
    %c0_303 = arith.constant 0 : index
    %664 = vector.load %arg27[%c1_301, %c0_302, %c0_303] : memref<2x32x96xf32, #tpu.memory_space<vmem>>, vector<1x32x96xf32>
    %665 = vector.shape_cast %664 : vector<1x32x96xf32> to vector<32x96xf32>
    %c1_304 = arith.constant 1 : index
    %c0_305 = arith.constant 0 : index
    %c0_306 = arith.constant 0 : index
    %666 = vector.load %arg28[%c1_304, %c0_305, %c0_306] : memref<2x1x96xf32, #tpu.memory_space<vmem>>, vector<1x1x96xf32>
    %667 = vector.shape_cast %666 : vector<1x1x96xf32> to vector<1x96xf32>
    %c1_307 = arith.constant 1 : index
    %c0_308 = arith.constant 0 : index
    %c0_309 = arith.constant 0 : index
    %668 = vector.load %arg29[%c1_307, %c0_308, %c0_309] : memref<2x32x32xf32, #tpu.memory_space<vmem>>, vector<1x32x32xf32>
    %669 = vector.shape_cast %668 : vector<1x32x32xf32> to vector<32x32xf32>
    %c1_310 = arith.constant 1 : index
    %c0_311 = arith.constant 0 : index
    %c0_312 = arith.constant 0 : index
    %670 = vector.load %arg30[%c1_310, %c0_311, %c0_312] : memref<2x1x32xf32, #tpu.memory_space<vmem>>, vector<1x1x32xf32>
    %671 = vector.shape_cast %670 : vector<1x1x32xf32> to vector<1x32xf32>
    %672 = vector.extract_strided_slice %665 {offsets = [0, 0], sizes = [32, 32], strides = [1, 1]} : vector<32x96xf32> to vector<32x32xf32>
    %cst_313 = arith.constant dense<0.000000e+00> : vector<12x32xf32>
    %673 = tpu.matmul %663, %672, %cst_313 {dimension_numbers = #tpu.dot_dimension_numbers<[1], [0], [0], [1], [0, 0, 1, 1], [], []>} : vector<12x32xf32>, vector<32x32xf32>, vector<12x32xf32> -> vector<12x32xf32>
    %674 = vector.extract_strided_slice %667 {offsets = [0, 0], sizes = [1, 32], strides = [1, 1]} : vector<1x96xf32> to vector<1x32xf32>
    %675 = vector.broadcast %674 : vector<1x32xf32> to vector<12x32xf32>
    %676 = arith.addf %673, %675 : vector<12x32xf32>
    %677 = vector.extract_strided_slice %665 {offsets = [0, 32], sizes = [32, 64], strides = [1, 1]} : vector<32x96xf32> to vector<32x64xf32>
    %cst_314 = arith.constant dense<0.000000e+00> : vector<8x64xf32>
    %678 = tpu.matmul %298, %677, %cst_314 {dimension_numbers = #tpu.dot_dimension_numbers<[1], [0], [0], [1], [0, 0, 1, 1], [], []>} : vector<8x32xf32>, vector<32x64xf32>, vector<8x64xf32> -> vector<8x64xf32>
    %679 = vector.extract_strided_slice %667 {offsets = [0, 32], sizes = [1, 64], strides = [1, 1]} : vector<1x96xf32> to vector<1x64xf32>
    %680 = vector.broadcast %679 : vector<1x64xf32> to vector<8x64xf32>
    %681 = arith.addf %678, %680 : vector<8x64xf32>
    %682 = vector.extract_strided_slice %676 {offsets = [0, 0], sizes = [12, 8], strides = [1, 1]} : vector<12x32xf32> to vector<12x8xf32>
    %683 = vector.extract_strided_slice %681 {offsets = [0, 0], sizes = [8, 8], strides = [1, 1]} : vector<8x64xf32> to vector<8x8xf32>
    %684 = vector.extract_strided_slice %681 {offsets = [0, 32], sizes = [8, 8], strides = [1, 1]} : vector<8x64xf32> to vector<8x8xf32>
    %cst_315 = arith.constant dense<0.000000e+00> : vector<12x8xf32>
    %685 = tpu.matmul %682, %683, %cst_315 {dimension_numbers = #tpu.dot_dimension_numbers<[1], [1], [0], [0], [0, 0, 1, 0], [], []>} : vector<12x8xf32>, vector<8x8xf32>, vector<12x8xf32> -> vector<12x8xf32>
    %cst_316 = arith.constant dense<0xFF800000> : vector<12xf32>
    %686 = vector.multi_reduction <maximumf>, %685, %cst_316 [1] : vector<12x8xf32> to vector<12xf32>
    %687 = vector.shape_cast %686 : vector<12xf32> to vector<12x1xf32>
    %688 = vector.broadcast %687 : vector<12x1xf32> to vector<12x8xf32>
    %689 = arith.subf %685, %688 : vector<12x8xf32>
    %690 = math.exp %689 : vector<12x8xf32>
    %cst_317 = arith.constant dense<0.000000e+00> : vector<12x8xf32>
    %691 = tpu.matmul %690, %684, %cst_317 {dimension_numbers = #tpu.dot_dimension_numbers<[1], [0], [0], [1], [0, 0, 1, 1], [], []>} : vector<12x8xf32>, vector<8x8xf32>, vector<12x8xf32> -> vector<12x8xf32>
    %cst_318 = arith.constant dense<0.000000e+00> : vector<12xf32>
    %692 = vector.multi_reduction <add>, %690, %cst_318 [1] : vector<12x8xf32> to vector<12xf32>
    %693 = vector.shape_cast %692 : vector<12xf32> to vector<12x1xf32>
    %694 = tpu.reciprocal %693 {approx = true} : vector<12x1xf32> -> vector<12x1xf32>
    %695 = vector.broadcast %694 : vector<12x1xf32> to vector<12x8xf32>
    %696 = arith.mulf %691, %695 : vector<12x8xf32>
    %697 = vector.extract_strided_slice %676 {offsets = [0, 8], sizes = [12, 8], strides = [1, 1]} : vector<12x32xf32> to vector<12x8xf32>
    %698 = vector.extract_strided_slice %681 {offsets = [0, 8], sizes = [8, 8], strides = [1, 1]} : vector<8x64xf32> to vector<8x8xf32>
    %699 = vector.extract_strided_slice %681 {offsets = [0, 40], sizes = [8, 8], strides = [1, 1]} : vector<8x64xf32> to vector<8x8xf32>
    %cst_319 = arith.constant dense<0.000000e+00> : vector<12x8xf32>
    %700 = tpu.matmul %697, %698, %cst_319 {dimension_numbers = #tpu.dot_dimension_numbers<[1], [1], [0], [0], [0, 0, 1, 0], [], []>} : vector<12x8xf32>, vector<8x8xf32>, vector<12x8xf32> -> vector<12x8xf32>
    %cst_320 = arith.constant dense<0xFF800000> : vector<12xf32>
    %701 = vector.multi_reduction <maximumf>, %700, %cst_320 [1] : vector<12x8xf32> to vector<12xf32>
    %702 = vector.shape_cast %701 : vector<12xf32> to vector<12x1xf32>
    %703 = vector.broadcast %702 : vector<12x1xf32> to vector<12x8xf32>
    %704 = arith.subf %700, %703 : vector<12x8xf32>
    %705 = math.exp %704 : vector<12x8xf32>
    %cst_321 = arith.constant dense<0.000000e+00> : vector<12x8xf32>
    %706 = tpu.matmul %705, %699, %cst_321 {dimension_numbers = #tpu.dot_dimension_numbers<[1], [0], [0], [1], [0, 0, 1, 1], [], []>} : vector<12x8xf32>, vector<8x8xf32>, vector<12x8xf32> -> vector<12x8xf32>
    %cst_322 = arith.constant dense<0.000000e+00> : vector<12xf32>
    %707 = vector.multi_reduction <add>, %705, %cst_322 [1] : vector<12x8xf32> to vector<12xf32>
    %708 = vector.shape_cast %707 : vector<12xf32> to vector<12x1xf32>
    %709 = tpu.reciprocal %708 {approx = true} : vector<12x1xf32> -> vector<12x1xf32>
    %710 = vector.broadcast %709 : vector<12x1xf32> to vector<12x8xf32>
    %711 = arith.mulf %706, %710 : vector<12x8xf32>
    %712 = vector.extract_strided_slice %676 {offsets = [0, 16], sizes = [12, 8], strides = [1, 1]} : vector<12x32xf32> to vector<12x8xf32>
    %713 = vector.extract_strided_slice %681 {offsets = [0, 16], sizes = [8, 8], strides = [1, 1]} : vector<8x64xf32> to vector<8x8xf32>
    %714 = vector.extract_strided_slice %681 {offsets = [0, 48], sizes = [8, 8], strides = [1, 1]} : vector<8x64xf32> to vector<8x8xf32>
    %cst_323 = arith.constant dense<0.000000e+00> : vector<12x8xf32>
    %715 = tpu.matmul %712, %713, %cst_323 {dimension_numbers = #tpu.dot_dimension_numbers<[1], [1], [0], [0], [0, 0, 1, 0], [], []>} : vector<12x8xf32>, vector<8x8xf32>, vector<12x8xf32> -> vector<12x8xf32>
    %cst_324 = arith.constant dense<0xFF800000> : vector<12xf32>
    %716 = vector.multi_reduction <maximumf>, %715, %cst_324 [1] : vector<12x8xf32> to vector<12xf32>
    %717 = vector.shape_cast %716 : vector<12xf32> to vector<12x1xf32>
    %718 = vector.broadcast %717 : vector<12x1xf32> to vector<12x8xf32>
    %719 = arith.subf %715, %718 : vector<12x8xf32>
    %720 = math.exp %719 : vector<12x8xf32>
    %cst_325 = arith.constant dense<0.000000e+00> : vector<12x8xf32>
    %721 = tpu.matmul %720, %714, %cst_325 {dimension_numbers = #tpu.dot_dimension_numbers<[1], [0], [0], [1], [0, 0, 1, 1], [], []>} : vector<12x8xf32>, vector<8x8xf32>, vector<12x8xf32> -> vector<12x8xf32>
    %cst_326 = arith.constant dense<0.000000e+00> : vector<12xf32>
    %722 = vector.multi_reduction <add>, %720, %cst_326 [1] : vector<12x8xf32> to vector<12xf32>
    %723 = vector.shape_cast %722 : vector<12xf32> to vector<12x1xf32>
    %724 = tpu.reciprocal %723 {approx = true} : vector<12x1xf32> -> vector<12x1xf32>
    %725 = vector.broadcast %724 : vector<12x1xf32> to vector<12x8xf32>
    %726 = arith.mulf %721, %725 : vector<12x8xf32>
    %727 = vector.extract_strided_slice %676 {offsets = [0, 24], sizes = [12, 8], strides = [1, 1]} : vector<12x32xf32> to vector<12x8xf32>
    %728 = vector.extract_strided_slice %681 {offsets = [0, 24], sizes = [8, 8], strides = [1, 1]} : vector<8x64xf32> to vector<8x8xf32>
    %729 = vector.extract_strided_slice %681 {offsets = [0, 56], sizes = [8, 8], strides = [1, 1]} : vector<8x64xf32> to vector<8x8xf32>
    %cst_327 = arith.constant dense<0.000000e+00> : vector<12x8xf32>
    %730 = tpu.matmul %727, %728, %cst_327 {dimension_numbers = #tpu.dot_dimension_numbers<[1], [1], [0], [0], [0, 0, 1, 0], [], []>} : vector<12x8xf32>, vector<8x8xf32>, vector<12x8xf32> -> vector<12x8xf32>
    %cst_328 = arith.constant dense<0xFF800000> : vector<12xf32>
    %731 = vector.multi_reduction <maximumf>, %730, %cst_328 [1] : vector<12x8xf32> to vector<12xf32>
    %732 = vector.shape_cast %731 : vector<12xf32> to vector<12x1xf32>
    %733 = vector.broadcast %732 : vector<12x1xf32> to vector<12x8xf32>
    %734 = arith.subf %730, %733 : vector<12x8xf32>
    %735 = math.exp %734 : vector<12x8xf32>
    %cst_329 = arith.constant dense<0.000000e+00> : vector<12x8xf32>
    %736 = tpu.matmul %735, %729, %cst_329 {dimension_numbers = #tpu.dot_dimension_numbers<[1], [0], [0], [1], [0, 0, 1, 1], [], []>} : vector<12x8xf32>, vector<8x8xf32>, vector<12x8xf32> -> vector<12x8xf32>
    %cst_330 = arith.constant dense<0.000000e+00> : vector<12xf32>
    %737 = vector.multi_reduction <add>, %735, %cst_330 [1] : vector<12x8xf32> to vector<12xf32>
    %738 = vector.shape_cast %737 : vector<12xf32> to vector<12x1xf32>
    %739 = tpu.reciprocal %738 {approx = true} : vector<12x1xf32> -> vector<12x1xf32>
    %740 = vector.broadcast %739 : vector<12x1xf32> to vector<12x8xf32>
    %741 = arith.mulf %736, %740 : vector<12x8xf32>
    %742 = tpu.concatenate %696, %711, %726, %741 in 1 : vector<12x8xf32>, vector<12x8xf32>, vector<12x8xf32>, vector<12x8xf32> -> vector<12x32xf32>
    %cst_331 = arith.constant dense<0.000000e+00> : vector<12x32xf32>
    %743 = tpu.matmul %742, %669, %cst_331 {dimension_numbers = #tpu.dot_dimension_numbers<[1], [0], [0], [1], [0, 0, 1, 1], [], []>} : vector<12x32xf32>, vector<32x32xf32>, vector<12x32xf32> -> vector<12x32xf32>
    %744 = vector.broadcast %671 : vector<1x32xf32> to vector<12x32xf32>
    %745 = arith.addf %743, %744 : vector<12x32xf32>
    %746 = arith.addf %663, %745 : vector<12x32xf32>
    %c1_332 = arith.constant 1 : index
    %c0_333 = arith.constant 0 : index
    %c0_334 = arith.constant 0 : index
    %747 = vector.load %arg31[%c1_332, %c0_333, %c0_334] : memref<2x1x32xf32, #tpu.memory_space<vmem>>, vector<1x1x32xf32>
    %748 = vector.shape_cast %747 : vector<1x1x32xf32> to vector<1x32xf32>
    %c1_335 = arith.constant 1 : index
    %c0_336 = arith.constant 0 : index
    %c0_337 = arith.constant 0 : index
    %749 = vector.load %arg32[%c1_335, %c0_336, %c0_337] : memref<2x1x32xf32, #tpu.memory_space<vmem>>, vector<1x1x32xf32>
    %750 = vector.shape_cast %749 : vector<1x1x32xf32> to vector<1x32xf32>
    %cst_338 = arith.constant dense<0.000000e+00> : vector<12xf32>
    %751 = vector.multi_reduction <add>, %746, %cst_338 [1] : vector<12x32xf32> to vector<12xf32>
    %752 = vector.shape_cast %751 : vector<12xf32> to vector<12x1xf32>
    %cst_339 = arith.constant 3.200000e+01 : f32
    %753 = vector.broadcast %cst_339 : f32 to vector<12x1xf32>
    %754 = arith.divf %752, %753 : vector<12x1xf32>
    %755 = vector.broadcast %754 : vector<12x1xf32> to vector<12x32xf32>
    %756 = arith.subf %746, %755 : vector<12x32xf32>
    %757 = arith.mulf %756, %756 : vector<12x32xf32>
    %cst_340 = arith.constant dense<0.000000e+00> : vector<12xf32>
    %758 = vector.multi_reduction <add>, %757, %cst_340 [1] : vector<12x32xf32> to vector<12xf32>
    %759 = vector.shape_cast %758 : vector<12xf32> to vector<12x1xf32>
    %cst_341 = arith.constant 3.200000e+01 : f32
    %760 = vector.broadcast %cst_341 : f32 to vector<12x1xf32>
    %761 = arith.divf %759, %760 : vector<12x1xf32>
    %762 = vector.broadcast %754 : vector<12x1xf32> to vector<12x32xf32>
    %763 = arith.subf %746, %762 : vector<12x32xf32>
    %cst_342 = arith.constant 9.99999974E-6 : f32
    %764 = vector.broadcast %cst_342 : f32 to vector<12x1xf32>
    %765 = arith.addf %761, %764 : vector<12x1xf32>
    %766 = math.rsqrt %765 : vector<12x1xf32>
    %767 = vector.broadcast %766 : vector<12x1xf32> to vector<12x32xf32>
    %768 = arith.mulf %763, %767 : vector<12x32xf32>
    %769 = vector.broadcast %748 : vector<1x32xf32> to vector<12x32xf32>
    %770 = arith.mulf %768, %769 : vector<12x32xf32>
    %771 = vector.broadcast %750 : vector<1x32xf32> to vector<12x32xf32>
    %772 = arith.addf %770, %771 : vector<12x32xf32>
    %c1_343 = arith.constant 1 : index
    %c0_344 = arith.constant 0 : index
    %c0_345 = arith.constant 0 : index
    %773 = vector.load %arg33[%c1_343, %c0_344, %c0_345] : memref<2x32x512xf32, #tpu.memory_space<vmem>>, vector<1x32x512xf32>
    %774 = vector.shape_cast %773 : vector<1x32x512xf32> to vector<32x512xf32>
    %cst_346 = arith.constant dense<0.000000e+00> : vector<12x512xf32>
    %775 = tpu.matmul %772, %774, %cst_346 {dimension_numbers = #tpu.dot_dimension_numbers<[1], [0], [0], [1], [0, 0, 1, 1], [], []>} : vector<12x32xf32>, vector<32x512xf32>, vector<12x512xf32> -> vector<12x512xf32>
    %c1_347 = arith.constant 1 : index
    %c0_348 = arith.constant 0 : index
    %c0_349 = arith.constant 0 : index
    %776 = vector.load %arg34[%c1_347, %c0_348, %c0_349] : memref<2x1x512xf32, #tpu.memory_space<vmem>>, vector<1x1x512xf32>
    %777 = vector.shape_cast %776 : vector<1x1x512xf32> to vector<1x512xf32>
    %778 = vector.broadcast %777 : vector<1x512xf32> to vector<12x512xf32>
    %779 = arith.addf %775, %778 : vector<12x512xf32>
    %cst_350 = arith.constant 0.000000e+00 : f32
    %780 = vector.broadcast %cst_350 : f32 to vector<12x512xf32>
    %781 = arith.maximumf %779, %780 : vector<12x512xf32>
    %c1_351 = arith.constant 1 : index
    %c0_352 = arith.constant 0 : index
    %c0_353 = arith.constant 0 : index
    %782 = vector.load %arg35[%c1_351, %c0_352, %c0_353] : memref<2x512x32xf32, #tpu.memory_space<vmem>>, vector<1x512x32xf32>
    %783 = vector.shape_cast %782 : vector<1x512x32xf32> to vector<512x32xf32>
    %cst_354 = arith.constant dense<0.000000e+00> : vector<12x32xf32>
    %784 = tpu.matmul %781, %783, %cst_354 {dimension_numbers = #tpu.dot_dimension_numbers<[1], [0], [0], [1], [0, 0, 1, 1], [], []>} : vector<12x512xf32>, vector<512x32xf32>, vector<12x32xf32> -> vector<12x32xf32>
    %c1_355 = arith.constant 1 : index
    %c0_356 = arith.constant 0 : index
    %c0_357 = arith.constant 0 : index
    %785 = vector.load %arg36[%c1_355, %c0_356, %c0_357] : memref<2x1x32xf32, #tpu.memory_space<vmem>>, vector<1x1x32xf32>
    %786 = vector.shape_cast %785 : vector<1x1x32xf32> to vector<1x32xf32>
    %787 = vector.broadcast %786 : vector<1x32xf32> to vector<12x32xf32>
    %788 = arith.addf %784, %787 : vector<12x32xf32>
    %789 = arith.addf %772, %788 : vector<12x32xf32>
    %c1_358 = arith.constant 1 : index
    %c0_359 = arith.constant 0 : index
    %c0_360 = arith.constant 0 : index
    %790 = vector.load %arg37[%c1_358, %c0_359, %c0_360] : memref<2x1x32xf32, #tpu.memory_space<vmem>>, vector<1x1x32xf32>
    %791 = vector.shape_cast %790 : vector<1x1x32xf32> to vector<1x32xf32>
    %c1_361 = arith.constant 1 : index
    %c0_362 = arith.constant 0 : index
    %c0_363 = arith.constant 0 : index
    %792 = vector.load %arg38[%c1_361, %c0_362, %c0_363] : memref<2x1x32xf32, #tpu.memory_space<vmem>>, vector<1x1x32xf32>
    %793 = vector.shape_cast %792 : vector<1x1x32xf32> to vector<1x32xf32>
    %cst_364 = arith.constant dense<0.000000e+00> : vector<12xf32>
    %794 = vector.multi_reduction <add>, %789, %cst_364 [1] : vector<12x32xf32> to vector<12xf32>
    %795 = vector.shape_cast %794 : vector<12xf32> to vector<12x1xf32>
    %cst_365 = arith.constant 3.200000e+01 : f32
    %796 = vector.broadcast %cst_365 : f32 to vector<12x1xf32>
    %797 = arith.divf %795, %796 : vector<12x1xf32>
    %798 = vector.broadcast %797 : vector<12x1xf32> to vector<12x32xf32>
    %799 = arith.subf %789, %798 : vector<12x32xf32>
    %800 = arith.mulf %799, %799 : vector<12x32xf32>
    %cst_366 = arith.constant dense<0.000000e+00> : vector<12xf32>
    %801 = vector.multi_reduction <add>, %800, %cst_366 [1] : vector<12x32xf32> to vector<12xf32>
    %802 = vector.shape_cast %801 : vector<12xf32> to vector<12x1xf32>
    %cst_367 = arith.constant 3.200000e+01 : f32
    %803 = vector.broadcast %cst_367 : f32 to vector<12x1xf32>
    %804 = arith.divf %802, %803 : vector<12x1xf32>
    %805 = vector.broadcast %797 : vector<12x1xf32> to vector<12x32xf32>
    %806 = arith.subf %789, %805 : vector<12x32xf32>
    %cst_368 = arith.constant 9.99999974E-6 : f32
    %807 = vector.broadcast %cst_368 : f32 to vector<12x1xf32>
    %808 = arith.addf %804, %807 : vector<12x1xf32>
    %809 = math.rsqrt %808 : vector<12x1xf32>
    %810 = vector.broadcast %809 : vector<12x1xf32> to vector<12x32xf32>
    %811 = arith.mulf %806, %810 : vector<12x32xf32>
    %812 = vector.broadcast %791 : vector<1x32xf32> to vector<12x32xf32>
    %813 = arith.mulf %811, %812 : vector<12x32xf32>
    %814 = vector.broadcast %793 : vector<1x32xf32> to vector<12x32xf32>
    %815 = arith.addf %813, %814 : vector<12x32xf32>
    %c0_369 = arith.constant 0 : index
    %c0_370 = arith.constant 0 : index
    %816 = vector.load %arg39[%c0_369, %c0_370] : memref<32x128xf32, #tpu.memory_space<vmem>>, vector<32x128xf32>
    %cst_371 = arith.constant dense<0.000000e+00> : vector<12x128xf32>
    %817 = tpu.matmul %815, %816, %cst_371 {dimension_numbers = #tpu.dot_dimension_numbers<[1], [0], [0], [1], [0, 0, 1, 1], [], []>} : vector<12x32xf32>, vector<32x128xf32>, vector<12x128xf32> -> vector<12x128xf32>
    %c0_372 = arith.constant 0 : index
    %c0_373 = arith.constant 0 : index
    %818 = vector.load %arg40[%c0_372, %c0_373] : memref<1x128xf32, #tpu.memory_space<vmem>>, vector<1x128xf32>
    %819 = vector.broadcast %818 : vector<1x128xf32> to vector<12x128xf32>
    %820 = arith.addf %817, %819 : vector<12x128xf32>
    %821 = vector.shape_cast %820 : vector<12x128xf32> to vector<1x12x128xf32>
    %c0_374 = arith.constant 0 : index
    %c0_375 = arith.constant 0 : index
    %c0_376 = arith.constant 0 : index
    %822 = vector.load %arg41[%c0_374, %c0_375, %c0_376] : memref<1x12x128xf32, #tpu.memory_space<vmem>>, vector<1x12x128xf32>
    tpu.vector_store %arg41[%c0_374, %c0_375, %c0_376], %821 {strides = array<i32>} : memref<1x12x128xf32, #tpu.memory_space<vmem>>, vector<1x12x128xf32>,
    return
  }
  func.func @transform_0(%arg0: i32) -> (i32, i32, i32) {
    %c0_i32 = arith.constant 0 : i32
    %c0_i32_0 = arith.constant 0 : i32
    %c0_i32_1 = arith.constant 0 : i32
    return %arg0, %c0_i32, %c0_i32_0 : i32, i32, i32
  }
  func.func @transform_1(%arg0: i32) -> (i32, i32, i32) {
    %c0_i32 = arith.constant 0 : i32
    %c0_i32_0 = arith.constant 0 : i32
    %c0_i32_1 = arith.constant 0 : i32
    return %arg0, %c0_i32, %c0_i32_0 : i32, i32, i32
  }
  func.func @transform_2(%arg0: i32) -> (i32, i32) {
    %c0_i32 = arith.constant 0 : i32
    %c0_i32_0 = arith.constant 0 : i32
    %c0_i32_1 = arith.constant 0 : i32
    return %c0_i32, %c0_i32_0 : i32, i32
  }
  func.func @transform_3(%arg0: i32) -> (i32, i32) {
    %c0_i32 = arith.constant 0 : i32
    %c0_i32_0 = arith.constant 0 : i32
    %c0_i32_1 = arith.constant 0 : i32
    return %c0_i32, %c0_i32_0 : i32, i32
  }
  func.func @transform_4(%arg0: i32) -> (i32, i32) {
    %c0_i32 = arith.constant 0 : i32
    %c0_i32_0 = arith.constant 0 : i32
    %c0_i32_1 = arith.constant 0 : i32
    return %c0_i32, %c0_i32_0 : i32, i32
  }
  func.func @transform_5(%arg0: i32) -> (i32, i32) {
    %c0_i32 = arith.constant 0 : i32
    %c0_i32_0 = arith.constant 0 : i32
    %c0_i32_1 = arith.constant 0 : i32
    return %c0_i32, %c0_i32_0 : i32, i32
  }
  func.func @transform_6(%arg0: i32) -> (i32, i32, i32) {
    %c0_i32 = arith.constant 0 : i32
    %c0_i32_0 = arith.constant 0 : i32
    %c0_i32_1 = arith.constant 0 : i32
    %c0_i32_2 = arith.constant 0 : i32
    return %c0_i32, %c0_i32_0, %c0_i32_1 : i32, i32, i32
  }
  func.func @transform_7(%arg0: i32) -> (i32, i32, i32) {
    %c0_i32 = arith.constant 0 : i32
    %c0_i32_0 = arith.constant 0 : i32
    %c0_i32_1 = arith.constant 0 : i32
    %c0_i32_2 = arith.constant 0 : i32
    return %c0_i32, %c0_i32_0, %c0_i32_1 : i32, i32, i32
  }
  func.func @transform_8(%arg0: i32) -> (i32, i32, i32) {
    %c0_i32 = arith.constant 0 : i32
    %c0_i32_0 = arith.constant 0 : i32
    %c0_i32_1 = arith.constant 0 : i32
    %c0_i32_2 = arith.constant 0 : i32
    return %c0_i32, %c0_i32_0, %c0_i32_1 : i32, i32, i32
  }
  func.func @transform_9(%arg0: i32) -> (i32, i32, i32) {
    %c0_i32 = arith.constant 0 : i32
    %c0_i32_0 = arith.constant 0 : i32
    %c0_i32_1 = arith.constant 0 : i32
    %c0_i32_2 = arith.constant 0 : i32
    return %c0_i32, %c0_i32_0, %c0_i32_1 : i32, i32, i32
  }
  func.func @transform_10(%arg0: i32) -> (i32, i32, i32) {
    %c0_i32 = arith.constant 0 : i32
    %c0_i32_0 = arith.constant 0 : i32
    %c0_i32_1 = arith.constant 0 : i32
    %c0_i32_2 = arith.constant 0 : i32
    return %c0_i32, %c0_i32_0, %c0_i32_1 : i32, i32, i32
  }
  func.func @transform_11(%arg0: i32) -> (i32, i32, i32) {
    %c0_i32 = arith.constant 0 : i32
    %c0_i32_0 = arith.constant 0 : i32
    %c0_i32_1 = arith.constant 0 : i32
    %c0_i32_2 = arith.constant 0 : i32
    return %c0_i32, %c0_i32_0, %c0_i32_1 : i32, i32, i32
  }
  func.func @transform_12(%arg0: i32) -> (i32, i32, i32) {
    %c0_i32 = arith.constant 0 : i32
    %c0_i32_0 = arith.constant 0 : i32
    %c0_i32_1 = arith.constant 0 : i32
    %c0_i32_2 = arith.constant 0 : i32
    return %c0_i32, %c0_i32_0, %c0_i32_1 : i32, i32, i32
  }
  func.func @transform_13(%arg0: i32) -> (i32, i32, i32) {
    %c0_i32 = arith.constant 0 : i32
    %c0_i32_0 = arith.constant 0 : i32
    %c0_i32_1 = arith.constant 0 : i32
    %c0_i32_2 = arith.constant 0 : i32
    return %c0_i32, %c0_i32_0, %c0_i32_1 : i32, i32, i32
  }
  func.func @transform_14(%arg0: i32) -> (i32, i32, i32) {
    %c0_i32 = arith.constant 0 : i32
    %c0_i32_0 = arith.constant 0 : i32
    %c0_i32_1 = arith.constant 0 : i32
    %c0_i32_2 = arith.constant 0 : i32
    return %c0_i32, %c0_i32_0, %c0_i32_1 : i32, i32, i32
  }
  func.func @transform_15(%arg0: i32) -> (i32, i32, i32) {
    %c0_i32 = arith.constant 0 : i32
    %c0_i32_0 = arith.constant 0 : i32
    %c0_i32_1 = arith.constant 0 : i32
    %c0_i32_2 = arith.constant 0 : i32
    return %c0_i32, %c0_i32_0, %c0_i32_1 : i32, i32, i32
  }
  func.func @transform_16(%arg0: i32) -> (i32, i32, i32) {
    %c0_i32 = arith.constant 0 : i32
    %c0_i32_0 = arith.constant 0 : i32
    %c0_i32_1 = arith.constant 0 : i32
    %c0_i32_2 = arith.constant 0 : i32
    return %c0_i32, %c0_i32_0, %c0_i32_1 : i32, i32, i32
  }
  func.func @transform_17(%arg0: i32) -> (i32, i32, i32) {
    %c0_i32 = arith.constant 0 : i32
    %c0_i32_0 = arith.constant 0 : i32
    %c0_i32_1 = arith.constant 0 : i32
    %c0_i32_2 = arith.constant 0 : i32
    return %c0_i32, %c0_i32_0, %c0_i32_1 : i32, i32, i32
  }
  func.func @transform_18(%arg0: i32) -> (i32, i32) {
    %c0_i32 = arith.constant 0 : i32
    %c0_i32_0 = arith.constant 0 : i32
    %c0_i32_1 = arith.constant 0 : i32
    return %c0_i32, %c0_i32_0 : i32, i32
  }
  func.func @transform_19(%arg0: i32) -> (i32, i32) {
    %c0_i32 = arith.constant 0 : i32
    %c0_i32_0 = arith.constant 0 : i32
    %c0_i32_1 = arith.constant 0 : i32
    return %c0_i32, %c0_i32_0 : i32, i32
  }
  func.func @transform_20(%arg0: i32) -> (i32, i32, i32) {
    %c0_i32 = arith.constant 0 : i32
    %c0_i32_0 = arith.constant 0 : i32
    %c0_i32_1 = arith.constant 0 : i32
    %c0_i32_2 = arith.constant 0 : i32
    return %c0_i32, %c0_i32_0, %c0_i32_1 : i32, i32, i32
  }
  func.func @transform_21(%arg0: i32) -> (i32, i32, i32) {
    %c0_i32 = arith.constant 0 : i32
    %c0_i32_0 = arith.constant 0 : i32
    %c0_i32_1 = arith.constant 0 : i32
    %c0_i32_2 = arith.constant 0 : i32
    return %c0_i32, %c0_i32_0, %c0_i32_1 : i32, i32, i32
  }
  func.func @transform_22(%arg0: i32) -> (i32, i32, i32) {
    %c0_i32 = arith.constant 0 : i32
    %c0_i32_0 = arith.constant 0 : i32
    %c0_i32_1 = arith.constant 0 : i32
    %c0_i32_2 = arith.constant 0 : i32
    return %c0_i32, %c0_i32_0, %c0_i32_1 : i32, i32, i32
  }
  func.func @transform_23(%arg0: i32) -> (i32, i32, i32) {
    %c0_i32 = arith.constant 0 : i32
    %c0_i32_0 = arith.constant 0 : i32
    %c0_i32_1 = arith.constant 0 : i32
    %c0_i32_2 = arith.constant 0 : i32
    return %c0_i32, %c0_i32_0, %c0_i32_1 : i32, i32, i32
  }
  func.func @transform_24(%arg0: i32) -> (i32, i32, i32) {
    %c0_i32 = arith.constant 0 : i32
    %c0_i32_0 = arith.constant 0 : i32
    %c0_i32_1 = arith.constant 0 : i32
    %c0_i32_2 = arith.constant 0 : i32
    return %c0_i32, %c0_i32_0, %c0_i32_1 : i32, i32, i32
  }
  func.func @transform_25(%arg0: i32) -> (i32, i32, i32) {
    %c0_i32 = arith.constant 0 : i32
    %c0_i32_0 = arith.constant 0 : i32
    %c0_i32_1 = arith.constant 0 : i32
    %c0_i32_2 = arith.constant 0 : i32
    return %c0_i32, %c0_i32_0, %c0_i32_1 : i32, i32, i32
  }
  func.func @transform_26(%arg0: i32) -> (i32, i32, i32) {
    %c0_i32 = arith.constant 0 : i32
    %c0_i32_0 = arith.constant 0 : i32
    %c0_i32_1 = arith.constant 0 : i32
    %c0_i32_2 = arith.constant 0 : i32
    return %c0_i32, %c0_i32_0, %c0_i32_1 : i32, i32, i32
  }
  func.func @transform_27(%arg0: i32) -> (i32, i32, i32) {
    %c0_i32 = arith.constant 0 : i32
    %c0_i32_0 = arith.constant 0 : i32
    %c0_i32_1 = arith.constant 0 : i32
    %c0_i32_2 = arith.constant 0 : i32
    return %c0_i32, %c0_i32_0, %c0_i32_1 : i32, i32, i32
  }
  func.func @transform_28(%arg0: i32) -> (i32, i32, i32) {
    %c0_i32 = arith.constant 0 : i32
    %c0_i32_0 = arith.constant 0 : i32
    %c0_i32_1 = arith.constant 0 : i32
    %c0_i32_2 = arith.constant 0 : i32
    return %c0_i32, %c0_i32_0, %c0_i32_1 : i32, i32, i32
  }
  func.func @transform_29(%arg0: i32) -> (i32, i32, i32) {
    %c0_i32 = arith.constant 0 : i32
    %c0_i32_0 = arith.constant 0 : i32
    %c0_i32_1 = arith.constant 0 : i32
    %c0_i32_2 = arith.constant 0 : i32
    return %c0_i32, %c0_i32_0, %c0_i32_1 : i32, i32, i32
  }
  func.func @transform_30(%arg0: i32) -> (i32, i32, i32) {
    %c0_i32 = arith.constant 0 : i32
    %c0_i32_0 = arith.constant 0 : i32
    %c0_i32_1 = arith.constant 0 : i32
    %c0_i32_2 = arith.constant 0 : i32
    return %c0_i32, %c0_i32_0, %c0_i32_1 : i32, i32, i32
  }
  func.func @transform_31(%arg0: i32) -> (i32, i32, i32) {
    %c0_i32 = arith.constant 0 : i32
    %c0_i32_0 = arith.constant 0 : i32
    %c0_i32_1 = arith.constant 0 : i32
    %c0_i32_2 = arith.constant 0 : i32
    return %c0_i32, %c0_i32_0, %c0_i32_1 : i32, i32, i32
  }
  func.func @transform_32(%arg0: i32) -> (i32, i32, i32) {
    %c0_i32 = arith.constant 0 : i32
    %c0_i32_0 = arith.constant 0 : i32
    %c0_i32_1 = arith.constant 0 : i32
    %c0_i32_2 = arith.constant 0 : i32
    return %c0_i32, %c0_i32_0, %c0_i32_1 : i32, i32, i32
  }
  func.func @transform_33(%arg0: i32) -> (i32, i32, i32) {
    %c0_i32 = arith.constant 0 : i32
    %c0_i32_0 = arith.constant 0 : i32
    %c0_i32_1 = arith.constant 0 : i32
    %c0_i32_2 = arith.constant 0 : i32
    return %c0_i32, %c0_i32_0, %c0_i32_1 : i32, i32, i32
  }
  func.func @transform_34(%arg0: i32) -> (i32, i32, i32) {
    %c0_i32 = arith.constant 0 : i32
    %c0_i32_0 = arith.constant 0 : i32
    %c0_i32_1 = arith.constant 0 : i32
    %c0_i32_2 = arith.constant 0 : i32
    return %c0_i32, %c0_i32_0, %c0_i32_1 : i32, i32, i32
  }
  func.func @transform_35(%arg0: i32) -> (i32, i32, i32) {
    %c0_i32 = arith.constant 0 : i32
    %c0_i32_0 = arith.constant 0 : i32
    %c0_i32_1 = arith.constant 0 : i32
    %c0_i32_2 = arith.constant 0 : i32
    return %c0_i32, %c0_i32_0, %c0_i32_1 : i32, i32, i32
  }
  func.func @transform_36(%arg0: i32) -> (i32, i32, i32) {
    %c0_i32 = arith.constant 0 : i32
    %c0_i32_0 = arith.constant 0 : i32
    %c0_i32_1 = arith.constant 0 : i32
    %c0_i32_2 = arith.constant 0 : i32
    return %c0_i32, %c0_i32_0, %c0_i32_1 : i32, i32, i32
  }
  func.func @transform_37(%arg0: i32) -> (i32, i32, i32) {
    %c0_i32 = arith.constant 0 : i32
    %c0_i32_0 = arith.constant 0 : i32
    %c0_i32_1 = arith.constant 0 : i32
    %c0_i32_2 = arith.constant 0 : i32
    return %c0_i32, %c0_i32_0, %c0_i32_1 : i32, i32, i32
  }
  func.func @transform_38(%arg0: i32) -> (i32, i32) {
    %c0_i32 = arith.constant 0 : i32
    %c0_i32_0 = arith.constant 0 : i32
    %c0_i32_1 = arith.constant 0 : i32
    return %c0_i32, %c0_i32_0 : i32, i32
  }
  func.func @transform_39(%arg0: i32) -> (i32, i32) {
    %c0_i32 = arith.constant 0 : i32
    %c0_i32_0 = arith.constant 0 : i32
    %c0_i32_1 = arith.constant 0 : i32
    return %c0_i32, %c0_i32_0 : i32, i32
  }
  func.func @transform_40(%arg0: i32) -> (i32, i32, i32) {
    %c0_i32 = arith.constant 0 : i32
    %c0_i32_0 = arith.constant 0 : i32
    %c0_i32_1 = arith.constant 0 : i32
    return %arg0, %c0_i32, %c0_i32_0 : i32, i32, i32
  }
}

</mosaic_0001>

<bundles_post_ra>
// kernel: multires_traffic_transformer.1
= control target key start
LH: loop header
LB: loop body
LE: loop exit
PB: predicated region body
PF: predicated region fallthrough
CT: control target
= control target key end

     0   :  { %s11846_s6 = smov 1   ;;  %s11847_s10 = smov 2   ;;  %s13335_s0 = inlined_call_operand.smem [shape: u32[41], index: -1, kind: input, shape index: {}] }
   0x1   :  { %s11912_s5 = sld [smem:[%s13335_s0]]   ;;  %s11848_s14 = smov 3  }
   0x2   :  { %s11917_s9 = sld [smem:[%s13335_s0 + %s11846_s6]]   ;;  %s11849_s18 = smov 4  }
   0x3   :  { %s11922_s13 = sld [smem:[%s13335_s0 + %s11847_s10]]   ;;  %s11850_s22 = smov 5  }
   0x4   :  { %s11927_s17 = sld [smem:[%s13335_s0 + %s11848_s14]]   ;;  %s11851_s26 = smov 6  }
   0x5   :  { %s11932_s21 = sld [smem:[%s13335_s0 + %s11849_s18]]   ;;  %s11852_s30 = smov 7  }
   0x6   :  { %s11937_s25 = sld [smem:[%s13335_s0 + %s11850_s22]]   ;;  %s11853_s4 = smov 8  }
   0x7   :  { %13401 = sst [smem:[#allocation2_spill]] %s11912_s5  ;;  %s11854_s10 = smov 9  }
   0x8   :  { %13402 = sst [smem:[#allocation3_spill]] %s11917_s9  ;;  %s11855_s15 = smov 10  }
   0x9   :  { %13403 = sst [smem:[#allocation4_spill]] %s11922_s13  ;;  %s11856_s20 = smov 11  }
   0xa   :  { %13404 = sst [smem:[#allocation5_spill]] %s11927_s17  ;;  %s11858_s1 = smov 13  }
   0xb   :  { %13405 = sst [smem:[#allocation6_spill]] %s11932_s21  ;;  %s11859_s7 = smov 14  }
   0xc   :  { %13406 = sst [smem:[#allocation7_spill]] %s11937_s25  ;;  %s11861_s22 = smov 16  }
   0xd   :  { %s11942_s29 = sld [smem:[%s13335_s0 + %s11851_s26]]   ;;  %s11857_s26 = smov 12  }
   0xe   :  { %s11947_s3 = sld [smem:[%s13335_s0 + %s11852_s30]]   ;;  %s11862_s28 = smov 17  }
   0xf   :  { %s11952_s8 = sld [smem:[%s13335_s0 + %s11853_s4]]  }
  0x10   :  { %s11957_s14 = sld [smem:[%s13335_s0 + %s11854_s10]]  }
  0x11   :  { %s11962_s19 = sld [smem:[%s13335_s0 + %s11855_s15]]   ;;  %s11860_s15 = smov 15  }
  0x12   :  { %s11967_s24 = sld [smem:[%s13335_s0 + %s11856_s20]]  }
  0x13   :  { %13407 = sst [smem:[#allocation8_spill]] %s11942_s29 }
  0x14   :  { %13408 = sst [smem:[#allocation9_spill]] %s11947_s3 }
  0x15   :  { %13409 = sst [smem:[#allocation10_spill]] %s11952_s8 }
  0x16   :  { %13410 = sst [smem:[#allocation11_spill]] %s11957_s14 }
  0x17   :  { %13411 = sst [smem:[#allocation12_spill]] %s11962_s19 }
  0x18   :  { %13412 = sst [smem:[#allocation13_spill]] %s11967_s24 }
  0x19   :  { %s11972_s30 = sld [smem:[%s13335_s0 + %s11857_s26]]  }
  0x1a   :  { %s11977_s6 = sld [smem:[%s13335_s0 + %s11858_s1]]  }
  0x1b   :  { %s11982_s12 = sld [smem:[%s13335_s0 + %s11859_s7]]   ;;  %s11863_s7 = smov 18  }
  0x1c   :  { %s11987_s20 = sld [smem:[%s13335_s0 + %s11860_s15]]   ;;  %s11864_s15 = smov 19  }
  0x1d   :  { %s11992_s27 = sld [smem:[%s13335_s0 + %s11861_s22]]   ;;  %s11865_s22 = smov 20  }
  0x1e   :  { %s11997_s4 = sld [smem:[%s13335_s0 + %s11862_s28]]   ;;  %s11866_s28 = smov 21  }
  0x1f   :  { %13413 = sst [smem:[#allocation14_spill]] %s11972_s30 }
  0x20   :  { %13414 = sst [smem:[#allocation15_spill]] %s11977_s6 }
  0x21   :  { %13415 = sst [smem:[#allocation16_spill]] %s11982_s12 }
  0x22   :  { %13416 = sst [smem:[#allocation17_spill]] %s11987_s20 }
  0x23   :  { %13417 = sst [smem:[#allocation18_spill]] %s11992_s27 }
  0x24   :  { %13418 = sst [smem:[#allocation19_spill]] %s11997_s4 }
  0x25   :  { %s12002_s17 = sld [smem:[%s13335_s0 + %s11863_s7]]   ;;  %s11867_s7 = smov 22  }
  0x26   :  { %s12007_s9 = sld [smem:[%s13335_s0 + %s11864_s15]]   ;;  %s11868_s15 = smov 23  }
  0x27   :  { %s12012_s27 = sld [smem:[%s13335_s0 + %s11865_s22]]   ;;  %s11869_s22 = smov 24  }
  0x28   :  { %s12017_s4 = sld [smem:[%s13335_s0 + %s11866_s28]]   ;;  %s11870_s28 = smov 25  }
  0x2b   :  { %13419 = sst [smem:[#allocation20_spill]] %s12002_s17 }
  0x2c   :  { %13420 = sst [smem:[#allocation21_spill]] %s12007_s9 }
  0x2d   :  { %13421 = sst [smem:[#allocation22_spill]] %s12012_s27 }
  0x2e   :  { %13422 = sst [smem:[#allocation23_spill]] %s12017_s4 }
  0x2f   :  { %s12022_s17 = sld [smem:[%s13335_s0 + %s11867_s7]]   ;;  %s11871_s7 = smov 26  }
  0x30   :  { %s12027_s9 = sld [smem:[%s13335_s0 + %s11868_s15]]   ;;  %s11872_s15 = smov 27  }
  0x31   :  { %s12032_s27 = sld [smem:[%s13335_s0 + %s11869_s22]]   ;;  %s11873_s22 = smov 28  }
  0x32   :  { %s12037_s4 = sld [smem:[%s13335_s0 + %s11870_s28]]   ;;  %s11874_s28 = smov 29  }
  0x35   :  { %13423 = sst [smem:[#allocation24_spill]] %s12022_s17 }
  0x36   :  { %13424 = sst [smem:[#allocation25_spill]] %s12027_s9 }
  0x37   :  { %13425 = sst [smem:[#allocation26_spill]] %s12032_s27 }
  0x38   :  { %13426 = sst [smem:[#allocation27_spill]] %s12037_s4 }
  0x39   :  { %s12042_s17 = sld [smem:[%s13335_s0 + %s11871_s7]]   ;;  %s11875_s7 = smov 30  }
  0x3a   :  { %s12047_s9 = sld [smem:[%s13335_s0 + %s11872_s15]]   ;;  %s11876_s15 = smov 31  }
  0x3b   :  { %s12052_s27 = sld [smem:[%s13335_s0 + %s11873_s22]]   ;;  %s11877_s22 = smov 32  }
  0x3c   :  { %s12057_s4 = sld [smem:[%s13335_s0 + %s11874_s28]]   ;;  %s11878_s28 = smov 33  }
  0x3f   :  { %13427 = sst [smem:[#allocation28_spill]] %s12042_s17 }
  0x40   :  { %13428 = sst [smem:[#allocation29_spill]] %s12047_s9 }
  0x41   :  { %13429 = sst [smem:[#allocation30_spill]] %s12052_s27 }
  0x42   :  { %13430 = sst [smem:[#allocation31_spill]] %s12057_s4 }
  0x43   :  { %s12062_s17 = sld [smem:[%s13335_s0 + %s11875_s7]]   ;;  %s11879_s7 = smov 34  }
  0x44   :  { %s12067_s9 = sld [smem:[%s13335_s0 + %s11876_s15]]   ;;  %s11880_s15 = smov 35  }
  0x45   :  { %s12072_s27 = sld [smem:[%s13335_s0 + %s11877_s22]]   ;;  %s11881_s22 = smov 36  }
  0x46   :  { %s12077_s4 = sld [smem:[%s13335_s0 + %s11878_s28]]   ;;  %s11882_s28 = smov 37  }
  0x49   :  { %13431 = sst [smem:[#allocation32_spill]] %s12062_s17 }
  0x4a   :  { %13432 = sst [smem:[#allocation33_spill]] %s12067_s9 }
  0x4b   :  { %13433 = sst [smem:[#allocation34_spill]] %s12072_s27 }
  0x4c   :  { %13434 = sst [smem:[#allocation35_spill]] %s12077_s4 }
  0x4d   :  { %s12082_s17 = sld [smem:[%s13335_s0 + %s11879_s7]]   ;;  %s11883_s7 = smov 38  }
  0x4e   :  { %s12087_s9 = sld [smem:[%s13335_s0 + %s11880_s15]]   ;;  %s11884_s15 = smov 39  }
  0x4f   :  { %s12092_s27 = sld [smem:[%s13335_s0 + %s11881_s22]]   ;;  %s11885_s22 = smov 40  }
  0x50   :  { %s12097_s4 = sld [smem:[%s13335_s0 + %s11882_s28]]   ;;  %s12114_s28 = smov 0  }
  0x53   :  { %13435 = sst [smem:[#allocation36_spill]] %s12082_s17 }
  0x54   :  { %13436 = sst [smem:[#allocation37_spill]] %s12087_s9 }
  0x55   :  { %13437 = sst [smem:[#allocation38_spill]] %s12092_s27 }
  0x56   :  { %s12102_s17 = sld [smem:[%s13335_s0 + %s11883_s7]]  }
  0x57   :  { %s12107_s9 = sld [smem:[%s13335_s0 + %s11884_s15]]  }
  0x58   :  { %s12112_s27 = sld [smem:[%s13335_s0 + %s11885_s22]]  }
  0x5c   :  { %13438 = sst [smem:[#allocation39_spill]] %s12102_s17 }
  0x5d   :  { %13439 = sst [smem:[#allocation40_spill]] %s12107_s9 }
  0x5e   :  { %13440 = sst [smem:[#allocation41_spill]] %s12112_s27 }
  0x5f LB: > { %s13441_s30 = sld [smem:[#allocation14_spill]]  ;;  %s13442_s29 = sld [smem:[#allocation8_spill]]  ;;  %s11844_s28 = sphi %s12114_s28, %s91_s28  }
  0x60   : > { %s13443_s24 = sld [smem:[#allocation13_spill]]  ;;  %s13444_s20 = sld [smem:[#allocation17_spill]] }
  0x61   : > { %s13445_s19 = sld [smem:[#allocation12_spill]]  ;;  %s13446_s14 = sld [smem:[#allocation11_spill]] }
  0x62   : > { %s13447_s12 = sld [smem:[#allocation16_spill]]  ;;  %s13448_s8 = sld [smem:[#allocation10_spill]] }
  0x63   : > { %s13449_s6 = sld [smem:[#allocation15_spill]]  ;;  %s13450_s3 = sld [smem:[#allocation9_spill]] }
  0x64   : > { %13451 = sst [smem:[#allocation42_spill]] %s11844_s28  ;;  %s9566_s1 = sadd.s32 4294967295, %s11844_s28  }
  0x65   : > { %p9570_p0 = scmp.ge.s32.totalorder %s11844_s28, 1  ;;  %p1112_p1 = scmp.lt.s32.totalorder %s11844_s28, 3 }
  0x67   : > { %p1113_p2 = pnand %p9570_p0, %p1112_p1 }
  0x69   : > { %1116 = sbr.rel (%p1113_p2) target bundleno = 14721 (0x3981), region = 180 }
  0x70   : > { %s13452_s21 = sld [smem:[#allocation6_spill]]  ;;  %vm1241_vm0 = vcmask 1043456   ;;  %v11886_v1 = vmov 0.0   ;;  %vm11887_vm1 = vmmov 0   ;;  %s13453_s5 = sld [smem:[#allocation2_spill]]  ;;  %v1317_v2 = vld [vmem:[%s13442_s29] sm:$0xff] }
  0x71   : > { %10509 = vmatprep.subr.mxu0 %v11886_v1  ;;  %10511 = vmatprep.mubr.msk.f32.mxu0 %vm11887_vm1, %v11886_v1  ;;  %p1214_p3 = scmp.lt.s32.totalorder %s9566_s1, 1  ;;  %v1318_v3 = vld [vmem:[%s13442_s29 + $0x8] sm:$0xff]  ;;  %v11888_v4 = vmov 0.0|0.0   ;;  %s13455_s25 = sld [smem:[#allocation7_spill]]  ;;  %vm1237_vm2 = vcmask 31744   ;;  %v1319_v7 = vld [vmem:[%s13442_s29 + $0x10] sm:$0xff] }
  0x72   : > { %10956 = vmatprep.subr.bf16.mxu1 %v11888_v4  ;;  %v10957_v5 = vpack.c.bf16 %v1318_v3, %v1317_v2  ;;  %10522 = vmatprep.mubr.msk.f32.mxu1 %vm11887_vm1, %v11886_v1  ;;  %s13456_s13 = sld [smem:[#allocation4_spill]]  ;;  %v1320_v8 = vld [vmem:[%s13442_s29 + $0x18] sm:$0xff]  ;;  %vm1333_vm3 = vcmask 261120   ;;  %v9579_v16 = vld [vmem:[%s13450_s3] ss:$0 sm:$0xff]  ;;  %s13378_s7 = smov 120  }
  0x73   : > { %s13509_s1 = smov (!%p1214_p3, %s9566_s1), 1  ;;  %v10960_v9 = vpack.c.bf16 %v1320_v8, %v1319_v7  ;;  %s13380_s10 = smov 96   ;;  %vm1410_vm4 = vcmask 64512   ;;  %vm2080_vm5 = vcmask 130048   ;;  %vm2082_vm6 = vcmask 195584  }
  0x74   : > { %13454 = sst [smem:[#allocation43_spill]] %s13509_s1  ;;  %10958 = vmatpush3.bf16.msra.mxu1 %v10957_v5  ;;  %s9571_s0 = sshll.u32 %s13509_s1, 3  ;;  %vm3951_vm7 = vcmask 1045504   ;;  %vm3944_vm8 = vcmask 48128   ;;  %vm12559_vm9 = vmpackc.low %vm1410_vm4, %vm1410_vm4  ;;  %vm11903_vm10 = vmmov 1   ;;  %vm4224_vm12 = vcmask 93184  }
  0x75   : > { %10959 = vmatprep.subr.bf16.mxu1 %v11888_v4  ;;  %s13374_s11 = smov 80   ;;  %s13382_s15 = smov 88   ;;  %vm12570_vm11 = vmpackc.low %vm1241_vm0, %vm11903_vm10  ;;  %vm4220_vm13 = vcmask 97280   ;;  %vm5059_vm14 = vcmask 257024   ;;  %vm5375_vm15 = vcmask 60416  }
  0x76   : > { %v1229_v0 = vld [vmem:[%s13452_s21] sm:$0xf]  ;;  %s1217_s2 = scalar_lea.vmem %s13453_s5, %s9571_s0  ;;  %s13368_s16 = smov 72  }
  0x77   : > { %10510 = vmatpush3.msk.msra.mxu0 %vm1241_vm0, %v1229_v0  ;;  %v1228_v6 = vld [vmem:[%s1217_s2] sm:$0xff]  ;;  %s13372_s18 = smov 112   ;;  %s13366_s22 = smov 104  }
  0x78   : > { %10525 = vmatprep.subr.mxu0 %v11886_v1  ;;  %10512 = vmatmul.mubr.msk.f32.vlgmr.msra.gmra.mrb[0].mxu0 %vm1237_vm2, %v1228_v6  ;;  %v9576_v10 = vld [vmem:[%s13455_s25] ss:$0 sm:$0xff]  ;;  %s13370_s23 = smov 56   ;;  %s13376_s26 = smov 64  }
  0x79   : > { %10527 = vmatprep.mubr.msk.f32.mxu0 %vm11887_vm1, %v11886_v1  ;;  %10961 = vmatpush3.bf16.msra.mxu1 %v10960_v9  ;;  %v1315_v12 = vld [vmem:[%s13456_s13] sm:$0xff]  ;;  %s13358_s0 = smov 40   ;;  %s13356_s2 = smov 48  }
  0x7a   : > { %10535 = vmatprep.subr.mxu1 %v11886_v1  ;;  %v1322_v9 = vld [vmem:[%s13448_s8] sm:$0xff]  ;;  %s13472_s5 = smov 120   ;;  %s13481_s13 = smov 56  }
  0x7b   : > { %s13485_s21 = sld [smem:[#allocation28_spill]]  ;;  %s13487_s25 = sld [smem:[#allocation26_spill]] }
  0x7c   : > { %s13492_s28 = sld [smem:[#allocation36_spill]]  ;;  %s13495_s9 = sld [smem:[#allocation33_spill]] }
  0x82   : > { %s13493_s27 = smov %s13492_s28 }
 0x14b   : > { %v1311_v11 = vpop.f32.mrb[0].mxu0 }
 0x14c   : > { %v1312_v13 = vadd.f32 %v9576_v10, %v1311_v11  ;;  %v10513_v14 = vpop.f32.mrb[1].mxu0  ;;  %v1323_v10 = vld [vmem:[%s13448_s8 + $0x8] sm:$0xff]  ;;  %v1324_v11 = vld [vmem:[%s13448_s8 + $0x10] sm:$0xff] }
 0x14e   : > { %v12145_v15 = vadd.f32 %v1315_v12, %v1312_v13  ;;  %v10963_v12 = vpack.c.bf16 %v1323_v10, %v1322_v9  ;;  %v1325_v13 = vld [vmem:[%s13448_s8 + $0x18] sm:$0xff]  ;;  %v2430_v10 = vld [vmem:[%s13447_s12 + $0x188] sm:$0xff] }
 0x14f   : > { %v10966_v14 = vpack.c.bf16 %v1325_v13, %v1324_v11 }
 0x150   : > { %10523 = vmatmul.mubr.msk.f32.vlgmr.msra.gmra.mrb[0].mxu1 %vm1333_vm3, %v12145_v15 }
 0x151   : > { %10537 = vmatprep.mubr.msk.f32.mxu1 %vm11887_vm1, %v11886_v1 }
 0x223   : > { %v1403_v17 = vpop.f32.mrb[0].mxu1 }
 0x224   : > { %v1404_v18 = vadd.f32 %v9579_v16, %v1403_v17  ;;  %v10524_v19 = vpop.f32.mrb[1].mxu1 }
 0x226   : > { %1572 = vrot.lane.b32.xlu1 %v1404_v18, %s13378_s7  ;;  %1408 = vrot.lane.b32.xlu0 %v1404_v18, %s13380_s10 }
 0x22a   : > { %1739 = vrot.lane.b32.xlu1 %v1404_v18, %s13374_s11  ;;  %1574 = vrot.lane.b32.xlu0 %v1404_v18, %s13382_s15 }
 0x22e   : > { %1904 = vrot.lane.b32.xlu1 %v1404_v18, %s13368_s16  ;;  %1737 = vrot.lane.b32.xlu0 %v1404_v18, %s13372_s18 }
 0x232   : > { %1902 = vrot.lane.b32.xlu0 %v1404_v18, %s13366_s22 }
 0x298   : > { %v1573_v20 = vpop.permute.xlu1 %1572  ;;  %v1409_v21 = vpop.permute.xlu0 %1408 }
 0x299   : > { %10526 = vmatpush3.xpose.msk.msra.mxu0 %vm1410_vm4, %v1409_v21 }
 0x29a   : > { %10530 = vmatprep.subr.mxu0 %v11886_v1 }
 0x29c   : > { %10528 = vmatmul.mubr.msk.f32.vlgmr.msra.gmra.mrb[2].mxu0 %vm1410_vm4, %v1404_v18  ;;  %v1575_v22 = vpop.permute.xlu0 %1574  ;;  %v1740_v23 = vpop.permute.xlu1 %1739 }
 0x29d   : > { %10536 = vmatpush3.xpose.msk.msra.mxu1 %vm1410_vm4, %v1575_v22  ;;  %10532 = vmatprep.mubr.msk.f32.mxu0 %vm11887_vm1, %v11886_v1 }
 0x29e   : > { %10545 = vmatprep.subr.mxu1 %v11886_v1 }
 0x2a0   : > { %10538 = vmatmul.mubr.msk.f32.vlgmr.msra.gmra.mrb[2].mxu1 %vm1410_vm4, %v1573_v20  ;;  %v1738_v24 = vpop.permute.xlu0 %1737  ;;  %v1905_v25 = vpop.permute.xlu1 %1904 }
 0x2a1   : > { %10546 = vmatpush3.xpose.msk.msra.mxu1 %vm1410_vm4, %v1740_v23  ;;  %10547 = vmatprep.mubr.msk.f32.mxu1 %vm11887_vm1, %v11886_v1 }
 0x2a2   : > { %10555 = vmatprep.subr.mxu1 %v11886_v1 }
 0x2a4   : > { %10548 = vmatmul.mubr.msk.f32.vlgmr.msra.gmra.mrb[4].mxu1 %vm1410_vm4, %v1738_v24  ;;  %v1903_v26 = vpop.permute.xlu0 %1902 }
 0x2a5   : > { %10556 = vmatpush3.xpose.msk.msra.mxu1 %vm1410_vm4, %v1905_v25  ;;  %10557 = vmatprep.mubr.msk.f32.mxu1 %vm11887_vm1, %v11886_v1 }
 0x2a6   : > { %10962 = vmatprep.subr.bf16.mxu1 %v11888_v4 }
 0x2a8   : > { %10558 = vmatmul.mubr.msk.f32.vlgmr.msra.gmra.mrb[6].mxu1 %vm1410_vm4, %v1903_v26 }
 0x2a9   : > { %10573 = vmatprep.mubr.msk.f32.mxu1 %vm11887_vm1, %v11886_v1  ;;  %10964 = vmatpush3.bf16.msra.mxu1 %v10963_v12 }
 0x2aa   : > { %10965 = vmatprep.subr.bf16.mxu1 %v11888_v4 }
 0x2ad   : > { %10967 = vmatpush3.bf16.msra.mxu1 %v10966_v14 }
 0x36f   : > { %v1481_v27 = vpop.f32.mrb[2].mxu0 }
 0x370   : > { %v10529_v28 = vpop.f32.mrb[3].mxu0  ;;  %v1485_v29 = vsel %vm1410_vm4, %v1481_v27, -inf }
 0x371   : > { %1486 = vmax.xlane.f32.xlu1 %v1485_v29 }
 0x373   : > { %v1646_v30 = vpop.f32.mrb[2].mxu1 }
 0x374   : > { %v10539_v31 = vpop.f32.mrb[3].mxu1  ;;  %v1650_v32 = vsel %vm1410_vm4, %v1646_v30, -inf }
 0x375   : > { %1651 = vmax.xlane.f32.xlu0 %v1650_v32 }
 0x377   : > { %v1811_v33 = vpop.f32.mrb[4].mxu1 }
 0x378   : > { %v10549_v34 = vpop.f32.mrb[5].mxu1  ;;  %v1815_v35 = vsel %vm1410_vm4, %v1811_v33, -inf }
 0x379   : > { %1816 = vmax.xlane.f32.xlu0 %v1815_v35  ;;  %v9593_v34 = vld [vmem:[%s13446_s14] ss:$0 sm:$0xff] }
 0x37b   : > { %v1976_v36 = vpop.f32.mrb[6].mxu1 }
 0x37c   : > { %v10559_v37 = vpop.f32.mrb[7].mxu1  ;;  %v1980_v38 = vsel %vm1410_vm4, %v1976_v36, -inf }
 0x382   : > { %1656 = vrot.lane.b32.xlu1 %v1404_v18, %s13370_s23 }
 0x38f   : > { %1491 = vrot.lane.b32.xlu0 %v1404_v18, %s13376_s26 }
 0x393   : > { %1986 = vrot.lane.b32.xlu0 %v1404_v18, %s13358_s0  ;;  %s13364_s0 = smov 16  }
 0x3a6   : > { %1981 = vmax.xlane.f32.xlu1 %v1980_v38 }
 0x3b7   : > { %1821 = vrot.lane.b32.xlu1 %v1404_v18, %s13356_s2  ;;  %s13360_s2 = smov 8  }
 0x3fe   : > { %v1487_v39 = vpop.xlane.xlu1 %1486 }
 0x3ff   : > { %v1488_v40 = vsub.f32 %v1481_v27, %v1487_v39 }
 0x401   : > { %v1489_v41 = vmul.f32 1.442695, %v1488_v40 }
 0x402   : > { %v1652_v42 = vpop.xlane.xlu0 %1651  ;;  %v1657_v50 = vpop.permute.xlu1 %1656 }
 0x403   : > { %11646 = vpow2.f32 %v1489_v41  ;;  %v1653_v43 = vsub.f32 %v1646_v30, %v1652_v42 }
 0x405   : > { %v1654_v44 = vmul.f32 1.442695, %v1653_v43 }
 0x406   : > { %v1817_v45 = vpop.xlane.xlu0 %1816 }
 0x407   : > { %11648 = vpow2.f32 %v1654_v44  ;;  %v1818_v46 = vsub.f32 %v1811_v33, %v1817_v45  ;;  %v2195_v45 = vld [vmem:[%s13441_s30 + $0x8] sm:$0xff] }
 0x409   : > { %v1819_v47 = vmul.f32 1.442695, %v1818_v46  ;;  %v2199_v46 = vld [vmem:[%s13441_s30 + $0x28] sm:$0xff] }
 0x40a   : > { %v1492_v48 = vpop.permute.xlu0 %1491 }
 0x40b   : > { %11650 = vpow2.f32 %v1819_v47  ;;  %10531 = vmatpush3.msra.mxu0 %v1492_v48  ;;  %v2197_v47 = vld [vmem:[%s13441_s30 + $0x18] sm:$0xff]  ;;  %v10968_v48 = vpack.c.bf16 %v2199_v46, %v2195_v45  ;;  %v2386_v45 = vld [vmem:[%s13447_s12 + $0x28] sm:$0xff] }
 0x40c   : > { %10540 = vmatprep.subr.mxu0 %v11886_v1 }
 0x40d   : > { %v11647_v49 = vpop.eup %11646 }
 0x40e   : > { %10533 = vmatmul.mubr.msk.f32.vlgmr.msra.gmra.mrb[4].mxu0 %vm1410_vm4, %v11647_v49  ;;  %v1567_v55 = vsel %vm1410_vm4, %v11647_v49, 0.0  ;;  %v1987_v60 = vpop.permute.xlu0 %1986  ;;  %v2194_v49 = vld [vmem:[%s13441_s30] sm:$0xff] }
 0x40f   : > { %10541 = vmatpush3.msra.mxu0 %v1657_v50  ;;  %10542 = vmatprep.mubr.msk.f32.mxu0 %vm11887_vm1, %v11886_v1  ;;  %v2198_v50 = vld [vmem:[%s13441_s30 + $0x20] sm:$0xff] }
 0x410   : > { %10550 = vmatprep.subr.mxu0 %v11886_v1 }
 0x411   : > { %v11649_v51 = vpop.eup %11648 }
 0x412   : > { %10543 = vmatmul.mubr.msk.f32.vlgmr.msra.gmra.mrb[6].mxu0 %vm1410_vm4, %v11649_v51  ;;  %v1732_v52 = vsel %vm1410_vm4, %v11649_v51, 0.0 }
 0x413   : > { %1733 = vadd.xlane.f32.xlu1 %v1732_v52  ;;  %10552 = vmatprep.mubr.msk.f32.mxu0 %vm11887_vm1, %v11886_v1  ;;  %v10970_v52 = vpack.c.bf16 %v2198_v50, %v2194_v49  ;;  %v2403_v49 = vld [vmem:[%s13447_s12 + $0xb0] sm:$0xff]  ;;  %v2404_v50 = vld [vmem:[%s13447_s12 + $0xb8] sm:$0xff] }
 0x415   : > { %v11651_v53 = vpop.eup %11650 }
 0x416   : > { %v1897_v54 = vsel %vm1410_vm4, %v11651_v53, 0.0 }
 0x417   : > { %1898 = vadd.xlane.f32.xlu0 %v1897_v54  ;;  %1568 = vadd.xlane.f32.xlu1 %v1567_v55  ;;  %v2200_v54 = vld [vmem:[%s13441_s30 + $0x30] sm:$0xff] }
 0x433   : > { %v1982_v56 = vpop.xlane.xlu1 %1981 }
 0x434   : > { %v1983_v57 = vsub.f32 %v1976_v36, %v1982_v56  ;;  %v2203_v56 = vld [vmem:[%s13441_s30 + $0x48] sm:$0xff] }
 0x436   : > { %v1984_v58 = vmul.f32 1.442695, %v1983_v57  ;;  %v2207_v57 = vld [vmem:[%s13441_s30 + $0x68] sm:$0xff] }
 0x437   : > { %v1822_v59 = vpop.permute.xlu1 %1821 }
 0x438   : > { %11652 = vpow2.f32 %v1984_v58  ;;  %10551 = vmatpush3.msra.mxu0 %v1822_v59  ;;  %v2205_v58 = vld [vmem:[%s13441_s30 + $0x58] sm:$0xff]  ;;  %v10972_v59 = vpack.c.bf16 %v2207_v57, %v2203_v56  ;;  %v10996_v57 = vpack.c.bf16 %v2404_v50, %v2403_v49  ;;  %v2212_v50 = vlaneseq }
 0x439   : > { %10553 = vmatmul.mubr.msk.f32.vlgmr.msra.gmra.mrb[8].mxu0 %vm1410_vm4, %v11651_v53  ;;  %10560 = vmatprep.subr.mxu0 %v11886_v1  ;;  %v2196_v53 = vld [vmem:[%s13441_s30 + $0x10] sm:$0xff]  ;;  %v2388_v56 = vld [vmem:[%s13447_s12 + $0x38] sm:$0xff] }
 0x43a   : > { %10561 = vmatpush3.msra.mxu0 %v1987_v60  ;;  %10562 = vmatprep.mubr.msk.f32.mxu0 %vm11887_vm1, %v11886_v1  ;;  %v10978_v55 = vpack.c.bf16 %v2200_v54, %v2196_v53  ;;  %v2209_v60 = vld [vmem:[%s13441_s30 + $0x78] sm:$0xff] }
 0x43b   : > { %10969 = vmatprep.subr.bf16.mxu0 %v10968_v48  ;;  %v2417_v48 = vld [vmem:[%s13447_s12 + $0x120] sm:$0xff] }
 0x442   : > { %v11653_v61 = vpop.eup %11652 }
 0x443   : > { %10563 = vmatmul.mubr.msk.f32.vlgmr.msra.gmra.mrb[10].mxu0 %vm1410_vm4, %v11653_v61  ;;  %v2062_v62 = vsel %vm1410_vm4, %v11653_v61, 0.0  ;;  %v2202_v61 = vld [vmem:[%s13441_s30 + $0x40] sm:$0xff] }
 0x444   : > { %2063 = vadd.xlane.f32.xlu0 %v2062_v62  ;;  %2299 = vmatprep.mubr.f32.mxu0 %v11886_v1  ;;  %v2206_v62 = vld [vmem:[%s13441_s30 + $0x60] sm:$0xff] }
 0x445   : > { %10971 = vmatpush1.bf16.msra.mxu0 %v10970_v52  ;;  %v2436_v52 = vld [vmem:[%s13447_s12 + $0x1b8] sm:$0xff] }
 0x446   : > { %10973 = vmatprep.subr.bf16.mxu0 %v10972_v59  ;;  %v2419_v59 = vld [vmem:[%s13447_s12 + $0x130] sm:$0xff] }
 0x4a0   : > { %v1734_v63 = vpop.xlane.xlu1 %1733 }
 0x4a1   : > { %11654 = vrcp.f32 %v1734_v63  ;;  %v10980_v63 = vpack.c.bf16 %v2209_v60, %v2205_v58  ;;  %v2420_v60 = vld [vmem:[%s13447_s12 + $0x138] sm:$0xff] }
 0x4a4   : > { %v1899_v8 = vpop.xlane.xlu0 %1898  ;;  %v1569_v25 = vpop.xlane.xlu1 %1568 }
 0x4a5   : > { %11656 = vrcp.f32 %v1899_v8  ;;  %v2429_v8 = vld [vmem:[%s13447_s12 + $0x180] sm:$0xff] }
 0x4a6   : > { %v11016_v11 = vpack.c.bf16 %v2430_v10, %v2429_v8  ;;  %v2422_v10 = vld [vmem:[%s13447_s12 + $0x148] sm:$0xff] }
 0x4ab   : > { %v11655_v3 = vpop.eup %11654 }
 0x4af   : > { %v11657_v17 = vpop.eup %11656 }
 0x4d1   : > { %v2064_v16 = vpop.xlane.xlu0 %2063 }
 0x4d2   : > { %11658 = vrcp.f32 %v2064_v16  ;;  %v9595_v16 = vld [vmem:[%s13445_s19] ss:$0 sm:$0xff] }
 0x4d3   : > { %11660 = vrcp.f32 %v1569_v25  ;;  %v2400_v25 = vld [vmem:[%s13447_s12 + $0x98] sm:$0xff] }
 0x4dc   : > { %v11659_v21 = vpop.eup %11658 }
 0x4dd   : > { %v11661_v26 = vpop.eup %11660 }
 0x4e1   : > { %v1563_v0 = vpop.f32.mrb[4].mxu0 }
 0x4e2   : > { %v10534_v2 = vpop.f32.mrb[5].mxu0  ;;  %v1571_v29 = vmul.f32 %v11661_v26, %v1563_v0  ;;  %v10974_v0 = vpack.c.bf16 %v2206_v62, %v2202_v61  ;;  %v2431_v26 = vld [vmem:[%s13447_s12 + $0x190] sm:$0xff]  ;;  %v2405_v61 = vld [vmem:[%s13447_s12 + $0xc0] sm:$0xff]  ;;  %v2406_v62 = vld [vmem:[%s13447_s12 + $0xc8] sm:$0xff] }
 0x4e3   : > { %v2204_v2 = vld [vmem:[%s13441_s30 + $0x50] sm:$0xff] }
 0x4e4   : > { %10975 = vmatpush1.bf16.msra.mxu0 %v10974_v0  ;;  %v2438_v0 = vld [vmem:[%s13447_s12 + $0x1c8] sm:$0xff] }
 0x4e5   : > { %v1728_v5 = vpop.f32.mrb[6].mxu0 }
 0x4e6   : > { %v1736_v6 = vmul.f32 %v11655_v3, %v1728_v5  ;;  %v10544_v7 = vpop.f32.mrb[7].mxu0  ;;  %v2208_v3 = vld [vmem:[%s13441_s30 + $0x70] sm:$0xff] }
 0x4e7   : > { %v10982_v5 = vpack.c.bf16 %v2208_v3, %v2204_v2  ;;  %v2398_v7 = vld [vmem:[%s13447_s12 + $0x88] sm:$0xff]  ;;  %v11030_v3 = vpack.c.bf16 %v2420_v60, %v2419_v59 }
 0x4e8   : > { %2068 = vrot.lane.b32.xlu0 %v1736_v6, %s13360_s2  ;;  %s13362_s2 = smov 24   ;;  %v2397_v6 = vld [vmem:[%s13447_s12 + $0x80] sm:$0xff] }
 0x4e9   : > { %v10984_v9 = vpack.c.bf16 %v2398_v7, %v2397_v6  ;;  %v2390_v6 = vld [vmem:[%s13447_s12 + $0x48] sm:$0xff]  ;;  %v11000_v7 = vpack.c.bf16 %v2406_v62, %v2405_v61 }
 0x4eb   : > { %10985 = vmatprep.subr.bf16.mxu0 %v10984_v9  ;;  %v2421_v9 = vld [vmem:[%s13447_s12 + $0x140] sm:$0xff] }
 0x50c   : > { %v1893_v18 = vpop.f32.mrb[8].mxu0 }
 0x50d   : > { %v1901_v19 = vmul.f32 %v11657_v17, %v1893_v18  ;;  %v10554_v20 = vpop.f32.mrb[9].mxu0  ;;  %v9596_v18 = vld [vmem:[%s13443_s24] ss:$0 sm:$0xff] }
 0x50e   : > { %v2382_v20 = vld [vmem:[%s13447_s12 + $0x8] sm:$0xff] }
 0x50f   : > { %2072 = vrot.lane.b32.xlu1 %v1901_v19, %s13364_s0  ;;  %v2381_v19 = vld [vmem:[%s13447_s12] sm:$0xff]  ;;  %s13458_s0 = sld [smem:[#allocation19_spill]] }
 0x516   : > { %v2058_v22 = vpop.f32.mrb[10].mxu0 }
 0x517   : > { %v2066_v23 = vmul.f32 %v11659_v21, %v2058_v22  ;;  %v10564_v24 = vpop.f32.mrb[11].mxu0  ;;  %v2413_v22 = vld [vmem:[%s13447_s12 + $0x100] sm:$0xff] }
 0x518   : > { %v2399_v24 = vld [vmem:[%s13447_s12 + $0x90] sm:$0xff] }
 0x519   : > { %2076 = vrot.lane.b32.xlu1 %v2066_v23, %s13362_s2  ;;  %v2414_v23 = vld [vmem:[%s13447_s12 + $0x108] sm:$0xff]  ;;  %s13457_s2 = sld [smem:[#allocation18_spill]] }
 0x55a   : > { %v2069_v27 = vpop.permute.xlu0 %2068 }
 0x55b   : > { %v2079_v30 = vsel %vm1410_vm4, %v1571_v29, %v2069_v27  ;;  %v2432_v27 = vld [vmem:[%s13447_s12 + $0x198] sm:$0xff]  ;;  %v10986_v29 = vpack.c.bf16 %v2382_v20, %v2381_v19 }
 0x55c   : > { %v2392_v19 = vld [vmem:[%s13447_s12 + $0x58] sm:$0xff] }
 0x581   : > { %v2073_v28 = vpop.permute.xlu1 %2072 }
 0x582   : > { %v2081_v31 = vsel %vm2080_vm5, %v2079_v30, %v2073_v28  ;;  %v11018_v30 = vpack.c.bf16 %v2414_v23, %v2413_v22  ;;  %v2423_v22 = vld [vmem:[%s13447_s12 + $0x150] sm:$0xff]  ;;  %v2424_v23 = vld [vmem:[%s13447_s12 + $0x158] sm:$0xff] }
 0x58b   : > { %v2077_v32 = vpop.permute.xlu1 %2076 }
 0x58c   : > { %v2083_v33 = vsel %vm2082_vm6, %v2081_v31, %v2077_v32  ;;  %v2383_v31 = vld [vmem:[%s13447_s12 + $0x10] sm:$0xff]  ;;  %v2384_v32 = vld [vmem:[%s13447_s12 + $0x18] sm:$0xff] }
 0x58d   : > { %10574 = vmatmul.mubr.msk.f32.vlgmr.msra.gmra.mrb[8].mxu1 %vm1333_vm3, %v2083_v33 }
 0x58e   : > { %2370 = vmatprep.mubr.f32.mxu1 %v11886_v1 }
 0x660   : > { %v2159_v35 = vpop.f32.mrb[8].mxu1 }
 0x661   : > { %v2160_v36 = vadd.f32 %v9593_v34, %v2159_v35  ;;  %v10575_v37 = vpop.f32.mrb[9].mxu1  ;;  %v10988_v34 = vpack.c.bf16 %v2400_v25, %v2399_v24  ;;  %v11020_v35 = vpack.c.bf16 %v2432_v27, %v2431_v26  ;;  %v2409_v24 = vld [vmem:[%s13447_s12 + $0xe0] sm:$0xff]  ;;  %v2410_v25 = vld [vmem:[%s13447_s12 + $0xe8] sm:$0xff] }
 0x662   : > { %v2416_v37 = vld [vmem:[%s13447_s12 + $0x118] sm:$0xff]  ;;  %v2441_v26 = vld [vmem:[%s13447_s12 + $0x1e0] sm:$0xff]  ;;  %v2442_v27 = vld [vmem:[%s13447_s12 + $0x1e8] sm:$0xff] }
 0x663   : > { %v2163_v38 = vadd.f32 %v2160_v36, %v12145_v15  ;;  %v2201_v15 = vld [vmem:[%s13441_s30 + $0x38] sm:$0xff]  ;;  %v2415_v36 = vld [vmem:[%s13447_s12 + $0x110] sm:$0xff] }
 0x664   : > { %v10976_v51 = vpack.c.bf16 %v2201_v15, %v2197_v47  ;;  %v2418_v15 = vld [vmem:[%s13447_s12 + $0x128] sm:$0xff] }
 0x665   : > { %v2166_v39 = vsel %vm1333_vm3, %v2163_v38, 0.0  ;;  %v11026_v54 = vpack.c.bf16 %v2418_v15, %v2417_v48  ;;  %v2427_v48 = vld [vmem:[%s13447_s12 + $0x170] sm:$0xff]  ;;  %v2428_v15 = vld [vmem:[%s13447_s12 + $0x178] sm:$0xff] }
 0x666   : > { %2167 = vadd.xlane.f32.xlu0 %v2166_v39  ;;  %10977 = vmatprep.subr.bf16.mxu1 %v10976_v51  ;;  %v2402_v39 = vld [vmem:[%s13447_s12 + $0xa8] sm:$0xff]  ;;  %v2435_v51 = vld [vmem:[%s13447_s12 + $0x1b0] sm:$0xff]  ;;  %v11046_v49 = vpack.c.bf16 %v2428_v15, %v2427_v48 }
 0x667   : > { %10979 = vmatpush1.bf16.msra.mxu1 %v10978_v55  ;;  %v2387_v55 = vld [vmem:[%s13447_s12 + $0x30] sm:$0xff]  ;;  %v11028_v58 = vpack.c.bf16 %v2436_v52, %v2435_v51  ;;  %v2213_v51 = vshrl.u32 %v2212_v50, 7 }
 0x668   : > { %10981 = vmatprep.subr.bf16.mxu1 %v10980_v63  ;;  %v2437_v63 = vld [vmem:[%s13447_s12 + $0x1c0] sm:$0xff]  ;;  %v10998_v2 = vpack.c.bf16 %v2388_v56, %v2387_v55 }
 0x669   : > { %v11032_v8 = vpack.c.bf16 %v2438_v0, %v2437_v63  ;;  %v12312_v52 = vsub.s32 0, %v2213_v51  ;;  %v12317_v55 = vsub.s32 1, %v2213_v51  ;;  %v12319_v56 = vsub.s32 3, %v2213_v51 }
 0x66b   : > { %10983 = vmatpush1.bf16.msra.mxu1 %v10982_v5  ;;  %v2389_v5 = vld [vmem:[%s13447_s12 + $0x40] sm:$0xff] }
 0x66c   : > { %11017 = vmatprep.subr.bf16.mxu1 %v11016_v11  ;;  %v2407_v11 = vld [vmem:[%s13447_s12 + $0xd0] sm:$0xff] }
 0x6f3   : > { %v2168_v40 = vpop.xlane.xlu0 %2167 }
 0x6f4   : > { %v2170_v41 = vmul.f32 0.03125, %v2168_v40  ;;  %v2433_v40 = vld [vmem:[%s13447_s12 + $0x1a0] sm:$0xff] }
 0x6f6   : > { %v2171_v42 = vsub.f32 %v2163_v38, %v2170_v41  ;;  %v2401_v38 = vld [vmem:[%s13447_s12 + $0xa0] sm:$0xff]  ;;  %v2434_v41 = vld [vmem:[%s13447_s12 + $0x1a8] sm:$0xff] }
 0x6f7   : > { %v10992_v46 = vpack.c.bf16 %v2402_v39, %v2401_v38  ;;  %v11024_v47 = vpack.c.bf16 %v2434_v41, %v2433_v40  ;;  %v2411_v39 = vld [vmem:[%s13447_s12 + $0xf0] sm:$0xff]  ;;  %v2412_v40 = vld [vmem:[%s13447_s12 + $0xf8] sm:$0xff] }
 0x6f8   : > { %v2172_v43 = vmul.f32 %v2171_v42, %v2171_v42  ;;  %v2443_v41 = vld [vmem:[%s13447_s12 + $0x1f0] sm:$0xff] }
 0x6fa   : > { %v2173_v44 = vsel %vm1333_vm3, %v2172_v43, 0.0  ;;  %v11022_v43 = vpack.c.bf16 %v2416_v37, %v2415_v36  ;;  %v2426_v37 = vld [vmem:[%s13447_s12 + $0x168] sm:$0xff] }
 0x6fb   : > { %2174 = vadd.xlane.f32.xlu1 %v2173_v44  ;;  %v2385_v44 = vld [vmem:[%s13447_s12 + $0x20] sm:$0xff] }
 0x6fc   : > { %v10994_v53 = vpack.c.bf16 %v2386_v45, %v2385_v44  ;;  %v2395_v44 = vld [vmem:[%s13447_s12 + $0x70] sm:$0xff]  ;;  %v2396_v45 = vld [vmem:[%s13447_s12 + $0x78] sm:$0xff] }
 0x788   : > { %v2175_v12 = vpop.xlane.xlu1 %2174 }
 0x789   : > { %v2176_v13 = vmul.f32 0.03125, %v2175_v12  ;;  %v2408_v12 = vld [vmem:[%s13447_s12 + $0xd8] sm:$0xff] }
 0x78a   : > { %v11004_v20 = vpack.c.bf16 %v2408_v12, %v2407_v11 }
 0x78b   : > { %v2177_v14 = vadd.f32 1e-05, %v2176_v13  ;;  %v2439_v13 = vld [vmem:[%s13447_s12 + $0x1d0] sm:$0xff] }
 0x78d   : > { %11662 = vrsqrt.f32 %v2177_v14  ;;  %v2440_v14 = vld [vmem:[%s13447_s12 + $0x1d8] sm:$0xff] }
 0x797   : > { %v11663_v17 = vpop.eup %11662 }
 0x798   : > { %v2179_v21 = vmul.f32 %v11663_v17, %v2171_v42  ;;  %v10990_v42 = vpack.c.bf16 %v2384_v32, %v2383_v31  ;;  %v11034_v17 = vpack.c.bf16 %v2422_v10, %v2421_v9  ;;  %v11040_v31 = vpack.c.bf16 %v2442_v27, %v2441_v26  ;;  %v2393_v32 = vld [vmem:[%s13447_s12 + $0x60] sm:$0xff] }
 0x79a   : > { %v2186_v28 = vmul.f32 %v9595_v16, %v2179_v21  ;;  %v11002_v16 = vpack.c.bf16 %v2390_v6, %v2389_v5  ;;  %v11036_v21 = vpack.c.bf16 %v2440_v14, %v2439_v13  ;;  %v9599_v13 = vld [vmem:[%s13444_s20] ss:$0 sm:$0xff] }
 0x79c   : > { %v12254_v33 = vadd.f32 %v9596_v18, %v2186_v28  ;;  %v2391_v18 = vld [vmem:[%s13447_s12 + $0x50] sm:$0xff] }
 0x79d   : > { %v11006_v28 = vpack.c.bf16 %v2392_v19, %v2391_v18 }
 0x79e   : > { %9597 = vmatmul.mubr.msk.f32.vlgmr.msra.gmra.mrb[12].mxu0 %vm1333_vm3, %v12254_v33  ;;  %9598 = vmatmul.mubr.msk.f32.vlgmr.msra.gmra.mrb[10].mxu1 %vm1333_vm3, %v12254_v33 }
 0x79f   : > { %10987 = vmatpush3.bf16.msra.mxu0 %v10986_v29  ;;  %11019 = vmatpush3.bf16.msra.mxu1 %v11018_v30  ;;  %v11038_v29 = vpack.c.bf16 %v2424_v23, %v2423_v22  ;;  %v11008_v30 = vpack.c.bf16 %v2410_v25, %v2409_v24 }
 0x7a0   : > { %10989 = vmatprep.subr.bf16.mxu0 %v10988_v34  ;;  %11021 = vmatprep.subr.bf16.mxu1 %v11020_v35  ;;  %v2394_v34 = vld [vmem:[%s13447_s12 + $0x68] sm:$0xff]  ;;  %v2425_v35 = vld [vmem:[%s13447_s12 + $0x160] sm:$0xff] }
 0x7a1   : > { %v11010_v36 = vpack.c.bf16 %v2394_v34, %v2393_v32  ;;  %v11042_v38 = vpack.c.bf16 %v2426_v37, %v2425_v35  ;;  %v9605_v32 = vld [vmem:[%s13442_s29 + $0x38] sm:$0xff] }
 0x7a3   : > { %10991 = vmatpush3.bf16.msra.mxu0 %v10990_v42  ;;  %11023 = vmatpush3.bf16.msra.mxu1 %v11022_v43  ;;  %v11012_v42 = vpack.c.bf16 %v2412_v40, %v2411_v39  ;;  %v2444_v43 = vld [vmem:[%s13447_s12 + $0x1f8] sm:$0xff]  ;;  %v9601_v40 = vld [vmem:[%s13458_s0] ss:$0 sm:$0xff] }
 0x7a4   : > { %10993 = vmatprep.subr.bf16.mxu0 %v10992_v46  ;;  %11025 = vmatprep.subr.bf16.mxu1 %v11024_v47  ;;  %v11044_v46 = vpack.c.bf16 %v2444_v43, %v2443_v41  ;;  %v11014_v47 = vpack.c.bf16 %v2396_v45, %v2395_v44  ;;  %v9612_v43 = vld [vmem:[%s13450_s3 + $0x1] ss:$0 sm:$0xff]  ;;  %s13471_s3 = smov 96  }
 0x7a7   : > { %10995 = vmatpush3.bf16.msra.mxu0 %v10994_v53  ;;  %11027 = vmatpush3.bf16.msra.mxu1 %v11026_v54  ;;  %v12314_v53 = vsub.s32 2, %v2213_v51  ;;  %v2210_v54 = vld [vmem:[%s13449_s6] sm:$0xf] }
 0x7a8   : > { %10997 = vmatprep.subr.bf16.mxu0 %v10996_v57  ;;  %11029 = vmatprep.subr.bf16.mxu1 %v11028_v58  ;;  %v2215_v57 = vrot.slane %v2210_v54, %v12312_v52  ;;  %v2219_v59 = vrot.slane %v2210_v54, %v12317_v55  ;;  %v2227_v60 = vrot.slane %v2210_v54, %v12319_v56 }
 0x7a9   : > { %v2223_v58 = vrot.slane %v2210_v54, %v12314_v53 }
 0x7ab   : > { %10999 = vmatpush3.bf16.msra.mxu0 %v10998_v2  ;;  %11031 = vmatpush3.bf16.msra.mxu1 %v11030_v3 }
 0x7ac   : > { %11001 = vmatprep.subr.bf16.mxu0 %v11000_v7  ;;  %11033 = vmatprep.subr.bf16.mxu1 %v11032_v8 }
 0x7af   : > { %11003 = vmatpush3.bf16.msra.mxu0 %v11002_v16  ;;  %11035 = vmatpush3.bf16.msra.mxu1 %v11034_v17 }
 0x7b0   : > { %11005 = vmatprep.subr.bf16.mxu0 %v11004_v20  ;;  %11037 = vmatprep.subr.bf16.mxu1 %v11036_v21 }
 0x7b3   : > { %11007 = vmatpush3.bf16.msra.mxu0 %v11006_v28  ;;  %11039 = vmatpush3.bf16.msra.mxu1 %v11038_v29  ;;  %v9602_v28 = vld [vmem:[%s13442_s29 + $0x20] sm:$0xff]  ;;  %v9603_v29 = vld [vmem:[%s13442_s29 + $0x28] sm:$0xff] }
 0x7b4   : > { %11009 = vmatprep.subr.bf16.mxu0 %v11008_v30  ;;  %11041 = vmatprep.subr.bf16.mxu1 %v11040_v31  ;;  %v11049_v30 = vpack.c.bf16 %v9603_v29, %v9602_v28  ;;  %v9604_v31 = vld [vmem:[%s13442_s29 + $0x30] sm:$0xff]  ;;  %s13488_s29 = sld [smem:[#allocation27_spill]] }
 0x7b7   : > { %11011 = vmatpush3.bf16.msra.mxu0 %v11010_v36  ;;  %11043 = vmatpush3.bf16.msra.mxu1 %v11042_v38  ;;  %v9600_v38 = vld [vmem:[%s13457_s2] ss:$0 sm:$0xff] }
 0x7b8   : > { %11013 = vmatprep.subr.bf16.mxu0 %v11012_v42  ;;  %11045 = vmatprep.subr.bf16.mxu1 %v11044_v46 }
 0x7bb   : > { %11015 = vmatpush3.bf16.msra.mxu0 %v11014_v47  ;;  %11047 = vmatpush3.bf16.msra.mxu1 %v11046_v49 }
 0x7bc   : > { %11048 = vmatprep.subr.bf16.mxu0 %v11888_v4  ;;  %10587 = vmatprep.subr.mxu1 %v11886_v1 }
 0x871   : > { %v2301_v61 = vpop.f32.mrb[12].mxu0  ;;  %v2372_v62 = vpop.f32.mrb[10].mxu1 }
 0x872   : > { %v2302_v63 = vadd.f32 %v2301_v61, %v2215_v57  ;;  %v2373_v0 = vadd.f32 %v2372_v62, %v2223_v58  ;;  %v2303_v2 = vpop.f32.mrb[13].mxu0  ;;  %v2374_v3 = vpop.f32.mrb[11].mxu1 }
 0x873   : > { %v2304_v5 = vadd.f32 %v2303_v2, %v2219_v59  ;;  %v2375_v6 = vadd.f32 %v2374_v3, %v2227_v60 }
 0x874   : > { %v2377_v9 = vmax.f32 %v2302_v63, 0.0  ;;  %v2379_v10 = vmax.f32 %v2373_v0, 0.0 }
 0x875   : > { %v2378_v7 = vmax.f32 %v2304_v5, 0.0  ;;  %v2380_v8 = vmax.f32 %v2375_v6, 0.0 }
 0x877   : > { %2516 = vmatprep.mubr.f32.mxu0 %v2378_v7  ;;  %2586 = vmatprep.mubr.f32.mxu1 %v2380_v8 }
 0x878   : > { %2517 = vmatmul.mubr.f32.vlgmr.msra.gmra.mrb[14].mxu0 %v2377_v9  ;;  %2587 = vmatmul.mubr.f32.vlgmr.msra.gmra.mrb[12].mxu1 %v2379_v10 }
 0x879   : > { %10584 = vmatprep.mubr.msk.f32.mxu0 %vm11887_vm1, %v11886_v1  ;;  %10589 = vmatprep.mubr.msk.f32.mxu1 %vm11887_vm1, %v11886_v1 }
 0x87a   : > { %11050 = vmatpush3.bf16.msra.mxu0 %v11049_v30 }
 0x87b   : > { %11051 = vmatprep.subr.bf16.mxu0 %v11888_v4 }
 0x94b   : > { %v10044_v11 = vpop.f32.mrb[14].mxu0  ;;  %v10079_v12 = vpop.f32.mrb[12].mxu1 }
 0x94c   : > { %v10045_v14 = vpop.f32.mrb[15].mxu0  ;;  %v10080_v16 = vpop.f32.mrb[13].mxu1 }
 0x94d   : > { %v10046_v17 = vadd.f32 %v10045_v14, %v10044_v11  ;;  %v10081_v18 = vadd.f32 %v10080_v16, %v10079_v12 }
 0x94f   : > { %v2519_v19 = vadd.f32 %v10046_v17, %v9599_v13 }
 0x951   : > { %v2589_v20 = vadd.f32 %v10081_v18, %v2519_v19 }
 0x953   : > { %v2592_v21 = vadd.f32 %v2589_v20, %v12254_v33  ;;  %v11052_v33 = vpack.c.bf16 %v9605_v32, %v9604_v31 }
 0x955   : > { %v2595_v22 = vsel %vm1333_vm3, %v2592_v21, 0.0  ;;  %11053 = vmatpush3.bf16.msra.mxu0 %v11052_v33 }
 0x956   : > { %2596 = vadd.xlane.f32.xlu0 %v2595_v22  ;;  %10592 = vmatprep.subr.mxu0 %v11886_v1 }
 0x9e3   : > { %v2597_v23 = vpop.xlane.xlu0 %2596 }
 0x9e4   : > { %v2598_v24 = vmul.f32 0.03125, %v2597_v23 }
 0x9e6   : > { %v2599_v25 = vsub.f32 %v2592_v21, %v2598_v24 }
 0x9e8   : > { %v2600_v26 = vmul.f32 %v2599_v25, %v2599_v25 }
 0x9ea   : > { %v2601_v27 = vsel %vm1333_vm3, %v2600_v26, 0.0 }
 0x9eb   : > { %2602 = vadd.xlane.f32.xlu0 %v2601_v27 }
 0xa78   : > { %v2603_v34 = vpop.xlane.xlu0 %2602 }
 0xa79   : > { %v2604_v35 = vmul.f32 0.03125, %v2603_v34 }
 0xa7b   : > { %v2605_v36 = vadd.f32 1e-05, %v2604_v35 }
 0xa7d   : > { %11664 = vrsqrt.f32 %v2605_v36 }
 0xa87   : > { %v11665_v37 = vpop.eup %11664 }
 0xa88   : > { %v2607_v39 = vmul.f32 %v11665_v37, %v2599_v25 }
 0xa8a   : > { %v2614_v41 = vmul.f32 %v9600_v38, %v2607_v39 }
 0xa8c   : > { %v12341_v42 = vadd.f32 %v9601_v40, %v2614_v41  ;;  %v9607_v40 = vld [vmem:[%s13448_s8 + $0x20] sm:$0xff]  ;;  %v9608_v41 = vld [vmem:[%s13448_s8 + $0x28] sm:$0xff] }
 0xa8e   : > { %10585 = vmatmul.mubr.msk.f32.vlgmr.msra.gmra.mrb[16].mxu0 %vm1333_vm3, %v12341_v42 }
 0xa8f   : > { %10594 = vmatprep.mubr.msk.f32.mxu0 %vm11887_vm1, %v11886_v1 }
 0xb61   : > { %v2711_v44 = vpop.f32.mrb[16].mxu0 }
 0xb62   : > { %v2712_v45 = vadd.f32 %v9612_v43, %v2711_v44  ;;  %v10586_v46 = vpop.f32.mrb[17].mxu0  ;;  %v9609_v43 = vld [vmem:[%s13448_s8 + $0x30] sm:$0xff]  ;;  %v11055_v44 = vpack.c.bf16 %v9608_v41, %v9607_v40  ;;  %v9667_v41 = vld [vmem:[%s13447_s12 + $0x280] sm:$0xff] }
 0xb64   : > { %2881 = vrot.lane.b32.xlu0 %v2712_v45, %s13382_s15  ;;  %2716 = vrot.lane.b32.xlu1 %v2712_v45, %s13380_s10  ;;  %s13384_s10 = sshll.u32 %s13509_s1, 4  ;;  %s13494_s1 = sld [smem:[#allocation32_spill]] }
 0xb68   : > { %3044 = vrot.lane.b32.xlu0 %v2712_v45, %s13372_s18  ;;  %2879 = vrot.lane.b32.xlu1 %v2712_v45, %s13378_s7  ;;  %s13462_s18 = smov 16   ;;  %s13465_s7 = sld [smem:[#allocation3_spill]] }
 0xb6c   : > { %3209 = vrot.lane.b32.xlu0 %v2712_v45, %s13366_s22  ;;  %3046 = vrot.lane.b32.xlu1 %v2712_v45, %s13374_s11  ;;  %s13459_s22 = smov 40   ;;  %s13463_s11 = smov 24  }
 0xb6e   : > { %s1222_s15 = scalar_lea.vmem %s13465_s7, %s13384_s10  ;;  %s13467_s7 = sld [smem:[#allocation21_spill]] }
 0xb6f   : > { %s13468_s10 = sld [smem:[#allocation5_spill]] }
 0xb70   : > { %3211 = vrot.lane.b32.xlu1 %v2712_v45, %s13368_s16  ;;  %s13460_s16 = smov 48  }
 0xbd6   : > { %v2717_v47 = vpop.permute.xlu1 %2716  ;;  %v2882_v48 = vpop.permute.xlu0 %2881 }
 0xbd7   : > { %10588 = vmatpush3.xpose.msk.msra.mxu1 %vm1410_vm4, %v2717_v47 }
 0xbd8   : > { %10597 = vmatprep.subr.mxu1 %v11886_v1 }
 0xbda   : > { %10590 = vmatmul.mubr.msk.f32.vlgmr.msra.gmra.mrb[14].mxu1 %vm1410_vm4, %v2712_v45  ;;  %v2880_v15 = vpop.permute.xlu1 %2879  ;;  %v3045_v50 = vpop.permute.xlu0 %3044 }
 0xbdb   : > { %10598 = vmatpush3.xpose.msk.msra.mxu1 %vm1410_vm4, %v2882_v48  ;;  %10599 = vmatprep.mubr.msk.f32.mxu1 %vm11887_vm1, %v11886_v1 }
 0xbdc   : > { %10607 = vmatprep.subr.mxu1 %v11886_v1 }
 0xbde   : > { %10600 = vmatmul.mubr.msk.f32.vlgmr.msra.gmra.mrb[16].mxu1 %vm1410_vm4, %v2880_v15  ;;  %v3047_v49 = vpop.permute.xlu1 %3046  ;;  %v3210_v54 = vpop.permute.xlu0 %3209 }
 0xbdf   : > { %10608 = vmatpush3.xpose.msk.msra.mxu1 %vm1410_vm4, %v3047_v49  ;;  %10609 = vmatprep.mubr.msk.f32.mxu1 %vm11887_vm1, %v11886_v1 }
 0xbe0   : > { %10617 = vmatprep.subr.mxu1 %v11886_v1 }
 0xbe2   : > { %10610 = vmatmul.mubr.msk.f32.vlgmr.msra.gmra.mrb[18].mxu1 %vm1410_vm4, %v3045_v50  ;;  %v3212_v51 = vpop.permute.xlu1 %3211 }
 0xbe3   : > { %10618 = vmatpush3.xpose.msk.msra.mxu1 %vm1410_vm4, %v3212_v51  ;;  %10619 = vmatprep.mubr.msk.f32.mxu1 %vm11887_vm1, %v11886_v1 }
 0xbe4   : > { %11054 = vmatprep.subr.bf16.mxu1 %v11888_v4 }
 0xbe6   : > { %10620 = vmatmul.mubr.msk.f32.vlgmr.msra.gmra.mrb[20].mxu1 %vm1410_vm4, %v3210_v54 }
 0xbe7   : > { %10635 = vmatprep.mubr.msk.f32.mxu1 %vm11887_vm1, %v11886_v1  ;;  %11056 = vmatpush3.bf16.msra.mxu1 %v11055_v44  ;;  %v9699_v44 = vld [vmem:[%s13447_s12 + $0x380] sm:$0xff] }
 0xbe8   : > { %11057 = vmatprep.subr.bf16.mxu1 %v11888_v4 }
 0xcad   : > { %v2788_v57 = vpop.f32.mrb[14].mxu1 }
 0xcae   : > { %v10591_v58 = vpop.f32.mrb[15].mxu1  ;;  %v2792_v59 = vsel %vm1410_vm4, %v2788_v57, -inf }
 0xcaf   : > { %2793 = vmax.xlane.f32.xlu1 %v2792_v59 }
 0xcb1   : > { %v2953_v60 = vpop.f32.mrb[16].mxu1 }
 0xcb2   : > { %v10601_v61 = vpop.f32.mrb[17].mxu1  ;;  %v2957_v62 = vsel %vm1410_vm4, %v2953_v60, -inf }
 0xcb3   : > { %2958 = vmax.xlane.f32.xlu0 %v2957_v62 }
 0xcb5   : > { %v3118_v63 = vpop.f32.mrb[18].mxu1 }
 0xcb6   : > { %v10611_v0 = vpop.f32.mrb[19].mxu1  ;;  %v3122_v2 = vsel %vm1410_vm4, %v3118_v63, -inf }
 0xcb7   : > { %3123 = vmax.xlane.f32.xlu0 %v3122_v2 }
 0xcb9   : > { %v3283_v3 = vpop.f32.mrb[20].mxu1 }
 0xcba   : > { %v10621_v5 = vpop.f32.mrb[21].mxu1  ;;  %v3287_v6 = vsel %vm1410_vm4, %v3283_v3, -inf }
 0xcc0   : > { %2963 = vrot.lane.b32.xlu1 %v2712_v45, %s13370_s23  ;;  %s13461_s23 = smov 8  }
 0xccd   : > { %2798 = vrot.lane.b32.xlu0 %v2712_v45, %s13376_s26  ;;  %s13464_s26 = sld [smem:[#allocation20_spill]] }
 0xcd1   : > { %3293 = vrot.lane.b32.xlu0 %v2712_v45, %s13459_s22 }
 0xce4   : > { %3288 = vmax.xlane.f32.xlu1 %v3287_v6  ;;  %v9626_v6 = vld [vmem:[%s13446_s14 + $0x1] ss:$0 sm:$0xff]  ;;  %s13482_s14 = smov 104  }
 0xcf5   : > { %3128 = vrot.lane.b32.xlu1 %v2712_v45, %s13460_s16  ;;  %v9610_v45 = vld [vmem:[%s13448_s8 + $0x38] sm:$0xff]  ;;  %s13478_s8 = smov 80  }
 0xcf6   : > { %v11058_v46 = vpack.c.bf16 %v9610_v45, %v9609_v43  ;;  %v9668_v43 = vld [vmem:[%s13447_s12 + $0x288] sm:$0xff] }
 0xcf7   : > { %v11076_v45 = vpack.c.bf16 %v9668_v43, %v9667_v41  ;;  %v9708_v41 = vld [vmem:[%s13447_s12 + $0x3c8] sm:$0xff] }
 0xcf8   : > { %11059 = vmatpush3.bf16.msra.mxu1 %v11058_v46  ;;  %v9700_v46 = vld [vmem:[%s13447_s12 + $0x388] sm:$0xff] }
 0xd3c   : > { %v2794_v7 = vpop.xlane.xlu1 %2793 }
 0xd3d   : > { %v2795_v8 = vsub.f32 %v2788_v57, %v2794_v7 }
 0xd3f   : > { %v2796_v9 = vmul.f32 1.442695, %v2795_v8 }
 0xd40   : > { %v2959_v10 = vpop.xlane.xlu0 %2958  ;;  %v2964_v19 = vpop.permute.xlu1 %2963 }
 0xd41   : > { %11666 = vpow2.f32 %v2796_v9  ;;  %v2960_v11 = vsub.f32 %v2953_v60, %v2959_v10 }
 0xd43   : > { %v2961_v12 = vmul.f32 1.442695, %v2960_v11 }
 0xd44   : > { %v3124_v13 = vpop.xlane.xlu0 %3123 }
 0xd45   : > { %11668 = vpow2.f32 %v2961_v12  ;;  %v3125_v14 = vsub.f32 %v3118_v63, %v3124_v13 }
 0xd47   : > { %v3126_v16 = vmul.f32 1.442695, %v3125_v14 }
 0xd48   : > { %v2799_v17 = vpop.permute.xlu0 %2798 }
 0xd49   : > { %11670 = vpow2.f32 %v3126_v16  ;;  %10593 = vmatpush3.msra.mxu0 %v2799_v17 }
 0xd4a   : > { %10602 = vmatprep.subr.mxu0 %v11886_v1 }
 0xd4b   : > { %v11667_v18 = vpop.eup %11666 }
 0xd4c   : > { %10595 = vmatmul.mubr.msk.f32.vlgmr.msra.gmra.mrb[18].mxu0 %vm1410_vm4, %v11667_v18  ;;  %v2874_v24 = vsel %vm1410_vm4, %v11667_v18, 0.0  ;;  %v3294_v29 = vpop.permute.xlu0 %3293  ;;  %v9633_v18 = vld [vmem:[%s13441_s30 + $0x88] sm:$0xff] }
 0xd4d   : > { %10603 = vmatpush3.msra.mxu0 %v2964_v19  ;;  %10604 = vmatprep.mubr.msk.f32.mxu0 %vm11887_vm1, %v11886_v1  ;;  %v9637_v19 = vld [vmem:[%s13441_s30 + $0xa8] sm:$0xff] }
 0xd4e   : > { %10612 = vmatprep.subr.mxu0 %v11886_v1 }
 0xd4f   : > { %v11669_v20 = vpop.eup %11668 }
 0xd50   : > { %10605 = vmatmul.mubr.msk.f32.vlgmr.msra.gmra.mrb[20].mxu0 %vm1410_vm4, %v11669_v20  ;;  %v3039_v21 = vsel %vm1410_vm4, %v11669_v20, 0.0  ;;  %v9635_v20 = vld [vmem:[%s13441_s30 + $0x98] sm:$0xff] }
 0xd51   : > { %3040 = vadd.xlane.f32.xlu1 %v3039_v21  ;;  %10614 = vmatprep.mubr.msk.f32.mxu0 %vm11887_vm1, %v11886_v1  ;;  %v11060_v21 = vpack.c.bf16 %v9637_v19, %v9633_v18  ;;  %v9704_v18 = vld [vmem:[%s13447_s12 + $0x3a8] sm:$0xff] }
 0xd53   : > { %v11671_v22 = vpop.eup %11670 }
 0xd54   : > { %v3204_v23 = vsel %vm1410_vm4, %v11671_v22, 0.0 }
 0xd55   : > { %3205 = vadd.xlane.f32.xlu0 %v3204_v23  ;;  %2875 = vadd.xlane.f32.xlu1 %v2874_v24  ;;  %v9636_v23 = vld [vmem:[%s13441_s30 + $0xa0] sm:$0xff] }
 0xd71   : > { %v3289_v25 = vpop.xlane.xlu1 %3288 }
 0xd72   : > { %v3290_v26 = vsub.f32 %v3283_v3, %v3289_v25 }
 0xd74   : > { %v3291_v27 = vmul.f32 1.442695, %v3290_v26  ;;  %v9634_v26 = vld [vmem:[%s13441_s30 + $0x90] sm:$0xff] }
 0xd75   : > { %v3129_v28 = vpop.permute.xlu1 %3128 }
 0xd76   : > { %11672 = vpow2.f32 %v3291_v27  ;;  %10613 = vmatpush3.msra.mxu0 %v3129_v28  ;;  %v9638_v27 = vld [vmem:[%s13441_s30 + $0xb0] sm:$0xff] }
 0xd77   : > { %10615 = vmatmul.mubr.msk.f32.vlgmr.msra.gmra.mrb[22].mxu0 %vm1410_vm4, %v11671_v22  ;;  %10622 = vmatprep.subr.mxu0 %v11886_v1  ;;  %v9632_v22 = vld [vmem:[%s13441_s30 + $0x80] sm:$0xff]  ;;  %v11070_v28 = vpack.c.bf16 %v9638_v27, %v9634_v26  ;;  %v9673_v26 = vld [vmem:[%s13447_s12 + $0x2b0] sm:$0xff]  ;;  %v9674_v27 = vld [vmem:[%s13447_s12 + $0x2b8] sm:$0xff] }
 0xd78   : > { %10623 = vmatpush3.msra.mxu0 %v3294_v29  ;;  %10624 = vmatprep.mubr.msk.f32.mxu0 %vm11887_vm1, %v11886_v1  ;;  %v11062_v25 = vpack.c.bf16 %v9636_v23, %v9632_v22  ;;  %v9641_v29 = vld [vmem:[%s13441_s30 + $0xc8] sm:$0xff] }
 0xd79   : > { %11061 = vmatprep.subr.bf16.mxu0 %v11060_v21  ;;  %v9655_v21 = vld [vmem:[%s13447_s12 + $0x220] sm:$0xff] }
 0xd80   : > { %v11673_v30 = vpop.eup %11672 }
 0xd81   : > { %10625 = vmatmul.mubr.msk.f32.vlgmr.msra.gmra.mrb[24].mxu0 %vm1410_vm4, %v11673_v30  ;;  %v3369_v31 = vsel %vm1410_vm4, %v11673_v30, 0.0  ;;  %v9645_v30 = vld [vmem:[%s13441_s30 + $0xe8] sm:$0xff] }
 0xd82   : > { %3370 = vadd.xlane.f32.xlu0 %v3369_v31  ;;  %3607 = vmatprep.mubr.f32.mxu0 %v11886_v1  ;;  %v9643_v31 = vld [vmem:[%s13441_s30 + $0xd8] sm:$0xff] }
 0xd83   : > { %11063 = vmatpush1.bf16.msra.mxu0 %v11062_v25  ;;  %v9688_v25 = vld [vmem:[%s13447_s12 + $0x328] sm:$0xff] }
 0xdde   : > { %v3041_v32 = vpop.xlane.xlu1 %3040 }
 0xddf   : > { %11674 = vrcp.f32 %v3041_v32  ;;  %v11064_v32 = vpack.c.bf16 %v9645_v30, %v9641_v29  ;;  %v9706_v29 = vld [vmem:[%s13447_s12 + $0x3b8] sm:$0xff] }
 0xde1   : > { %11065 = vmatprep.subr.bf16.mxu0 %v11064_v32  ;;  %v9657_v32 = vld [vmem:[%s13447_s12 + $0x230] sm:$0xff] }
 0xde2   : > { %v3206_v39 = vpop.xlane.xlu0 %3205  ;;  %v2876_v59 = vpop.xlane.xlu1 %2875 }
 0xde3   : > { %11676 = vrcp.f32 %v3206_v39  ;;  %v9646_v39 = vld [vmem:[%s13441_s30 + $0xf0] sm:$0xff] }
 0xde9   : > { %v11675_v35 = vpop.eup %11674 }
 0xded   : > { %v11677_v48 = vpop.eup %11676 }
 0xe0f   : > { %v3371_v47 = vpop.xlane.xlu0 %3370 }
 0xe10   : > { %11678 = vrcp.f32 %v3371_v47  ;;  %v11108_v47 = vpack.c.bf16 %v9700_v46, %v9699_v44  ;;  %v9660_v46 = vld [vmem:[%s13447_s12 + $0x248] sm:$0xff] }
 0xe11   : > { %11680 = vrcp.f32 %v2876_v59 }
 0xe1a   : > { %v11679_v51 = vpop.eup %11678 }
 0xe1b   : > { %v11681_v60 = vpop.eup %11680 }
 0xe1f   : > { %v2870_v33 = vpop.f32.mrb[18].mxu0 }
 0xe20   : > { %v10596_v34 = vpop.f32.mrb[19].mxu0  ;;  %v2878_v63 = vmul.f32 %v11681_v60, %v2870_v33  ;;  %v9647_v33 = vld [vmem:[%s13441_s30 + $0xf8] sm:$0xff]  ;;  %v9683_v60 = vld [vmem:[%s13447_s12 + $0x300] sm:$0xff] }
 0xe21   : > { %v9640_v34 = vld [vmem:[%s13441_s30 + $0xc0] sm:$0xff] }
 0xe23   : > { %v3035_v36 = vpop.f32.mrb[20].mxu0 }
 0xe24   : > { %v3043_v37 = vmul.f32 %v11675_v35, %v3035_v36  ;;  %v10606_v38 = vpop.f32.mrb[21].mxu0  ;;  %v9644_v35 = vld [vmem:[%s13441_s30 + $0xe0] sm:$0xff]  ;;  %v11072_v36 = vpack.c.bf16 %v9647_v33, %v9643_v31  ;;  %v9658_v33 = vld [vmem:[%s13447_s12 + $0x238] sm:$0xff] }
 0xe25   : > { %v9642_v38 = vld [vmem:[%s13441_s30 + $0xd0] sm:$0xff]  ;;  %v11090_v43 = vpack.c.bf16 %v9658_v33, %v9657_v32  ;;  %v9648_v32 = vld [vmem:[%s13449_s6 + $0x4] sm:$0xf]  ;;  %s13473_s6 = smov 64  }
 0xe26   : > { %3375 = vrot.lane.b32.xlu0 %v3043_v37, %s13461_s23  ;;  %v11066_v37 = vpack.c.bf16 %v9644_v35, %v9640_v34  ;;  %v11074_v40 = vpack.c.bf16 %v9646_v39, %v9642_v38  ;;  %v11088_v34 = vpack.c.bf16 %v9674_v27, %v9673_v26  ;;  %v9675_v38 = vld [vmem:[%s13447_s12 + $0x2c0] sm:$0xff]  ;;  %v9676_v39 = vld [vmem:[%s13447_s12 + $0x2c8] sm:$0xff]  ;;  %v3523_v33 = vrot.slane %v9648_v32, %v12312_v52 }
 0xe28   : > { %11067 = vmatpush1.bf16.msra.mxu0 %v11066_v37  ;;  %v9690_v37 = vld [vmem:[%s13447_s12 + $0x338] sm:$0xff] }
 0xe29   : > { %11077 = vmatprep.subr.bf16.mxu0 %v11076_v45  ;;  %v9659_v45 = vld [vmem:[%s13447_s12 + $0x240] sm:$0xff] }
 0xe4a   : > { %v3200_v15 = vpop.f32.mrb[22].mxu0 }
 0xe4b   : > { %v3208_v49 = vmul.f32 %v11677_v48, %v3200_v15  ;;  %v10616_v50 = vpop.f32.mrb[23].mxu0 }
 0xe4c   : > { %v9630_v50 = vld [vmem:[%s13445_s19 + $0x1] ss:$0 sm:$0xff]  ;;  %s13483_s19 = sld [smem:[#allocation24_spill]] }
 0xe4d   : > { %3379 = vrot.lane.b32.xlu1 %v3208_v49, %s13462_s18 }
 0xe54   : > { %v3365_v54 = vpop.f32.mrb[24].mxu0 }
 0xe55   : > { %v3373_v57 = vmul.f32 %v11679_v51, %v3365_v54  ;;  %v10626_v58 = vpop.f32.mrb[25].mxu0  ;;  %v9631_v54 = vld [vmem:[%s13443_s24 + $0x1] ss:$0 sm:$0xff]  ;;  %s13486_s24 = sld [smem:[#allocation29_spill]] }
 0xe56   : > { %v9652_v58 = vld [vmem:[%s13447_s12 + $0x208] sm:$0xff] }
 0xe57   : > { %3383 = vrot.lane.b32.xlu1 %v3373_v57, %s13463_s11  ;;  %v9651_v57 = vld [vmem:[%s13447_s12 + $0x200] sm:$0xff] }
 0xe98   : > { %v3376_v61 = vpop.permute.xlu0 %3375 }
 0xe99   : > { %v3386_v0 = vsel %vm1410_vm4, %v2878_v63, %v3376_v61  ;;  %v9684_v61 = vld [vmem:[%s13447_s12 + $0x308] sm:$0xff]  ;;  %v9670_v63 = vld [vmem:[%s13447_s12 + $0x298] sm:$0xff] }
 0xebf   : > { %v3380_v62 = vpop.permute.xlu1 %3379 }
 0xec0   : > { %v3387_v2 = vsel %vm2080_vm5, %v3386_v0, %v3380_v62  ;;  %v9669_v62 = vld [vmem:[%s13447_s12 + $0x290] sm:$0xff] }
 0xec1   : > { %v9701_v0 = vld [vmem:[%s13447_s12 + $0x390] sm:$0xff] }
 0xec9   : > { %v3384_v3 = vpop.permute.xlu1 %3383 }
 0xeca   : > { %v3388_v5 = vsel %vm2082_vm6, %v3387_v2, %v3384_v3  ;;  %v9702_v2 = vld [vmem:[%s13447_s12 + $0x398] sm:$0xff] }
 0xecb   : > { %10636 = vmatmul.mubr.msk.f32.vlgmr.msra.gmra.mrb[22].mxu1 %vm1333_vm3, %v3388_v5  ;;  %v11078_v5 = vpack.c.bf16 %v9652_v58, %v9651_v57  ;;  %v9710_v57 = vld [vmem:[%s13447_s12 + $0x3d8] sm:$0xff]  ;;  %v11094_v58 = vpack.c.bf16 %v9660_v46, %v9659_v45 }
 0xecc   : > { %3678 = vmatprep.mubr.f32.mxu1 %v11886_v1 }
 0xf9e   : > { %v3464_v7 = vpop.f32.mrb[22].mxu1 }
 0xf9f   : > { %v3465_v8 = vadd.f32 %v9626_v6, %v3464_v7  ;;  %v10637_v9 = vpop.f32.mrb[23].mxu1  ;;  %v11110_v6 = vpack.c.bf16 %v9684_v61, %v9683_v60  ;;  %v9653_v7 = vld [vmem:[%s13447_s12 + $0x210] sm:$0xff]  ;;  %v9662_v61 = vld [vmem:[%s13447_s12 + $0x258] sm:$0xff] }
 0xfa0   : > { %v9661_v60 = vld [vmem:[%s13447_s12 + $0x250] sm:$0xff] }
 0xfa1   : > { %v3468_v10 = vadd.f32 %v3465_v8, %v12341_v42  ;;  %v9639_v42 = vld [vmem:[%s13441_s30 + $0xb8] sm:$0xff]  ;;  %s13491_s30 = sld [smem:[#allocation34_spill]] }
 0xfa2   : > { %v11068_v24 = vpack.c.bf16 %v9639_v42, %v9635_v20  ;;  %v9654_v8 = vld [vmem:[%s13447_s12 + $0x218] sm:$0xff]  ;;  %v9656_v42 = vld [vmem:[%s13447_s12 + $0x228] sm:$0xff] }
 0xfa3   : > { %v3473_v11 = vsel %vm1333_vm3, %v3468_v10, 0.0  ;;  %v11082_v19 = vpack.c.bf16 %v9654_v8, %v9653_v7  ;;  %v11086_v30 = vpack.c.bf16 %v9656_v42, %v9655_v21  ;;  %v9712_v7 = vld [vmem:[%s13447_s12 + $0x3e8] sm:$0xff]  ;;  %v11098_v8 = vpack.c.bf16 %v9662_v61, %v9661_v60  ;;  %v9682_v21 = vld [vmem:[%s13447_s12 + $0x2f8] sm:$0xff]  ;;  %v9713_v42 = vld [vmem:[%s13447_s12 + $0x3f0] sm:$0xff] }
 0xfa4   : > { %3474 = vadd.xlane.f32.xlu0 %v3473_v11  ;;  %11069 = vmatprep.subr.bf16.mxu1 %v11068_v24  ;;  %v11112_v11 = vpack.c.bf16 %v9702_v2, %v9701_v0  ;;  %v9687_v24 = vld [vmem:[%s13447_s12 + $0x320] sm:$0xff]  ;;  %v9693_v0 = vld [vmem:[%s13447_s12 + $0x350] sm:$0xff]  ;;  %v9694_v2 = vld [vmem:[%s13447_s12 + $0x358] sm:$0xff] }
 0xfa5   : > { %11071 = vmatpush1.bf16.msra.mxu1 %v11070_v28  ;;  %v9705_v28 = vld [vmem:[%s13447_s12 + $0x3b0] sm:$0xff]  ;;  %v11118_v31 = vpack.c.bf16 %v9688_v25, %v9687_v24  ;;  %v9666_v25 = vld [vmem:[%s13447_s12 + $0x278] sm:$0xff] }
 0xfa6   : > { %11073 = vmatprep.subr.bf16.mxu1 %v11072_v36  ;;  %v11120_v35 = vpack.c.bf16 %v9706_v29, %v9705_v28  ;;  %v9689_v36 = vld [vmem:[%s13447_s12 + $0x330] sm:$0xff]  ;;  %v9698_v29 = vld [vmem:[%s13447_s12 + $0x378] sm:$0xff] }
 0xfa7   : > { %v11122_v44 = vpack.c.bf16 %v9690_v37, %v9689_v36  ;;  %v9665_v24 = vld [vmem:[%s13447_s12 + $0x270] sm:$0xff]  ;;  %v3535_v36 = vrot.slane %v9648_v32, %v12319_v56 }
 0xfa8   : > { %v11106_v27 = vpack.c.bf16 %v9666_v25, %v9665_v24  ;;  %v9697_v28 = vld [vmem:[%s13447_s12 + $0x370] sm:$0xff] }
 0xfa9   : > { %11075 = vmatpush1.bf16.msra.mxu1 %v11074_v40  ;;  %v9707_v40 = vld [vmem:[%s13447_s12 + $0x3c0] sm:$0xff] }
 0xfaa   : > { %11109 = vmatprep.subr.bf16.mxu1 %v11108_v47  ;;  %v11092_v47 = vpack.c.bf16 %v9676_v39, %v9675_v38 }
0x1031   : > { %v3475_v12 = vpop.xlane.xlu0 %3474 }
0x1032   : > { %v3476_v13 = vmul.f32 0.03125, %v3475_v12  ;;  %v9685_v12 = vld [vmem:[%s13447_s12 + $0x310] sm:$0xff] }
0x1034   : > { %v3477_v14 = vsub.f32 %v3468_v10, %v3476_v13  ;;  %v11080_v10 = vpack.c.bf16 %v9670_v63, %v9669_v62  ;;  %v9686_v13 = vld [vmem:[%s13447_s12 + $0x318] sm:$0xff] }
0x1035   : > { %v11114_v20 = vpack.c.bf16 %v9686_v13, %v9685_v12  ;;  %v9663_v13 = vld [vmem:[%s13447_s12 + $0x260] sm:$0xff] }
0x1036   : > { %v3478_v16 = vmul.f32 %v3477_v14, %v3477_v14 }
0x1038   : > { %v3479_v17 = vsel %vm1333_vm3, %v3478_v16, 0.0  ;;  %v9672_v16 = vld [vmem:[%s13447_s12 + $0x2a8] sm:$0xff] }
0x1039   : > { %3480 = vadd.xlane.f32.xlu1 %v3479_v17  ;;  %v9703_v17 = vld [vmem:[%s13447_s12 + $0x3a0] sm:$0xff] }
0x103a   : > { %v11116_v23 = vpack.c.bf16 %v9704_v18, %v9703_v17  ;;  %v9696_v18 = vld [vmem:[%s13447_s12 + $0x368] sm:$0xff] }
0x10c6   : > { %v3481_v48 = vpop.xlane.xlu1 %3480 }
0x10c7   : > { %v3482_v15 = vmul.f32 0.03125, %v3481_v48  ;;  %v11124_v48 = vpack.c.bf16 %v9708_v41, %v9707_v40 }
0x10c9   : > { %v3483_v49 = vadd.f32 1e-05, %v3482_v15  ;;  %v9691_v15 = vld [vmem:[%s13447_s12 + $0x340] sm:$0xff] }
0x10cb   : > { %11682 = vrsqrt.f32 %v3483_v49  ;;  %v9692_v49 = vld [vmem:[%s13447_s12 + $0x348] sm:$0xff] }
0x10d5   : > { %v11683_v51 = vpop.eup %11682 }
0x10d6   : > { %v3485_v59 = vmul.f32 %v11683_v51, %v3477_v14  ;;  %v9671_v14 = vld [vmem:[%s13447_s12 + $0x2a0] sm:$0xff]  ;;  %v9678_v51 = vld [vmem:[%s13447_s12 + $0x2d8] sm:$0xff] }
0x10d7   : > { %v11084_v22 = vpack.c.bf16 %v9672_v16, %v9671_v14  ;;  %v9664_v14 = vld [vmem:[%s13447_s12 + $0x268] sm:$0xff]  ;;  %v9695_v16 = vld [vmem:[%s13447_s12 + $0x360] sm:$0xff] }
0x10d8   : > { %v3492_v3 = vmul.f32 %v9630_v50, %v3485_v59  ;;  %v9677_v50 = vld [vmem:[%s13447_s12 + $0x2d0] sm:$0xff]  ;;  %v11126_v59 = vpack.c.bf16 %v9692_v49, %v9691_v15  ;;  %v11102_v17 = vpack.c.bf16 %v9664_v14, %v9663_v13  ;;  %v3934_v49 = vld [vmem:[%s1222_s15] sm:$0xff]  ;;  %v4031_v14 = vld [vmem:[%s13468_s10 + $0x8] sm:$0xf] }
0x10d9   : > { %v11096_v62 = vpack.c.bf16 %v9678_v51, %v9677_v50  ;;  %v3935_v50 = vld [vmem:[%s1222_s15 + $0x8] sm:$0xf]  ;;  %s13469_s15 = sld [smem:[#allocation23_spill]] }
0x10da   : > { %v12450_v9 = vadd.f32 %v9631_v54, %v3492_v3  ;;  %v9709_v54 = vld [vmem:[%s13447_s12 + $0x3d0] sm:$0xff]  ;;  %v9679_v3 = vld [vmem:[%s13447_s12 + $0x2e0] sm:$0xff] }
0x10db   : > { %v11128_v63 = vpack.c.bf16 %v9710_v57, %v9709_v54 }
0x10dc   : > { %9649 = vmatmul.mubr.msk.f32.vlgmr.msra.gmra.mrb[26].mxu0 %vm1333_vm3, %v12450_v9  ;;  %9650 = vmatmul.mubr.msk.f32.vlgmr.msra.gmra.mrb[24].mxu1 %vm1333_vm3, %v12450_v9 }
0x10dd   : > { %11079 = vmatpush3.bf16.msra.mxu0 %v11078_v5  ;;  %11111 = vmatpush3.bf16.msra.mxu1 %v11110_v6  ;;  %v9680_v5 = vld [vmem:[%s13447_s12 + $0x2e8] sm:$0xff]  ;;  %v9711_v6 = vld [vmem:[%s13447_s12 + $0x3e0] sm:$0xff] }
0x10de   : > { %11081 = vmatprep.subr.bf16.mxu0 %v11080_v10  ;;  %11113 = vmatprep.subr.bf16.mxu1 %v11112_v11  ;;  %v11130_v10 = vpack.c.bf16 %v9694_v2, %v9693_v0  ;;  %v11100_v11 = vpack.c.bf16 %v9680_v5, %v9679_v3  ;;  %v11132_v12 = vpack.c.bf16 %v9712_v7, %v9711_v6  ;;  %v9721_v6 = vld [vmem:[%s13467_s7] ss:$0 sm:$0xff]  ;;  %s13470_s7 = smov 88  }
0x10e1   : > { %11083 = vmatpush3.bf16.msra.mxu0 %v11082_v19  ;;  %11115 = vmatpush3.bf16.msra.mxu1 %v11114_v20  ;;  %v11134_v19 = vpack.c.bf16 %v9696_v18, %v9695_v16  ;;  %v9681_v20 = vld [vmem:[%s13447_s12 + $0x2f0] sm:$0xff] }
0x10e2   : > { %11085 = vmatprep.subr.bf16.mxu0 %v11084_v22  ;;  %11117 = vmatprep.subr.bf16.mxu1 %v11116_v23  ;;  %v11104_v22 = vpack.c.bf16 %v9682_v21, %v9681_v20  ;;  %v9714_v23 = vld [vmem:[%s13447_s12 + $0x3f8] sm:$0xff]  ;;  %s13480_s12 = smov 72  }
0x10e3   : > { %v11136_v26 = vpack.c.bf16 %v9714_v23, %v9713_v42 }
0x10e5   : > { %11087 = vmatpush3.bf16.msra.mxu0 %v11086_v30  ;;  %11119 = vmatpush3.bf16.msra.mxu1 %v11118_v31  ;;  %v11138_v30 = vpack.c.bf16 %v9698_v29, %v9697_v28  ;;  %v3936_v31 = vld [vmem:[%s13464_s26] sm:$0x3f]  ;;  %s13466_s26 = sld [smem:[#allocation22_spill]] }
0x10e6   : > { %11089 = vmatprep.subr.bf16.mxu0 %v11088_v34  ;;  %11121 = vmatprep.subr.bf16.mxu1 %v11120_v35  ;;  %v3531_v34 = vrot.slane %v9648_v32, %v12314_v53  ;;  %v3527_v35 = vrot.slane %v9648_v32, %v12317_v55 }
0x10e9   : > { %11091 = vmatpush3.bf16.msra.mxu0 %v11090_v43  ;;  %11123 = vmatpush3.bf16.msra.mxu1 %v11122_v44 }
0x10ea   : > { %11093 = vmatprep.subr.bf16.mxu0 %v11092_v47  ;;  %11125 = vmatprep.subr.bf16.mxu1 %v11124_v48 }
0x10eb   : > { %v4034_v51 = vld [vmem:[%s13466_s26] sm:$0xff]  ;;  %v4035_v54 = vld [vmem:[%s13466_s26 + $0x8] sm:$0xff] }
0x10ec   : > { %v11140_v57 = vpack.c.bf16 %v4035_v54, %v4034_v51 }
0x10ed   : > { %11095 = vmatpush3.bf16.msra.mxu0 %v11094_v58  ;;  %11127 = vmatpush3.bf16.msra.mxu1 %v11126_v59  ;;  %v4036_v58 = vld [vmem:[%s13466_s26 + $0x10] sm:$0xff]  ;;  %v4037_v59 = vld [vmem:[%s13466_s26 + $0x18] sm:$0xff] }
0x10ee   : > { %11097 = vmatprep.subr.bf16.mxu0 %v11096_v62  ;;  %11129 = vmatprep.subr.bf16.mxu1 %v11128_v63  ;;  %v11144_v60 = vpack.c.bf16 %v4037_v59, %v4036_v58  ;;  %v9716_v63 = vld [vmem:[%s13444_s20 + $0x1] ss:$0 sm:$0xff]  ;;  %s13484_s20 = sld [smem:[#allocation25_spill]] }
0x10f1   : > { %11099 = vmatpush3.bf16.msra.mxu0 %v11098_v8  ;;  %11131 = vmatpush3.bf16.msra.mxu1 %v11130_v10 }
0x10f2   : > { %11101 = vmatprep.subr.bf16.mxu0 %v11100_v11  ;;  %11133 = vmatprep.subr.bf16.mxu1 %v11132_v12  ;;  %v4030_v12 = vld [vmem:[%s13468_s10] sm:$0xff]  ;;  %s13479_s10 = smov 112  }
0x10f5   : > { %11103 = vmatpush3.bf16.msra.mxu0 %v11102_v17  ;;  %11135 = vmatpush3.bf16.msra.mxu1 %v11134_v19  ;;  %v9725_v19 = vld [vmem:[%s13469_s15] ss:$0 sm:$0xff] }
0x10f6   : > { %11105 = vmatprep.subr.bf16.mxu0 %v11104_v22  ;;  %11137 = vmatprep.subr.bf16.mxu1 %v11136_v26 }
0x10f9   : > { %11107 = vmatpush3.bf16.msra.mxu0 %v11106_v27  ;;  %11139 = vmatpush3.bf16.msra.mxu1 %v11138_v30 }
0x10fa   : > { %10638 = vmatprep.subr.msk.mxu0 %vm3951_vm7, %v3936_v31 }
0x11af   : > { %v3609_v37 = vpop.f32.mrb[26].mxu0  ;;  %v3680_v38 = vpop.f32.mrb[24].mxu1 }
0x11b0   : > { %v3610_v39 = vadd.f32 %v3609_v37, %v3523_v33  ;;  %v3681_v40 = vadd.f32 %v3680_v38, %v3531_v34  ;;  %v3611_v41 = vpop.f32.mrb[27].mxu0  ;;  %v3682_v43 = vpop.f32.mrb[25].mxu1 }
0x11b1   : > { %v3612_v44 = vadd.f32 %v3611_v41, %v3527_v35  ;;  %v3683_v45 = vadd.f32 %v3682_v43, %v3535_v36 }
0x11b2   : > { %v3685_v48 = vmax.f32 %v3610_v39, 0.0  ;;  %v3687_v15 = vmax.f32 %v3681_v40, 0.0 }
0x11b3   : > { %v3686_v46 = vmax.f32 %v3612_v44, 0.0  ;;  %v3688_v47 = vmax.f32 %v3683_v45, 0.0 }
0x11b5   : > { %3826 = vmatprep.mubr.f32.mxu0 %v3686_v46  ;;  %3896 = vmatprep.mubr.f32.mxu1 %v3688_v47 }
0x11b6   : > { %3827 = vmatmul.mubr.f32.vlgmr.msra.gmra.mrb[28].mxu0 %v3685_v48  ;;  %3897 = vmatmul.mubr.f32.vlgmr.msra.gmra.mrb[26].mxu1 %v3687_v15 }
0x11b7   : > { %10639 = vmatpush3.msk.msra.mxu0 %vm3951_vm7, %v3936_v31  ;;  %10640 = vmatprep.mubr.msk.f32.mxu0 %vm3944_vm8, %v3934_v49 }
0x11b8   : > { %11141 = vmatprep.subr.bf16.mxu0 %v11140_v57 }
0x11ba   : > { %10641 = vmatmul.mubr.msk.f32.vlgmr.msra.gmra.mrb[30].mxu0 %vm3944_vm8, %v3935_v50 }
0x11bb   : > { %11143 = vmatpush3.bf16.msra.mxu0 %v11140_v57 }
0x11bc   : > { %11145 = vmatprep.subr.bf16.mxu0 %v11144_v60 }
0x11bf   : > { %11147 = vmatpush3.bf16.msra.mxu0 %v11144_v60 }
0x1289   : > { %v10140_v61 = vpop.f32.mrb[28].mxu0  ;;  %v10175_v62 = vpop.f32.mrb[26].mxu1 }
0x128a   : > { %v10141_v0 = vpop.f32.mrb[29].mxu0  ;;  %v10176_v2 = vpop.f32.mrb[27].mxu1 }
0x128b   : > { %v10142_v3 = vadd.f32 %v10141_v0, %v10140_v61  ;;  %v10177_v5 = vadd.f32 %v10176_v2, %v10175_v62 }
0x128d   : > { %v3829_v7 = vadd.f32 %v10142_v3, %v9716_v63  ;;  %v10642_v8 = vpop.f32.mrb[30].mxu0 }
0x128e   : > { %v4027_v10 = vadd.f32 %v10642_v8, %v9721_v6  ;;  %v4021_v11 = vpop.f32.mrb[31].mxu0 }
0x128f   : > { %v12525_v13 = vadd.f32 %v10177_v5, %v3829_v7  ;;  %v4022_v16 = vadd.f32 %v9721_v6, %v4021_v11 }
0x1290   : > { %v12530_v18 = vadd.f32 %v4031_v14, %v4027_v10 }
0x1291   : > { %v12528_v17 = vadd.f32 %v4030_v12, %v4022_v16 }
0x1293   : > { %10651 = vmatprep.mubr.msk.f32.mxu0 %vm1333_vm3, %v12528_v17 }
0x1294   : > { %10652 = vmatmul.mubr.msk.f32.vlgmr.msra.gmra.mrb[32].mxu0 %vm1333_vm3, %v12530_v18 }
0x1367   : > { %v10653_v20 = vpop.f32.mrb[32].mxu0 }
0x1368   : > { %v12537_v21 = vadd.f32 %v10653_v20, %v9725_v19  ;;  %v4122_v42 = vpop.f32.mrb[33].mxu0 }
0x1369   : > { %v12539_v22 = vadd.f32 %v9725_v19, %v4122_v42 }
0x136b   : > { %10658 = vmatprep.mubr.msk.f32.mxu1 %vm1410_vm4, %v12539_v22  ;;  %v12545_v23 = vpack.i.bf16 %v12537_v21, %v12539_v22 }
0x136d   : > { %11552 = vrot.lane.b32.xlu1 %v12545_v23, %s13470_s7  ;;  %11547 = vrot.lane.b32.xlu0 %v12545_v23, %s13471_s3 }
0x1371   : > { %4334 = vrot.lane.b32.xlu1 %v12537_v21, %s13472_s5  ;;  %4332 = vrot.lane.b32.xlu0 %v12539_v22, %s13472_s5 }
0x1375   : > { %11557 = vrot.lane.b32.xlu1 %v12545_v23, %s13473_s6 }
0x13df   : > { %v11553_v24 = vpop.permute.xlu1 %11552  ;;  %v11548_v25 = vpop.permute.xlu0 %11547 }
0x13e0   : > { %v11555_v26 = vunpack.i.h.bf16 %v11553_v24  ;;  %v11554_v27 = vunpack.i.l.bf16 %v11553_v24  ;;  %v11550_v28 = vunpack.i.h.bf16 %v11548_v25  ;;  %v11549_v29 = vunpack.i.l.bf16 %v11548_v25 }
0x13e2   : > { %v11148_v31 = vpack.c.bf16 %v11550_v28, %v11549_v29  ;;  %v11160_v33 = vpack.c.bf16 %v11555_v26, %v11554_v27 }
0x13e3   : > { %v4335_v32 = vpop.permute.xlu1 %4334  ;;  %v4333_v39 = vpop.permute.xlu0 %4332 }
0x13e4   : > { %11150 = vmatprep.subr.msk.bf16.mxu1 %vm12559_vm9, %v11148_v31 }
0x13e5   : > { %11153 = vmatpush3.bf16.xpose.msk.msra.mxu1 %vm12559_vm9, %v11148_v31 }
0x13e6   : > { %11162 = vmatprep.subr.msk.bf16.mxu1 %vm12559_vm9, %v11160_v33 }
0x13e7   : > { %v11558_v34 = vpop.permute.xlu1 %11557 }
0x13e8   : > { %v11560_v35 = vunpack.i.h.bf16 %v11558_v34  ;;  %v11559_v36 = vunpack.i.l.bf16 %v11558_v34 }
0x13ea   : > { %v11154_v38 = vpack.c.bf16 %v11560_v35, %v11559_v36 }
0x13ec   : > { %10659 = vmatmul.mubr.msk.f32.vlgmr.msra.gmra.mrb[28].mxu1 %vm1410_vm4, %v12537_v21  ;;  %11156 = vmatprep.subr.msk.bf16.mxu0 %vm12570_vm11, %v11154_v38 }
0x13ed   : > { %11159 = vmatpush3.bf16.msk.msra.mxu0 %vm12570_vm11, %v11154_v38  ;;  %11165 = vmatpush3.bf16.xpose.msk.msra.mxu1 %vm12559_vm9, %v11160_v33 }
0x13ee   : > { %10672 = vmatprep.mubr.msk.f32.mxu1 %vm1410_vm4, %v4333_v39 }
0x13f4   : > { %10673 = vmatmul.mubr.msk.f32.vlgmr.msra.gmra.mrb[30].mxu1 %vm1410_vm4, %v4335_v32 }
0x14bf   : > { %v10660_v40 = vpop.f32.mrb[28].mxu1 }
0x14c0   : > { %v4211_v41 = vpop.f32.mrb[29].mxu1  ;;  %v4225_v43 = vsel %vm4224_vm12, %v10660_v40, -inf }
0x14c1   : > { %4226 = vmax.xlane.f32.xlu1 %v4225_v43  ;;  %v4221_v44 = vsel %vm4220_vm13, %v4211_v41, -inf }
0x14c2   : > { %4222 = vmax.xlane.f32.xlu0 %v4221_v44 }
0x14c7   : > { %v10674_v45 = vpop.f32.mrb[30].mxu1 }
0x14c8   : > { %v4414_v46 = vpop.f32.mrb[31].mxu1  ;;  %v4426_v47 = vsel %vm4224_vm12, %v10674_v45, -inf }
0x14c9   : > { %4427 = vmax.xlane.f32.xlu0 %v4426_v47  ;;  %v4423_v48 = vsel %vm4220_vm13, %v4414_v46, -inf }
0x14cd   : > { %4424 = vmax.xlane.f32.xlu0 %v4423_v48 }
0x14d2   : > { %11567 = vrot.lane.b32.xlu1 %v12545_v23, %s13478_s8 }
0x14d6   : > { %4533 = vrot.lane.b32.xlu1 %v12539_v22, %s13479_s10 }
0x14da   : > { %11577 = vrot.lane.b32.xlu1 %v12545_v23, %s13480_s12 }
0x14e3   : > { %11562 = vrot.lane.b32.xlu0 %v12545_v23, %s13481_s13 }
0x14e7   : > { %4535 = vrot.lane.b32.xlu0 %v12537_v21, %s13479_s10 }
0x154e   : > { %v4227_v15 = vpop.xlane.xlu1 %4226 }
0x154f   : > { %v4229_v49 = vsub.f32 %v10660_v40, %v4227_v15  ;;  %v4223_v50 = vpop.xlane.xlu0 %4222 }
0x1550   : > { %v4228_v51 = vsub.f32 %v4211_v41, %v4223_v50 }
0x1551   : > { %v4232_v54 = vmul.f32 1.442695, %v4229_v49 }
0x1552   : > { %v4230_v57 = vmul.f32 1.442695, %v4228_v51  ;;  %v11568_v61 = vpop.permute.xlu1 %11567 }
0x1553   : > { %v11570_v3 = vunpack.i.h.bf16 %v11568_v61  ;;  %v11569_v7 = vunpack.i.l.bf16 %v11568_v61 }
0x1554   : > { %11684 = vpow2.f32 %v4230_v57 }
0x1555   : > { %11686 = vpow2.f32 %v4232_v54  ;;  %v11172_v12 = vpack.c.bf16 %v11570_v3, %v11569_v7 }
0x1556   : > { %v4428_v58 = vpop.xlane.xlu0 %4427  ;;  %v4534_v19 = vpop.permute.xlu1 %4533 }
0x1557   : > { %v4430_v59 = vsub.f32 %v10674_v45, %v4428_v58 }
0x1559   : > { %v4433_v63 = vmul.f32 1.442695, %v4430_v59 }
0x155a   : > { %v4425_v60 = vpop.xlane.xlu0 %4424  ;;  %v11578_v32 = vpop.permute.xlu1 %11577 }
0x155b   : > { %v4429_v62 = vsub.f32 %v4414_v46, %v4425_v60  ;;  %v11580_v41 = vunpack.i.h.bf16 %v11578_v32  ;;  %v11579_v43 = vunpack.i.l.bf16 %v11578_v32 }
0x155d   : > { %v4431_v0 = vmul.f32 1.442695, %v4429_v62  ;;  %v11184_v46 = vpack.c.bf16 %v11580_v41, %v11579_v43  ;;  %v4039_v41 = vld [vmem:[%s13483_s19] sm:$0xff]  ;;  %v4040_v43 = vld [vmem:[%s13483_s19 + $0x8] sm:$0xff] }
0x155e   : > { %v12598_v2 = vpop.eup %11684  ;;  %v11563_v5 = vpop.permute.xlu0 %11562 }
0x155f   : > { %v12600_v6 = vpop.eup %11686  ;;  %11688 = vpow2.f32 %v4431_v0  ;;  %v11565_v8 = vunpack.i.h.bf16 %v11563_v5  ;;  %v11564_v10 = vunpack.i.l.bf16 %v11563_v5  ;;  %10665 = vmatprep.mubr.msk.f32.mxu0 %vm4220_vm13, %v12598_v2 }
0x1560   : > { %11690 = vpow2.f32 %v4433_v63  ;;  %10666 = vmatmul.mubr.msk.f32.vlgmr.msra.gmra.mrb[34].mxu0 %vm4220_vm13, %v12600_v6  ;;  %v4322_v63 = vsel %vm4220_vm13, %v12598_v2, 0.0  ;;  %v4325_v32 = vsel %vm4224_vm12, %v12600_v6, 0.0 }
0x1561   : > { %v11166_v11 = vpack.c.bf16 %v11565_v8, %v11564_v10 }
0x1562   : > { %v4536_v20 = vpop.permute.xlu0 %4535 }
0x1563   : > { %11168 = vmatprep.subr.msk.bf16.mxu0 %vm12570_vm11, %v11166_v11 }
0x1564   : > { %11171 = vmatpush3.bf16.msk.msra.mxu0 %vm12570_vm11, %v11166_v11 }
0x1565   : > { %11174 = vmatprep.subr.msk.bf16.mxu0 %vm12559_vm9, %v11172_v12 }
0x1569   : > { %v11689_v14 = vpop.eup %11688 }
0x156a   : > { %v11691_v16 = vpop.eup %11690  ;;  %10679 = vmatprep.mubr.msk.f32.mxu0 %vm4220_vm13, %v11689_v14  ;;  %v4523_v59 = vsel %vm4220_vm13, %v11689_v14, 0.0 }
0x156b   : > { %10680 = vmatmul.mubr.msk.f32.vlgmr.msra.gmra.mrb[36].mxu0 %vm4220_vm13, %v11691_v16  ;;  %v4526_v60 = vsel %vm4224_vm12, %v11691_v16, 0.0 }
0x156c   : > { %10686 = vmatprep.mubr.msk.f32.mxu0 %vm1410_vm4, %v4534_v19 }
0x156d   : > { %11177 = vmatpush3.bf16.xpose.msk.msra.mxu0 %vm12559_vm9, %v11172_v12 }
0x1574   : > { %10687 = vmatmul.mubr.msk.f32.vlgmr.msra.gmra.mrb[38].mxu0 %vm1410_vm4, %v4536_v20 }
0x1633   : > { %v12618_v42 = vpop.f32.mrb[34].mxu0 }
0x1634   : > { %v12620_v24 = vpop.f32.mrb[35].mxu0 }
0x163e   : > { %v12622_v25 = vpop.f32.mrb[36].mxu0 }
0x163f   : > { %v12624_v26 = vpop.f32.mrb[37].mxu0 }
0x1647   : > { %v10688_v27 = vpop.f32.mrb[38].mxu0 }
0x1648   : > { %v4615_v28 = vpop.f32.mrb[39].mxu0  ;;  %v4627_v29 = vsel %vm4224_vm12, %v10688_v27, -inf }
0x1649   : > { %4628 = vmax.xlane.f32.xlu0 %v4627_v29  ;;  %v4624_v31 = vsel %vm4220_vm13, %v4615_v28, -inf }
0x164a   : > { %4625 = vmax.xlane.f32.xlu1 %v4624_v31 }
0x165b   : > { %4734 = vrot.lane.b32.xlu1 %v12539_v22, %s13482_s14 }
0x165f   : > { %11572 = vrot.lane.b32.xlu0 %v12545_v23, %s13460_s16 }
0x1663   : > { %4736 = vrot.lane.b32.xlu0 %v12537_v21, %s13482_s14 }
0x16d6   : > { %v4629_v33 = vpop.xlane.xlu0 %4628 }
0x16d7   : > { %v4631_v34 = vsub.f32 %v10688_v27, %v4629_v33  ;;  %v4626_v35 = vpop.xlane.xlu1 %4625 }
0x16d8   : > { %v4630_v36 = vsub.f32 %v4615_v28, %v4626_v35 }
0x16d9   : > { %v4634_v38 = vmul.f32 1.442695, %v4631_v34 }
0x16da   : > { %v4632_v39 = vmul.f32 1.442695, %v4630_v36  ;;  %v11573_v40 = vpop.permute.xlu0 %11572 }
0x16db   : > { %v11575_v44 = vunpack.i.h.bf16 %v11573_v40  ;;  %v11574_v45 = vunpack.i.l.bf16 %v11573_v40  ;;  %v4735_v48 = vpop.permute.xlu1 %4734 }
0x16dc   : > { %11692 = vpow2.f32 %v4632_v39 }
0x16dd   : > { %11694 = vpow2.f32 %v4634_v38  ;;  %v11178_v22 = vpack.c.bf16 %v11575_v44, %v11574_v45  ;;  %v11196_v44 = vpack.c.bf16 %v4040_v43, %v4039_v41 }
0x16de   : > { %v4737_v15 = vpop.permute.xlu0 %4736 }
0x16df   : > { %11180 = vmatprep.subr.msk.bf16.mxu1 %vm12570_vm11, %v11178_v22 }
0x16e0   : > { %11183 = vmatpush3.bf16.msk.msra.mxu1 %vm12570_vm11, %v11178_v22  ;;  %v4041_v22 = vld [vmem:[%s13483_s19 + $0x10] sm:$0xff] }
0x16e1   : > { %11186 = vmatprep.subr.msk.bf16.mxu1 %vm12559_vm9, %v11184_v46 }
0x16e6   : > { %v11693_v21 = vpop.eup %11692 }
0x16e7   : > { %v11695_v47 = vpop.eup %11694  ;;  %10693 = vmatprep.mubr.msk.f32.mxu1 %vm4220_vm13, %v11693_v21  ;;  %v4724_v61 = vsel %vm4220_vm13, %v11693_v21, 0.0 }
0x16e8   : > { %10694 = vmatmul.mubr.msk.f32.vlgmr.msra.gmra.mrb[32].mxu1 %vm4220_vm13, %v11695_v47  ;;  %v4727_v62 = vsel %vm4224_vm12, %v11695_v47, 0.0 }
0x16e9   : > { %11189 = vmatpush3.bf16.xpose.msk.msra.mxu1 %vm12559_vm9, %v11184_v46  ;;  %10700 = vmatprep.mubr.msk.f32.mxu1 %vm1410_vm4, %v4735_v48  ;;  %v4042_v46 = vld [vmem:[%s13483_s19 + $0x18] sm:$0xff] }
0x16f0   : > { %10701 = vmatmul.mubr.msk.f32.vlgmr.msra.gmra.mrb[34].mxu1 %vm1410_vm4, %v4737_v15 }
0x17bb   : > { %v10695_v49 = vpop.f32.mrb[32].mxu1 }
0x17bc   : > { %v4715_v50 = vpop.f32.mrb[33].mxu1 }
0x17c3   : > { %v10702_v51 = vpop.f32.mrb[34].mxu1 }
0x17c4   : > { %v4816_v54 = vpop.f32.mrb[35].mxu1  ;;  %v4828_v57 = vsel %vm4224_vm12, %v10702_v51, -inf }
0x17c5   : > { %4829 = vmax.xlane.f32.xlu0 %v4828_v57  ;;  %v4825_v58 = vsel %vm4220_vm13, %v4816_v54, -inf }
0x17c6   : > { %4826 = vmax.xlane.f32.xlu1 %v4825_v58 }
0x17ca   : > { %4524 = vadd.xlane.f32.xlu1 %v4523_v59 }
0x17ce   : > { %4527 = vadd.xlane.f32.xlu1 %v4526_v60 }
0x17d2   : > { %4725 = vadd.xlane.f32.xlu1 %v4724_v61 }
0x17d6   : > { %4728 = vadd.xlane.f32.xlu1 %v4727_v62 }
0x17db   : > { %11582 = vrot.lane.b32.xlu0 %v12545_v23, %s13459_s22 }
0x17fa   : > { %4323 = vadd.xlane.f32.xlu0 %v4322_v63 }
0x1852   : > { %v4830_v0 = vpop.xlane.xlu0 %4829 }
0x1853   : > { %v4832_v3 = vsub.f32 %v10702_v51, %v4830_v0  ;;  %v4827_v5 = vpop.xlane.xlu1 %4826  ;;  %v3902_v51 = vadd.f32 %v12525_v13, %v12450_v9 }
0x1854   : > { %v4831_v7 = vsub.f32 %v4816_v54, %v4827_v5 }
0x1855   : > { %v4835_v8 = vmul.f32 1.442695, %v4832_v3  ;;  %v3907_v54 = vsel %vm1333_vm3, %v3902_v51, 0.0 }
0x1856   : > { %v4833_v10 = vmul.f32 1.442695, %v4831_v7  ;;  %v11583_v11 = vpop.permute.xlu0 %11582 }
0x1857   : > { %v11585_v12 = vunpack.i.h.bf16 %v11583_v11  ;;  %v11584_v14 = vunpack.i.l.bf16 %v11583_v11  ;;  %v4525_v16 = vpop.xlane.xlu1 %4524 }
0x1858   : > { %11696 = vpow2.f32 %v4833_v10 }
0x1859   : > { %11698 = vpow2.f32 %v4835_v8  ;;  %v11190_v19 = vpack.c.bf16 %v11585_v12, %v11584_v14 }
0x185b   : > { %11192 = vmatprep.subr.msk.bf16.mxu0 %vm12570_vm11, %v11190_v19  ;;  %v4528_v23 = vpop.xlane.xlu1 %4527 }
0x185c   : > { %11195 = vmatpush3.bf16.msk.msra.mxu0 %vm12570_vm11, %v11190_v19 }
0x185d   : > { %11197 = vmatprep.subr.bf16.mxu0 %v11196_v44 }
0x185f   : > { %v4726_v2 = vpop.xlane.xlu1 %4725 }
0x1862   : > { %v11697_v20 = vpop.eup %11696 }
0x1863   : > { %v11699_v27 = vpop.eup %11698  ;;  %10707 = vmatprep.mubr.msk.f32.mxu0 %vm4220_vm13, %v11697_v20  ;;  %v4729_v28 = vpop.xlane.xlu1 %4728  ;;  %v4925_v29 = vsel %vm4220_vm13, %v11697_v20, 0.0 }
0x1864   : > { %11700 = vrcp.f32 %v4729_v28  ;;  %4926 = vadd.xlane.f32.xlu1 %v4925_v29  ;;  %10708 = vmatmul.mubr.msk.f32.vlgmr.msra.gmra.mrb[40].mxu0 %vm4220_vm13, %v11699_v27  ;;  %v4928_v31 = vsel %vm4224_vm12, %v11699_v27, 0.0 }
0x1865   : > { %11702 = vrcp.f32 %v4525_v16  ;;  %11199 = vmatpush3.bf16.msra.mxu0 %v11196_v44  ;;  %v9756_v16 = vld [vmem:[%s13484_s20] ss:$0 sm:$0xff]  ;;  %v5101_v44 = vld [vmem:[%s13485_s21 + $0x10] sm:$0xff] }
0x1866   : > { %11704 = vrcp.f32 %v4528_v23 }
0x1867   : > { %11706 = vrcp.f32 %v4726_v2 }
0x1868   : > { %4929 = vadd.xlane.f32.xlu1 %v4928_v31 }
0x186c   : > { %4326 = vadd.xlane.f32.xlu1 %v4325_v32 }
0x186e   : > { %v11701_v33 = vpop.eup %11700 }
0x186f   : > { %v4733_v34 = vmul.f32 %v11701_v33, %v10695_v49  ;;  %v11703_v35 = vpop.eup %11702 }
0x1870   : > { %v4531_v36 = vmul.f32 %v11703_v35, %v12624_v26  ;;  %v11705_v38 = vpop.eup %11704  ;;  %v11200_v26 = vpack.c.bf16 %v4042_v46, %v4041_v22  ;;  %v5099_v46 = vld [vmem:[%s13485_s21] sm:$0xff] }
0x1871   : > { %4947 = vrot.lane.b32.xlu0 %v4733_v34, %s13462_s18  ;;  %v4532_v6 = vmul.f32 %v11705_v38, %v12622_v25  ;;  %v11707_v39 = vpop.eup %11706 }
0x1872   : > { %v4732_v40 = vmul.f32 %v11707_v39, %v4715_v50  ;;  %11201 = vmatprep.subr.bf16.mxu0 %v11200_v26 }
0x1873   : > { %11203 = vmatpush3.bf16.msra.mxu0 %v11200_v26  ;;  %v5100_v26 = vld [vmem:[%s13485_s21 + $0x8] sm:$0xff] }
0x1874   : > { %11212 = vmatprep.subr.bf16.mxu0 %v11888_v4 }
0x187d   : > { %4937 = vrot.lane.b32.xlu1 %v4531_v36, %s13461_s23 }
0x1881   : > { %4939 = vrot.lane.b32.xlu1 %v4532_v6, %s13461_s23 }
0x1885   : > { %4945 = vrot.lane.b32.xlu1 %v4732_v40, %s13462_s18 }
0x1887   : > { %v4324_v58 = vpop.xlane.xlu0 %4323 }
0x18e3   : > { %v4948_v10 = vpop.permute.xlu0 %4947 }
0x18f1   : > { %v4927_v45 = vpop.xlane.xlu1 %4926 }
0x18f2   : > { %11708 = vrcp.f32 %v4927_v45  ;;  %v5102_v45 = vld [vmem:[%s13485_s21 + $0x18] sm:$0xff] }
0x18f3   : > { %v11591_v22 = vpack.i.bf16 %v5102_v45, %v5101_v44 }
0x18f5   : > { %v4930_v21 = vpop.xlane.xlu1 %4929 }
0x18f6   : > { %11710 = vrcp.f32 %v4930_v21  ;;  %v11586_v21 = vpack.i.bf16 %v5100_v26, %v5099_v46 }
0x18f7   : > { %11712 = vrcp.f32 %v4324_v58 }
0x18f9   : > { %v4327_v57 = vpop.xlane.xlu1 %4326 }
0x18fa   : > { %11714 = vrcp.f32 %v4327_v57 }
0x18fc   : > { %v11709_v47 = vpop.eup %11708 }
0x18fd   : > { %v4938_v59 = vpop.permute.xlu1 %4937 }
0x1900   : > { %v11711_v49 = vpop.eup %11710 }
0x1901   : > { %v4940_v60 = vpop.permute.xlu1 %4939  ;;  %v11713_v61 = vpop.eup %11712 }
0x1902   : > { %v4330_v0 = vmul.f32 %v11713_v61, %v12620_v24 }
0x1904   : > { %v11715_v62 = vpop.eup %11714  ;;  %v4959_v5 = vsel %vm1410_vm4, %v4330_v0, %v4938_v59 }
0x1905   : > { %v4946_v63 = vpop.permute.xlu1 %4945  ;;  %v4331_v3 = vmul.f32 %v11715_v62, %v12618_v42 }
0x1906   : > { %v4961_v9 = vsel %vm2080_vm5, %v4959_v5, %v4946_v63 }
0x1907   : > { %v4960_v7 = vsel %vm1410_vm4, %v4331_v3, %v4940_v60 }
0x1908   : > { %v4962_v11 = vsel %vm2080_vm5, %v4960_v7, %v4948_v10 }
0x1937   : > { %v10709_v25 = vpop.f32.mrb[40].mxu0 }
0x1938   : > { %v4916_v48 = vpop.f32.mrb[41].mxu0  ;;  %v4934_v50 = vmul.f32 %v11711_v49, %v10709_v25  ;;  %v11204_v25 = vpack.c.bf16 %v5100_v26, %v5099_v46 }
0x1939   : > { %v4933_v15 = vmul.f32 %v11709_v47, %v4916_v48  ;;  %v11208_v47 = vpack.c.bf16 %v5102_v45, %v5101_v44  ;;  %v9761_v48 = vld [vmem:[%s13486_s24] ss:$0 sm:$0xff] }
0x193a   : > { %11205 = vmatprep.subr.bf16.mxu1 %v11204_v25 }
0x193b   : > { %4953 = vrot.lane.b32.xlu1 %v4933_v15, %s13463_s11  ;;  %11207 = vmatpush3.bf16.msra.mxu1 %v11204_v25 }
0x193c   : > { %11209 = vmatprep.subr.bf16.mxu1 %v11208_v47 }
0x193f   : > { %4955 = vrot.lane.b32.xlu1 %v4934_v50, %s13463_s11  ;;  %11211 = vmatpush3.bf16.msra.mxu1 %v11208_v47 }
0x1963   : > { %3908 = vadd.xlane.f32.xlu1 %v3907_v54 }
0x19ad   : > { %v4954_v13 = vpop.permute.xlu1 %4953 }
0x19ae   : > { %v4963_v8 = vsel %vm2082_vm6, %v4961_v9, %v4954_v13 }
0x19af   : > { %10718 = vmatprep.mubr.msk.f32.mxu0 %vm1333_vm3, %v4963_v8  ;;  %v9719_v8 = vld [vmem:[%s13457_s2 + $0x1] ss:$0 sm:$0xff]  ;;  %s13490_s2 = sld [smem:[#allocation31_spill]] }
0x19b1   : > { %v4956_v12 = vpop.permute.xlu1 %4955 }
0x19b2   : > { %v4964_v24 = vsel %vm2082_vm6, %v4962_v11, %v4956_v12  ;;  %v9720_v12 = vld [vmem:[%s13458_s0 + $0x1] ss:$0 sm:$0xff]  ;;  %s13489_s0 = sld [smem:[#allocation30_spill]] }
0x19b3   : > { %10719 = vmatmul.mubr.msk.f32.vlgmr.msra.gmra.mrb[42].mxu0 %vm1333_vm3, %v4964_v24 }
0x19b4   : > { %10740 = vmatprep.mubr.msk.f32.mxu0 %vm11887_vm1, %v11886_v1 }
0x19f0   : > { %v3909_v42 = vpop.xlane.xlu1 %3908 }
0x19f1   : > { %v3910_v14 = vmul.f32 0.03125, %v3909_v42 }
0x19f3   : > { %v3911_v23 = vsub.f32 %v3902_v51, %v3910_v14  ;;  %v9759_v14 = vld [vmem:[%s13487_s25] ss:$0 sm:$0xff] }
0x19f5   : > { %v3912_v32 = vmul.f32 %v3911_v23, %v3911_v23 }
0x19f7   : > { %v3913_v34 = vsel %vm1333_vm3, %v3912_v32, 0.0 }
0x1a86   : > { %v10720_v19 = vpop.f32.mrb[42].mxu0 }
0x1a87   : > { %v5049_v2 = vadd.f32 %v10720_v19, %v9756_v16  ;;  %v5043_v20 = vpop.f32.mrb[43].mxu0 }
0x1a88   : > { %v5044_v27 = vadd.f32 %v9756_v16, %v5043_v20 }
0x1a89   : > { %v5053_v28 = vadd.f32 %v5049_v2, %v12530_v18  ;;  %v9760_v2 = vld [vmem:[%s13488_s29] ss:$0 sm:$0xff] }
0x1a8a   : > { %v5052_v29 = vadd.f32 %v5044_v27, %v12528_v17 }
0x1a8b   : > { %v5060_v31 = vsel %vm5059_vm14, %v5053_v28, 0.0 }
0x1a8c   : > { %5061 = vadd.xlane.f32.xlu1 %v5060_v31  ;;  %v5056_v33 = vsel %vm1333_vm3, %v5052_v29, 0.0 }
0x1a8d   : > { %5057 = vadd.xlane.f32.xlu0 %v5056_v33 }
0x1a90   : > { %3914 = vadd.xlane.f32.xlu1 %v3913_v34 }
0x1b19   : > { %v5062_v35 = vpop.xlane.xlu1 %5061 }
0x1b1a   : > { %v5064_v36 = vmul.f32 0.03125, %v5062_v35  ;;  %v5058_v38 = vpop.xlane.xlu0 %5057 }
0x1b1b   : > { %v5063_v18 = vmul.f32 0.03125, %v5058_v38 }
0x1b1c   : > { %v5066_v6 = vsub.f32 %v5053_v28, %v5064_v36 }
0x1b1d   : > { %v5065_v17 = vsub.f32 %v5052_v29, %v5063_v18  ;;  %v3915_v15 = vpop.xlane.xlu1 %3914 }
0x1b1e   : > { %v5068_v39 = vmul.f32 %v5066_v6, %v5066_v6  ;;  %v3916_v49 = vmul.f32 0.03125, %v3915_v15 }
0x1b1f   : > { %v5067_v40 = vmul.f32 %v5065_v17, %v5065_v17 }
0x1b20   : > { %v5072_v41 = vsel %vm5059_vm14, %v5068_v39, 0.0  ;;  %v3917_v50 = vadd.f32 1e-05, %v3916_v49 }
0x1b21   : > { %5073 = vadd.xlane.f32.xlu1 %v5072_v41  ;;  %v5069_v43 = vsel %vm1333_vm3, %v5067_v40, 0.0 }
0x1b22   : > { %5070 = vadd.xlane.f32.xlu0 %v5069_v43  ;;  %11716 = vrsqrt.f32 %v3917_v50 }
0x1b2c   : > { %v11717_v60 = vpop.eup %11716 }
0x1b2d   : > { %v3919_v13 = vmul.f32 %v11717_v60, %v3911_v23 }
0x1b2f   : > { %v3926_v11 = vmul.f32 %v9719_v8, %v3919_v13 }
0x1b31   : > { %v12713_v42 = vadd.f32 %v9720_v12, %v3926_v11 }
0x1b32   : > { %11592 = vrot.lane.b32.xlu1 %v11591_v22, %s13471_s3 }
0x1b36   : > { %5212 = vrot.lane.b32.xlu1 %v9761_v48, %s13471_s3 }
0x1b38   : > { %11587 = vrot.lane.b32.xlu0 %v11586_v21, %s13471_s3 }
0x1bae   : > { %v5074_v51 = vpop.xlane.xlu1 %5073 }
0x1baf   : > { %v5076_v54 = vmul.f32 0.03125, %v5074_v51  ;;  %v5071_v57 = vpop.xlane.xlu0 %5070 }
0x1bb0   : > { %v5075_v58 = vmul.f32 0.03125, %v5071_v57 }
0x1bb1   : > { %v5078_v59 = vadd.f32 1e-05, %v5076_v54 }
0x1bb2   : > { %v5077_v61 = vadd.f32 1e-05, %v5075_v58  ;;  %v11593_v62 = vpop.permute.xlu1 %11592 }
0x1bb3   : > { %11718 = vrsqrt.f32 %v5078_v59  ;;  %v11588_v63 = vpop.permute.xlu0 %11587  ;;  %v11595_v0 = vunpack.i.h.bf16 %v11593_v62  ;;  %v11594_v9 = vunpack.i.l.bf16 %v11593_v62 }
0x1bb4   : > { %11720 = vrsqrt.f32 %v5077_v61  ;;  %v11590_v3 = vunpack.i.h.bf16 %v11588_v63  ;;  %v11589_v5 = vunpack.i.l.bf16 %v11588_v63 }
0x1bb5   : > { %v11216_v10 = vpack.c.bf16 %v11595_v0, %v11594_v9 }
0x1bb6   : > { %v11213_v7 = vpack.c.bf16 %v11590_v3, %v11589_v5  ;;  %v5213_v31 = vpop.permute.xlu1 %5212 }
0x1bb8   : > { %11214 = vmatpush3.bf16.msra.mxu0 %v11213_v7 }
0x1bb9   : > { %11215 = vmatprep.subr.bf16.mxu0 %v11888_v4 }
0x1bbc   : > { %11217 = vmatpush3.bf16.msra.mxu0 %v11216_v10 }
0x1bbd   : > { %v11719_v24 = vpop.eup %11718 }
0x1bbe   : > { %v11721_v16 = vpop.eup %11720  ;;  %v5082_v19 = vmul.f32 %v11719_v24, %v5066_v6 }
0x1bbf   : > { %10741 = vmatmul.mubr.msk.f32.vlgmr.msra.gmra.mrb[44].mxu0 %vm1333_vm3, %v12713_v42  ;;  %v5081_v23 = vmul.f32 %v11721_v16, %v5065_v17 }
0x1bc0   : > { %v5090_v20 = vmul.f32 %v9759_v14, %v5082_v19 }
0x1bc1   : > { %v5089_v27 = vmul.f32 %v9759_v14, %v5081_v23 }
0x1bc2   : > { %v12721_v29 = vadd.f32 %v9760_v2, %v5090_v20 }
0x1bc3   : > { %v12719_v28 = vadd.f32 %v9760_v2, %v5089_v27 }
0x1bc5   : > { %10729 = vmatprep.mubr.msk.f32.mxu1 %vm1333_vm3, %v12719_v28 }
0x1bc6   : > { %10730 = vmatmul.mubr.msk.f32.vlgmr.msra.gmra.mrb[36].mxu1 %vm1333_vm3, %v12721_v29 }
0x1c92   : > { %v5284_v32 = vpop.f32.mrb[44].mxu0 }
0x1c93   : > { %v12727_v33 = vadd.f32 %v5284_v32, %v5213_v31  ;;  %v10742_v34 = vpop.f32.mrb[45].mxu0 }
0x1c95   : > { %5676 = vrot.lane.b32.xlu0 %v12727_v33, %s13479_s10  ;;  %5483 = vrot.lane.b32.xlu1 %v12727_v33, %s13472_s5 }
0x1c96   : > { %10743 = vmatprep.subr.msk.mxu1 %vm1410_vm4, %v12727_v33 }
0x1c97   : > { %10744 = vmatpush3.xpose.msk.msra.mxu1 %vm1410_vm4, %v12727_v33 }
0x1c99   : > { %v10731_v35 = vpop.f32.mrb[36].mxu1 }
0x1c9a   : > { %v5193_v36 = vadd.f32 %v10731_v35, %v9761_v48  ;;  %v5187_v38 = vpop.f32.mrb[37].mxu1 }
0x1c9b   : > { %v5188_v18 = vadd.f32 %v9761_v48, %v5187_v38 }
0x1c9c   : > { %5481 = vrot.lane.b32.xlu1 %v5193_v36, %s13472_s5 }
0x1c9d   : > { %10745 = vmatprep.mubr.msk.f32.mxu1 %vm1410_vm4, %v5188_v18  ;;  %5479 = vrot.lane.b32.xlu0 %v5188_v18, %s13472_s5 }
0x1c9e   : > { %10746 = vmatmul.mubr.msk.f32.vlgmr.msra.gmra.mrb[38].mxu1 %vm1410_vm4, %v5193_v36 }
0x1ca0   : > { %5672 = vrot.lane.b32.xlu1 %v5188_v18, %s13479_s10 }
0x1ca1   : > { %5674 = vrot.lane.b32.xlu0 %v5193_v36, %s13479_s10 }
0x1ca4   : > { %5869 = vrot.lane.b32.xlu1 %v12727_v33, %s13482_s14 }
0x1ca5   : > { %5865 = vrot.lane.b32.xlu0 %v5188_v18, %s13482_s14 }
0x1ca8   : > { %5867 = vrot.lane.b32.xlu1 %v5193_v36, %s13482_s14 }
0x1d07   : > { %v5484_v6 = vpop.permute.xlu1 %5483  ;;  %v5677_v17 = vpop.permute.xlu0 %5676 }
0x1d08   : > { %10753 = vmatprep.subr.msk.mxu0 %vm1410_vm4, %v5484_v6 }
0x1d09   : > { %10754 = vmatpush3.xpose.msk.msra.mxu0 %vm1410_vm4, %v5484_v6 }
0x1d0a   : > { %10763 = vmatprep.subr.msk.mxu0 %vm1410_vm4, %v5677_v17 }
0x1d0e   : > { %v5482_v39 = vpop.permute.xlu1 %5481 }
0x1d0f   : > { %v5480_v40 = vpop.permute.xlu0 %5479 }
0x1d10   : > { %10755 = vmatprep.mubr.msk.f32.mxu0 %vm1410_vm4, %v5480_v40 }
0x1d11   : > { %10756 = vmatmul.mubr.msk.f32.vlgmr.msra.gmra.mrb[46].mxu0 %vm1410_vm4, %v5482_v39 }
0x1d12   : > { %10764 = vmatpush3.xpose.msk.msra.mxu0 %vm1410_vm4, %v5677_v17  ;;  %v5673_v41 = vpop.permute.xlu1 %5672 }
0x1d13   : > { %v5675_v43 = vpop.permute.xlu0 %5674  ;;  %10765 = vmatprep.mubr.msk.f32.mxu0 %vm1410_vm4, %v5673_v41 }
0x1d15   : > { %10766 = vmatmul.mubr.msk.f32.vlgmr.msra.gmra.mrb[48].mxu0 %vm1410_vm4, %v5675_v43 }
0x1d16   : > { %v5870_v44 = vpop.permute.xlu1 %5869 }
0x1d17   : > { %v5866_v45 = vpop.permute.xlu0 %5865  ;;  %10773 = vmatprep.subr.msk.mxu0 %vm1410_vm4, %v5870_v44 }
0x1d18   : > { %10774 = vmatpush3.xpose.msk.msra.mxu0 %vm1410_vm4, %v5870_v44  ;;  %10775 = vmatprep.mubr.msk.f32.mxu0 %vm1410_vm4, %v5866_v45 }
0x1d1a   : > { %v5868_v22 = vpop.permute.xlu1 %5867 }
0x1d1b   : > { %10776 = vmatmul.mubr.msk.f32.vlgmr.msra.gmra.mrb[50].mxu0 %vm1410_vm4, %v5868_v22 }
0x1d71   : > { %v10747_v46 = vpop.f32.mrb[38].mxu1 }
0x1d72   : > { %v5363_v26 = vpop.f32.mrb[39].mxu1  ;;  %v5376_v21 = vsel %vm5375_vm15, %v10747_v46, -inf }
0x1d73   : > { %5377 = vmax.xlane.f32.xlu1 %v5376_v21  ;;  %v5372_v25 = vsel %vm1410_vm4, %v5363_v26, -inf }
0x1d74   : > { %5373 = vmax.xlane.f32.xlu0 %v5372_v25 }
0x1de4   : > { %v10757_v47 = vpop.f32.mrb[46].mxu0 }
0x1de5   : > { %v5557_v48 = vpop.f32.mrb[47].mxu0  ;;  %v5569_v15 = vsel %vm5375_vm15, %v10757_v47, -inf }
0x1de6   : > { %5570 = vmax.xlane.f32.xlu0 %v5569_v15  ;;  %v5566_v54 = vsel %vm1410_vm4, %v5557_v48, -inf }
0x1de8   : > { %v10767_v49 = vpop.f32.mrb[48].mxu0 }
0x1de9   : > { %v5750_v50 = vpop.f32.mrb[49].mxu0  ;;  %v5762_v51 = vsel %vm5375_vm15, %v10767_v49, -inf }
0x1dea   : > { %5763 = vmax.xlane.f32.xlu1 %v5762_v51  ;;  %5567 = vmax.xlane.f32.xlu0 %v5566_v54  ;;  %v5759_v57 = vsel %vm1410_vm4, %v5750_v50, -inf }
0x1dee   : > { %v10777_v58 = vpop.f32.mrb[50].mxu0  ;;  %5760 = vmax.xlane.f32.xlu0 %v5759_v57  ;;  %v5104_v57 = vld [vmem:[%s13489_s0] sm:$0xff] }
0x1def   : > { %v5943_v59 = vpop.f32.mrb[51].mxu0  ;;  %v5955_v60 = vsel %vm5375_vm15, %v10777_v58, -inf }
0x1df0   : > { %5956 = vmax.xlane.f32.xlu1 %v5955_v60  ;;  %v5952_v61 = vsel %vm1410_vm4, %v5943_v59, -inf }
0x1df2   : > { %5953 = vmax.xlane.f32.xlu0 %v5952_v61 }
0x1e00   : > { %v5378_v5 = vpop.xlane.xlu1 %5377 }
0x1e01   : > { %v5374_v62 = vpop.xlane.xlu0 %5373  ;;  %5578 = vrot.lane.b32.xlu1 %v12727_v33, %s13470_s7  ;;  %v5380_v9 = vsub.f32 %v10747_v46, %v5378_v5 }
0x1e02   : > { %v5379_v63 = vsub.f32 %v5363_v26, %v5374_v62 }
0x1e03   : > { %v5383_v10 = vmul.f32 1.442695, %v5380_v9 }
0x1e04   : > { %v5381_v0 = vmul.f32 1.442695, %v5379_v63  ;;  %v5106_v63 = vld [vmem:[%s13489_s0 + $0x10] sm:$0xff] }
0x1e05   : > { %5771 = vrot.lane.b32.xlu1 %v12727_v33, %s13478_s8 }
0x1e06   : > { %11722 = vpow2.f32 %v5381_v0  ;;  %v5107_v0 = vld [vmem:[%s13489_s0 + $0x18] sm:$0xff] }
0x1e08   : > { %5385 = vrot.lane.b32.xlu0 %v12727_v33, %s13471_s3 }
0x1e09   : > { %5964 = vrot.lane.b32.xlu1 %v12727_v33, %s13480_s12 }
0x1e10   : > { %v12775_v3 = vpop.eup %11722 }
0x1e11   : > { %10750 = vmatprep.mubr.msk.f32.mxu1 %vm1410_vm4, %v12775_v3  ;;  %v5469_v15 = vsel %vm1410_vm4, %v12775_v3, 0.0  ;;  %v11222_v3 = vpack.c.bf16 %v5107_v0, %v5106_v63 }
0x1e73   : > { %v5571_v13 = vpop.xlane.xlu0 %5570 }
0x1e74   : > { %v5573_v7 = vsub.f32 %v10757_v47, %v5571_v13 }
0x1e76   : > { %v5576_v8 = vmul.f32 1.442695, %v5573_v7 }
0x1e77   : > { %v5764_v11 = vpop.xlane.xlu1 %5763  ;;  %v5568_v12 = vpop.xlane.xlu0 %5567 }
0x1e78   : > { %11724 = vpow2.f32 %v5576_v8  ;;  %v5766_v24 = vsub.f32 %v10767_v49, %v5764_v11  ;;  %v5572_v14 = vsub.f32 %v5557_v48, %v5568_v12 }
0x1e79   : > { %11726 = vpow2.f32 %v5383_v10 }
0x1e7a   : > { %v5574_v16 = vmul.f32 1.442695, %v5572_v14  ;;  %v5769_v19 = vmul.f32 1.442695, %v5766_v24 }
0x1e7b   : > { %v5761_v23 = vpop.xlane.xlu0 %5760 }
0x1e7c   : > { %v5765_v2 = vsub.f32 %v5750_v50, %v5761_v23  ;;  %11728 = vpow2.f32 %v5574_v16 }
0x1e7d   : > { %v5957_v20 = vpop.xlane.xlu1 %5956  ;;  %11730 = vpow2.f32 %v5769_v19 }
0x1e7e   : > { %v5767_v27 = vmul.f32 1.442695, %v5765_v2  ;;  %v5959_v31 = vsub.f32 %v10777_v58, %v5957_v20  ;;  %v5105_v58 = vld [vmem:[%s13489_s0 + $0x8] sm:$0xff] }
0x1e7f   : > { %v5954_v32 = vpop.xlane.xlu0 %5953 }
0x1e80   : > { %11732 = vpow2.f32 %v5767_v27  ;;  %v5962_v33 = vmul.f32 1.442695, %v5959_v31  ;;  %v5958_v34 = vsub.f32 %v5943_v59, %v5954_v32  ;;  %v11218_v59 = vpack.c.bf16 %v5105_v58, %v5104_v57 }
0x1e81   : > { %v5579_v35 = vpop.permute.xlu1 %5578 }
0x1e82   : > { %v11725_v36 = vpop.eup %11724  ;;  %11734 = vpow2.f32 %v5962_v33  ;;  %v5960_v38 = vmul.f32 1.442695, %v5958_v34  ;;  %11219 = vmatprep.subr.bf16.mxu0 %v11218_v59 }
0x1e83   : > { %v5386_v18 = vpop.permute.xlu0 %5385  ;;  %v5665_v6 = vsel %vm5375_vm15, %v11725_v36, 0.0  ;;  %v11727_v17 = vpop.eup %11726  ;;  %11221 = vmatpush3.bf16.msra.mxu0 %v11218_v59 }
0x1e84   : > { %11736 = vpow2.f32 %v5960_v38  ;;  %5666 = vadd.xlane.f32.xlu1 %v5665_v6  ;;  %10748 = vmatprep.subr.mxu1 %v5386_v18  ;;  %v5472_v47 = vsel %vm5375_vm15, %v11727_v17, 0.0 }
0x1e85   : > { %v5772_v39 = vpop.permute.xlu1 %5771  ;;  %10749 = vmatpush3.msra.mxu1 %v5386_v18  ;;  %11223 = vmatprep.subr.bf16.mxu0 %v11222_v3 }
0x1e86   : > { %10751 = vmatmul.mubr.msk.f32.vlgmr.msra.gmra.mrb[40].mxu1 %vm1410_vm4, %v11727_v17  ;;  %10758 = vmatprep.subr.mxu1 %v5579_v35  ;;  %v11729_v40 = vpop.eup %11728 }
0x1e87   : > { %10759 = vmatpush3.msra.mxu1 %v5579_v35  ;;  %10760 = vmatprep.mubr.msk.f32.mxu1 %vm1410_vm4, %v11729_v40  ;;  %v5662_v41 = vsel %vm1410_vm4, %v11729_v40, 0.0  ;;  %v11731_v43 = vpop.eup %11730 }
0x1e88   : > { %10768 = vmatprep.subr.mxu1 %v5772_v39  ;;  %5663 = vadd.xlane.f32.xlu0 %v5662_v41  ;;  %v5858_v46 = vsel %vm5375_vm15, %v11731_v43, 0.0 }
0x1e89   : > { %v5965_v44 = vpop.permute.xlu1 %5964  ;;  %11225 = vmatpush3.bf16.msra.mxu0 %v11222_v3 }
0x1e8a   : > { %v11733_v45 = vpop.eup %11732  ;;  %10761 = vmatmul.mubr.msk.f32.vlgmr.msra.gmra.mrb[42].mxu1 %vm1410_vm4, %v11725_v36 }
0x1e8b   : > { %10769 = vmatpush3.msra.mxu1 %v5772_v39  ;;  %10770 = vmatprep.mubr.msk.f32.mxu1 %vm1410_vm4, %v11733_v45  ;;  %v5855_v25 = vsel %vm1410_vm4, %v11733_v45, 0.0 }
0x1e8c   : > { %v11735_v22 = vpop.eup %11734  ;;  %10778 = vmatprep.subr.mxu1 %v5965_v44  ;;  %5859 = vadd.xlane.f32.xlu0 %v5858_v46 }
0x1e8d   : > { %v6051_v26 = vsel %vm5375_vm15, %v11735_v22, 0.0 }
0x1e8e   : > { %v11737_v21 = vpop.eup %11736  ;;  %6052 = vadd.xlane.f32.xlu1 %v6051_v26  ;;  %10771 = vmatmul.mubr.msk.f32.vlgmr.msra.gmra.mrb[44].mxu1 %vm1410_vm4, %v11731_v43 }
0x1e8f   : > { %10779 = vmatpush3.msra.mxu1 %v5965_v44  ;;  %10780 = vmatprep.mubr.msk.f32.mxu1 %vm1410_vm4, %v11737_v21  ;;  %v6048_v48 = vsel %vm1410_vm4, %v11737_v21, 0.0 }
0x1e90   : > { %5856 = vadd.xlane.f32.xlu0 %v5855_v25 }
0x1e92   : > { %5473 = vadd.xlane.f32.xlu1 %v5472_v47  ;;  %10781 = vmatmul.mubr.msk.f32.vlgmr.msra.gmra.mrb[46].mxu1 %vm1410_vm4, %v11735_v22  ;;  %v9785_v47 = vld [vmem:[%s13490_s2] ss:$0 sm:$0xff] }
0x1e93   : > { %6329 = vmatprep.mubr.f32.mxu1 %v11886_v1 }
0x1e94   : > { %6049 = vadd.xlane.f32.xlu0 %v6048_v48 }
0x1e98   : > { %5470 = vadd.xlane.f32.xlu0 %v5469_v15 }
0x1f11   : > { %v5667_v51 = vpop.xlane.xlu1 %5666 }
0x1f12   : > { %11738 = vrcp.f32 %v5667_v51 }
0x1f15   : > { %v5664_v49 = vpop.xlane.xlu0 %5663 }
0x1f16   : > { %11740 = vrcp.f32 %v5664_v49 }
0x1f19   : > { %v5860_v50 = vpop.xlane.xlu0 %5859 }
0x1f1a   : > { %11742 = vrcp.f32 %v5860_v50 }
0x1f1b   : > { %v6053_v5 = vpop.xlane.xlu1 %6052 }
0x1f1c   : > { %v11739_v9 = vpop.eup %11738 }
0x1f1d   : > { %v5857_v54 = vpop.xlane.xlu0 %5856 }
0x1f1e   : > { %11744 = vrcp.f32 %v5857_v54 }
0x1f1f   : > { %v5474_v35 = vpop.xlane.xlu1 %5473 }
0x1f20   : > { %v11741_v7 = vpop.eup %11740 }
0x1f21   : > { %v6050_v60 = vpop.xlane.xlu0 %6049 }
0x1f22   : > { %11746 = vrcp.f32 %v6050_v60 }
0x1f23   : > { %11748 = vrcp.f32 %v6053_v5 }
0x1f24   : > { %v11743_v12 = vpop.eup %11742 }
0x1f25   : > { %v5471_v34 = vpop.xlane.xlu0 %5470 }
0x1f26   : > { %11750 = vrcp.f32 %v5471_v34  ;;  %v6233_v34 = vld [vmem:[%s13491_s30 + $0x60] sm:$0xff] }
0x1f27   : > { %11752 = vrcp.f32 %v5474_v35 }
0x1f28   : > { %v11745_v19 = vpop.eup %11744 }
0x1f2c   : > { %v11747_v2 = vpop.eup %11746 }
0x1f2d   : > { %v11749_v32 = vpop.eup %11748 }
0x1f30   : > { %v11751_v18 = vpop.eup %11750 }
0x1f31   : > { %v11753_v39 = vpop.eup %11752 }
0x1f59   : > { %v10752_v61 = vpop.f32.mrb[40].mxu1 }
0x1f5a   : > { %v5460_v62 = vpop.f32.mrb[41].mxu1  ;;  %v5478_v43 = vmul.f32 %v11753_v39, %v10752_v61  ;;  %v6444_v39 = vld [vmem:[%s13493_s27 + $0x88] sm:$0xff] }
0x1f5b   : > { %v5477_v17 = vmul.f32 %v11751_v18, %v5460_v62  ;;  %v6235_v18 = vld [vmem:[%s13491_s30 + $0x70] sm:$0xff] }
0x1f5d   : > { %v10762_v13 = vpop.f32.mrb[42].mxu1 }
0x1f5e   : > { %v5671_v8 = vmul.f32 %v11739_v9, %v10762_v13  ;;  %v5653_v10 = vpop.f32.mrb[43].mxu1  ;;  %v6222_v9 = vld [vmem:[%s13491_s30 + $0x8] sm:$0xff] }
0x1f5f   : > { %v5670_v11 = vmul.f32 %v11741_v7, %v5653_v10  ;;  %v6226_v13 = vld [vmem:[%s13491_s30 + $0x28] sm:$0xff]  ;;  %v6224_v7 = vld [vmem:[%s13491_s30 + $0x18] sm:$0xff] }
0x1f60   : > { %6062 = vrot.lane.b32.xlu1 %v5671_v8, %s13461_s23  ;;  %v11226_v8 = vpack.c.bf16 %v6226_v13, %v6222_v9  ;;  %v6228_v10 = vld [vmem:[%s13491_s30 + $0x38] sm:$0xff]  ;;  %v6429_v9 = vld [vmem:[%s13493_s27 + $0x10] sm:$0xff] }
0x1f61   : > { %v10772_v24 = vpop.f32.mrb[44].mxu1  ;;  %6060 = vrot.lane.b32.xlu0 %v5670_v11, %s13461_s23  ;;  %v6221_v11 = vld [vmem:[%s13491_s30] sm:$0xff]  ;;  %v6430_v13 = vld [vmem:[%s13493_s27 + $0x18] sm:$0xff] }
0x1f62   : > { %v5864_v14 = vmul.f32 %v11743_v12, %v10772_v24  ;;  %v5846_v16 = vpop.f32.mrb[45].mxu1  ;;  %v6225_v12 = vld [vmem:[%s13491_s30 + $0x20] sm:$0xff]  ;;  %v11234_v24 = vpack.c.bf16 %v6228_v10, %v6224_v7  ;;  %11227 = vmatprep.subr.bf16.mxu1 %v11226_v8  ;;  %v6461_v10 = vld [vmem:[%s13493_s27 + $0x110] sm:$0xff] }
0x1f63   : > { %v5863_v20 = vmul.f32 %v11745_v19, %v5846_v16  ;;  %v6223_v16 = vld [vmem:[%s13491_s30 + $0x10] sm:$0xff] }
0x1f64   : > { %6070 = vrot.lane.b32.xlu1 %v5864_v14, %s13462_s18  ;;  %v11228_v14 = vpack.c.bf16 %v6225_v12, %v6221_v11  ;;  %v6227_v19 = vld [vmem:[%s13491_s30 + $0x30] sm:$0xff]  ;;  %11235 = vmatprep.subr.bf16.mxu0 %v11234_v24  ;;  %v6462_v11 = vld [vmem:[%s13493_s27 + $0x118] sm:$0xff]  ;;  %v6447_v12 = vld [vmem:[%s13493_s27 + $0xa0] sm:$0xff] }
0x1f65   : > { %v10782_v23 = vpop.f32.mrb[46].mxu1 }
0x1f66   : > { %v6039_v27 = vpop.f32.mrb[47].mxu1  ;;  %v6057_v33 = vmul.f32 %v11749_v32, %v10782_v23  ;;  %v11236_v23 = vpack.c.bf16 %v6227_v19, %v6223_v16  ;;  %11229 = vmatpush1.bf16.msra.mxu1 %v11228_v14  ;;  %v6236_v32 = vld [vmem:[%s13491_s30 + $0x78] sm:$0xff]  ;;  %v6448_v14 = vld [vmem:[%s13493_s27 + $0xa8] sm:$0xff] }
0x1f67   : > { %v6056_v31 = vmul.f32 %v11747_v2, %v6039_v27  ;;  %v6230_v2 = vld [vmem:[%s13491_s30 + $0x48] sm:$0xff]  ;;  %v6232_v27 = vld [vmem:[%s13491_s30 + $0x58] sm:$0xff] }
0x1f68   : > { %6068 = vrot.lane.b32.xlu1 %v5863_v20, %s13462_s18  ;;  %v6234_v20 = vld [vmem:[%s13491_s30 + $0x68] sm:$0xff]  ;;  %v11238_v35 = vpack.c.bf16 %v6236_v32, %v6232_v27 }
0x1f69   : > { %6076 = vrot.lane.b32.xlu0 %v6056_v31, %s13463_s11  ;;  %v11230_v31 = vpack.c.bf16 %v6234_v20, %v6230_v2  ;;  %v6480_v16 = vld [vmem:[%s13493_s27 + $0x1a8] sm:$0xff]  ;;  %v11280_v2 = vpack.c.bf16 %v6462_v11, %v6461_v10  ;;  %v6431_v20 = vld [vmem:[%s13493_s27 + $0x20] sm:$0xff] }
0x1f6a   : > { %v6432_v27 = vld [vmem:[%s13493_s27 + $0x28] sm:$0xff]  ;;  %v6487_v10 = vld [vmem:[%s13493_s27 + $0x1e0] sm:$0xff] }
0x1f6b   : > { %11231 = vmatprep.subr.bf16.mxu1 %v11230_v31  ;;  %v11250_v31 = vpack.c.bf16 %v6448_v14, %v6447_v12  ;;  %v6488_v11 = vld [vmem:[%s13493_s27 + $0x1e8] sm:$0xff] }
0x1f6c   : > { %6078 = vrot.lane.b32.xlu1 %v6057_v33, %s13463_s11  ;;  %v6229_v33 = vld [vmem:[%s13491_s30 + $0x40] sm:$0xff] }
0x1fd2   : > { %v6063_v36 = vpop.permute.xlu1 %6062 }
0x1fd3   : > { %v6061_v6 = vpop.permute.xlu0 %6060  ;;  %v6083_v46 = vsel %vm1410_vm4, %v5478_v43, %v6063_v36  ;;  %v11232_v36 = vpack.c.bf16 %v6233_v34, %v6229_v33  ;;  %v6476_v43 = vld [vmem:[%s13493_s27 + $0x188] sm:$0xff]  ;;  %v6463_v33 = vld [vmem:[%s13493_s27 + $0x120] sm:$0xff] }
0x1fd4   : > { %v6082_v40 = vsel %vm1410_vm4, %v5477_v17, %v6061_v6  ;;  %v6443_v17 = vld [vmem:[%s13492_s28 + $0x80] sm:$0xff]  ;;  %v6464_v34 = vld [vmem:[%s13493_s27 + $0x128] sm:$0xff]  ;;  %s13496_s28 = sld [smem:[#allocation35_spill]] }
0x1fd5   : > { %11233 = vmatpush1.bf16.msra.mxu1 %v11232_v36  ;;  %v6450_v36 = vld [vmem:[%s13493_s27 + $0xb8] sm:$0xff] }
0x1fd6   : > { %v6071_v38 = vpop.permute.xlu1 %6070 }
0x1fd7   : > { %v6085_v26 = vsel %vm2080_vm5, %v6083_v46, %v6071_v38  ;;  %v6231_v38 = vld [vmem:[%s13491_s30 + $0x50] sm:$0xff] }
0x1fd8   : > { %v11240_v6 = vpack.c.bf16 %v6235_v18, %v6231_v38  ;;  %v6481_v38 = vld [vmem:[%s13493_s27 + $0x1b0] sm:$0xff]  ;;  %v6482_v18 = vld [vmem:[%s13493_s27 + $0x1b8] sm:$0xff] }
0x1fda   : > { %v6069_v41 = vpop.permute.xlu1 %6068 }
0x1fdb   : > { %v6084_v44 = vsel %vm2080_vm5, %v6082_v40, %v6069_v41  ;;  %v6077_v45 = vpop.permute.xlu0 %6076  ;;  %v6475_v40 = vld [vmem:[%s13493_s27 + $0x180] sm:$0xff]  ;;  %v11242_v41 = vpack.c.bf16 %v6444_v39, %v6443_v17  ;;  %v11284_v17 = vpack.c.bf16 %v6464_v34, %v6463_v33  ;;  %v6433_v39 = vld [vmem:[%s13493_s27 + $0x30] sm:$0xff]  ;;  %v6458_v33 = vld [vmem:[%s13493_s27 + $0xf8] sm:$0xff] }
0x1fdc   : > { %v6086_v22 = vsel %vm2082_vm6, %v6084_v44, %v6077_v45  ;;  %v11274_v44 = vpack.c.bf16 %v6476_v43, %v6475_v40  ;;  %v6434_v40 = vld [vmem:[%s13493_s27 + $0x38] sm:$0xff]  ;;  %v11286_v43 = vpack.c.bf16 %v6482_v18, %v6481_v38  ;;  %v6489_v34 = vld [vmem:[%s13493_s27 + $0x1f0] sm:$0xff] }
0x1fdd   : > { %10791 = vmatprep.mubr.msk.f32.mxu0 %vm1333_vm3, %v6086_v22  ;;  %11243 = vmatprep.subr.bf16.mxu1 %v11242_v41  ;;  %v6441_v38 = vld [vmem:[%s13493_s27 + $0x70] sm:$0xff]  ;;  %v6442_v18 = vld [vmem:[%s13493_s27 + $0x78] sm:$0xff] }
0x1fde   : > { %v6079_v21 = vpop.permute.xlu1 %6078 }
0x1fdf   : > { %v6087_v25 = vsel %vm2082_vm6, %v6085_v26, %v6079_v21 }
0x1fe0   : > { %10792 = vmatmul.mubr.msk.f32.vlgmr.msra.gmra.mrb[52].mxu0 %vm1333_vm3, %v6087_v25 }
0x1fe1   : > { %6406 = vmatprep.mubr.f32.mxu0 %v11886_v1  ;;  %11237 = vmatpush1.bf16.msra.mxu0 %v11236_v23  ;;  %v11248_v23 = vpack.c.bf16 %v6430_v13, %v6429_v9  ;;  %v6469_v9 = vld [vmem:[%s13493_s27 + $0x150] sm:$0xff]  ;;  %v6470_v13 = vld [vmem:[%s13493_s27 + $0x158] sm:$0xff] }
0x1fe2   : > { %11239 = vmatprep.subr.bf16.mxu0 %v11238_v35  ;;  %v6449_v35 = vld [vmem:[%s13493_s27 + $0xb0] sm:$0xff] }
0x1fe3   : > { %v11254_v41 = vpack.c.bf16 %v6450_v36, %v6449_v35  ;;  %v6490_v36 = vld [vmem:[%s13493_s27 + $0x1f8] sm:$0xff] }
0x1fe5   : > { %11241 = vmatpush1.bf16.msra.mxu0 %v11240_v6  ;;  %v11252_v6 = vpack.c.bf16 %v6432_v27, %v6431_v20  ;;  %v6472_v27 = vld [vmem:[%s13493_s27 + $0x168] sm:$0xff] }
0x1fe6   : > { %11275 = vmatprep.subr.bf16.mxu0 %v11274_v44  ;;  %v6465_v44 = vld [vmem:[%s13493_s27 + $0x130] sm:$0xff] }
0x20b3   : > { %v10793_v48 = vpop.f32.mrb[52].mxu0 }
0x20b4   : > { %v6172_v15 = vadd.f32 %v10793_v48, %v9785_v47  ;;  %v6166_v49 = vpop.f32.mrb[53].mxu0  ;;  %v9788_v48 = vld [vmem:[%s13494_s1] ss:$0 sm:$0xff] }
0x20b5   : > { %v6167_v50 = vadd.f32 %v9785_v47, %v6166_v49  ;;  %v9789_v49 = vld [vmem:[%s13495_s9] ss:$0 sm:$0xff] }
0x20b6   : > { %v6176_v51 = vadd.f32 %v6172_v15, %v12721_v29 }
0x20b7   : > { %v6175_v54 = vadd.f32 %v6167_v50, %v12719_v28  ;;  %v6427_v50 = vld [vmem:[%s13493_s27] sm:$0xff] }
0x20b8   : > { %v6182_v57 = vsel %vm5059_vm14, %v6176_v51, 0.0 }
0x20b9   : > { %6183 = vadd.xlane.f32.xlu1 %v6182_v57  ;;  %v6179_v58 = vsel %vm1333_vm3, %v6175_v54, 0.0  ;;  %v6460_v57 = vld [vmem:[%s13493_s27 + $0x108] sm:$0xff] }
0x20ba   : > { %6180 = vadd.xlane.f32.xlu0 %v6179_v58  ;;  %v6445_v58 = vld [vmem:[%s13493_s27 + $0x90] sm:$0xff] }
0x2146   : > { %v6184_v59 = vpop.xlane.xlu1 %6183 }
0x2147   : > { %v6186_v60 = vmul.f32 0.03125, %v6184_v59  ;;  %v6181_v61 = vpop.xlane.xlu0 %6180 }
0x2148   : > { %v6185_v62 = vmul.f32 0.03125, %v6181_v61  ;;  %v6477_v61 = vld [vmem:[%s13493_s27 + $0x190] sm:$0xff] }
0x2149   : > { %v12820_v63 = vsub.f32 %v6176_v51, %v6186_v60  ;;  %v6428_v51 = vld [vmem:[%s13493_s27 + $0x8] sm:$0xff]  ;;  %v6446_v60 = vld [vmem:[%s13493_s27 + $0x98] sm:$0xff] }
0x214a   : > { %v6187_v29 = vsub.f32 %v6175_v54, %v6185_v62  ;;  %v6459_v54 = vld [vmem:[%s13493_s27 + $0x100] sm:$0xff]  ;;  %v6478_v62 = vld [vmem:[%s13493_s27 + $0x198] sm:$0xff]  ;;  %v11246_v7 = vpack.c.bf16 %v6446_v60, %v6445_v58 }
0x214b   : > { %v6190_v3 = vmul.f32 %v12820_v63, %v12820_v63  ;;  %v11278_v8 = vpack.c.bf16 %v6478_v62, %v6477_v61  ;;  %v6454_v58 = vld [vmem:[%s13493_s27 + $0xd8] sm:$0xff] }
0x214c   : > { %v6189_v28 = vmul.f32 %v6187_v29, %v6187_v29  ;;  %v6486_v60 = vld [vmem:[%s13493_s27 + $0x1d8] sm:$0xff] }
0x214d   : > { %v6194_v5 = vsel %vm5059_vm14, %v6190_v3, 0.0  ;;  %v11244_v3 = vpack.c.bf16 %v6428_v51, %v6427_v50  ;;  %v6467_v51 = vld [vmem:[%s13493_s27 + $0x140] sm:$0xff] }
0x214e   : > { %v6191_v0 = vsel %vm1333_vm3, %v6189_v28, 0.0 }
0x214f   : > { %6192 = vadd.xlane.f32.xlu0 %v6191_v0 }
0x2153   : > { %6195 = vadd.xlane.f32.xlu0 %v6194_v5  ;;  %v11276_v5 = vpack.c.bf16 %v6460_v57, %v6459_v54  ;;  %v6468_v54 = vld [vmem:[%s13493_s27 + $0x148] sm:$0xff]  ;;  %v6453_v57 = vld [vmem:[%s13493_s27 + $0xd0] sm:$0xff] }
0x2154   : > { %v11292_v62 = vpack.c.bf16 %v6468_v54, %v6467_v51 }
0x21dc   : > { %v6193_v45 = vpop.xlane.xlu0 %6192 }
0x21dd   : > { %v6197_v22 = vmul.f32 0.03125, %v6193_v45  ;;  %v6466_v45 = vld [vmem:[%s13493_s27 + $0x138] sm:$0xff] }
0x21df   : > { %v6199_v46 = vadd.f32 1e-05, %v6197_v22  ;;  %v6451_v22 = vld [vmem:[%s13493_s27 + $0xc0] sm:$0xff] }
0x21e0   : > { %v6196_v26 = vpop.xlane.xlu0 %6195 }
0x21e1   : > { %11754 = vrsqrt.f32 %v6199_v46  ;;  %v6198_v21 = vmul.f32 0.03125, %v6196_v26  ;;  %v6452_v46 = vld [vmem:[%s13493_s27 + $0xc8] sm:$0xff]  ;;  %v6483_v26 = vld [vmem:[%s13493_s27 + $0x1c0] sm:$0xff] }
0x21e3   : > { %v6200_v25 = vadd.f32 1e-05, %v6198_v21  ;;  %v6484_v21 = vld [vmem:[%s13493_s27 + $0x1c8] sm:$0xff] }
0x21e4   : > { %v11290_v50 = vpack.c.bf16 %v6484_v21, %v6483_v26 }
0x21e5   : > { %11756 = vrsqrt.f32 %v6200_v25  ;;  %v11256_v25 = vpack.c.bf16 %v6434_v40, %v6433_v39  ;;  %v6473_v39 = vld [vmem:[%s13493_s27 + $0x170] sm:$0xff]  ;;  %v6474_v40 = vld [vmem:[%s13493_s27 + $0x178] sm:$0xff] }
0x21eb   : > { %v11755_v47 = vpop.eup %11754 }
0x21ec   : > { %v6203_v15 = vmul.f32 %v11755_v47, %v6187_v29  ;;  %v11288_v47 = vpack.c.bf16 %v6466_v45, %v6465_v44 }
0x21ee   : > { %v6211_v59 = vmul.f32 %v9788_v48, %v6203_v15  ;;  %v6436_v15 = vld [vmem:[%s13493_s27 + $0x48] sm:$0xff] }
0x21ef   : > { %v11757_v28 = vpop.eup %11756 }
0x21f0   : > { %v12856_v0 = vadd.f32 %v9789_v49, %v6211_v59  ;;  %v6204_v29 = vmul.f32 %v11757_v28, %v12820_v63  ;;  %v6479_v63 = vld [vmem:[%s13493_s27 + $0x1a0] sm:$0xff]  ;;  %v6485_v59 = vld [vmem:[%s13493_s27 + $0x1d0] sm:$0xff] }
0x21f1   : > { %v11282_v32 = vpack.c.bf16 %v6480_v16, %v6479_v63  ;;  %v6437_v28 = vld [vmem:[%s13493_s27 + $0x50] sm:$0xff]  ;;  %v11298_v63 = vpack.c.bf16 %v6488_v11, %v6487_v10  ;;  %v6439_v16 = vld [vmem:[%s13493_s27 + $0x60] sm:$0xff] }
0x21f2   : > { %9790 = vmatmul.mubr.msk.f32.vlgmr.msra.gmra.mrb[48].mxu1 %vm1333_vm3, %v12856_v0  ;;  %9792 = vmatmul.mubr.msk.f32.vlgmr.msra.gmra.mrb[54].mxu0 %vm1333_vm3, %v12856_v0  ;;  %v6212_v24 = vmul.f32 %v9788_v48, %v6204_v29  ;;  %v6435_v48 = vld [vmem:[%s13493_s27 + $0x40] sm:$0xff]  ;;  %v6438_v29 = vld [vmem:[%s13493_s27 + $0x58] sm:$0xff] }
0x21f3   : > { %6335 = vmatprep.mubr.f32.mxu1 %v11886_v1  ;;  %6412 = vmatprep.mubr.f32.mxu0 %v11886_v1  ;;  %v11260_v61 = vpack.c.bf16 %v6436_v15, %v6435_v48  ;;  %v11264_v12 = vpack.c.bf16 %v6438_v29, %v6437_v28 }
0x21f4   : > { %v12873_v19 = vadd.f32 %v9789_v49, %v6212_v24  ;;  %11245 = vmatpush3.bf16.msra.mxu1 %v11244_v3  ;;  %11277 = vmatpush3.bf16.msra.mxu0 %v11276_v5  ;;  %v11258_v49 = vpack.c.bf16 %v6452_v46, %v6451_v22  ;;  %v11262_v3 = vpack.c.bf16 %v6454_v58, %v6453_v57 }
0x21f5   : > { %11247 = vmatprep.subr.bf16.mxu1 %v11246_v7  ;;  %11279 = vmatprep.subr.bf16.mxu0 %v11278_v8  ;;  %v11294_v5 = vpack.c.bf16 %v6486_v60, %v6485_v59  ;;  %v6455_v7 = vld [vmem:[%s13493_s27 + $0xe0] sm:$0xff]  ;;  %v6456_v8 = vld [vmem:[%s13493_s27 + $0xe8] sm:$0xff]  ;;  %v11296_v24 = vpack.c.bf16 %v6470_v13, %v6469_v9 }
0x21f6   : > { %9791 = vmatmul.mubr.msk.f32.gmra.mrb[50].mxu1 %vm1333_vm3, %v12873_v19  ;;  %9793 = vmatmul.mubr.msk.f32.gmra.mrb[56].mxu0 %vm1333_vm3, %v12873_v19  ;;  %v11266_v14 = vpack.c.bf16 %v6456_v8, %v6455_v7 }
0x21f8   : > { %11249 = vmatpush3.bf16.msra.mxu1 %v11248_v23  ;;  %11281 = vmatpush3.bf16.msra.mxu0 %v11280_v2  ;;  %v6440_v23 = vld [vmem:[%s13493_s27 + $0x68] sm:$0xff]  ;;  %v6471_v2 = vld [vmem:[%s13493_s27 + $0x160] sm:$0xff] }
0x21f9   : > { %11251 = vmatprep.subr.bf16.mxu1 %v11250_v31  ;;  %11283 = vmatprep.subr.bf16.mxu0 %v11282_v32  ;;  %v11268_v20 = vpack.c.bf16 %v6440_v23, %v6439_v16  ;;  %v11300_v31 = vpack.c.bf16 %v6472_v27, %v6471_v2  ;;  %v6457_v32 = vld [vmem:[%s13493_s27 + $0xf0] sm:$0xff] }
0x21fa   : > { %v11270_v35 = vpack.c.bf16 %v6458_v33, %v6457_v32 }
0x21fc   : > { %11253 = vmatpush3.bf16.msra.mxu1 %v11252_v6  ;;  %11285 = vmatpush3.bf16.msra.mxu0 %v11284_v17  ;;  %v11302_v6 = vpack.c.bf16 %v6490_v36, %v6489_v34  ;;  %v11272_v17 = vpack.c.bf16 %v6442_v18, %v6441_v38 }
0x21fd   : > { %11255 = vmatprep.subr.bf16.mxu1 %v11254_v41  ;;  %11287 = vmatprep.subr.bf16.mxu0 %v11286_v43  ;;  %v11304_v41 = vpack.c.bf16 %v6474_v40, %v6473_v39  ;;  %v6237_v43 = vld [vmem:[%s13496_s28] sm:$0xf]  ;;  %s13497_s28 = sld [smem:[#allocation37_spill]] }
0x21fe   : > { %v6242_v44 = vrot.slane %v6237_v43, %v12312_v52  ;;  %v6250_v45 = vrot.slane %v6237_v43, %v12314_v53  ;;  %v6246_v22 = vrot.slane %v6237_v43, %v12317_v55  ;;  %v6254_v46 = vrot.slane %v6237_v43, %v12319_v56 }
0x2200   : > { %11257 = vmatpush3.bf16.msra.mxu1 %v11256_v25  ;;  %11289 = vmatpush3.bf16.msra.mxu0 %v11288_v47 }
0x2201   : > { %11259 = vmatprep.subr.bf16.mxu1 %v11258_v49  ;;  %11291 = vmatprep.subr.bf16.mxu0 %v11290_v50 }
0x2204   : > { %11261 = vmatpush3.bf16.msra.mxu1 %v11260_v61  ;;  %11293 = vmatpush3.bf16.msra.mxu0 %v11292_v62 }
0x2205   : > { %11263 = vmatprep.subr.bf16.mxu1 %v11262_v3  ;;  %11295 = vmatprep.subr.bf16.mxu0 %v11294_v5 }
0x2208   : > { %11265 = vmatpush3.bf16.msra.mxu1 %v11264_v12  ;;  %11297 = vmatpush3.bf16.msra.mxu0 %v11296_v24  ;;  %v9794_v12 = vld [vmem:[%s13497_s28] ss:$0 sm:$0xff]  ;;  %s13498_s28 = sld [smem:[#allocation38_spill]] }
0x2209   : > { %11267 = vmatprep.subr.bf16.mxu1 %v11266_v14  ;;  %11299 = vmatprep.subr.bf16.mxu0 %v11298_v63 }
0x220c   : > { %11269 = vmatpush3.bf16.msra.mxu1 %v11268_v20  ;;  %11301 = vmatpush3.bf16.msra.mxu0 %v11300_v31 }
0x220d   : > { %11271 = vmatprep.subr.bf16.mxu1 %v11270_v35  ;;  %11303 = vmatprep.subr.bf16.mxu0 %v11302_v6 }
0x220e   : > { %s13499_s17 = smov %s13498_s28 }
0x2210   : > { %11273 = vmatpush3.bf16.msra.mxu1 %v11272_v17  ;;  %11305 = vmatpush3.bf16.msra.mxu0 %v11304_v41 }
0x22c5   : > { %v6331_v26 = vpop.f32.mrb[48].mxu1  ;;  %v6408_v21 = vpop.f32.mrb[54].mxu0 }
0x22c6   : > { %v6332_v25 = vadd.f32 %v6331_v26, %v6242_v44  ;;  %v6409_v47 = vadd.f32 %v6408_v21, %v6250_v45  ;;  %v6333_v48 = vpop.f32.mrb[49].mxu1  ;;  %v6410_v15 = vpop.f32.mrb[55].mxu0  ;;  %v9798_v21 = vld [vmem:[%s13466_s26 + $0x28] sm:$0xff] }
0x22c7   : > { %v6334_v49 = vadd.f32 %v6333_v48, %v6246_v22  ;;  %v6411_v50 = vadd.f32 %v6410_v15, %v6254_v46  ;;  %v9800_v48 = vld [vmem:[%s13466_s26 + $0x38] sm:$0xff] }
0x22c8   : > { %v6419_v59 = vmax.f32 %v6332_v25, 0.0  ;;  %v6421_v60 = vmax.f32 %v6409_v47, 0.0  ;;  %v9799_v25 = vld [vmem:[%s13466_s26 + $0x30] sm:$0xff] }
0x22c9   : > { %v6420_v51 = vmax.f32 %v6334_v49, 0.0  ;;  %v6422_v54 = vmax.f32 %v6411_v50, 0.0  ;;  %v6337_v57 = vpop.f32.mrb[50].mxu1  ;;  %v6414_v58 = vpop.f32.mrb[56].mxu0  ;;  %v11310_v15 = vpack.c.bf16 %v9800_v48, %v9799_v25 }
0x22ca   : > { %v6338_v61 = vadd.f32 %v6337_v57, %v6242_v44  ;;  %v6415_v62 = vadd.f32 %v6414_v58, %v6250_v45  ;;  %v6339_v28 = vpop.f32.mrb[51].mxu1  ;;  %v6416_v29 = vpop.f32.mrb[57].mxu0 }
0x22cb   : > { %v6340_v3 = vadd.f32 %v6339_v28, %v6246_v22  ;;  %v6417_v5 = vadd.f32 %v6416_v29, %v6254_v46  ;;  %6562 = vmatprep.mubr.f32.mxu1 %v6420_v51  ;;  %6637 = vmatprep.mubr.f32.mxu0 %v6422_v54 }
0x22cc   : > { %6563 = vmatmul.mubr.f32.vlgmr.msra.gmra.mrb[52].mxu1 %v6419_v59  ;;  %6638 = vmatmul.mubr.f32.vlgmr.msra.gmra.mrb[58].mxu0 %v6421_v60  ;;  %v6423_v7 = vmax.f32 %v6338_v61, 0.0  ;;  %v6425_v8 = vmax.f32 %v6415_v62, 0.0  ;;  %v9795_v60 = vld [vmem:[%s13498_s28] ss:$0 sm:$0xff] }
0x22cd   : > { %v6424_v9 = vmax.f32 %v6340_v3, 0.0  ;;  %v6426_v13 = vmax.f32 %v6417_v5, 0.0  ;;  %v9796_v62 = vld [vmem:[%s12097_s4] ss:$0 sm:$0xff] }
0x22cf   : > { %6567 = vmatprep.mubr.f32.mxu1 %v6424_v9  ;;  %6642 = vmatprep.mubr.f32.mxu0 %v6426_v13 }
0x22d0   : > { %6568 = vmatmul.mubr.f32.gmra.mrb[54].mxu1 %v6423_v7  ;;  %6643 = vmatmul.mubr.f32.gmra.mrb[60].mxu0 %v6425_v8  ;;  %v9807_v7 = vld [vmem:[%s13469_s15 + $0x1] ss:$0 sm:$0xff] }
0x239f   : > { %v10298_v10 = vpop.f32.mrb[52].mxu1  ;;  %v10336_v11 = vpop.f32.mrb[58].mxu0 }
0x23a0   : > { %v10299_v24 = vpop.f32.mrb[53].mxu1  ;;  %v10337_v14 = vpop.f32.mrb[59].mxu0 }
0x23a1   : > { %v10300_v63 = vadd.f32 %v10299_v24, %v10298_v10  ;;  %v10338_v16 = vadd.f32 %v10337_v14, %v10336_v11 }
0x23a3   : > { %v6565_v23 = vadd.f32 %v10300_v63, %v9794_v12  ;;  %v10301_v2 = vpop.f32.mrb[54].mxu1  ;;  %v10339_v20 = vpop.f32.mrb[60].mxu0 }
0x23a4   : > { %v10302_v27 = vpop.f32.mrb[55].mxu1  ;;  %v10340_v31 = vpop.f32.mrb[61].mxu0 }
0x23a5   : > { %v6640_v32 = vadd.f32 %v10338_v16, %v6565_v23  ;;  %v10303_v33 = vadd.f32 %v10302_v27, %v10301_v2  ;;  %v10341_v34 = vadd.f32 %v10340_v31, %v10339_v20 }
0x23a7   : > { %v6570_v35 = vadd.f32 %v10303_v33, %v9794_v12  ;;  %v6648_v36 = vadd.f32 %v6640_v32, %v12856_v0 }
0x23a9   : > { %v6645_v38 = vadd.f32 %v10341_v34, %v6570_v35  ;;  %v6652_v18 = vsel %vm1333_vm3, %v6648_v36, 0.0 }
0x23aa   : > { %6653 = vadd.xlane.f32.xlu0 %v6652_v18 }
0x23ab   : > { %v6649_v6 = vadd.f32 %v6645_v38, %v12873_v19  ;;  %v9797_v19 = vld [vmem:[%s13466_s26 + $0x20] sm:$0xff] }
0x23ac   : > { %v11306_v47 = vpack.c.bf16 %v9798_v21, %v9797_v19 }
0x23ad   : > { %v6655_v17 = vsel %vm5059_vm14, %v6649_v6, 0.0 }
0x23ae   : > { %6656 = vadd.xlane.f32.xlu1 %v6655_v17  ;;  %11307 = vmatprep.subr.bf16.mxu1 %v11306_v47 }
0x23af   : > { %11309 = vmatpush3.bf16.msra.mxu1 %v11306_v47 }
0x23b0   : > { %11311 = vmatprep.subr.bf16.mxu1 %v11310_v15 }
0x23b3   : > { %11313 = vmatpush3.bf16.msra.mxu1 %v11310_v15 }
0x2437   : > { %v6654_v39 = vpop.xlane.xlu0 %6653 }
0x2438   : > { %v6658_v40 = vmul.f32 0.03125, %v6654_v39 }
0x243a   : > { %v6660_v41 = vsub.f32 %v6648_v36, %v6658_v40 }
0x243b   : > { %v6657_v43 = vpop.xlane.xlu1 %6656 }
0x243c   : > { %v6659_v44 = vmul.f32 0.03125, %v6657_v43  ;;  %v6662_v45 = vmul.f32 %v6660_v41, %v6660_v41 }
0x243e   : > { %v6661_v0 = vsub.f32 %v6649_v6, %v6659_v44  ;;  %v6664_v22 = vsel %vm1333_vm3, %v6662_v45, 0.0 }
0x243f   : > { %6665 = vadd.xlane.f32.xlu0 %v6664_v22 }
0x2440   : > { %v6663_v46 = vmul.f32 %v6661_v0, %v6661_v0 }
0x2442   : > { %v6667_v26 = vsel %vm5059_vm14, %v6663_v46, 0.0 }
0x2443   : > { %6668 = vadd.xlane.f32.xlu1 %v6667_v26 }
0x24cc   : > { %v6666_v49 = vpop.xlane.xlu0 %6665 }
0x24cd   : > { %v6670_v50 = vmul.f32 0.03125, %v6666_v49 }
0x24cf   : > { %v6672_v51 = vadd.f32 1e-05, %v6670_v50 }
0x24d0   : > { %v6669_v54 = vpop.xlane.xlu1 %6668 }
0x24d1   : > { %11758 = vrsqrt.f32 %v6672_v51  ;;  %v6671_v57 = vmul.f32 0.03125, %v6669_v54 }
0x24d3   : > { %v6673_v58 = vadd.f32 1e-05, %v6671_v57 }
0x24d5   : > { %11760 = vrsqrt.f32 %v6673_v58 }
0x24db   : > { %v11759_v59 = vpop.eup %11758 }
0x24dc   : > { %v6676_v61 = vmul.f32 %v11759_v59, %v6660_v41 }
0x24de   : > { %v6684_v28 = vmul.f32 %v9795_v60, %v6676_v61 }
0x24df   : > { %v11761_v29 = vpop.eup %11760 }
0x24e0   : > { %v6677_v3 = vmul.f32 %v11761_v29, %v6661_v0  ;;  %v12941_v5 = vadd.f32 %v9796_v62, %v6684_v28 }
0x24e2   : > { %v6685_v9 = vmul.f32 %v9795_v60, %v6677_v3  ;;  %10802 = vmatprep.mubr.msk.f32.mxu1 %vm1333_vm3, %v12941_v5 }
0x24e4   : > { %v12945_v13 = vadd.f32 %v9796_v62, %v6685_v9 }
0x24e6   : > { %10803 = vmatmul.mubr.msk.f32.vlgmr.msra.gmra.mrb[56].mxu1 %vm1333_vm3, %v12945_v13 }
0x25b9   : > { %v10804_v8 = vpop.f32.mrb[56].mxu1 }
0x25ba   : > { %v12950_v10 = vadd.f32 %v10804_v8, %v9807_v7  ;;  %v6786_v11 = vpop.f32.mrb[57].mxu1 }
0x25bb   : > { %v12952_v12 = vadd.f32 %v9807_v7, %v6786_v11 }
0x25bd   : > { %10809 = vmatprep.mubr.msk.f32.mxu0 %vm1410_vm4, %v12952_v12  ;;  %v12958_v24 = vpack.i.bf16 %v12950_v10, %v12952_v12 }
0x25bf   : > { %11602 = vrot.lane.b32.xlu1 %v12958_v24, %s13473_s6  ;;  %11597 = vrot.lane.b32.xlu0 %v12958_v24, %s13471_s3  ;;  %s13505_s6 = sld [smem:[#allocation41_spill]] }
0x25c3   : > { %11607 = vrot.lane.b32.xlu0 %v12958_v24, %s13470_s7 }
0x25c7   : > { %6996 = vrot.lane.b32.xlu0 %v12950_v10, %s13472_s5 }
0x2631   : > { %v11603_v14 = vpop.permute.xlu1 %11602  ;;  %v11598_v63 = vpop.permute.xlu0 %11597 }
0x2632   : > { %v11605_v16 = vunpack.i.h.bf16 %v11603_v14  ;;  %v11604_v23 = vunpack.i.l.bf16 %v11603_v14  ;;  %v11600_v2 = vunpack.i.h.bf16 %v11598_v63  ;;  %v11599_v20 = vunpack.i.l.bf16 %v11598_v63 }
0x2634   : > { %v11320_v27 = vpack.c.bf16 %v11605_v16, %v11604_v23  ;;  %v11314_v31 = vpack.c.bf16 %v11600_v2, %v11599_v20 }
0x2635   : > { %v11608_v32 = vpop.permute.xlu0 %11607 }
0x2636   : > { %v11610_v33 = vunpack.i.h.bf16 %v11608_v32  ;;  %v11609_v34 = vunpack.i.l.bf16 %v11608_v32  ;;  %11316 = vmatprep.subr.msk.bf16.mxu0 %vm12559_vm9, %v11314_v31  ;;  %11322 = vmatprep.subr.msk.bf16.mxu1 %vm12570_vm11, %v11320_v27 }
0x2637   : > { %11319 = vmatpush3.bf16.xpose.msk.msra.mxu0 %vm12559_vm9, %v11314_v31  ;;  %11325 = vmatpush3.bf16.msk.msra.mxu1 %vm12570_vm11, %v11320_v27 }
0x2638   : > { %v11326_v35 = vpack.c.bf16 %v11610_v33, %v11609_v34 }
0x2639   : > { %v6997_v46 = vpop.permute.xlu0 %6996 }
0x263a   : > { %11328 = vmatprep.subr.msk.bf16.mxu1 %vm12559_vm9, %v11326_v35 }
0x263e   : > { %10810 = vmatmul.mubr.msk.f32.vlgmr.msra.gmra.mrb[62].mxu0 %vm1410_vm4, %v12950_v10 }
0x2711   : > { %v10811_v36 = vpop.f32.mrb[62].mxu0 }
0x2712   : > { %v6875_v38 = vpop.f32.mrb[63].mxu0  ;;  %v6887_v18 = vsel %vm4224_vm12, %v10811_v36, -inf }
0x2713   : > { %6888 = vmax.xlane.f32.xlu1 %v6887_v18  ;;  %v6884_v6 = vsel %vm4220_vm13, %v6875_v38, -inf }
0x2717   : > { %6885 = vmax.xlane.f32.xlu1 %v6884_v6 }
0x2728   : > { %6994 = vrot.lane.b32.xlu1 %v12952_v12, %s13472_s5 }
0x272c   : > { %11617 = vrot.lane.b32.xlu1 %v12958_v24, %s13478_s8 }
0x27a0   : > { %v6889_v17 = vpop.xlane.xlu1 %6888 }
0x27a1   : > { %v6891_v39 = vsub.f32 %v10811_v36, %v6889_v17 }
0x27a3   : > { %v6894_v43 = vmul.f32 1.442695, %v6891_v39 }
0x27a4   : > { %v6886_v40 = vpop.xlane.xlu1 %6885 }
0x27a5   : > { %v6890_v41 = vsub.f32 %v6875_v38, %v6886_v40 }
0x27a7   : > { %v6892_v44 = vmul.f32 1.442695, %v6890_v41 }
0x27a8   : > { %v6995_v22 = vpop.permute.xlu1 %6994 }
0x27a9   : > { %11762 = vpow2.f32 %v6892_v44 }
0x27aa   : > { %11764 = vpow2.f32 %v6894_v43 }
0x27ac   : > { %v11618_v15 = vpop.permute.xlu1 %11617 }
0x27ad   : > { %v11620_v60 = vunpack.i.h.bf16 %v11618_v15  ;;  %v11619_v61 = vunpack.i.l.bf16 %v11618_v15 }
0x27af   : > { %v11338_v3 = vpack.c.bf16 %v11620_v60, %v11619_v61 }
0x27b3   : > { %v12986_v45 = vpop.eup %11762 }
0x27b4   : > { %v12988_v0 = vpop.eup %11764  ;;  %10816 = vmatprep.mubr.msk.f32.mxu1 %vm4220_vm13, %v12986_v45 }
0x27b5   : > { %10817 = vmatmul.mubr.msk.f32.vlgmr.msra.gmra.mrb[58].mxu1 %vm4220_vm13, %v12988_v0  ;;  %v6987_v37 = vsel %vm4224_vm12, %v12988_v0, 0.0 }
0x27b6   : > { %11331 = vmatpush3.bf16.xpose.msk.msra.mxu1 %vm12559_vm9, %v11326_v35  ;;  %10823 = vmatprep.mubr.msk.f32.mxu1 %vm1410_vm4, %v6995_v22 }
0x27bd   : > { %10824 = vmatmul.mubr.msk.f32.vlgmr.msra.gmra.mrb[60].mxu1 %vm1410_vm4, %v6997_v46 }
0x2888   : > { %v12998_v26 = vpop.f32.mrb[58].mxu1 }
0x2889   : > { %v13000_v19 = vpop.f32.mrb[59].mxu1 }
0x2890   : > { %v10825_v21 = vpop.f32.mrb[60].mxu1 }
0x2891   : > { %v7076_v25 = vpop.f32.mrb[61].mxu1  ;;  %v7088_v47 = vsel %vm4224_vm12, %v10825_v21, -inf }
0x2892   : > { %7089 = vmax.xlane.f32.xlu0 %v7088_v47  ;;  %v7085_v48 = vsel %vm4220_vm13, %v7076_v25, -inf }
0x2893   : > { %7086 = vmax.xlane.f32.xlu1 %v7085_v48 }
0x28a4   : > { %7195 = vrot.lane.b32.xlu1 %v12952_v12, %s13479_s10 }
0x28a8   : > { %11612 = vrot.lane.b32.xlu0 %v12958_v24, %s13481_s13  ;;  %11627 = vrot.lane.b32.xlu1 %v12958_v24, %s13480_s12  ;;  %s13501_s13 = sld [smem:[#allocation37_spill]] }
0x28ac   : > { %7197 = vrot.lane.b32.xlu0 %v12950_v10, %s13479_s10 }
0x291f   : > { %v7090_v49 = vpop.xlane.xlu0 %7089 }
0x2920   : > { %v7092_v50 = vsub.f32 %v10825_v21, %v7090_v49  ;;  %v7087_v51 = vpop.xlane.xlu1 %7086 }
0x2921   : > { %v7091_v54 = vsub.f32 %v7076_v25, %v7087_v51 }
0x2922   : > { %v7095_v57 = vmul.f32 1.442695, %v7092_v50 }
0x2923   : > { %v7093_v58 = vmul.f32 1.442695, %v7091_v54  ;;  %v11613_v59 = vpop.permute.xlu0 %11612 }
0x2924   : > { %v11615_v62 = vunpack.i.h.bf16 %v11613_v59  ;;  %v11614_v28 = vunpack.i.l.bf16 %v11613_v59  ;;  %v7196_v8 = vpop.permute.xlu1 %7195 }
0x2925   : > { %11766 = vpow2.f32 %v7093_v58 }
0x2926   : > { %11768 = vpow2.f32 %v7095_v57  ;;  %v11332_v29 = vpack.c.bf16 %v11615_v62, %v11614_v28 }
0x2927   : > { %v7198_v11 = vpop.permute.xlu0 %7197 }
0x2928   : > { %11334 = vmatprep.subr.msk.bf16.mxu0 %vm12570_vm11, %v11332_v29  ;;  %v11628_v27 = vpop.permute.xlu1 %11627 }
0x2929   : > { %11337 = vmatpush3.bf16.msk.msra.mxu0 %vm12570_vm11, %v11332_v29  ;;  %v11630_v18 = vunpack.i.h.bf16 %v11628_v27  ;;  %v11629_v6 = vunpack.i.l.bf16 %v11628_v27 }
0x292a   : > { %11340 = vmatprep.subr.msk.bf16.mxu0 %vm12559_vm9, %v11338_v3 }
0x292b   : > { %v11350_v40 = vpack.c.bf16 %v11630_v18, %v11629_v6  ;;  %v9804_v6 = vld [vmem:[%s13483_s19 + $0x30] sm:$0xff] }
0x292f   : > { %v11767_v9 = vpop.eup %11766 }
0x2930   : > { %v11769_v7 = vpop.eup %11768  ;;  %10830 = vmatprep.mubr.msk.f32.mxu0 %vm4220_vm13, %v11767_v9  ;;  %v7185_v15 = vsel %vm4220_vm13, %v11767_v9, 0.0 }
0x2931   : > { %10831 = vmatmul.mubr.msk.f32.vlgmr.msra.gmra.mrb[64].mxu0 %vm4220_vm13, %v11769_v7  ;;  %v7188_v30 = vsel %vm4224_vm12, %v11769_v7, 0.0 }
0x2932   : > { %11343 = vmatpush3.bf16.xpose.msk.msra.mxu0 %vm12559_vm9, %v11338_v3  ;;  %10837 = vmatprep.mubr.msk.f32.mxu0 %vm1410_vm4, %v7196_v8 }
0x2939   : > { %10838 = vmatmul.mubr.msk.f32.vlgmr.msra.gmra.mrb[66].mxu0 %vm1410_vm4, %v7198_v11 }
0x2a04   : > { %v13024_v14 = vpop.f32.mrb[64].mxu0 }
0x2a05   : > { %v13026_v63 = vpop.f32.mrb[65].mxu0 }
0x2a0c   : > { %v10839_v16 = vpop.f32.mrb[66].mxu0 }
0x2a0d   : > { %v7277_v23 = vpop.f32.mrb[67].mxu0  ;;  %v7289_v2 = vsel %vm4224_vm12, %v10839_v16, -inf }
0x2a0e   : > { %7290 = vmax.xlane.f32.xlu0 %v7289_v2  ;;  %v7286_v20 = vsel %vm4220_vm13, %v7277_v23, -inf }
0x2a0f   : > { %7287 = vmax.xlane.f32.xlu1 %v7286_v20 }
0x2a20   : > { %7396 = vrot.lane.b32.xlu1 %v12952_v12, %s13482_s14 }
0x2a24   : > { %11622 = vrot.lane.b32.xlu0 %v12958_v24, %s13460_s16 }
0x2a28   : > { %7398 = vrot.lane.b32.xlu0 %v12950_v10, %s13482_s14 }
0x2a9b   : > { %v7291_v31 = vpop.xlane.xlu0 %7290 }
0x2a9c   : > { %v7293_v32 = vsub.f32 %v10839_v16, %v7291_v31  ;;  %v7288_v33 = vpop.xlane.xlu1 %7287 }
0x2a9d   : > { %v7292_v34 = vsub.f32 %v7277_v23, %v7288_v33  ;;  %v6984_v23 = vsel %vm4220_vm13, %v12986_v45, 0.0 }
0x2a9e   : > { %v7296_v35 = vmul.f32 1.442695, %v7293_v32 }
0x2a9f   : > { %v7294_v36 = vmul.f32 1.442695, %v7292_v34  ;;  %v11623_v38 = vpop.permute.xlu0 %11622 }
0x2aa0   : > { %v11625_v17 = vunpack.i.h.bf16 %v11623_v38  ;;  %v11624_v39 = vunpack.i.l.bf16 %v11623_v38  ;;  %v7397_v43 = vpop.permute.xlu1 %7396 }
0x2aa1   : > { %11770 = vpow2.f32 %v7294_v36  ;;  %v9803_v36 = vld [vmem:[%s13483_s19 + $0x28] sm:$0xff] }
0x2aa2   : > { %11772 = vpow2.f32 %v7296_v35  ;;  %v11344_v12 = vpack.c.bf16 %v11625_v17, %v11624_v39  ;;  %v9802_v35 = vld [vmem:[%s13483_s19 + $0x20] sm:$0xff]  ;;  %v9805_v17 = vld [vmem:[%s13483_s19 + $0x38] sm:$0xff] }
0x2aa3   : > { %v7399_v44 = vpop.permute.xlu0 %7398  ;;  %v11362_v38 = vpack.c.bf16 %v9803_v36, %v9802_v35 }
0x2aa4   : > { %11346 = vmatprep.subr.msk.bf16.mxu1 %vm12570_vm11, %v11344_v12 }
0x2aa5   : > { %11349 = vmatpush3.bf16.msk.msra.mxu1 %vm12570_vm11, %v11344_v12 }
0x2aa6   : > { %11352 = vmatprep.subr.msk.bf16.mxu1 %vm12559_vm9, %v11350_v40 }
0x2aab   : > { %v11771_v10 = vpop.eup %11770 }
0x2aac   : > { %v11773_v41 = vpop.eup %11772  ;;  %10844 = vmatprep.mubr.msk.f32.mxu1 %vm4220_vm13, %v11771_v10  ;;  %v7386_v49 = vsel %vm4220_vm13, %v11771_v10, 0.0 }
0x2aad   : > { %10845 = vmatmul.mubr.msk.f32.vlgmr.msra.gmra.mrb[62].mxu1 %vm4220_vm13, %v11773_v41  ;;  %v7389_v50 = vsel %vm4224_vm12, %v11773_v41, 0.0 }
0x2aae   : > { %11355 = vmatpush3.bf16.xpose.msk.msra.mxu1 %vm12559_vm9, %v11350_v40  ;;  %10851 = vmatprep.mubr.msk.f32.mxu1 %vm1410_vm4, %v7397_v43 }
0x2ab5   : > { %10852 = vmatmul.mubr.msk.f32.vlgmr.msra.gmra.mrb[64].mxu1 %vm1410_vm4, %v7399_v44 }
0x2b80   : > { %v10846_v22 = vpop.f32.mrb[62].mxu1 }
0x2b81   : > { %v7377_v46 = vpop.f32.mrb[63].mxu1 }
0x2b88   : > { %v10853_v21 = vpop.f32.mrb[64].mxu1 }
0x2b89   : > { %v7478_v25 = vpop.f32.mrb[65].mxu1  ;;  %v7490_v47 = vsel %vm4224_vm12, %v10853_v21, -inf }
0x2b8a   : > { %7491 = vmax.xlane.f32.xlu0 %v7490_v47  ;;  %v7487_v48 = vsel %vm4220_vm13, %v7478_v25, -inf }
0x2b8b   : > { %7488 = vmax.xlane.f32.xlu1 %v7487_v48 }
0x2b8f   : > { %7186 = vadd.xlane.f32.xlu1 %v7185_v15 }
0x2b93   : > { %7189 = vadd.xlane.f32.xlu1 %v7188_v30 }
0x2b97   : > { %7387 = vadd.xlane.f32.xlu1 %v7386_v49 }
0x2b9b   : > { %7390 = vadd.xlane.f32.xlu1 %v7389_v50 }
0x2ba0   : > { %11632 = vrot.lane.b32.xlu0 %v12958_v24, %s13459_s22 }
0x2c17   : > { %v7492_v51 = vpop.xlane.xlu0 %7491 }
0x2c18   : > { %v7494_v54 = vsub.f32 %v10853_v21, %v7492_v51  ;;  %v7489_v57 = vpop.xlane.xlu1 %7488 }
0x2c19   : > { %v7493_v58 = vsub.f32 %v7478_v25, %v7489_v57 }
0x2c1a   : > { %v7497_v59 = vmul.f32 1.442695, %v7494_v54 }
0x2c1b   : > { %v7495_v60 = vmul.f32 1.442695, %v7493_v58  ;;  %v11633_v61 = vpop.permute.xlu0 %11632 }
0x2c1c   : > { %11774 = vpow2.f32 %v7497_v59  ;;  %v11635_v62 = vunpack.i.h.bf16 %v11633_v61  ;;  %v11634_v28 = vunpack.i.l.bf16 %v11633_v61  ;;  %v7187_v3 = vpop.xlane.xlu1 %7186 }
0x2c1d   : > { %11776 = vpow2.f32 %v7495_v60 }
0x2c1e   : > { %v11356_v29 = vpack.c.bf16 %v11635_v62, %v11634_v28 }
0x2c20   : > { %11358 = vmatprep.subr.msk.bf16.mxu0 %vm12570_vm11, %v11356_v29  ;;  %v7190_v9 = vpop.xlane.xlu1 %7189 }
0x2c21   : > { %11361 = vmatpush3.bf16.msk.msra.mxu0 %vm12570_vm11, %v11356_v29 }
0x2c22   : > { %11363 = vmatprep.subr.bf16.mxu0 %v11362_v38 }
0x2c24   : > { %v7388_v16 = vpop.xlane.xlu1 %7387 }
0x2c25   : > { %11778 = vrcp.f32 %v7388_v16 }
0x2c26   : > { %v11775_v24 = vpop.eup %11774  ;;  %11780 = vrcp.f32 %v7187_v3 }
0x2c27   : > { %v11777_v7 = vpop.eup %11776  ;;  %v7590_v8 = vsel %vm4224_vm12, %v11775_v24, 0.0  ;;  %11782 = vrcp.f32 %v7190_v9 }
0x2c28   : > { %7591 = vadd.xlane.f32.xlu0 %v7590_v8  ;;  %10858 = vmatprep.mubr.msk.f32.mxu0 %vm4220_vm13, %v11777_v7  ;;  %v7587_v11 = vsel %vm4220_vm13, %v11777_v7, 0.0  ;;  %v7391_v2 = vpop.xlane.xlu1 %7390  ;;  %v9845_v8 = vld [vmem:[%s13485_s21 + $0x20] sm:$0xff] }
0x2c29   : > { %7588 = vadd.xlane.f32.xlu1 %v7587_v11  ;;  %10859 = vmatmul.mubr.msk.f32.vlgmr.msra.gmra.mrb[68].mxu0 %vm4220_vm13, %v11775_v24  ;;  %11784 = vrcp.f32 %v7391_v2  ;;  %v9846_v11 = vld [vmem:[%s13485_s21 + $0x28] sm:$0xff] }
0x2c2a   : > { %11365 = vmatpush3.bf16.msra.mxu0 %v11362_v38  ;;  %v11636_v16 = vpack.i.bf16 %v9846_v11, %v9845_v8 }
0x2c2d   : > { %6985 = vadd.xlane.f32.xlu1 %v6984_v23 }
0x2c2f   : > { %v11779_v20 = vpop.eup %11778 }
0x2c30   : > { %v7394_v27 = vmul.f32 %v11779_v20, %v7377_v46  ;;  %v11781_v31 = vpop.eup %11780 }
0x2c31   : > { %6988 = vadd.xlane.f32.xlu1 %v6987_v37  ;;  %v7193_v45 = vmul.f32 %v11781_v31, %v13026_v63  ;;  %v11783_v32 = vpop.eup %11782  ;;  %v11366_v63 = vpack.c.bf16 %v9805_v17, %v9804_v6  ;;  %v11370_v6 = vpack.c.bf16 %v9846_v11, %v9845_v8 }
0x2c32   : > { %v7194_v0 = vmul.f32 %v11783_v32, %v13024_v14 }
0x2c33   : > { %v11785_v33 = vpop.eup %11784  ;;  %11367 = vmatprep.subr.bf16.mxu0 %v11366_v63  ;;  %11371 = vmatprep.subr.bf16.mxu1 %v11370_v6 }
0x2c34   : > { %v7395_v34 = vmul.f32 %v11785_v33, %v10846_v22  ;;  %11369 = vmatpush3.bf16.msra.mxu0 %v11366_v63  ;;  %v9848_v33 = vld [vmem:[%s13485_s21 + $0x38] sm:$0xff]  ;;  %11373 = vmatpush3.bf16.msra.mxu1 %v11370_v6  ;;  %v9855_v63 = vld [vmem:[%s13486_s24 + $0x1] ss:$0 sm:$0xff] }
0x2c35   : > { %11378 = vmatprep.subr.bf16.mxu0 %v11888_v4 }
0x2c3e   : > { %7607 = vrot.lane.b32.xlu0 %v7394_v27, %s13462_s18 }
0x2c42   : > { %7599 = vrot.lane.b32.xlu1 %v7193_v45, %s13461_s23 }
0x2c46   : > { %7601 = vrot.lane.b32.xlu1 %v7194_v0, %s13461_s23  ;;  %v9847_v0 = vld [vmem:[%s13485_s21 + $0x30] sm:$0xff] }
0x2c47   : > { %v11374_v17 = vpack.c.bf16 %v9848_v33, %v9847_v0 }
0x2c49   : > { %11375 = vmatprep.subr.bf16.mxu1 %v11374_v17 }
0x2c4a   : > { %7609 = vrot.lane.b32.xlu1 %v7395_v34, %s13462_s18  ;;  %v11641_v34 = vpack.i.bf16 %v9848_v33, %v9847_v0  ;;  %11377 = vmatpush3.bf16.msra.mxu1 %v11374_v17 }
0x2cb5   : > { %v7592_v39 = vpop.xlane.xlu0 %7591 }
0x2cb6   : > { %v7589_v18 = vpop.xlane.xlu1 %7588 }
0x2cb7   : > { %11786 = vrcp.f32 %v7589_v18 }
0x2cb8   : > { %11788 = vrcp.f32 %v7592_v39 }
0x2cb9   : > { %v7608_v50 = vpop.permute.xlu0 %7607 }
0x2cba   : > { %v6986_v44 = vpop.xlane.xlu1 %6985 }
0x2cbb   : > { %11790 = vrcp.f32 %v6986_v44 }
0x2cbe   : > { %v6989_v22 = vpop.xlane.xlu1 %6988 }
0x2cbf   : > { %11792 = vrcp.f32 %v6989_v22 }
0x2cc1   : > { %v11787_v12 = vpop.eup %11786 }
0x2cc2   : > { %v11789_v41 = vpop.eup %11788  ;;  %v7600_v46 = vpop.permute.xlu1 %7599 }
0x2cc5   : > { %v11791_v21 = vpop.eup %11790 }
0x2cc6   : > { %v7602_v25 = vpop.permute.xlu1 %7601  ;;  %v6992_v47 = vmul.f32 %v11791_v21, %v13000_v19 }
0x2cc8   : > { %v7621_v30 = vsel %vm1410_vm4, %v6992_v47, %v7600_v46 }
0x2cc9   : > { %v11793_v48 = vpop.eup %11792  ;;  %v7623_v51 = vsel %vm2080_vm5, %v7621_v30, %v7608_v50  ;;  %v9844_v30 = vld [vmem:[%s13488_s29 + $0x1] ss:$0 sm:$0xff] }
0x2cca   : > { %v7610_v15 = vpop.permute.xlu1 %7609  ;;  %v6993_v49 = vmul.f32 %v11793_v48, %v12998_v26  ;;  %v9838_v26 = vld [vmem:[%s13484_s20 + $0x1] ss:$0 sm:$0xff] }
0x2ccc   : > { %v7622_v57 = vsel %vm1410_vm4, %v6993_v49, %v7602_v25  ;;  %v9843_v25 = vld [vmem:[%s13487_s25 + $0x1] ss:$0 sm:$0xff] }
0x2ccd   : > { %v7624_v59 = vsel %vm2080_vm5, %v7622_v57, %v7610_v15 }
0x2cfc   : > { %v10860_v14 = vpop.f32.mrb[68].mxu0 }
0x2cfd   : > { %v7578_v40 = vpop.f32.mrb[69].mxu0  ;;  %v7596_v43 = vmul.f32 %v11789_v41, %v10860_v14 }
0x2cfe   : > { %v7595_v10 = vmul.f32 %v11787_v12, %v7578_v40 }
0x2d00   : > { %7615 = vrot.lane.b32.xlu1 %v7595_v10, %s13463_s11 }
0x2d04   : > { %7617 = vrot.lane.b32.xlu1 %v7596_v43, %s13463_s11 }
0x2d72   : > { %v7616_v54 = vpop.permute.xlu1 %7615 }
0x2d73   : > { %v7625_v58 = vsel %vm2082_vm6, %v7623_v51, %v7616_v54 }
0x2d74   : > { %10869 = vmatprep.mubr.msk.f32.mxu0 %vm1333_vm3, %v7625_v58 }
0x2d76   : > { %v7618_v19 = vpop.permute.xlu1 %7617 }
0x2d77   : > { %v7626_v60 = vsel %vm2082_vm6, %v7624_v59, %v7618_v19 }
0x2d78   : > { %10870 = vmatmul.mubr.msk.f32.vlgmr.msra.gmra.mrb[70].mxu0 %vm1333_vm3, %v7626_v60 }
0x2d79   : > { %10891 = vmatprep.mubr.msk.f32.mxu0 %vm11887_vm1, %v11886_v1 }
0x2e4b   : > { %v10871_v61 = vpop.f32.mrb[70].mxu0 }
0x2e4c   : > { %v7711_v62 = vadd.f32 %v10871_v61, %v9838_v26  ;;  %v7705_v28 = vpop.f32.mrb[71].mxu0 }
0x2e4d   : > { %v7706_v29 = vadd.f32 %v9838_v26, %v7705_v28 }
0x2e4e   : > { %v7715_v3 = vadd.f32 %v7711_v62, %v12945_v13 }
0x2e4f   : > { %v7714_v24 = vadd.f32 %v7706_v29, %v12941_v5 }
0x2e50   : > { %v7723_v9 = vsel %vm5059_vm14, %v7715_v3, 0.0 }
0x2e51   : > { %7724 = vadd.xlane.f32.xlu0 %v7723_v9  ;;  %v7720_v7 = vsel %vm1333_vm3, %v7714_v24, 0.0 }
0x2e52   : > { %7721 = vadd.xlane.f32.xlu1 %v7720_v7 }
0x2e67   : > { %11637 = vrot.lane.b32.xlu0 %v11636_v16, %s13471_s3 }
0x2ede   : > { %v7725_v23 = vpop.xlane.xlu0 %7724 }
0x2edf   : > { %v7727_v37 = vmul.f32 0.03125, %v7725_v23  ;;  %v7722_v2 = vpop.xlane.xlu1 %7721 }
0x2ee0   : > { %v7726_v20 = vmul.f32 0.03125, %v7722_v2 }
0x2ee1   : > { %v7729_v13 = vsub.f32 %v7715_v3, %v7727_v37 }
0x2ee2   : > { %v7728_v27 = vsub.f32 %v7714_v24, %v7726_v20  ;;  %v11638_v35 = vpop.permute.xlu0 %11637 }
0x2ee3   : > { %v7731_v5 = vmul.f32 %v7729_v13, %v7729_v13  ;;  %v11640_v36 = vunpack.i.h.bf16 %v11638_v35  ;;  %v11639_v38 = vunpack.i.l.bf16 %v11638_v35 }
0x2ee4   : > { %v7730_v45 = vmul.f32 %v7728_v27, %v7728_v27 }
0x2ee5   : > { %v7735_v31 = vsel %vm5059_vm14, %v7731_v5, 0.0  ;;  %v11379_v18 = vpack.c.bf16 %v11640_v36, %v11639_v38 }
0x2ee6   : > { %7736 = vadd.xlane.f32.xlu1 %v7735_v31  ;;  %v7732_v32 = vsel %vm1333_vm3, %v7730_v45, 0.0 }
0x2ee7   : > { %11380 = vmatpush3.bf16.msra.mxu0 %v11379_v18 }
0x2ee8   : > { %11381 = vmatprep.subr.bf16.mxu0 %v11888_v4 }
0x2eea   : > { %7733 = vadd.xlane.f32.xlu1 %v7732_v32 }
0x2efb   : > { %11642 = vrot.lane.b32.xlu1 %v11641_v34, %s13471_s3 }
0x2eff   : > { %7879 = vrot.lane.b32.xlu1 %v9855_v63, %s13471_s3 }
0x2f73   : > { %v7737_v39 = vpop.xlane.xlu1 %7736 }
0x2f74   : > { %v7739_v14 = vmul.f32 0.03125, %v7737_v39 }
0x2f76   : > { %v7741_v12 = vadd.f32 1e-05, %v7739_v14 }
0x2f77   : > { %v7734_v40 = vpop.xlane.xlu1 %7733 }
0x2f78   : > { %11794 = vrsqrt.f32 %v7741_v12  ;;  %v7738_v10 = vmul.f32 0.03125, %v7734_v40 }
0x2f7a   : > { %v7740_v41 = vadd.f32 1e-05, %v7738_v10 }
0x2f7b   : > { %v11643_v43 = vpop.permute.xlu1 %11642 }
0x2f7c   : > { %11796 = vrsqrt.f32 %v7740_v41  ;;  %v11645_v4 = vunpack.i.h.bf16 %v11643_v43  ;;  %v11644_v44 = vunpack.i.l.bf16 %v11643_v43 }
0x2f7e   : > { %v11382_v22 = vpack.c.bf16 %v11645_v4, %v11644_v44 }
0x2f7f   : > { %v7880_v54 = vpop.permute.xlu1 %7879 }
0x2f80   : > { %11383 = vmatpush3.bf16.msra.mxu0 %v11382_v22 }
0x2f82   : > { %v11795_v46 = vpop.eup %11794 }
0x2f83   : > { %10892 = vmatmul.mubr.msk.f32.vlgmr.msra.gmra.mrb[72].mxu0 %vm1333_vm3, %v12713_v42  ;;  %v7745_v21 = vmul.f32 %v11795_v46, %v7729_v13 }
0x2f85   : > { %v7753_v15 = vmul.f32 %v9843_v25, %v7745_v21 }
0x2f86   : > { %v11797_v47 = vpop.eup %11796 }
0x2f87   : > { %v7744_v48 = vmul.f32 %v11797_v47, %v7728_v27  ;;  %v13115_v51 = vadd.f32 %v9844_v30, %v7753_v15 }
0x2f89   : > { %v7752_v49 = vmul.f32 %v9843_v25, %v7744_v48 }
0x2f8b   : > { %v13113_v50 = vadd.f32 %v9844_v30, %v7752_v49 }
0x2f8d   : > { %10880 = vmatprep.mubr.msk.f32.mxu1 %vm1333_vm3, %v13113_v50 }
0x2f8e   : > { %10881 = vmatmul.mubr.msk.f32.vlgmr.msra.gmra.mrb[66].mxu1 %vm1333_vm3, %v13115_v51 }
0x3056   : > { %v7948_v57 = vpop.f32.mrb[72].mxu0 }
0x3057   : > { %v13121_v42 = vadd.f32 %v7948_v57, %v7880_v54  ;;  %v10893_v58 = vpop.f32.mrb[73].mxu0 }
0x3059   : > { %8339 = vrot.lane.b32.xlu1 %v13121_v42, %s13479_s10  ;;  %8146 = vrot.lane.b32.xlu0 %v13121_v42, %s13472_s5 }
0x305a   : > { %10894 = vmatprep.subr.msk.mxu1 %vm1410_vm4, %v13121_v42 }
0x305b   : > { %10895 = vmatpush3.xpose.msk.msra.mxu1 %vm1410_vm4, %v13121_v42 }
0x3061   : > { %v10882_v59 = vpop.f32.mrb[66].mxu1 }
0x3062   : > { %v7860_v19 = vadd.f32 %v10882_v59, %v9855_v63  ;;  %v7854_v60 = vpop.f32.mrb[67].mxu1 }
0x3063   : > { %v7855_v26 = vadd.f32 %v9855_v63, %v7854_v60 }
0x3064   : > { %8144 = vrot.lane.b32.xlu0 %v7860_v19, %s13472_s5 }
0x3065   : > { %10896 = vmatprep.mubr.msk.f32.mxu1 %vm1410_vm4, %v7855_v26  ;;  %8142 = vrot.lane.b32.xlu1 %v7855_v26, %s13472_s5  ;;  %s13500_s5 = sld [smem:[#allocation35_spill]] }
0x3066   : > { %10897 = vmatmul.mubr.msk.f32.vlgmr.msra.gmra.mrb[68].mxu1 %vm1410_vm4, %v7860_v19 }
0x3068   : > { %8335 = vrot.lane.b32.xlu0 %v7855_v26, %s13479_s10 }
0x3069   : > { %8337 = vrot.lane.b32.xlu1 %v7860_v19, %s13479_s10 }
0x306c   : > { %8532 = vrot.lane.b32.xlu0 %v13121_v42, %s13482_s14 }
0x306d   : > { %8528 = vrot.lane.b32.xlu1 %v7855_v26, %s13482_s14 }
0x3070   : > { %8530 = vrot.lane.b32.xlu0 %v7860_v19, %s13482_s14  ;;  %s13504_s14 = sld [smem:[#allocation43_spill]] }
0x3071   : > { %8241 = vrot.lane.b32.xlu1 %v13121_v42, %s13470_s7 }
0x3074   : > { %8048 = vrot.lane.b32.xlu0 %v13121_v42, %s13471_s3  ;;  %s13502_s3 = sld [smem:[#allocation39_spill]] }
0x30cb   : > { %v8147_v61 = vpop.permute.xlu0 %8146  ;;  %v8340_v62 = vpop.permute.xlu1 %8339 }
0x30cc   : > { %10904 = vmatprep.subr.msk.mxu0 %vm1410_vm4, %v8147_v61 }
0x30cd   : > { %10905 = vmatpush3.xpose.msk.msra.mxu0 %vm1410_vm4, %v8147_v61 }
0x30ce   : > { %10914 = vmatprep.subr.msk.mxu0 %vm1410_vm4, %v8340_v62 }
0x30d6   : > { %v8145_v28 = vpop.permute.xlu0 %8144 }
0x30d7   : > { %v8143_v29 = vpop.permute.xlu1 %8142 }
0x30d8   : > { %10906 = vmatprep.mubr.msk.f32.mxu0 %vm1410_vm4, %v8143_v29 }
0x30d9   : > { %10907 = vmatmul.mubr.msk.f32.vlgmr.msra.gmra.mrb[74].mxu0 %vm1410_vm4, %v8145_v28 }
0x30da   : > { %10915 = vmatpush3.xpose.msk.msra.mxu0 %vm1410_vm4, %v8340_v62  ;;  %v8336_v3 = vpop.permute.xlu0 %8335 }
0x30db   : > { %v8338_v24 = vpop.permute.xlu1 %8337  ;;  %10916 = vmatprep.mubr.msk.f32.mxu0 %vm1410_vm4, %v8336_v3 }
0x30dd   : > { %10917 = vmatmul.mubr.msk.f32.vlgmr.msra.gmra.mrb[76].mxu0 %vm1410_vm4, %v8338_v24 }
0x30de   : > { %v8533_v9 = vpop.permute.xlu0 %8532 }
0x30df   : > { %v8529_v7 = vpop.permute.xlu1 %8528  ;;  %10924 = vmatprep.subr.msk.mxu0 %vm1410_vm4, %v8533_v9 }
0x30e0   : > { %10925 = vmatpush3.xpose.msk.msra.mxu0 %vm1410_vm4, %v8533_v9  ;;  %10926 = vmatprep.mubr.msk.f32.mxu0 %vm1410_vm4, %v8529_v7 }
0x30e2   : > { %v8531_v8 = vpop.permute.xlu0 %8530 }
0x30e3   : > { %10927 = vmatmul.mubr.msk.f32.vlgmr.msra.gmra.mrb[78].mxu0 %vm1410_vm4, %v8531_v8  ;;  %v8242_v16 = vpop.permute.xlu1 %8241 }
0x30e6   : > { %v8049_v11 = vpop.permute.xlu0 %8048 }
0x30e7   : > { %10899 = vmatprep.subr.mxu1 %v8049_v11 }
0x30e8   : > { %10900 = vmatpush3.msra.mxu1 %v8049_v11 }
0x30e9   : > { %10909 = vmatprep.subr.mxu1 %v8242_v16 }
0x3139   : > { %v10898_v23 = vpop.f32.mrb[68].mxu1 }
0x313a   : > { %v8027_v37 = vpop.f32.mrb[69].mxu1  ;;  %v8039_v2 = vsel %vm5375_vm15, %v10898_v23, -inf }
0x313b   : > { %8040 = vmax.xlane.f32.xlu0 %v8039_v2  ;;  %v8036_v20 = vsel %vm1410_vm4, %v8027_v37, -inf }
0x313c   : > { %8037 = vmax.xlane.f32.xlu1 %v8036_v20 }
0x31ac   : > { %v10908_v13 = vpop.f32.mrb[74].mxu0 }
0x31ad   : > { %v8220_v27 = vpop.f32.mrb[75].mxu0  ;;  %v8232_v5 = vsel %vm5375_vm15, %v10908_v13, -inf }
0x31ae   : > { %8233 = vmax.xlane.f32.xlu1 %v8232_v5  ;;  %v8229_v31 = vsel %vm1410_vm4, %v8220_v27, -inf }
0x31af   : > { %8230 = vmax.xlane.f32.xlu0 %v8229_v31  ;;  %v9850_v31 = vld [vmem:[%s13489_s0 + $0x20] sm:$0xff] }
0x31b0   : > { %v10918_v45 = vpop.f32.mrb[76].mxu0 }
0x31b1   : > { %v8413_v32 = vpop.f32.mrb[77].mxu0  ;;  %v8425_v0 = vsel %vm5375_vm15, %v10918_v45, -inf }
0x31b2   : > { %8426 = vmax.xlane.f32.xlu1 %v8425_v0  ;;  %v8422_v33 = vsel %vm1410_vm4, %v8413_v32, -inf  ;;  %v9852_v0 = vld [vmem:[%s13489_s0 + $0x30] sm:$0xff] }
0x31b3   : > { %8423 = vmax.xlane.f32.xlu0 %v8422_v33  ;;  %v9853_v33 = vld [vmem:[%s13489_s0 + $0x38] sm:$0xff] }
0x31b6   : > { %v10928_v34 = vpop.f32.mrb[78].mxu0 }
0x31b7   : > { %v8606_v35 = vpop.f32.mrb[79].mxu0  ;;  %v8618_v36 = vsel %vm5375_vm15, %v10928_v34, -inf }
0x31b8   : > { %8619 = vmax.xlane.f32.xlu1 %v8618_v36  ;;  %v8615_v38 = vsel %vm1410_vm4, %v8606_v35, -inf }
0x31b9   : > { %8616 = vmax.xlane.f32.xlu0 %v8615_v38 }
0x31c8   : > { %v8041_v18 = vpop.xlane.xlu0 %8040 }
0x31c9   : > { %v8043_v6 = vsub.f32 %v10898_v23, %v8041_v18  ;;  %v8038_v17 = vpop.xlane.xlu1 %8037  ;;  %8434 = vrot.lane.b32.xlu1 %v13121_v42, %s13478_s8  ;;  %s13503_s8 = sld [smem:[#allocation40_spill]] }
0x31ca   : > { %v8042_v63 = vsub.f32 %v8027_v37, %v8038_v17 }
0x31cb   : > { %v8046_v39 = vmul.f32 1.442695, %v8043_v6 }
0x31cc   : > { %v8044_v14 = vmul.f32 1.442695, %v8042_v63 }
0x31ce   : > { %11798 = vpow2.f32 %v8044_v14 }
0x31cf   : > { %11800 = vpow2.f32 %v8046_v39  ;;  %8627 = vrot.lane.b32.xlu0 %v13121_v42, %s13480_s12  ;;  %s13506_s12 = sshll.u32 %s13504_s14, 4 }
0x31d0   : > { %s1227_s10 = scalar_lea.vmem %s13505_s6, %s13506_s12 }
0x31d8   : > { %v11799_v12 = vpop.eup %11798 }
0x31d9   : > { %v11801_v40 = vpop.eup %11800  ;;  %10901 = vmatprep.mubr.msk.f32.mxu1 %vm1410_vm4, %v11799_v12  ;;  %v8132_v23 = vsel %vm1410_vm4, %v11799_v12, 0.0 }
0x31da   : > { %10902 = vmatmul.mubr.msk.f32.vlgmr.msra.gmra.mrb[70].mxu1 %vm1410_vm4, %v11801_v40 }
0x31db   : > { %10910 = vmatpush3.msra.mxu1 %v8242_v16  ;;  %v8135_v16 = vsel %vm5375_vm15, %v11801_v40, 0.0 }
0x323b   : > { %v8234_v10 = vpop.xlane.xlu1 %8233 }
0x323c   : > { %v8236_v41 = vsub.f32 %v10908_v13, %v8234_v10  ;;  %v8231_v43 = vpop.xlane.xlu0 %8230 }
0x323d   : > { %v8235_v4 = vsub.f32 %v8220_v27, %v8231_v43 }
0x323e   : > { %v8239_v44 = vmul.f32 1.442695, %v8236_v41 }
0x323f   : > { %v8237_v22 = vmul.f32 1.442695, %v8235_v4  ;;  %v8427_v46 = vpop.xlane.xlu1 %8426 }
0x3240   : > { %11802 = vpow2.f32 %v8239_v44  ;;  %v8429_v21 = vsub.f32 %v10918_v45, %v8427_v46  ;;  %v8424_v25 = vpop.xlane.xlu0 %8423  ;;  %v9851_v45 = vld [vmem:[%s13489_s0 + $0x28] sm:$0xff] }
0x3241   : > { %11804 = vpow2.f32 %v8237_v22  ;;  %v8428_v47 = vsub.f32 %v8413_v32, %v8424_v25  ;;  %v11384_v32 = vpack.c.bf16 %v9851_v45, %v9850_v31 }
0x3242   : > { %v8432_v48 = vmul.f32 1.442695, %v8429_v21 }
0x3243   : > { %v8430_v15 = vmul.f32 1.442695, %v8428_v47  ;;  %11385 = vmatprep.subr.bf16.mxu0 %v11384_v32 }
0x3244   : > { %11806 = vpow2.f32 %v8432_v48  ;;  %11387 = vmatpush3.bf16.msra.mxu0 %v11384_v32 }
0x3245   : > { %11808 = vpow2.f32 %v8430_v15  ;;  %v8620_v30 = vpop.xlane.xlu1 %8619 }
0x3246   : > { %v8622_v49 = vsub.f32 %v10928_v34, %v8620_v30  ;;  %v8617_v54 = vpop.xlane.xlu0 %8616 }
0x3247   : > { %v8621_v57 = vsub.f32 %v8606_v35, %v8617_v54  ;;  %v11388_v35 = vpack.c.bf16 %v9853_v33, %v9852_v0  ;;  %v9887_v33 = vld [vmem:[%s13491_s30 + $0x88] sm:$0xff] }
0x3248   : > { %v8625_v42 = vmul.f32 1.442695, %v8622_v49 }
0x3249   : > { %v8623_v58 = vmul.f32 1.442695, %v8621_v57  ;;  %v8435_v59 = vpop.permute.xlu1 %8434  ;;  %11389 = vmatprep.subr.bf16.mxu0 %v11388_v35 }
0x324a   : > { %v11803_v19 = vpop.eup %11802  ;;  %11810 = vpow2.f32 %v8625_v42  ;;  %10919 = vmatprep.subr.mxu1 %v8435_v59  ;;  %v8628_v28 = vpop.permute.xlu0 %8627  ;;  %11391 = vmatpush3.bf16.msra.mxu0 %v11388_v35  ;;  %v9889_v35 = vld [vmem:[%s13491_s30 + $0x98] sm:$0xff] }
0x324b   : > { %v11805_v60 = vpop.eup %11804  ;;  %11812 = vpow2.f32 %v8623_v58  ;;  %v8328_v26 = vsel %vm5375_vm15, %v11803_v19, 0.0 }
0x324c   : > { %8329 = vadd.xlane.f32.xlu0 %v8328_v26  ;;  %10911 = vmatprep.mubr.msk.f32.mxu1 %vm1410_vm4, %v11805_v60  ;;  %v8325_v61 = vsel %vm1410_vm4, %v11805_v60, 0.0 }
0x324d   : > { %8326 = vadd.xlane.f32.xlu1 %v8325_v61  ;;  %10912 = vmatmul.mubr.msk.f32.vlgmr.msra.gmra.mrb[72].mxu1 %vm1410_vm4, %v11803_v19 }
0x324e   : > { %v11807_v62 = vpop.eup %11806  ;;  %10920 = vmatpush3.msra.mxu1 %v8435_v59 }
0x324f   : > { %v11809_v29 = vpop.eup %11808  ;;  %10929 = vmatprep.subr.mxu1 %v8628_v28  ;;  %v8521_v3 = vsel %vm5375_vm15, %v11807_v62, 0.0 }
0x3250   : > { %10921 = vmatprep.mubr.msk.f32.mxu1 %vm1410_vm4, %v11809_v29  ;;  %v8518_v24 = vsel %vm1410_vm4, %v11809_v29, 0.0 }
0x3251   : > { %8522 = vadd.xlane.f32.xlu1 %v8521_v3  ;;  %8519 = vadd.xlane.f32.xlu0 %v8518_v24  ;;  %v9879_v24 = vld [vmem:[%s13490_s2 + $0x1] ss:$0 sm:$0xff] }
0x3252   : > { %10922 = vmatmul.mubr.msk.f32.vlgmr.msra.gmra.mrb[74].mxu1 %vm1410_vm4, %v11807_v62 }
0x3253   : > { %10930 = vmatpush3.msra.mxu1 %v8628_v28 }
0x3254   : > { %v11811_v9 = vpop.eup %11810 }
0x3255   : > { %v11813_v7 = vpop.eup %11812  ;;  %v8714_v8 = vsel %vm5375_vm15, %v11811_v9, 0.0 }
0x3256   : > { %8715 = vadd.xlane.f32.xlu1 %v8714_v8  ;;  %10931 = vmatprep.mubr.msk.f32.mxu1 %vm1410_vm4, %v11813_v7  ;;  %v8711_v11 = vsel %vm1410_vm4, %v11813_v7, 0.0 }
0x3257   : > { %8712 = vadd.xlane.f32.xlu0 %v8711_v11  ;;  %10932 = vmatmul.mubr.msk.f32.vlgmr.msra.gmra.mrb[76].mxu1 %vm1410_vm4, %v11811_v9 }
0x3258   : > { %8996 = vmatprep.mubr.f32.mxu1 %v11886_v1 }
0x325a   : > { %8136 = vadd.xlane.f32.xlu1 %v8135_v16 }
0x325b   : > { %8133 = vadd.xlane.f32.xlu0 %v8132_v23 }
0x32ad   : > { %v10903_v37 = vpop.f32.mrb[70].mxu1 }
0x32ae   : > { %v8123_v2 = vpop.f32.mrb[71].mxu1 }
0x32d9   : > { %v8330_v13 = vpop.xlane.xlu0 %8329 }
0x32da   : > { %v8327_v20 = vpop.xlane.xlu1 %8326  ;;  %11814 = vrcp.f32 %v8330_v13 }
0x32db   : > { %11816 = vrcp.f32 %v8327_v20 }
0x32de   : > { %v8523_v27 = vpop.xlane.xlu1 %8522  ;;  %v8520_v5 = vpop.xlane.xlu0 %8519 }
0x32df   : > { %11818 = vrcp.f32 %v8523_v27 }
0x32e0   : > { %11820 = vrcp.f32 %v8520_v5 }
0x32e3   : > { %v8716_v34 = vpop.xlane.xlu1 %8715 }
0x32e4   : > { %v8713_v36 = vpop.xlane.xlu0 %8712  ;;  %v11815_v38 = vpop.eup %11814  ;;  %11822 = vrcp.f32 %v8716_v34  ;;  %v9891_v34 = vld [vmem:[%s13491_s30 + $0xa8] sm:$0xff] }
0x32e5   : > { %v11817_v6 = vpop.eup %11816  ;;  %11824 = vrcp.f32 %v8713_v36  ;;  %v11392_v36 = vpack.c.bf16 %v9891_v34, %v9887_v33  ;;  %v9941_v33 = vld [vmem:[%s13493_s27 + $0x310] sm:$0xff]  ;;  %v9942_v34 = vld [vmem:[%s13493_s27 + $0x318] sm:$0xff] }
0x32e7   : > { %v8137_v48 = vpop.xlane.xlu1 %8136  ;;  %11393 = vmatprep.subr.bf16.mxu1 %v11392_v36  ;;  %v9928_v36 = vld [vmem:[%s13493_s27 + $0x2a8] sm:$0xff] }
0x32e8   : > { %v8134_v47 = vpop.xlane.xlu0 %8133 }
0x32e9   : > { %v11819_v14 = vpop.eup %11818  ;;  %11826 = vrcp.f32 %v8134_v47  ;;  %v9900_v47 = vld [vmem:[%s13491_s30 + $0xf0] sm:$0xff] }
0x32ea   : > { %v11821_v40 = vpop.eup %11820  ;;  %11828 = vrcp.f32 %v8137_v48 }
0x32ee   : > { %v11823_v4 = vpop.eup %11822 }
0x32ef   : > { %v11825_v22 = vpop.eup %11824 }
0x32f3   : > { %v11827_v49 = vpop.eup %11826 }
0x32f4   : > { %v11829_v57 = vpop.eup %11828  ;;  %v8140_v58 = vmul.f32 %v11827_v49, %v8123_v2  ;;  %v9955_v49 = vld [vmem:[%s13493_s27 + $0x380] sm:$0xff] }
0x32f5   : > { %v8141_v59 = vmul.f32 %v11829_v57, %v10903_v37  ;;  %v9956_v57 = vld [vmem:[%s13493_s27 + $0x388] sm:$0xff] }
0x3320   : > { %v10913_v18 = vpop.f32.mrb[72].mxu1 }
0x3321   : > { %v8334_v17 = vmul.f32 %v11815_v38, %v10913_v18  ;;  %v8316_v63 = vpop.f32.mrb[73].mxu1  ;;  %v9893_v38 = vld [vmem:[%s13491_s30 + $0xb8] sm:$0xff]  ;;  %v9886_v18 = vld [vmem:[%s13491_s30 + $0x80] sm:$0xff] }
0x3322   : > { %v8333_v39 = vmul.f32 %v11817_v6, %v8316_v63  ;;  %v9890_v6 = vld [vmem:[%s13491_s30 + $0xa0] sm:$0xff] }
0x3323   : > { %8725 = vrot.lane.b32.xlu1 %v8334_v17, %s13461_s23  ;;  %v11400_v17 = vpack.c.bf16 %v9893_v38, %v9889_v35  ;;  %v11394_v63 = vpack.c.bf16 %v9890_v6, %v9886_v18  ;;  %v9927_v35 = vld [vmem:[%s13493_s27 + $0x2a0] sm:$0xff]  ;;  %v9960_v18 = vld [vmem:[%s13493_s27 + $0x3a8] sm:$0xff] }
0x3324   : > { %8723 = vrot.lane.b32.xlu0 %v8333_v39, %s13461_s23  ;;  %v9888_v39 = vld [vmem:[%s13491_s30 + $0x90] sm:$0xff]  ;;  %v9959_v38 = vld [vmem:[%s13493_s27 + $0x3a0] sm:$0xff] }
0x3325   : > { %v10923_v12 = vpop.f32.mrb[74].mxu1  ;;  %11401 = vmatprep.subr.bf16.mxu0 %v11400_v17  ;;  %11395 = vmatpush1.bf16.msra.mxu1 %v11394_v63  ;;  %v11446_v63 = vpack.c.bf16 %v9942_v34, %v9941_v33  ;;  %v9919_v33 = vld [vmem:[%s13493_s27 + $0x260] sm:$0xff]  ;;  %v9920_v34 = vld [vmem:[%s13493_s27 + $0x268] sm:$0xff] }
0x3326   : > { %v8527_v10 = vmul.f32 %v11819_v14, %v10923_v12  ;;  %v8509_v41 = vpop.f32.mrb[75].mxu1  ;;  %v9892_v14 = vld [vmem:[%s13491_s30 + $0xb0] sm:$0xff] }
0x3327   : > { %v8526_v43 = vmul.f32 %v11821_v40, %v8509_v41  ;;  %v11402_v12 = vpack.c.bf16 %v9892_v14, %v9888_v39  ;;  %v9895_v40 = vld [vmem:[%s13491_s30 + $0xc8] sm:$0xff]  ;;  %v9897_v41 = vld [vmem:[%s13491_s30 + $0xd8] sm:$0xff]  ;;  %v9911_v39 = vld [vmem:[%s13493_s27 + $0x220] sm:$0xff] }
0x3328   : > { %8733 = vrot.lane.b32.xlu0 %v8527_v10, %s13462_s18  ;;  %v9899_v10 = vld [vmem:[%s13491_s30 + $0xe8] sm:$0xff] }
0x3329   : > { %8731 = vrot.lane.b32.xlu1 %v8526_v43, %s13462_s18  ;;  %v11396_v43 = vpack.c.bf16 %v9899_v10, %v9895_v40  ;;  %v9912_v14 = vld [vmem:[%s13493_s27 + $0x228] sm:$0xff]  ;;  %v11448_v40 = vpack.c.bf16 %v9960_v18, %v9959_v38  ;;  %v9943_v10 = vld [vmem:[%s13493_s27 + $0x320] sm:$0xff] }
0x332a   : > { %v10933_v44 = vpop.f32.mrb[76].mxu1  ;;  %v9952_v38 = vld [vmem:[%s13493_s27 + $0x368] sm:$0xff] }
0x332b   : > { %v8720_v46 = vmul.f32 %v11823_v4, %v10933_v44  ;;  %v8702_v21 = vpop.f32.mrb[77].mxu1  ;;  %v9901_v4 = vld [vmem:[%s13491_s30 + $0xf8] sm:$0xff]  ;;  %v9894_v44 = vld [vmem:[%s13491_s30 + $0xc0] sm:$0xff]  ;;  %11397 = vmatprep.subr.bf16.mxu1 %v11396_v43 }
0x332c   : > { %v8719_v25 = vmul.f32 %v11825_v22, %v8702_v21  ;;  %v9898_v22 = vld [vmem:[%s13491_s30 + $0xe0] sm:$0xff]  ;;  %v9930_v43 = vld [vmem:[%s13493_s27 + $0x2b8] sm:$0xff] }
0x332d   : > { %8741 = vrot.lane.b32.xlu0 %v8720_v46, %s13463_s11  ;;  %v11404_v46 = vpack.c.bf16 %v9901_v4, %v9897_v41  ;;  %v11398_v21 = vpack.c.bf16 %v9898_v22, %v9894_v44  ;;  %v9944_v41 = vld [vmem:[%s13493_s27 + $0x328] sm:$0xff]  ;;  %v9961_v4 = vld [vmem:[%s13493_s27 + $0x3b0] sm:$0xff]  ;;  %v9962_v44 = vld [vmem:[%s13493_s27 + $0x3b8] sm:$0xff]  ;;  %v11418_v22 = vpack.c.bf16 %v9912_v14, %v9911_v39 }
0x332e   : > { %8739 = vrot.lane.b32.xlu1 %v8719_v25, %s13463_s11  ;;  %v9896_v25 = vld [vmem:[%s13491_s30 + $0xd0] sm:$0xff] }
0x332f   : > { %v11406_v48 = vpack.c.bf16 %v9900_v47, %v9896_v25  ;;  %11399 = vmatpush1.bf16.msra.mxu1 %v11398_v21  ;;  %v9913_v21 = vld [vmem:[%s13493_s27 + $0x230] sm:$0xff]  ;;  %v9914_v25 = vld [vmem:[%s13493_s27 + $0x238] sm:$0xff] }
0x3330   : > { %v9969_v39 = vld [vmem:[%s13493_s27 + $0x3f0] sm:$0xff] }
0x3395   : > { %v8726_v15 = vpop.permute.xlu1 %8725 }
0x3396   : > { %v8724_v30 = vpop.permute.xlu0 %8723  ;;  %v8746_v26 = vsel %vm1410_vm4, %v8141_v59, %v8726_v15  ;;  %v9923_v15 = vld [vmem:[%s13493_s27 + $0x280] sm:$0xff] }
0x3397   : > { %v8745_v19 = vsel %vm1410_vm4, %v8140_v58, %v8724_v30  ;;  %v9924_v30 = vld [vmem:[%s13493_s27 + $0x288] sm:$0xff] }
0x339a   : > { %v8734_v54 = vpop.permute.xlu0 %8733 }
0x339b   : > { %v8732_v42 = vpop.permute.xlu1 %8731  ;;  %v8748_v28 = vsel %vm2080_vm5, %v8746_v26, %v8734_v54  ;;  %v11408_v54 = vpack.c.bf16 %v9924_v30, %v9923_v15  ;;  %v9945_v15 = vld [vmem:[%s13493_s27 + $0x330] sm:$0xff]  ;;  %v9946_v30 = vld [vmem:[%s13493_s27 + $0x338] sm:$0xff] }
0x339c   : > { %v8747_v61 = vsel %vm2080_vm5, %v8745_v19, %v8732_v42  ;;  %v11440_v42 = vpack.c.bf16 %v9956_v57, %v9955_v49  ;;  %v9931_v49 = vld [vmem:[%s13493_s27 + $0x2c0] sm:$0xff] }
0x339d   : > { %11409 = vmatprep.subr.bf16.mxu1 %v11408_v54  ;;  %v9932_v54 = vld [vmem:[%s13493_s27 + $0x2c8] sm:$0xff]  ;;  %v9963_v57 = vld [vmem:[%s13493_s27 + $0x3c0] sm:$0xff] }
0x339f   : > { %v8742_v60 = vpop.permute.xlu0 %8741 }
0x33a0   : > { %v8740_v62 = vpop.permute.xlu1 %8739  ;;  %v8750_v3 = vsel %vm2082_vm6, %v8748_v28, %v8742_v60 }
0x33a1   : > { %v8749_v29 = vsel %vm2082_vm6, %v8747_v61, %v8740_v62 }
0x33a2   : > { %10942 = vmatprep.mubr.msk.f32.mxu0 %vm1333_vm3, %v8749_v29  ;;  %v9884_v29 = vld [vmem:[%s13494_s1 + $0x1] ss:$0 sm:$0xff] }
0x33a3   : > { %10943 = vmatmul.mubr.msk.f32.vlgmr.msra.gmra.mrb[80].mxu0 %vm1333_vm3, %v8750_v3 }
0x33a4   : > { %9073 = vmatprep.mubr.f32.mxu0 %v11886_v1  ;;  %11403 = vmatpush1.bf16.msra.mxu0 %v11402_v12  ;;  %v11416_v12 = vpack.c.bf16 %v9928_v36, %v9927_v35  ;;  %v9951_v35 = vld [vmem:[%s13493_s27 + $0x360] sm:$0xff]  ;;  %v11434_v36 = vpack.c.bf16 %v9920_v34, %v9919_v33 }
0x33a5   : > { %11405 = vmatprep.subr.bf16.mxu0 %v11404_v46  ;;  %v11450_v46 = vpack.c.bf16 %v9944_v41, %v9943_v10  ;;  %v11466_v18 = vpack.c.bf16 %v9952_v38, %v9951_v35  ;;  %v9922_v10 = vld [vmem:[%s13493_s27 + $0x278] sm:$0xff] }
0x33a8   : > { %11407 = vmatpush1.bf16.msra.mxu0 %v11406_v48  ;;  %v11452_v48 = vpack.c.bf16 %v9962_v44, %v9961_v4  ;;  %v9954_v4 = vld [vmem:[%s13493_s27 + $0x378] sm:$0xff] }
0x33a9   : > { %11441 = vmatprep.subr.bf16.mxu0 %v11440_v42  ;;  %v9964_v42 = vld [vmem:[%s13493_s27 + $0x3c8] sm:$0xff] }
0x3476   : > { %v10944_v9 = vpop.f32.mrb[80].mxu0 }
0x3477   : > { %v8835_v7 = vadd.f32 %v10944_v9, %v9879_v24  ;;  %v8829_v8 = vpop.f32.mrb[81].mxu0 }
0x3478   : > { %v8830_v11 = vadd.f32 %v9879_v24, %v8829_v8  ;;  %v9885_v24 = vld [vmem:[%s13495_s9 + $0x1] ss:$0 sm:$0xff]  ;;  %v9908_v8 = vld [vmem:[%s13493_s27 + $0x208] sm:$0xff] }
0x3479   : > { %v8839_v16 = vadd.f32 %v8835_v7, %v13115_v51  ;;  %v9907_v7 = vld [vmem:[%s13493_s27 + $0x200] sm:$0xff] }
0x347a   : > { %v8838_v23 = vadd.f32 %v8830_v11, %v13113_v50  ;;  %v9939_v11 = vld [vmem:[%s13493_s27 + $0x300] sm:$0xff] }
0x347b   : > { %v8847_v37 = vsel %vm5059_vm14, %v8839_v16, 0.0 }
0x347c   : > { %8848 = vadd.xlane.f32.xlu0 %v8847_v37  ;;  %v8844_v2 = vsel %vm1333_vm3, %v8838_v23, 0.0 }
0x347d   : > { %8845 = vadd.xlane.f32.xlu1 %v8844_v2  ;;  %v9926_v2 = vld [vmem:[%s13493_s27 + $0x298] sm:$0xff] }
0x3509   : > { %v8849_v20 = vpop.xlane.xlu0 %8848 }
0x350a   : > { %v8851_v13 = vmul.f32 0.03125, %v8849_v20  ;;  %v8846_v27 = vpop.xlane.xlu1 %8845  ;;  %v9957_v20 = vld [vmem:[%s13493_s27 + $0x390] sm:$0xff] }
0x350b   : > { %v8850_v5 = vmul.f32 0.03125, %v8846_v27 }
0x350c   : > { %v8853_v31 = vsub.f32 %v8839_v16, %v8851_v13  ;;  %v9940_v16 = vld [vmem:[%s13493_s27 + $0x308] sm:$0xff]  ;;  %v9958_v13 = vld [vmem:[%s13493_s27 + $0x398] sm:$0xff] }
0x350d   : > { %v8852_v51 = vsub.f32 %v8838_v23, %v8850_v5  ;;  %v9925_v23 = vld [vmem:[%s13493_s27 + $0x290] sm:$0xff] }
0x350e   : > { %v8855_v50 = vmul.f32 %v8853_v31, %v8853_v31 }
0x350f   : > { %v8854_v45 = vmul.f32 %v8852_v51, %v8852_v51 }
0x3510   : > { %v8859_v32 = vsel %vm5059_vm14, %v8855_v50, 0.0  ;;  %v9909_v50 = vld [vmem:[%s13493_s27 + $0x210] sm:$0xff] }
0x3511   : > { %8860 = vadd.xlane.f32.xlu1 %v8859_v32  ;;  %v8856_v0 = vsel %vm1333_vm3, %v8854_v45, 0.0  ;;  %v9910_v45 = vld [vmem:[%s13493_s27 + $0x218] sm:$0xff]  ;;  %v11412_v32 = vpack.c.bf16 %v9926_v2, %v9925_v23  ;;  %v9949_v2 = vld [vmem:[%s13493_s27 + $0x350] sm:$0xff] }
0x3512   : > { %8857 = vadd.xlane.f32.xlu0 %v8856_v0  ;;  %v11444_v0 = vpack.c.bf16 %v9958_v13, %v9957_v20  ;;  %v11414_v17 = vpack.c.bf16 %v9910_v45, %v9909_v50  ;;  %v9950_v20 = vld [vmem:[%s13493_s27 + $0x358] sm:$0xff]  ;;  %v9935_v13 = vld [vmem:[%s13493_s27 + $0x2e0] sm:$0xff] }
0x3513   : > { %v11462_v45 = vpack.c.bf16 %v9950_v20, %v9949_v2 }
0x359e   : > { %v8861_v58 = vpop.xlane.xlu1 %8860 }
0x359f   : > { %v8863_v59 = vmul.f32 0.03125, %v8861_v58  ;;  %v8858_v19 = vpop.xlane.xlu0 %8857  ;;  %v11422_v58 = vpack.c.bf16 %v9914_v25, %v9913_v21 }
0x35a0   : > { %v8862_v60 = vmul.f32 0.03125, %v8858_v19  ;;  %v9915_v19 = vld [vmem:[%s13493_s27 + $0x240] sm:$0xff] }
0x35a1   : > { %v8865_v26 = vadd.f32 1e-05, %v8863_v59  ;;  %v11454_v59 = vpack.c.bf16 %v9946_v30, %v9945_v15 }
0x35a2   : > { %v8864_v61 = vadd.f32 1e-05, %v8862_v60  ;;  %v9916_v60 = vld [vmem:[%s13493_s27 + $0x248] sm:$0xff] }
0x35a3   : > { %11830 = vrsqrt.f32 %v8865_v26  ;;  %v11424_v26 = vpack.c.bf16 %v9932_v54, %v9931_v49 }
0x35a4   : > { %11832 = vrsqrt.f32 %v8864_v61  ;;  %v11456_v61 = vpack.c.bf16 %v9964_v42, %v9963_v57 }
0x35ad   : > { %v11831_v62 = vpop.eup %11830 }
0x35ae   : > { %v11833_v28 = vpop.eup %11832  ;;  %v8869_v9 = vmul.f32 %v11831_v62, %v8853_v31  ;;  %v11442_v31 = vpack.c.bf16 %v9940_v16, %v9939_v11  ;;  %v9947_v62 = vld [vmem:[%s13493_s27 + $0x340] sm:$0xff]  ;;  %v9917_v11 = vld [vmem:[%s13493_s27 + $0x250] sm:$0xff]  ;;  %v9918_v16 = vld [vmem:[%s13493_s27 + $0x258] sm:$0xff] }
0x35af   : > { %v8868_v3 = vmul.f32 %v11833_v28, %v8852_v51  ;;  %v11410_v51 = vpack.c.bf16 %v9908_v8, %v9907_v7  ;;  %v9948_v28 = vld [vmem:[%s13493_s27 + $0x348] sm:$0xff]  ;;  %v11426_v7 = vpack.c.bf16 %v9916_v60, %v9915_v19  ;;  %v11430_v50 = vpack.c.bf16 %v9918_v16, %v9917_v11  ;;  %v9972_v16 = vld [vmem:[%s13501_s13 + $0x1] ss:$0 sm:$0xff] }
0x35b0   : > { %v8877_v5 = vmul.f32 %v9884_v29, %v8869_v9  ;;  %v9966_v9 = vld [vmem:[%s13493_s27 + $0x3d8] sm:$0xff]  ;;  %v11458_v8 = vpack.c.bf16 %v9948_v28, %v9947_v62 }
0x35b1   : > { %v8876_v37 = vmul.f32 %v9884_v29, %v8868_v3  ;;  %v9933_v29 = vld [vmem:[%s13493_s27 + $0x2d0] sm:$0xff]  ;;  %v9934_v3 = vld [vmem:[%s13493_s27 + $0x2d8] sm:$0xff] }
0x35b2   : > { %v13258_v6 = vadd.f32 %v9885_v24, %v8877_v5  ;;  %v11428_v23 = vpack.c.bf16 %v9934_v3, %v9933_v29  ;;  %v9936_v5 = vld [vmem:[%s13493_s27 + $0x2e8] sm:$0xff] }
0x35b3   : > { %v13242_v27 = vadd.f32 %v9885_v24, %v8876_v37  ;;  %v9965_v24 = vld [vmem:[%s13493_s27 + $0x3d0] sm:$0xff] }
0x35b4   : > { %v11460_v37 = vpack.c.bf16 %v9966_v9, %v9965_v24 }
0x35b5   : > { %9903 = vmatmul.mubr.msk.f32.vlgmr.msra.gmra.mrb[78].mxu1 %vm1333_vm3, %v13242_v27  ;;  %9905 = vmatmul.mubr.msk.f32.vlgmr.msra.gmra.mrb[82].mxu0 %vm1333_vm3, %v13242_v27 }
0x35b6   : > { %9002 = vmatprep.mubr.f32.mxu1 %v11886_v1  ;;  %9079 = vmatprep.mubr.f32.mxu0 %v11886_v1  ;;  %v9929_v1 = vld [vmem:[%s13493_s27 + $0x2b0] sm:$0xff] }
0x35b7   : > { %11411 = vmatpush3.bf16.msra.mxu1 %v11410_v51  ;;  %11443 = vmatpush3.bf16.msra.mxu0 %v11442_v31  ;;  %v11420_v47 = vpack.c.bf16 %v9930_v43, %v9929_v1  ;;  %v9967_v51 = vld [vmem:[%s13493_s27 + $0x3e0] sm:$0xff]  ;;  %v9968_v31 = vld [vmem:[%s13493_s27 + $0x3e8] sm:$0xff]  ;;  %v9953_v43 = vld [vmem:[%s13493_s27 + $0x370] sm:$0xff] }
0x35b8   : > { %11413 = vmatprep.subr.bf16.mxu1 %v11412_v32  ;;  %11445 = vmatprep.subr.bf16.mxu0 %v11444_v0  ;;  %v11432_v32 = vpack.c.bf16 %v9936_v5, %v9935_v13  ;;  %v11464_v0 = vpack.c.bf16 %v9968_v31, %v9967_v51  ;;  %v11470_v44 = vpack.c.bf16 %v9954_v4, %v9953_v43  ;;  %v9366_v43 = vld [vmem:[%s13502_s3 + $0x8] sm:$0xff] }
0x35b9   : > { %9904 = vmatmul.mubr.msk.f32.gmra.mrb[80].mxu1 %vm1333_vm3, %v13258_v6  ;;  %9906 = vmatmul.mubr.msk.f32.gmra.mrb[84].mxu0 %vm1333_vm3, %v13258_v6 }
0x35bb   : > { %11415 = vmatpush3.bf16.msra.mxu1 %v11414_v17  ;;  %11447 = vmatpush3.bf16.msra.mxu0 %v11446_v63  ;;  %v9937_v17 = vld [vmem:[%s13493_s27 + $0x2f0] sm:$0xff]  ;;  %v9938_v63 = vld [vmem:[%s13493_s27 + $0x2f8] sm:$0xff] }
0x35bc   : > { %11417 = vmatprep.subr.bf16.mxu1 %v11416_v12  ;;  %11449 = vmatprep.subr.bf16.mxu0 %v11448_v40  ;;  %v11436_v14 = vpack.c.bf16 %v9938_v63, %v9937_v17  ;;  %v9970_v12 = vld [vmem:[%s13493_s27 + $0x3f8] sm:$0xff]  ;;  %v9921_v40 = vld [vmem:[%s13493_s27 + $0x270] sm:$0xff] }
0x35bd   : > { %v11468_v41 = vpack.c.bf16 %v9970_v12, %v9969_v39  ;;  %v11438_v1 = vpack.c.bf16 %v9922_v10, %v9921_v40 }
0x35bf   : > { %11419 = vmatpush3.bf16.msra.mxu1 %v11418_v22  ;;  %11451 = vmatpush3.bf16.msra.mxu0 %v11450_v46  ;;  %v9902_v22 = vld [vmem:[%s13500_s5 + $0x4] sm:$0xf] }
0x35c0   : > { %11421 = vmatprep.subr.bf16.mxu1 %v11420_v47  ;;  %11453 = vmatprep.subr.bf16.mxu0 %v11452_v48  ;;  %v8909_v46 = vrot.slane %v9902_v22, %v12312_v52  ;;  %v8917_v21 = vrot.slane %v9902_v22, %v12314_v53  ;;  %v8913_v25 = vrot.slane %v9902_v22, %v12317_v55 }
0x35c1   : > { %v8921_v47 = vrot.slane %v9902_v22, %v12319_v56  ;;  %v9368_v22 = vld [vmem:[%s13502_s3 + $0x18] sm:$0xff] }
0x35c3   : > { %11423 = vmatpush3.bf16.msra.mxu1 %v11422_v58  ;;  %11455 = vmatpush3.bf16.msra.mxu0 %v11454_v59 }
0x35c4   : > { %11425 = vmatprep.subr.bf16.mxu1 %v11424_v26  ;;  %11457 = vmatprep.subr.bf16.mxu0 %v11456_v61 }
0x35c7   : > { %11427 = vmatpush3.bf16.msra.mxu1 %v11426_v7  ;;  %11459 = vmatpush3.bf16.msra.mxu0 %v11458_v8 }
0x35c8   : > { %11429 = vmatprep.subr.bf16.mxu1 %v11428_v23  ;;  %11461 = vmatprep.subr.bf16.mxu0 %v11460_v37 }
0x35cb   : > { %11431 = vmatpush3.bf16.msra.mxu1 %v11430_v50  ;;  %11463 = vmatpush3.bf16.msra.mxu0 %v11462_v45 }
0x35cc   : > { %11433 = vmatprep.subr.bf16.mxu1 %v11432_v32  ;;  %11465 = vmatprep.subr.bf16.mxu0 %v11464_v0 }
0x35cf   : > { %11435 = vmatpush3.bf16.msra.mxu1 %v11434_v36  ;;  %11467 = vmatpush3.bf16.msra.mxu0 %v11466_v18 }
0x35d0   : > { %11437 = vmatprep.subr.bf16.mxu1 %v11436_v14  ;;  %11469 = vmatprep.subr.bf16.mxu0 %v11468_v41 }
0x35d3   : > { %11439 = vmatpush3.bf16.msra.mxu1 %v11438_v1  ;;  %11471 = vmatpush3.bf16.msra.mxu0 %v11470_v44  ;;  %v9367_v44 = vld [vmem:[%s13502_s3 + $0x10] sm:$0xff] }
0x3688   : > { %v8998_v48 = vpop.f32.mrb[78].mxu1  ;;  %v9075_v15 = vpop.f32.mrb[82].mxu0 }
0x3689   : > { %v8999_v30 = vadd.f32 %v8998_v48, %v8909_v46  ;;  %v9076_v49 = vadd.f32 %v9075_v15, %v8917_v21  ;;  %v9000_v54 = vpop.f32.mrb[79].mxu1  ;;  %v9077_v57 = vpop.f32.mrb[83].mxu0 }
0x368a   : > { %v9001_v42 = vadd.f32 %v9000_v54, %v8913_v25  ;;  %v9078_v58 = vadd.f32 %v9077_v57, %v8921_v47  ;;  %v9975_v54 = vld [vmem:[%s13499_s17 + $0x1] ss:$0 sm:$0xff] }
0x368b   : > { %v9086_v61 = vmax.f32 %v8999_v30, 0.0  ;;  %v9088_v52 = vmax.f32 %v9076_v49, 0.0 }
0x368c   : > { %v9087_v59 = vmax.f32 %v9001_v42, 0.0  ;;  %v9089_v19 = vmax.f32 %v9078_v58, 0.0  ;;  %v9004_v60 = vpop.f32.mrb[80].mxu1  ;;  %v9081_v26 = vpop.f32.mrb[84].mxu0  ;;  %v9976_v42 = vld [vmem:[%s12097_s4 + $0x1] ss:$0 sm:$0xff] }
0x368d   : > { %v9005_v62 = vadd.f32 %v9004_v60, %v8909_v46  ;;  %v9082_v53 = vadd.f32 %v9081_v26, %v8917_v21  ;;  %v9006_v28 = vpop.f32.mrb[81].mxu1  ;;  %v9083_v55 = vpop.f32.mrb[85].mxu0  ;;  %v11476_v46 = vpack.c.bf16 %v9368_v22, %v9367_v44 }
0x368e   : > { %v9007_v29 = vadd.f32 %v9006_v28, %v8913_v25  ;;  %v9084_v56 = vadd.f32 %v9083_v55, %v8921_v47  ;;  %9231 = vmatprep.mubr.f32.mxu1 %v9087_v59  ;;  %9306 = vmatprep.mubr.f32.mxu0 %v9089_v19 }
0x368f   : > { %9232 = vmatmul.mubr.f32.vlgmr.msra.gmra.mrb[82].mxu1 %v9086_v61  ;;  %9307 = vmatmul.mubr.f32.vlgmr.msra.gmra.mrb[86].mxu0 %v9088_v52  ;;  %v9090_v9 = vmax.f32 %v9005_v62, 0.0  ;;  %v9092_v7 = vmax.f32 %v9082_v53, 0.0  ;;  %v9977_v52 = vld [vmem:[%s13503_s8] ss:$0 sm:$0xff] }
0x3690   : > { %v9091_v3 = vmax.f32 %v9007_v29, 0.0  ;;  %v9093_v24 = vmax.f32 %v9084_v56, 0.0 }
0x3692   : > { %9236 = vmatprep.mubr.f32.mxu1 %v9091_v3  ;;  %9311 = vmatprep.mubr.f32.mxu0 %v9093_v24 }
0x3693   : > { %9237 = vmatmul.mubr.f32.gmra.mrb[84].mxu1 %v9090_v9  ;;  %9312 = vmatmul.mubr.f32.gmra.mrb[88].mxu0 %v9092_v7 }
0x3762   : > { %v10459_v8 = vpop.f32.mrb[82].mxu1  ;;  %v10497_v11 = vpop.f32.mrb[86].mxu0 }
0x3763   : > { %v10460_v23 = vpop.f32.mrb[83].mxu1  ;;  %v10498_v37 = vpop.f32.mrb[87].mxu0 }
0x3764   : > { %v10461_v2 = vadd.f32 %v10460_v23, %v10459_v8  ;;  %v10499_v20 = vadd.f32 %v10498_v37, %v10497_v11 }
0x3766   : > { %v9234_v13 = vadd.f32 %v10461_v2, %v9972_v16  ;;  %v10462_v5 = vpop.f32.mrb[84].mxu1  ;;  %v10500_v51 = vpop.f32.mrb[88].mxu0 }
0x3767   : > { %v10463_v31 = vpop.f32.mrb[85].mxu1  ;;  %v10501_v50 = vpop.f32.mrb[89].mxu0 }
0x3768   : > { %v9309_v45 = vadd.f32 %v10499_v20, %v9234_v13  ;;  %v10464_v32 = vadd.f32 %v10463_v31, %v10462_v5  ;;  %v10502_v0 = vadd.f32 %v10501_v50, %v10500_v51 }
0x376a   : > { %v9239_v33 = vadd.f32 %v10464_v32, %v9972_v16  ;;  %v9317_v34 = vadd.f32 %v9309_v45, %v13242_v27 }
0x376c   : > { %v9314_v35 = vadd.f32 %v10502_v0, %v9239_v33  ;;  %v9323_v36 = vsel %vm1333_vm3, %v9317_v34, 0.0 }
0x376d   : > { %9324 = vadd.xlane.f32.xlu0 %v9323_v36 }
0x376e   : > { %v9318_v38 = vadd.f32 %v9314_v35, %v13258_v6  ;;  %v9365_v6 = vld [vmem:[%s13502_s3] sm:$0xff] }
0x376f   : > { %v11472_v4 = vpack.c.bf16 %v9366_v43, %v9365_v6 }
0x3770   : > { %v9326_v18 = vsel %vm5059_vm14, %v9318_v38, 0.0 }
0x3771   : > { %9327 = vadd.xlane.f32.xlu1 %v9326_v18  ;;  %11473 = vmatprep.subr.bf16.mxu1 %v11472_v4 }
0x3772   : > { %11475 = vmatpush3.bf16.msra.mxu1 %v11472_v4 }
0x3773   : > { %11477 = vmatprep.subr.bf16.mxu1 %v11476_v46 }
0x3776   : > { %11479 = vmatpush3.bf16.msra.mxu1 %v11476_v46 }
0x37fa   : > { %v9325_v17 = vpop.xlane.xlu0 %9324 }
0x37fb   : > { %v9329_v63 = vmul.f32 0.03125, %v9325_v17 }
0x37fd   : > { %v9331_v39 = vsub.f32 %v9317_v34, %v9329_v63 }
0x37fe   : > { %v9328_v14 = vpop.xlane.xlu1 %9327 }
0x37ff   : > { %v9330_v12 = vmul.f32 0.03125, %v9328_v14  ;;  %v9333_v40 = vmul.f32 %v9331_v39, %v9331_v39 }
0x3801   : > { %v9332_v27 = vsub.f32 %v9318_v38, %v9330_v12  ;;  %v9335_v10 = vsel %vm1333_vm3, %v9333_v40, 0.0 }
0x3802   : > { %9336 = vadd.xlane.f32.xlu0 %v9335_v10 }
0x3803   : > { %v9334_v41 = vmul.f32 %v9332_v27, %v9332_v27 }
0x3805   : > { %v9338_v1 = vsel %vm5059_vm14, %v9334_v41, 0.0 }
0x3806   : > { %9339 = vadd.xlane.f32.xlu1 %v9338_v1 }
0x388f   : > { %v9337_v21 = vpop.xlane.xlu0 %9336 }
0x3890   : > { %v9341_v25 = vmul.f32 0.03125, %v9337_v21 }
0x3892   : > { %v9343_v47 = vadd.f32 1e-05, %v9341_v25 }
0x3893   : > { %v9340_v48 = vpop.xlane.xlu1 %9339 }
0x3894   : > { %11834 = vrsqrt.f32 %v9343_v47  ;;  %v9342_v15 = vmul.f32 0.03125, %v9340_v48 }
0x3896   : > { %v9344_v30 = vadd.f32 1e-05, %v9342_v15 }
0x3898   : > { %11836 = vrsqrt.f32 %v9344_v30 }
0x389e   : > { %v11835_v49 = vpop.eup %11834 }
0x389f   : > { %v9347_v57 = vmul.f32 %v11835_v49, %v9331_v39 }
0x38a1   : > { %v9355_v58 = vmul.f32 %v9975_v54, %v9347_v57 }
0x38a2   : > { %v11837_v59 = vpop.eup %11836 }
0x38a3   : > { %v9348_v19 = vmul.f32 %v11837_v59, %v9332_v27  ;;  %v9363_v60 = vadd.f32 %v9976_v42, %v9355_v58 }
0x38a5   : > { %v9356_v26 = vmul.f32 %v9975_v54, %v9348_v19  ;;  %10953 = vmatprep.mubr.msk.f32.mxu1 %vm1333_vm3, %v9363_v60 }
0x38a7   : > { %v9364_v61 = vadd.f32 %v9976_v42, %v9356_v26 }
0x38a9   : > { %10954 = vmatmul.mubr.msk.f32.vlgmr.msra.gmra.mrb[86].mxu1 %vm1333_vm3, %v9364_v61 }
0x397c   : > { %v10955_v62 = vpop.f32.mrb[86].mxu1 }
0x397d   : > { %v9454_v53 = vadd.f32 %v10955_v62, %v9977_v52  ;;  %v9448_v28 = vpop.f32.mrb[87].mxu1 }
0x397e   : > { %v9449_v55 = vadd.f32 %v9977_v52, %v9448_v28 }
0x397f   : > { %9458 = vst [vmem:[%s1227_s10 + $0x8] sm:$0xf] %v9454_v53 }
0x3980   : > { %9457 = vst [vmem:[%s1227_s10] sm:$0xff] %v9449_v55 }
0x3981 PF: > { %s13507_s11 = sld [smem:[#allocation42_spill]] }
0x3987   : > { %s91_s28 = sadd.s32 1, %s13507_s11  }
0x3988   : > { %p88_p4 = scmp.ge.s32.totalorder %s91_s28, 4  }
0x398a   :  { %90 = sbr.rel (!%p88_p4) target bundleno = 95 (0x5f), region = 283 }

</bundles_post_ra>
